<compile_context>
chip_gen: v5e
topology: v5e:2x2
jax: 0.10.0
libtpu: 0.0.40
codegen_flags: <defaults>
</compile_context>

<pallas_src>
import functools

import jax
import jax.numpy as jnp
import numpy as np
from jax.experimental import pallas as pl
from jax.experimental.pallas import tpu as pltpu

embeddingDim = 128
eta = 1e-06
fBase = 32
vocabSize = 128          # synthetic vocab
latentDim = 64
maxSeqLen = 32           # required so the (4,4)/(1,4) conv stack ends at 4x4
BN_EPS = 1e-5


# ---------------------------------------------------------------------------
# Pallas kernel 1: fused  (X @ W) + bias -> ReLU      (BN already folded in W,b)
# ---------------------------------------------------------------------------
def _pick_tm(M, cap=4096):
    if M <= cap:
        return M
    for t in (4096, 2048, 1024, 512, 256, 128, 64, 32, 16, 8):
        if M % t == 0:
            return t
    return M


def fused_matmul_bias_relu(x, w, b):
    """x: (M, K) bf16, w: (K, N) bf16, b: (1, N) f32.  Returns (M, N) bf16."""
    M, K = x.shape
    N = w.shape[1]
    tm = _pick_tm(M)

    def kernel(x_ref, w_ref, b_ref, o_ref):
        acc = jnp.dot(x_ref[...], w_ref[...], preferred_element_type=jnp.float32)
        acc = jnp.maximum(acc + b_ref[...], 0.0)     # folded conv-bias+BN, ReLU
        o_ref[...] = acc.astype(o_ref.dtype)

    return pl.pallas_call(
        kernel,
        out_shape=jax.ShapeDtypeStruct((M, N), jnp.bfloat16),
        grid=(M // tm,),
        in_specs=[
            pl.BlockSpec((tm, K), lambda i: (i, 0)),
            pl.BlockSpec((K, N), lambda i: (0, 0)),
            pl.BlockSpec((1, N), lambda i: (0, 0)),
        ],
        out_specs=pl.BlockSpec((tm, N), lambda i: (i, 0)),
        compiler_params=pltpu.CompilerParams(dimension_semantics=("parallel",)),
    )(x, w, b)


# ---------------------------------------------------------------------------
# Pallas kernel 2: fused mu / logvar heads (both 4x4 "full" convs == matmuls)
#   grid axis of 2 (one program per head) marked "parallel" -> both v7x
#   TensorCores stream half of the head weights each.
# ---------------------------------------------------------------------------
def fused_heads(x, wh, bh):
    """x: (B, K) bf16, wh: (2, K, N) bf16, bh: (2, 1, N) f32 -> (2, B, N) f32."""
    B, K = x.shape
    N = wh.shape[-1]

    def kernel(x_ref, w_ref, b_ref, o_ref):
        h = pl.program_id(0)
        acc = jnp.dot(x_ref[...], w_ref[0], preferred_element_type=jnp.float32)
        acc = acc + b_ref[0]

        @pl.when(h == 0)
        def _():                                    # mu head: identity
            o_ref[0] = acc

        @pl.when(h == 1)
        def _():                                    # logvar head: softplus + eta
            o_ref[0] = (jnp.maximum(acc, 0.0)
                        + jnp.log1p(jnp.exp(-jnp.abs(acc))) + eta)

    return pl.pallas_call(
        kernel,
        out_shape=jax.ShapeDtypeStruct((2, B, N), jnp.float32),
        grid=(2,),
        in_specs=[
            pl.BlockSpec((B, K), lambda h: (0, 0)),
            pl.BlockSpec((1, K, N), lambda h: (h, 0, 0)),
            pl.BlockSpec((1, 1, N), lambda h: (h, 0, 0)),
        ],
        out_specs=pl.BlockSpec((1, B, N), lambda h: (h, 0, 0)),
        compiler_params=pltpu.CompilerParams(dimension_semantics=("parallel",)),
    )(x, wh, bh)


# ---------------------------------------------------------------------------
# Glue: im2col on NHWC (patch feature order (kh, kw, C)) -- no transposes
# ---------------------------------------------------------------------------
def im2col_nhwc(x, kh, kw, sh, sw, ph, pw):
    B, H, W, C = x.shape
    xp = jnp.pad(x, ((0, 0), (ph, ph), (pw, pw), (0, 0)))
    Ho = (H + 2 * ph - kh) // sh + 1
    Wo = (W + 2 * pw - kw) // sw + 1
    cols = []
    for i in range(kh):
        for j in range(kw):
            cols.append(xp[:, i:i + sh * Ho:sh, j:j + sw * Wo:sw, :])  # (B,Ho,Wo,C)
    col = jnp.stack(cols, axis=3)                    # (B,Ho,Wo,kh*kw,C)
    return col.reshape(B * Ho * Wo, kh * kw * C), Ho, Wo


def conv_bn_relu_nhwc(x, layer):
    """NHWC conv + (pre-folded) BN + ReLU, weights already in matmul form."""
    B = x.shape[0]
    kh, kw = layer["kh"], layer["kw"]
    sh, sw = layer["stride"]
    ph, pw = layer["pad"]
    col, Ho, Wo = im2col_nhwc(x, kh, kw, sh, sw, ph, pw)
    out = fused_matmul_bias_relu(col, layer["w"], layer["b"])   # (B*Ho*Wo, Cout)
    return out.reshape(B, Ho, Wo, -1)                           # NHWC, no transpose


# ---------------------------------------------------------------------------
# Deterministic parameter initialization (PyTorch-default-like), pre-folded
# ---------------------------------------------------------------------------
def init_conv(key, cout, cin, kh, kw):
    k1, k2 = jax.random.split(key)
    fan_in = cin * kh * kw
    bound = 1.0 / np.sqrt(fan_in)
    w = jax.random.uniform(k1, (cout, cin, kh, kw), jnp.float32, -bound, bound)
    b = jax.random.uniform(k2, (cout,), jnp.float32, -bound, bound)
    return w, b


def init_bn(c):
    gamma = jnp.ones((c,), jnp.float32)
    beta = jnp.zeros((c,), jnp.float32)
    rmean = jnp.zeros((c,), jnp.float32)
    rvar = jnp.ones((c,), jnp.float32)
    scale = gamma / jnp.sqrt(rvar + BN_EPS)
    shift = beta - rmean * scale
    return scale, shift


def _to_matmul_weight(w):
    """(Cout, Cin, kh, kw) -> (kh*kw*Cin, Cout), matching im2col_nhwc order."""
    cout, cin, kh, kw = w.shape
    return jnp.transpose(w, (2, 3, 1, 0)).reshape(kh * kw * cin, cout)


def build_params(key):
    keys = jax.random.split(key, 9)
    params = {}
    emb = jax.random.normal(keys[0], (vocabSize, embeddingDim), jnp.float32)
    emb = emb.at[0].set(0.0)                          # padding_idx=0
    params["embedding"] = emb

    conv_cfgs = [
        # (cout, cin, kh, kw, stride, pad)
        (fBase,      1,         4, 4, (2, 2), (1, 1)),
        (fBase * 2,  fBase,     4, 4, (2, 2), (1, 1)),
        (fBase * 4,  fBase * 2, 4, 4, (2, 2), (1, 1)),
        (fBase * 8,  fBase * 4, 1, 4, (1, 2), (0, 1)),
        (fBase * 16, fBase * 8, 1, 4, (1, 2), (0, 1)),
    ]
    params["enc"] = []
    for idx, (co, ci, kh, kw, st, pd) in enumerate(conv_cfgs):
        w, b = init_conv(keys[1 + idx], co, ci, kh, kw)
        scale, shift = init_bn(co)
        # Fold inference-mode BN into conv weight & bias (per output channel).
        wf = w * scale[:, None, None, None]
        bf = b * scale + shift
        params["enc"].append(dict(
            w=_to_matmul_weight(wf).astype(jnp.bfloat16),       # (K, Cout) bf16
            b=bf.reshape(1, co).astype(jnp.float32),             # (1, Cout) f32
            kh=kh, kw=kw, stride=st, pad=pd))

    # Heads c1 (mu) and c2 (logvar): 4x4 conv over a 4x4 map == plain matmul.
    w1, b1 = init_conv(keys[6], latentDim, fBase * 16, 4, 4)
    w2, b2 = init_conv(keys[7], latentDim, fBase * 16, 4, 4)
    params["head_w"] = jnp.stack(
        [_to_matmul_weight(w1), _to_matmul_weight(w2)], axis=0
    ).astype(jnp.bfloat16)                                        # (2, 8192, 64)
    params["head_b"] = jnp.stack(
        [b1.reshape(1, latentDim), b2.reshape(1, latentDim)], axis=0
    ).astype(jnp.float32)                                         # (2, 1, 64)
    return params


# ---------------------------------------------------------------------------
# Forward pass (== SentEncoder.forward)
# ---------------------------------------------------------------------------
def sent_encoder_forward(params, x_tokens):
    # embedding(x.long()).unsqueeze(1): NCHW (B,1,S,D)  ==  NHWC (B,S,D,1)
    e = jnp.take(params["embedding"], x_tokens.astype(jnp.int32), axis=0)
    e = e[:, :, :, None].astype(jnp.bfloat16)          # (B, S, D, 1) NHWC, bf16

    for layer in params["enc"]:
        e = conv_bn_relu_nhwc(e, layer)                # NHWC, bf16 throughout

    # e: (B, 4, 4, 512) NHWC -> (B, 8192); row-major == (kh, kw, Cin) weight order
    B = e.shape[0]
    flat = e.reshape(B, -1)

    heads = fused_heads(flat, params["head_w"], params["head_b"])  # (2, B, 64) f32
    # torch .squeeze(): drop all size-1 dims (incl. batch when B == 1)
    mu = jnp.squeeze(heads[0].reshape(B, latentDim, 1, 1))
    var = jnp.squeeze(heads[1].reshape(B, latentDim, 1, 1))        # softplus+eta already applied
    return mu, var


if __name__ == "__main__":
    key = jax.random.PRNGKey(0)
    pkey, xkey = jax.random.split(key)
    params = build_params(pkey)

    batch = 2
    x = jax.random.randint(xkey, (batch, maxSeqLen), 1, vocabSize, dtype=jnp.int32)

    fwd = jax.jit(functools.partial(sent_encoder_forward, params))
    mu, var = fwd(x)
    jax.block_until_ready((mu, var))

    assert mu.shape == (batch, latentDim) and var.shape == (batch, latentDim)
    assert bool(jnp.all(var > 0))
    print("KERNEL_OK")
</pallas_src>

<mosaic_0001>
module attributes {stable_mosaic.version = 11 : i64} {
  func.func @kernel(%arg0: i32, %arg1: memref<2048x16xbf16, #tpu.memory_space<vmem>>, %arg2: memref<16x32xbf16, #tpu.memory_space<vmem>>, %arg3: memref<1x32xf32, #tpu.memory_space<vmem>>, %arg4: memref<2048x32xbf16, #tpu.memory_space<vmem>>) attributes {dimension_semantics = [#tpu.dimension_semantics<parallel>], iteration_bounds = array<i64: 1>, scalar_prefetch = 0 : i64, scratch_operands = 0 : i64, tpu.core_type = #tpu.core_type<tc>, window_params = [{transform_indices = @transform_0, window_bounds = array<i64: 2048, 16>}, {pipeline_mode = #tpu.pipeline_mode<synchronous>, transform_indices = @transform_1, window_bounds = array<i64: 16, 32>}, {pipeline_mode = #tpu.pipeline_mode<synchronous>, transform_indices = @transform_2, window_bounds = array<i64: 1, 32>}, {transform_indices = @transform_3, window_bounds = array<i64: 2048, 32>}]} {
    %c0 = arith.constant 0 : index
    %c0_0 = arith.constant 0 : index
    %0 = vector.load %arg1[%c0, %c0_0] : memref<2048x16xbf16, #tpu.memory_space<vmem>>, vector<2048x16xbf16>
    %c0_1 = arith.constant 0 : index
    %c0_2 = arith.constant 0 : index
    %1 = vector.load %arg2[%c0_1, %c0_2] : memref<16x32xbf16, #tpu.memory_space<vmem>>, vector<16x32xbf16>
    %cst = arith.constant dense<0.000000e+00> : vector<2048x32xf32>
    %2 = tpu.matmul %0, %1, %cst {dimension_numbers = #tpu.dot_dimension_numbers<[1], [0], [0], [1], [0, 0, 1, 1], [], []>} : vector<2048x16xbf16>, vector<16x32xbf16>, vector<2048x32xf32> -> vector<2048x32xf32>
    %c0_3 = arith.constant 0 : index
    %c0_4 = arith.constant 0 : index
    %3 = vector.load %arg3[%c0_3, %c0_4] : memref<1x32xf32, #tpu.memory_space<vmem>>, vector<1x32xf32>
    %4 = vector.broadcast %3 : vector<1x32xf32> to vector<2048x32xf32>
    %5 = arith.addf %2, %4 : vector<2048x32xf32>
    %cst_5 = arith.constant 0.000000e+00 : f32
    %6 = vector.broadcast %cst_5 : f32 to vector<2048x32xf32>
    %7 = arith.maximumf %5, %6 : vector<2048x32xf32>
    %8 = arith.truncf %7 : vector<2048x32xf32> to vector<2048x32xbf16>
    %c0_6 = arith.constant 0 : index
    %c0_7 = arith.constant 0 : index
    %9 = vector.load %arg4[%c0_6, %c0_7] : memref<2048x32xbf16, #tpu.memory_space<vmem>>, vector<2048x32xbf16>
    tpu.vector_store %arg4[%c0_6, %c0_7], %8 {strides = array<i32>} : memref<2048x32xbf16, #tpu.memory_space<vmem>>, vector<2048x32xbf16>,
    return
  }
  func.func @transform_0(%arg0: i32) -> (i32, i32) {
    %c0_i32 = arith.constant 0 : i32
    %c0_i32_0 = arith.constant 0 : i32
    return %arg0, %c0_i32 : i32, i32
  }
  func.func @transform_1(%arg0: i32) -> (i32, i32) {
    %c0_i32 = arith.constant 0 : i32
    %c0_i32_0 = arith.constant 0 : i32
    %c0_i32_1 = arith.constant 0 : i32
    return %c0_i32, %c0_i32_0 : i32, i32
  }
  func.func @transform_2(%arg0: i32) -> (i32, i32) {
    %c0_i32 = arith.constant 0 : i32
    %c0_i32_0 = arith.constant 0 : i32
    %c0_i32_1 = arith.constant 0 : i32
    return %c0_i32, %c0_i32_0 : i32, i32
  }
  func.func @transform_3(%arg0: i32) -> (i32, i32) {
    %c0_i32 = arith.constant 0 : i32
    %c0_i32_0 = arith.constant 0 : i32
    return %arg0, %c0_i32 : i32, i32
  }
}

module attributes {stable_mosaic.version = 11 : i64} {
  func.func @kernel(%arg0: i32, %arg1: memref<512x512xbf16, #tpu.memory_space<vmem>>, %arg2: memref<512x64xbf16, #tpu.memory_space<vmem>>, %arg3: memref<1x64xf32, #tpu.memory_space<vmem>>, %arg4: memref<512x64xbf16, #tpu.memory_space<vmem>>) attributes {dimension_semantics = [#tpu.dimension_semantics<parallel>], iteration_bounds = array<i64: 1>, scalar_prefetch = 0 : i64, scratch_operands = 0 : i64, tpu.core_type = #tpu.core_type<tc>, window_params = [{transform_indices = @transform_0, window_bounds = array<i64: 512, 512>}, {pipeline_mode = #tpu.pipeline_mode<synchronous>, transform_indices = @transform_1, window_bounds = array<i64: 512, 64>}, {pipeline_mode = #tpu.pipeline_mode<synchronous>, transform_indices = @transform_2, window_bounds = array<i64: 1, 64>}, {transform_indices = @transform_3, window_bounds = array<i64: 512, 64>}]} {
    %c0 = arith.constant 0 : index
    %c0_0 = arith.constant 0 : index
    %0 = vector.load %arg1[%c0, %c0_0] : memref<512x512xbf16, #tpu.memory_space<vmem>>, vector<512x512xbf16>
    %c0_1 = arith.constant 0 : index
    %c0_2 = arith.constant 0 : index
    %1 = vector.load %arg2[%c0_1, %c0_2] : memref<512x64xbf16, #tpu.memory_space<vmem>>, vector<512x64xbf16>
    %cst = arith.constant dense<0.000000e+00> : vector<512x64xf32>
    %2 = tpu.matmul %0, %1, %cst {dimension_numbers = #tpu.dot_dimension_numbers<[1], [0], [0], [1], [0, 0, 1, 1], [], []>} : vector<512x512xbf16>, vector<512x64xbf16>, vector<512x64xf32> -> vector<512x64xf32>
    %c0_3 = arith.constant 0 : index
    %c0_4 = arith.constant 0 : index
    %3 = vector.load %arg3[%c0_3, %c0_4] : memref<1x64xf32, #tpu.memory_space<vmem>>, vector<1x64xf32>
    %4 = vector.broadcast %3 : vector<1x64xf32> to vector<512x64xf32>
    %5 = arith.addf %2, %4 : vector<512x64xf32>
    %cst_5 = arith.constant 0.000000e+00 : f32
    %6 = vector.broadcast %cst_5 : f32 to vector<512x64xf32>
    %7 = arith.maximumf %5, %6 : vector<512x64xf32>
    %8 = arith.truncf %7 : vector<512x64xf32> to vector<512x64xbf16>
    %c0_6 = arith.constant 0 : index
    %c0_7 = arith.constant 0 : index
    %9 = vector.load %arg4[%c0_6, %c0_7] : memref<512x64xbf16, #tpu.memory_space<vmem>>, vector<512x64xbf16>
    tpu.vector_store %arg4[%c0_6, %c0_7], %8 {strides = array<i32>} : memref<512x64xbf16, #tpu.memory_space<vmem>>, vector<512x64xbf16>,
    return
  }
  func.func @transform_0(%arg0: i32) -> (i32, i32) {
    %c0_i32 = arith.constant 0 : i32
    %c0_i32_0 = arith.constant 0 : i32
    return %arg0, %c0_i32 : i32, i32
  }
  func.func @transform_1(%arg0: i32) -> (i32, i32) {
    %c0_i32 = arith.constant 0 : i32
    %c0_i32_0 = arith.constant 0 : i32
    %c0_i32_1 = arith.constant 0 : i32
    return %c0_i32, %c0_i32_0 : i32, i32
  }
  func.func @transform_2(%arg0: i32) -> (i32, i32) {
    %c0_i32 = arith.constant 0 : i32
    %c0_i32_0 = arith.constant 0 : i32
    %c0_i32_1 = arith.constant 0 : i32
    return %c0_i32, %c0_i32_0 : i32, i32
  }
  func.func @transform_3(%arg0: i32) -> (i32, i32) {
    %c0_i32 = arith.constant 0 : i32
    %c0_i32_0 = arith.constant 0 : i32
    return %arg0, %c0_i32 : i32, i32
  }
}

module attributes {stable_mosaic.version = 11 : i64} {
  func.func @kernel(%arg0: i32, %arg1: memref<128x1024xbf16, #tpu.memory_space<vmem>>, %arg2: memref<1024x128xbf16, #tpu.memory_space<vmem>>, %arg3: memref<1x128xf32, #tpu.memory_space<vmem>>, %arg4: memref<128x128xbf16, #tpu.memory_space<vmem>>) attributes {dimension_semantics = [#tpu.dimension_semantics<parallel>], iteration_bounds = array<i64: 1>, scalar_prefetch = 0 : i64, scratch_operands = 0 : i64, tpu.core_type = #tpu.core_type<tc>, window_params = [{transform_indices = @transform_0, window_bounds = array<i64: 128, 1024>}, {pipeline_mode = #tpu.pipeline_mode<synchronous>, transform_indices = @transform_1, window_bounds = array<i64: 1024, 128>}, {pipeline_mode = #tpu.pipeline_mode<synchronous>, transform_indices = @transform_2, window_bounds = array<i64: 1, 128>}, {transform_indices = @transform_3, window_bounds = array<i64: 128, 128>}]} {
    %c0 = arith.constant 0 : index
    %c0_0 = arith.constant 0 : index
    %0 = vector.load %arg1[%c0, %c0_0] : memref<128x1024xbf16, #tpu.memory_space<vmem>>, vector<128x1024xbf16>
    %c0_1 = arith.constant 0 : index
    %c0_2 = arith.constant 0 : index
    %1 = vector.load %arg2[%c0_1, %c0_2] : memref<1024x128xbf16, #tpu.memory_space<vmem>>, vector<1024x128xbf16>
    %cst = arith.constant dense<0.000000e+00> : vector<128x128xf32>
    %2 = tpu.matmul %0, %1, %cst {dimension_numbers = #tpu.dot_dimension_numbers<[1], [0], [0], [1], [0, 0, 1, 1], [], []>} : vector<128x1024xbf16>, vector<1024x128xbf16>, vector<128x128xf32> -> vector<128x128xf32>
    %c0_3 = arith.constant 0 : index
    %c0_4 = arith.constant 0 : index
    %3 = vector.load %arg3[%c0_3, %c0_4] : memref<1x128xf32, #tpu.memory_space<vmem>>, vector<1x128xf32>
    %4 = vector.broadcast %3 : vector<1x128xf32> to vector<128x128xf32>
    %5 = arith.addf %2, %4 : vector<128x128xf32>
    %cst_5 = arith.constant 0.000000e+00 : f32
    %6 = vector.broadcast %cst_5 : f32 to vector<128x128xf32>
    %7 = arith.maximumf %5, %6 : vector<128x128xf32>
    %8 = arith.truncf %7 : vector<128x128xf32> to vector<128x128xbf16>
    %c0_6 = arith.constant 0 : index
    %c0_7 = arith.constant 0 : index
    %9 = vector.load %arg4[%c0_6, %c0_7] : memref<128x128xbf16, #tpu.memory_space<vmem>>, vector<128x128xbf16>
    tpu.vector_store %arg4[%c0_6, %c0_7], %8 {strides = array<i32>} : memref<128x128xbf16, #tpu.memory_space<vmem>>, vector<128x128xbf16>,
    return
  }
  func.func @transform_0(%arg0: i32) -> (i32, i32) {
    %c0_i32 = arith.constant 0 : i32
    %c0_i32_0 = arith.constant 0 : i32
    return %arg0, %c0_i32 : i32, i32
  }
  func.func @transform_1(%arg0: i32) -> (i32, i32) {
    %c0_i32 = arith.constant 0 : i32
    %c0_i32_0 = arith.constant 0 : i32
    %c0_i32_1 = arith.constant 0 : i32
    return %c0_i32, %c0_i32_0 : i32, i32
  }
  func.func @transform_2(%arg0: i32) -> (i32, i32) {
    %c0_i32 = arith.constant 0 : i32
    %c0_i32_0 = arith.constant 0 : i32
    %c0_i32_1 = arith.constant 0 : i32
    return %c0_i32, %c0_i32_0 : i32, i32
  }
  func.func @transform_3(%arg0: i32) -> (i32, i32) {
    %c0_i32 = arith.constant 0 : i32
    %c0_i32_0 = arith.constant 0 : i32
    return %arg0, %c0_i32 : i32, i32
  }
}

module attributes {stable_mosaic.version = 11 : i64} {
  func.func @kernel(%arg0: i32, %arg1: memref<64x512xbf16, #tpu.memory_space<vmem>>, %arg2: memref<512x256xbf16, #tpu.memory_space<vmem>>, %arg3: memref<1x256xf32, #tpu.memory_space<vmem>>, %arg4: memref<64x256xbf16, #tpu.memory_space<vmem>>) attributes {dimension_semantics = [#tpu.dimension_semantics<parallel>], iteration_bounds = array<i64: 1>, scalar_prefetch = 0 : i64, scratch_operands = 0 : i64, tpu.core_type = #tpu.core_type<tc>, window_params = [{transform_indices = @transform_0, window_bounds = array<i64: 64, 512>}, {pipeline_mode = #tpu.pipeline_mode<synchronous>, transform_indices = @transform_1, window_bounds = array<i64: 512, 256>}, {pipeline_mode = #tpu.pipeline_mode<synchronous>, transform_indices = @transform_2, window_bounds = array<i64: 1, 256>}, {transform_indices = @transform_3, window_bounds = array<i64: 64, 256>}]} {
    %c0 = arith.constant 0 : index
    %c0_0 = arith.constant 0 : index
    %0 = vector.load %arg1[%c0, %c0_0] : memref<64x512xbf16, #tpu.memory_space<vmem>>, vector<64x512xbf16>
    %c0_1 = arith.constant 0 : index
    %c0_2 = arith.constant 0 : index
    %1 = vector.load %arg2[%c0_1, %c0_2] : memref<512x256xbf16, #tpu.memory_space<vmem>>, vector<512x256xbf16>
    %cst = arith.constant dense<0.000000e+00> : vector<64x256xf32>
    %2 = tpu.matmul %0, %1, %cst {dimension_numbers = #tpu.dot_dimension_numbers<[1], [0], [0], [1], [0, 0, 1, 1], [], []>} : vector<64x512xbf16>, vector<512x256xbf16>, vector<64x256xf32> -> vector<64x256xf32>
    %c0_3 = arith.constant 0 : index
    %c0_4 = arith.constant 0 : index
    %3 = vector.load %arg3[%c0_3, %c0_4] : memref<1x256xf32, #tpu.memory_space<vmem>>, vector<1x256xf32>
    %4 = vector.broadcast %3 : vector<1x256xf32> to vector<64x256xf32>
    %5 = arith.addf %2, %4 : vector<64x256xf32>
    %cst_5 = arith.constant 0.000000e+00 : f32
    %6 = vector.broadcast %cst_5 : f32 to vector<64x256xf32>
    %7 = arith.maximumf %5, %6 : vector<64x256xf32>
    %8 = arith.truncf %7 : vector<64x256xf32> to vector<64x256xbf16>
    %c0_6 = arith.constant 0 : index
    %c0_7 = arith.constant 0 : index
    %9 = vector.load %arg4[%c0_6, %c0_7] : memref<64x256xbf16, #tpu.memory_space<vmem>>, vector<64x256xbf16>
    tpu.vector_store %arg4[%c0_6, %c0_7], %8 {strides = array<i32>} : memref<64x256xbf16, #tpu.memory_space<vmem>>, vector<64x256xbf16>,
    return
  }
  func.func @transform_0(%arg0: i32) -> (i32, i32) {
    %c0_i32 = arith.constant 0 : i32
    %c0_i32_0 = arith.constant 0 : i32
    return %arg0, %c0_i32 : i32, i32
  }
  func.func @transform_1(%arg0: i32) -> (i32, i32) {
    %c0_i32 = arith.constant 0 : i32
    %c0_i32_0 = arith.constant 0 : i32
    %c0_i32_1 = arith.constant 0 : i32
    return %c0_i32, %c0_i32_0 : i32, i32
  }
  func.func @transform_2(%arg0: i32) -> (i32, i32) {
    %c0_i32 = arith.constant 0 : i32
    %c0_i32_0 = arith.constant 0 : i32
    %c0_i32_1 = arith.constant 0 : i32
    return %c0_i32, %c0_i32_0 : i32, i32
  }
  func.func @transform_3(%arg0: i32) -> (i32, i32) {
    %c0_i32 = arith.constant 0 : i32
    %c0_i32_0 = arith.constant 0 : i32
    return %arg0, %c0_i32 : i32, i32
  }
}

module attributes {stable_mosaic.version = 11 : i64} {
  func.func @kernel(%arg0: i32, %arg1: memref<32x1024xbf16, #tpu.memory_space<vmem>>, %arg2: memref<1024x512xbf16, #tpu.memory_space<vmem>>, %arg3: memref<1x512xf32, #tpu.memory_space<vmem>>, %arg4: memref<32x512xbf16, #tpu.memory_space<vmem>>) attributes {dimension_semantics = [#tpu.dimension_semantics<parallel>], iteration_bounds = array<i64: 1>, scalar_prefetch = 0 : i64, scratch_operands = 0 : i64, tpu.core_type = #tpu.core_type<tc>, window_params = [{transform_indices = @transform_0, window_bounds = array<i64: 32, 1024>}, {pipeline_mode = #tpu.pipeline_mode<synchronous>, transform_indices = @transform_1, window_bounds = array<i64: 1024, 512>}, {pipeline_mode = #tpu.pipeline_mode<synchronous>, transform_indices = @transform_2, window_bounds = array<i64: 1, 512>}, {transform_indices = @transform_3, window_bounds = array<i64: 32, 512>}]} {
    %c0 = arith.constant 0 : index
    %c0_0 = arith.constant 0 : index
    %0 = vector.load %arg1[%c0, %c0_0] : memref<32x1024xbf16, #tpu.memory_space<vmem>>, vector<32x1024xbf16>
    %c0_1 = arith.constant 0 : index
    %c0_2 = arith.constant 0 : index
    %1 = vector.load %arg2[%c0_1, %c0_2] : memref<1024x512xbf16, #tpu.memory_space<vmem>>, vector<1024x512xbf16>
    %cst = arith.constant dense<0.000000e+00> : vector<32x512xf32>
    %2 = tpu.matmul %0, %1, %cst {dimension_numbers = #tpu.dot_dimension_numbers<[1], [0], [0], [1], [0, 0, 1, 1], [], []>} : vector<32x1024xbf16>, vector<1024x512xbf16>, vector<32x512xf32> -> vector<32x512xf32>
    %c0_3 = arith.constant 0 : index
    %c0_4 = arith.constant 0 : index
    %3 = vector.load %arg3[%c0_3, %c0_4] : memref<1x512xf32, #tpu.memory_space<vmem>>, vector<1x512xf32>
    %4 = vector.broadcast %3 : vector<1x512xf32> to vector<32x512xf32>
    %5 = arith.addf %2, %4 : vector<32x512xf32>
    %cst_5 = arith.constant 0.000000e+00 : f32
    %6 = vector.broadcast %cst_5 : f32 to vector<32x512xf32>
    %7 = arith.maximumf %5, %6 : vector<32x512xf32>
    %8 = arith.truncf %7 : vector<32x512xf32> to vector<32x512xbf16>
    %c0_6 = arith.constant 0 : index
    %c0_7 = arith.constant 0 : index
    %9 = vector.load %arg4[%c0_6, %c0_7] : memref<32x512xbf16, #tpu.memory_space<vmem>>, vector<32x512xbf16>
    tpu.vector_store %arg4[%c0_6, %c0_7], %8 {strides = array<i32>} : memref<32x512xbf16, #tpu.memory_space<vmem>>, vector<32x512xbf16>,
    return
  }
  func.func @transform_0(%arg0: i32) -> (i32, i32) {
    %c0_i32 = arith.constant 0 : i32
    %c0_i32_0 = arith.constant 0 : i32
    return %arg0, %c0_i32 : i32, i32
  }
  func.func @transform_1(%arg0: i32) -> (i32, i32) {
    %c0_i32 = arith.constant 0 : i32
    %c0_i32_0 = arith.constant 0 : i32
    %c0_i32_1 = arith.constant 0 : i32
    return %c0_i32, %c0_i32_0 : i32, i32
  }
  func.func @transform_2(%arg0: i32) -> (i32, i32) {
    %c0_i32 = arith.constant 0 : i32
    %c0_i32_0 = arith.constant 0 : i32
    %c0_i32_1 = arith.constant 0 : i32
    return %c0_i32, %c0_i32_0 : i32, i32
  }
  func.func @transform_3(%arg0: i32) -> (i32, i32) {
    %c0_i32 = arith.constant 0 : i32
    %c0_i32_0 = arith.constant 0 : i32
    return %arg0, %c0_i32 : i32, i32
  }
}

module attributes {stable_mosaic.version = 11 : i64} {
  func.func @kernel(%arg0: i32, %arg1: memref<2x8192xbf16, #tpu.memory_space<vmem>>, %arg2: memref<1x8192x64xbf16, #tpu.memory_space<vmem>>, %arg3: memref<1x1x64xf32, #tpu.memory_space<vmem>>, %arg4: memref<1x2x64xf32, #tpu.memory_space<vmem>>) attributes {dimension_semantics = [#tpu.dimension_semantics<parallel>], iteration_bounds = array<i64: 2>, scalar_prefetch = 0 : i64, scratch_operands = 0 : i64, tpu.core_type = #tpu.core_type<tc>, window_params = [{pipeline_mode = #tpu.pipeline_mode<synchronous>, transform_indices = @transform_0, window_bounds = array<i64: 2, 8192>}, {transform_indices = @transform_1, window_bounds = array<i64: 1, 8192, 64>}, {transform_indices = @transform_2, window_bounds = array<i64: 1, 1, 64>}, {transform_indices = @transform_3, window_bounds = array<i64: 1, 2, 64>}]} {
    %c0 = arith.constant 0 : index
    %c0_0 = arith.constant 0 : index
    %0 = vector.load %arg1[%c0, %c0_0] : memref<2x8192xbf16, #tpu.memory_space<vmem>>, vector<2x8192xbf16>
    %c0_1 = arith.constant 0 : index
    %c0_2 = arith.constant 0 : index
    %c0_3 = arith.constant 0 : index
    %1 = vector.load %arg2[%c0_1, %c0_2, %c0_3] : memref<1x8192x64xbf16, #tpu.memory_space<vmem>>, vector<1x8192x64xbf16>
    %2 = vector.shape_cast %1 : vector<1x8192x64xbf16> to vector<8192x64xbf16>
    %cst = arith.constant dense<0.000000e+00> : vector<2x64xf32>
    %3 = tpu.matmul %0, %2, %cst {dimension_numbers = #tpu.dot_dimension_numbers<[1], [0], [0], [1], [0, 0, 1, 1], [], []>} : vector<2x8192xbf16>, vector<8192x64xbf16>, vector<2x64xf32> -> vector<2x64xf32>
    %c0_4 = arith.constant 0 : index
    %c0_5 = arith.constant 0 : index
    %c0_6 = arith.constant 0 : index
    %4 = vector.load %arg3[%c0_4, %c0_5, %c0_6] : memref<1x1x64xf32, #tpu.memory_space<vmem>>, vector<1x1x64xf32>
    %5 = vector.shape_cast %4 : vector<1x1x64xf32> to vector<1x64xf32>
    %6 = vector.broadcast %5 : vector<1x64xf32> to vector<2x64xf32>
    %7 = arith.addf %3, %6 : vector<2x64xf32>
    %c0_i32 = arith.constant 0 : i32
    %8 = arith.cmpi eq, %arg0, %c0_i32 : i32
    %9 = arith.extui %8 : i1 to i32
    %c0_i32_7 = arith.constant 0 : i32
    %10 = arith.cmpi ne, %9, %c0_i32_7 : i32
    scf.if %10 {
      %c0_9 = arith.constant 0 : index
      %c0_10 = arith.constant 0 : index
      %c0_11 = arith.constant 0 : index
      %14 = vector.load %arg4[%c0_9, %c0_10, %c0_11] : memref<1x2x64xf32, #tpu.memory_space<vmem>>, vector<1x2x64xf32>
      %15 = vector.shape_cast %14 : vector<1x2x64xf32> to vector<2x64xf32>
      %16 = vector.shape_cast %7 : vector<2x64xf32> to vector<1x2x64xf32>
      tpu.vector_store %arg4[%c0_9, %c0_10, %c0_11], %16 {strides = array<i32>} : memref<1x2x64xf32, #tpu.memory_space<vmem>>, vector<1x2x64xf32>,
    } else {
    }
    %c1_i32 = arith.constant 1 : i32
    %11 = arith.cmpi eq, %arg0, %c1_i32 : i32
    %12 = arith.extui %11 : i1 to i32
    %c0_i32_8 = arith.constant 0 : i32
    %13 = arith.cmpi ne, %12, %c0_i32_8 : i32
    scf.if %13 {
      %cst_9 = arith.constant 0.000000e+00 : f32
      %14 = vector.broadcast %cst_9 : f32 to vector<2x64xf32>
      %15 = arith.maximumf %7, %14 : vector<2x64xf32>
      %16 = math.absf %7 : vector<2x64xf32>
      %cst_10 = arith.constant 0.000000e+00 : f32
      %17 = vector.broadcast %cst_10 : f32 to vector<2x64xf32>
      %18 = arith.subf %17, %16 : vector<2x64xf32>
      %19 = math.exp %18 : vector<2x64xf32>
      %20 = math.log1p %19 : vector<2x64xf32>
      %21 = arith.addf %15, %20 : vector<2x64xf32>
      %cst_11 = arith.constant 9.99999997E-7 : f32
      %22 = vector.broadcast %cst_11 : f32 to vector<2x64xf32>
      %23 = arith.addf %21, %22 : vector<2x64xf32>
      %c0_12 = arith.constant 0 : index
      %c0_13 = arith.constant 0 : index
      %c0_14 = arith.constant 0 : index
      %24 = vector.load %arg4[%c0_12, %c0_13, %c0_14] : memref<1x2x64xf32, #tpu.memory_space<vmem>>, vector<1x2x64xf32>
      %25 = vector.shape_cast %24 : vector<1x2x64xf32> to vector<2x64xf32>
      %26 = vector.shape_cast %23 : vector<2x64xf32> to vector<1x2x64xf32>
      tpu.vector_store %arg4[%c0_12, %c0_13, %c0_14], %26 {strides = array<i32>} : memref<1x2x64xf32, #tpu.memory_space<vmem>>, vector<1x2x64xf32>,
    } else {
    }
    return
  }
  func.func @transform_0(%arg0: i32) -> (i32, i32) {
    %c0_i32 = arith.constant 0 : i32
    %c0_i32_0 = arith.constant 0 : i32
    %c0_i32_1 = arith.constant 0 : i32
    return %c0_i32, %c0_i32_0 : i32, i32
  }
  func.func @transform_1(%arg0: i32) -> (i32, i32, i32) {
    %c0_i32 = arith.constant 0 : i32
    %c0_i32_0 = arith.constant 0 : i32
    %c0_i32_1 = arith.constant 0 : i32
    return %arg0, %c0_i32, %c0_i32_0 : i32, i32, i32
  }
  func.func @transform_2(%arg0: i32) -> (i32, i32, i32) {
    %c0_i32 = arith.constant 0 : i32
    %c0_i32_0 = arith.constant 0 : i32
    %c0_i32_1 = arith.constant 0 : i32
    return %arg0, %c0_i32, %c0_i32_0 : i32, i32, i32
  }
  func.func @transform_3(%arg0: i32) -> (i32, i32, i32) {
    %c0_i32 = arith.constant 0 : i32
    %c0_i32_0 = arith.constant 0 : i32
    %c0_i32_1 = arith.constant 0 : i32
    return %arg0, %c0_i32, %c0_i32_0 : i32, i32, i32
  }
}

</mosaic_0001>

<bundles_post_ra>
// kernel: sent_encoder_forward.6
= control target key start
LH: loop header
LB: loop body
LE: loop exit
PB: predicated region body
PF: predicated region fallthrough
CT: control target
= control target key end

     0   :  { %8 = vsyncpa [#allocation3], 0  ;;  %s5425_s0 = inlined_call_operand.vmem [shape: bf16[2048,16], index: 0, kind: input, shape index: {}]   ;;  %s5426_s1 = inlined_call_operand.hbm [shape: bf16[16,32], index: 1, kind: input, shape index: {}]   ;;  %s5427_s2 = inlined_call_operand.hbm [shape: f32[1,32], index: 2, kind: input, shape index: {}]   ;;  %s5428_s3 = inlined_call_operand.vmem [shape: bf16[2048,32], index: 3, kind: output, shape index: {}]  }
   0x1   :  { %s16_s14 = sshll.u32 %s5426_s1, 4  ;;  %s17_s14 = int_to_ptr.hbm [resolvable:$true] %s16_s14 }
   0x2   :  { %9 = vsyncpa [#allocation5], 0  ;;  %s3597_s15 = smov [#allocation2]   ;;  %s30_s19 = sshll.u32 %s5427_s2, 4  ;;  %s31_s19 = int_to_ptr.hbm [resolvable:$true] %s30_s19 }
   0x3   :  { %s18_s16 = sshll.u32 %s3597_s15, 4  ;;  %s3598_s20 = smov 64   ;;  %s19_s16 = int_to_ptr.vmem [resolvable:$true] %s18_s16 }
   0x4   :  { %s3599_s21 = smov 4   ;;  %s3600_s22 = smov [#allocation4]  }
   0x5   :  { %24 = dma.hbm_to_vmem [thread:$0]  %s17_s14, 128, %s19_s16, [#allocation3], %s3598_s20, %s3598_s20, %s3599_s21  }
   0x6   :  { %s32_s23 = sshll.u32 %s3600_s22, 4  ;;  %s33_s23 = int_to_ptr.vmem [resolvable:$true] %s32_s23 }
   0x7   :  { %35 = dma.hbm_to_vmem [thread:$0]  %s31_s19, 16, %s33_s23, [#allocation5]  }
   0x8   :  { %3593 = dma.done.wait [#allocation3], 128  }
   0x9   :  { %3594 = vsyncadd [#allocation3], 4294967168 }
   0xa   :  { %3595 = dma.done.wait [#allocation5], 16  }
   0xb   :  { %3596 = vsyncadd [#allocation5], 4294967280  ;;  %v3534_v0 = vld [vmem:[#allocation2] sm:$0xff]  ;;  %vm953_vm0 = vcmask 130048   ;;  %v3407_v5 = vld [vmem:[%s5425_s0 + $0x8] sm:$0xff]  ;;  %vm2499_vm1 = vcmask 257024  }
   0xc   :  { %v3406_v1 = vld [vmem:[%s5425_s0] sm:$0xff]  ;;  %1345 = vmatpush.bf16.msra.mxu0 %v3534_v0  ;;  %3535 = vmatpush.bf16.msra.mxu1 %v3534_v0  ;;  %v3439_v6 = vld [vmem:[%s5425_s0 + $0x108] sm:$0xff]  ;;  %v3408_v9 = vld [vmem:[%s5425_s0 + $0x10] sm:$0xff] }
   0xd   :  { %v3438_v2 = vld [vmem:[%s5425_s0 + $0x100] sm:$0xff]  ;;  %3536 = vmatpush.bf16.msra.mxu2 %v3534_v0  ;;  %3537 = vmatpush.bf16.msra.mxu3 %v3534_v0  ;;  %v3471_v7 = vld [vmem:[%s5425_s0 + $0x208] sm:$0xff]  ;;  %v3440_v10 = vld [vmem:[%s5425_s0 + $0x110] sm:$0xff] }
   0xe   :  { %v3470_v3 = vld [vmem:[%s5425_s0 + $0x200] sm:$0xff]  ;;  %v3503_v8 = vld [vmem:[%s5425_s0 + $0x308] sm:$0xff]  ;;  %v3472_v11 = vld [vmem:[%s5425_s0 + $0x210] sm:$0xff] }
   0xf   :  { %v3502_v4 = vld [vmem:[%s5425_s0 + $0x300] sm:$0xff]  ;;  %3278 = vmatmul.msk.bf16.vlgmr.msra.gmra.mxu0 %vm953_vm0, %v3406_v1  ;;  %3310 = vmatmul.msk.bf16.vlgmr.msra.gmra.mxu1 %vm953_vm0, %v3438_v2  ;;  %v3504_v12 = vld [vmem:[%s5425_s0 + $0x310] sm:$0xff]  ;;  %v3409_v13 = vld [vmem:[%s5425_s0 + $0x18] sm:$0xff] }
  0x10   :  { %3342 = vmatmul.msk.bf16.vlgmr.msra.gmra.mxu2 %vm953_vm0, %v3470_v3  ;;  %3374 = vmatmul.msk.bf16.vlgmr.msra.gmra.mxu3 %vm953_vm0, %v3502_v4  ;;  %v3441_v14 = vld [vmem:[%s5425_s0 + $0x118] sm:$0xff]  ;;  %v3410_v17 = vld [vmem:[%s5425_s0 + $0x20] sm:$0xff]  ;;  %v3411_v21 = vld [vmem:[%s5425_s0 + $0x28] sm:$0xff] }
  0x11   :  { %v3473_v15 = vld [vmem:[%s5425_s0 + $0x218] sm:$0xff]  ;;  %v3442_v18 = vld [vmem:[%s5425_s0 + $0x120] sm:$0xff]  ;;  %v3443_v22 = vld [vmem:[%s5425_s0 + $0x128] sm:$0xff] }
  0x12   :  { %v3505_v16 = vld [vmem:[%s5425_s0 + $0x318] sm:$0xff]  ;;  %v3474_v19 = vld [vmem:[%s5425_s0 + $0x220] sm:$0xff]  ;;  %v3475_v23 = vld [vmem:[%s5425_s0 + $0x228] sm:$0xff] }
  0x13   :  { %v3506_v20 = vld [vmem:[%s5425_s0 + $0x320] sm:$0xff]  ;;  %v3507_v24 = vld [vmem:[%s5425_s0 + $0x328] sm:$0xff]  ;;  %v3412_v25 = vld [vmem:[%s5425_s0 + $0x30] sm:$0xff] }
  0x14   :  { %v3444_v26 = vld [vmem:[%s5425_s0 + $0x130] sm:$0xff]  ;;  %v3413_v29 = vld [vmem:[%s5425_s0 + $0x38] sm:$0xff]  ;;  %v3755_v33 = vld [vmem:[#allocation4] ss:$0 sm:$0xff] }
  0x15   :  { %v3476_v27 = vld [vmem:[%s5425_s0 + $0x230] sm:$0xff]  ;;  %v3445_v30 = vld [vmem:[%s5425_s0 + $0x138] sm:$0xff]  ;;  %v3414_v34 = vld [vmem:[%s5425_s0 + $0x40] sm:$0xff] }
  0x16   :  { %v3508_v28 = vld [vmem:[%s5425_s0 + $0x330] sm:$0xff]  ;;  %v3477_v31 = vld [vmem:[%s5425_s0 + $0x238] sm:$0xff]  ;;  %v3446_v35 = vld [vmem:[%s5425_s0 + $0x140] sm:$0xff] }
  0x17   :  { %v3509_v32 = vld [vmem:[%s5425_s0 + $0x338] sm:$0xff]  ;;  %v3478_v38 = vld [vmem:[%s5425_s0 + $0x240] sm:$0xff]  ;;  %v3415_v0 = vld [vmem:[%s5425_s0 + $0x48] sm:$0xff] }
  0x18   :  { %v3510_v39 = vld [vmem:[%s5425_s0 + $0x340] sm:$0xff]  ;;  %v3447_v1 = vld [vmem:[%s5425_s0 + $0x148] sm:$0xff] }
  0x1f   :  { %3279 = vmatmul.msk.bf16.gmra.mxu0 %vm953_vm0, %v3407_v5  ;;  %3311 = vmatmul.msk.bf16.gmra.mxu1 %vm953_vm0, %v3439_v6  ;;  %v3479_v6 = vld [vmem:[%s5425_s0 + $0x248] sm:$0xff] }
  0x20   :  { %3343 = vmatmul.msk.bf16.gmra.mxu2 %vm953_vm0, %v3471_v7  ;;  %3375 = vmatmul.msk.bf16.gmra.mxu3 %vm953_vm0, %v3503_v8  ;;  %v3511_v7 = vld [vmem:[%s5425_s0 + $0x348] sm:$0xff] }
  0x2f   :  { %3280 = vmatmul.msk.bf16.gmra.mxu0 %vm953_vm0, %v3408_v9  ;;  %3312 = vmatmul.msk.bf16.gmra.mxu1 %vm953_vm0, %v3440_v10 }
  0x30   :  { %3344 = vmatmul.msk.bf16.gmra.mxu2 %vm953_vm0, %v3472_v11  ;;  %3376 = vmatmul.msk.bf16.gmra.mxu3 %vm953_vm0, %v3504_v12 }
  0x3f   :  { %3281 = vmatmul.msk.bf16.gmra.mxu0 %vm953_vm0, %v3409_v13  ;;  %3313 = vmatmul.msk.bf16.gmra.mxu1 %vm953_vm0, %v3441_v14 }
  0x40   :  { %3345 = vmatmul.msk.bf16.gmra.mxu2 %vm953_vm0, %v3473_v15  ;;  %3377 = vmatmul.msk.bf16.gmra.mxu3 %vm953_vm0, %v3505_v16 }
  0x4f   :  { %3282 = vmatmul.msk.bf16.gmra.mxu0 %vm953_vm0, %v3410_v17  ;;  %3314 = vmatmul.msk.bf16.gmra.mxu1 %vm953_vm0, %v3442_v18 }
  0x50   :  { %3346 = vmatmul.msk.bf16.gmra.mxu2 %vm953_vm0, %v3474_v19  ;;  %3378 = vmatmul.msk.bf16.gmra.mxu3 %vm953_vm0, %v3506_v20 }
  0x5f   :  { %3283 = vmatmul.msk.bf16.gmra.mxu0 %vm953_vm0, %v3411_v21  ;;  %3315 = vmatmul.msk.bf16.gmra.mxu1 %vm953_vm0, %v3443_v22 }
  0x60   :  { %3347 = vmatmul.msk.bf16.gmra.mxu2 %vm953_vm0, %v3475_v23  ;;  %3379 = vmatmul.msk.bf16.gmra.mxu3 %vm953_vm0, %v3507_v24 }
  0x6f   :  { %3284 = vmatmul.msk.bf16.gmra.mxu0 %vm953_vm0, %v3412_v25  ;;  %3316 = vmatmul.msk.bf16.gmra.mxu1 %vm953_vm0, %v3444_v26 }
  0x70   :  { %3348 = vmatmul.msk.bf16.gmra.mxu2 %vm953_vm0, %v3476_v27  ;;  %3380 = vmatmul.msk.bf16.gmra.mxu3 %vm953_vm0, %v3508_v28 }
  0x7f   :  { %3285 = vmatmul.msk.bf16.gmra.mxu0 %vm953_vm0, %v3413_v29  ;;  %3317 = vmatmul.msk.bf16.gmra.mxu1 %vm953_vm0, %v3445_v30 }
  0x80   :  { %3349 = vmatmul.msk.bf16.gmra.mxu2 %vm953_vm0, %v3477_v31  ;;  %3381 = vmatmul.msk.bf16.gmra.mxu3 %vm953_vm0, %v3509_v32 }
  0x8c   :  { %v1347_v36 = vpop.f32.mrf.mxu0  ;;  %v1507_v37 = vpop.f32.mrf.mxu1 }
  0x8d   :  { %v1348_v40 = vadd.f32 %v3755_v33, %v1347_v36  ;;  %v1508_v41 = vadd.f32 %v3755_v33, %v1507_v37  ;;  %v3416_v37 = vld [vmem:[%s5425_s0 + $0x50] sm:$0xff] }
  0x8f   :  { %v1987_v42 = vmax.f32 %v1348_v40, 0.0  ;;  %v2051_v43 = vmax.f32 %v1508_v41, 0.0  ;;  %3286 = vmatmul.msk.bf16.gmra.mxu0 %vm953_vm0, %v3414_v34  ;;  %3318 = vmatmul.msk.bf16.gmra.mxu1 %vm953_vm0, %v3446_v35 }
  0x90   :  { %3350 = vmatmul.msk.bf16.gmra.mxu2 %vm953_vm0, %v3478_v38  ;;  %3382 = vmatmul.msk.bf16.gmra.mxu3 %vm953_vm0, %v3510_v39  ;;  %v3448_v38 = vld [vmem:[%s5425_s0 + $0x150] sm:$0xff] }
  0x91   :  { %v2243_v44 = vpack.c.bf16 %v1987_v42, %v1987_v42  ;;  %v2307_v45 = vpack.c.bf16 %v2051_v43, %v2051_v43  ;;  %v3480_v43 = vld [vmem:[%s5425_s0 + $0x250] sm:$0xff] }
  0x93   :  { %2500 = vst.msk [vmem:[%s5428_s3] sm:$0xf] %vm2499_vm1, %v2243_v44  ;;  %v1667_v46 = vpop.f32.mrf.mxu2  ;;  %v1827_v47 = vpop.f32.mrf.mxu3  ;;  %v3512_v44 = vld [vmem:[%s5425_s0 + $0x350] sm:$0xff] }
  0x94   :  { %2564 = vst.msk [vmem:[%s5428_s3 + $0x100] sm:$0xf] %vm2499_vm1, %v2307_v45  ;;  %v1668_v48 = vadd.f32 %v3755_v33, %v1667_v46  ;;  %v1828_v49 = vadd.f32 %v3755_v33, %v1827_v47  ;;  %v1349_v50 = vpop.f32.mrf.mxu0  ;;  %v1509_v51 = vpop.f32.mrf.mxu1 }
  0x95   :  { %v1350_v52 = vadd.f32 %v3755_v33, %v1349_v50  ;;  %v1510_v53 = vadd.f32 %v3755_v33, %v1509_v51 }
  0x96   :  { %v2115_v54 = vmax.f32 %v1668_v48, 0.0  ;;  %v2179_v55 = vmax.f32 %v1828_v49, 0.0 }
  0x97   :  { %v1988_v56 = vmax.f32 %v1350_v52, 0.0  ;;  %v2052_v57 = vmax.f32 %v1510_v53, 0.0 }
  0x98   :  { %v2371_v58 = vpack.c.bf16 %v2115_v54, %v2115_v54  ;;  %v2435_v59 = vpack.c.bf16 %v2179_v55, %v2179_v55 }
  0x99   :  { %v2244_v60 = vpack.c.bf16 %v1988_v56, %v1988_v56  ;;  %v2308_v61 = vpack.c.bf16 %v2052_v57, %v2052_v57 }
  0x9a   :  { %2628 = vst.msk [vmem:[%s5428_s3 + $0x200] sm:$0xf] %vm2499_vm1, %v2371_v58 }
  0x9b   :  { %2692 = vst.msk [vmem:[%s5428_s3 + $0x300] sm:$0xf] %vm2499_vm1, %v2435_v59  ;;  %v1669_v62 = vpop.f32.mrf.mxu2  ;;  %v1829_v63 = vpop.f32.mrf.mxu3 }
  0x9c   :  { %2501 = vst.msk [vmem:[%s5428_s3 + $0x4] sm:$0xf] %vm2499_vm1, %v2244_v60  ;;  %v1670_v2 = vadd.f32 %v3755_v33, %v1669_v62  ;;  %v1830_v3 = vadd.f32 %v3755_v33, %v1829_v63  ;;  %v1352_v4 = vpop.f32.mrf.mxu0  ;;  %v1512_v5 = vpop.f32.mrf.mxu1 }
  0x9d   :  { %2565 = vst.msk [vmem:[%s5428_s3 + $0x104] sm:$0xf] %vm2499_vm1, %v2308_v61  ;;  %v1353_v8 = vadd.f32 %v3755_v33, %v1352_v4  ;;  %v1513_v9 = vadd.f32 %v3755_v33, %v1512_v5 }
  0x9e   :  { %v2116_v10 = vmax.f32 %v1670_v2, 0.0  ;;  %v2180_v11 = vmax.f32 %v1830_v3, 0.0 }
  0x9f   :  { %v1989_v12 = vmax.f32 %v1353_v8, 0.0  ;;  %v2053_v13 = vmax.f32 %v1513_v9, 0.0  ;;  %3287 = vmatmul.msk.bf16.gmra.mxu0 %vm953_vm0, %v3415_v0  ;;  %3319 = vmatmul.msk.bf16.gmra.mxu1 %vm953_vm0, %v3447_v1  ;;  %v3417_v9 = vld [vmem:[%s5425_s0 + $0x58] sm:$0xff] }
  0xa0   :  { %v2372_v14 = vpack.c.bf16 %v2116_v10, %v2116_v10  ;;  %v2436_v15 = vpack.c.bf16 %v2180_v11, %v2180_v11  ;;  %3351 = vmatmul.msk.bf16.gmra.mxu2 %vm953_vm0, %v3479_v6  ;;  %3383 = vmatmul.msk.bf16.gmra.mxu3 %vm953_vm0, %v3511_v7  ;;  %v3449_v10 = vld [vmem:[%s5425_s0 + $0x158] sm:$0xff] }
  0xa1   :  { %v2245_v16 = vpack.c.bf16 %v1989_v12, %v1989_v12  ;;  %v2309_v17 = vpack.c.bf16 %v2053_v13, %v2053_v13 }
  0xa2   :  { %2629 = vst.msk [vmem:[%s5428_s3 + $0x204] sm:$0xf] %vm2499_vm1, %v2372_v14 }
  0xa3   :  { %2693 = vst.msk [vmem:[%s5428_s3 + $0x304] sm:$0xf] %vm2499_vm1, %v2436_v15  ;;  %v1672_v18 = vpop.f32.mrf.mxu2  ;;  %v1832_v19 = vpop.f32.mrf.mxu3  ;;  %v3481_v15 = vld [vmem:[%s5425_s0 + $0x258] sm:$0xff] }
  0xa4   :  { %2502 = vst.msk [vmem:[%s5428_s3 + $0x8] sm:$0xf] %vm2499_vm1, %v2245_v16  ;;  %v1673_v20 = vadd.f32 %v3755_v33, %v1672_v18  ;;  %v1833_v21 = vadd.f32 %v3755_v33, %v1832_v19  ;;  %v1354_v22 = vpop.f32.mrf.mxu0  ;;  %v1514_v23 = vpop.f32.mrf.mxu1  ;;  %v3513_v16 = vld [vmem:[%s5425_s0 + $0x358] sm:$0xff] }
  0xa5   :  { %2566 = vst.msk [vmem:[%s5428_s3 + $0x108] sm:$0xf] %vm2499_vm1, %v2309_v17  ;;  %v1355_v24 = vadd.f32 %v3755_v33, %v1354_v22  ;;  %v1515_v25 = vadd.f32 %v3755_v33, %v1514_v23 }
  0xa6   :  { %v2117_v26 = vmax.f32 %v1673_v20, 0.0  ;;  %v2181_v27 = vmax.f32 %v1833_v21, 0.0 }
  0xa7   :  { %v1990_v28 = vmax.f32 %v1355_v24, 0.0  ;;  %v2054_v29 = vmax.f32 %v1515_v25, 0.0 }
  0xa8   :  { %v2373_v30 = vpack.c.bf16 %v2117_v26, %v2117_v26  ;;  %v2437_v31 = vpack.c.bf16 %v2181_v27, %v2181_v27 }
  0xa9   :  { %v2246_v32 = vpack.c.bf16 %v1990_v28, %v1990_v28  ;;  %v2310_v34 = vpack.c.bf16 %v2054_v29, %v2054_v29 }
  0xaa   :  { %2630 = vst.msk [vmem:[%s5428_s3 + $0x208] sm:$0xf] %vm2499_vm1, %v2373_v30 }
  0xab   :  { %2694 = vst.msk [vmem:[%s5428_s3 + $0x308] sm:$0xf] %vm2499_vm1, %v2437_v31  ;;  %v1674_v35 = vpop.f32.mrf.mxu2  ;;  %v1834_v36 = vpop.f32.mrf.mxu3 }
  0xac   :  { %2503 = vst.msk [vmem:[%s5428_s3 + $0xc] sm:$0xf] %vm2499_vm1, %v2246_v32  ;;  %v1675_v39 = vadd.f32 %v3755_v33, %v1674_v35  ;;  %v1835_v40 = vadd.f32 %v3755_v33, %v1834_v36  ;;  %v1357_v41 = vpop.f32.mrf.mxu0  ;;  %v1517_v42 = vpop.f32.mrf.mxu1 }
  0xad   :  { %2567 = vst.msk [vmem:[%s5428_s3 + $0x10c] sm:$0xf] %vm2499_vm1, %v2310_v34  ;;  %v1358_v45 = vadd.f32 %v3755_v33, %v1357_v41  ;;  %v1518_v46 = vadd.f32 %v3755_v33, %v1517_v42 }
  0xae   :  { %v2118_v47 = vmax.f32 %v1675_v39, 0.0  ;;  %v2182_v48 = vmax.f32 %v1835_v40, 0.0 }
  0xaf   :  { %v1991_v49 = vmax.f32 %v1358_v45, 0.0  ;;  %v2055_v50 = vmax.f32 %v1518_v46, 0.0  ;;  %3288 = vmatmul.msk.bf16.gmra.mxu0 %vm953_vm0, %v3416_v37  ;;  %3320 = vmatmul.msk.bf16.gmra.mxu1 %vm953_vm0, %v3448_v38  ;;  %v3418_v46 = vld [vmem:[%s5425_s0 + $0x60] sm:$0xff] }
  0xb0   :  { %v2374_v51 = vpack.c.bf16 %v2118_v47, %v2118_v47  ;;  %v2438_v52 = vpack.c.bf16 %v2182_v48, %v2182_v48  ;;  %3352 = vmatmul.msk.bf16.gmra.mxu2 %vm953_vm0, %v3480_v43  ;;  %3384 = vmatmul.msk.bf16.gmra.mxu3 %vm953_vm0, %v3512_v44  ;;  %v3450_v47 = vld [vmem:[%s5425_s0 + $0x160] sm:$0xff] }
  0xb1   :  { %v2247_v53 = vpack.c.bf16 %v1991_v49, %v1991_v49  ;;  %v2311_v54 = vpack.c.bf16 %v2055_v50, %v2055_v50 }
  0xb2   :  { %2631 = vst.msk [vmem:[%s5428_s3 + $0x20c] sm:$0xf] %vm2499_vm1, %v2374_v51 }
  0xb3   :  { %2695 = vst.msk [vmem:[%s5428_s3 + $0x30c] sm:$0xf] %vm2499_vm1, %v2438_v52  ;;  %v1677_v55 = vpop.f32.mrf.mxu2  ;;  %v1837_v56 = vpop.f32.mrf.mxu3  ;;  %v3482_v52 = vld [vmem:[%s5425_s0 + $0x260] sm:$0xff] }
  0xb4   :  { %2504 = vst.msk [vmem:[%s5428_s3 + $0x10] sm:$0xf] %vm2499_vm1, %v2247_v53  ;;  %v1678_v57 = vadd.f32 %v3755_v33, %v1677_v55  ;;  %v1838_v58 = vadd.f32 %v3755_v33, %v1837_v56  ;;  %v1359_v59 = vpop.f32.mrf.mxu0  ;;  %v1519_v60 = vpop.f32.mrf.mxu1  ;;  %v3514_v53 = vld [vmem:[%s5425_s0 + $0x360] sm:$0xff] }
  0xb5   :  { %2568 = vst.msk [vmem:[%s5428_s3 + $0x110] sm:$0xf] %vm2499_vm1, %v2311_v54  ;;  %v1360_v61 = vadd.f32 %v3755_v33, %v1359_v59  ;;  %v1520_v62 = vadd.f32 %v3755_v33, %v1519_v60 }
  0xb6   :  { %v2119_v63 = vmax.f32 %v1678_v57, 0.0  ;;  %v2183_v0 = vmax.f32 %v1838_v58, 0.0 }
  0xb7   :  { %v1992_v1 = vmax.f32 %v1360_v61, 0.0  ;;  %v2056_v2 = vmax.f32 %v1520_v62, 0.0 }
  0xb8   :  { %v2375_v3 = vpack.c.bf16 %v2119_v63, %v2119_v63  ;;  %v2439_v4 = vpack.c.bf16 %v2183_v0, %v2183_v0 }
  0xb9   :  { %v2248_v5 = vpack.c.bf16 %v1992_v1, %v1992_v1  ;;  %v2312_v6 = vpack.c.bf16 %v2056_v2, %v2056_v2 }
  0xba   :  { %2632 = vst.msk [vmem:[%s5428_s3 + $0x210] sm:$0xf] %vm2499_vm1, %v2375_v3 }
  0xbb   :  { %2696 = vst.msk [vmem:[%s5428_s3 + $0x310] sm:$0xf] %vm2499_vm1, %v2439_v4  ;;  %v1679_v7 = vpop.f32.mrf.mxu2  ;;  %v1839_v8 = vpop.f32.mrf.mxu3 }
  0xbc   :  { %2505 = vst.msk [vmem:[%s5428_s3 + $0x14] sm:$0xf] %vm2499_vm1, %v2248_v5  ;;  %v1680_v11 = vadd.f32 %v3755_v33, %v1679_v7  ;;  %v1840_v12 = vadd.f32 %v3755_v33, %v1839_v8  ;;  %v1362_v13 = vpop.f32.mrf.mxu0  ;;  %v1522_v14 = vpop.f32.mrf.mxu1 }
  0xbd   :  { %2569 = vst.msk [vmem:[%s5428_s3 + $0x114] sm:$0xf] %vm2499_vm1, %v2312_v6  ;;  %v1363_v17 = vadd.f32 %v3755_v33, %v1362_v13  ;;  %v1523_v18 = vadd.f32 %v3755_v33, %v1522_v14 }
  0xbe   :  { %v2120_v19 = vmax.f32 %v1680_v11, 0.0  ;;  %v2184_v20 = vmax.f32 %v1840_v12, 0.0 }
  0xbf   :  { %v1993_v21 = vmax.f32 %v1363_v17, 0.0  ;;  %v2057_v22 = vmax.f32 %v1523_v18, 0.0  ;;  %3289 = vmatmul.msk.bf16.gmra.mxu0 %vm953_vm0, %v3417_v9  ;;  %3321 = vmatmul.msk.bf16.gmra.mxu1 %vm953_vm0, %v3449_v10  ;;  %v3419_v18 = vld [vmem:[%s5425_s0 + $0x68] sm:$0xff] }
  0xc0   :  { %v2376_v23 = vpack.c.bf16 %v2120_v19, %v2120_v19  ;;  %v2440_v24 = vpack.c.bf16 %v2184_v20, %v2184_v20  ;;  %3353 = vmatmul.msk.bf16.gmra.mxu2 %vm953_vm0, %v3481_v15  ;;  %3385 = vmatmul.msk.bf16.gmra.mxu3 %vm953_vm0, %v3513_v16  ;;  %v3451_v19 = vld [vmem:[%s5425_s0 + $0x168] sm:$0xff] }
  0xc1   :  { %v2249_v25 = vpack.c.bf16 %v1993_v21, %v1993_v21  ;;  %v2313_v26 = vpack.c.bf16 %v2057_v22, %v2057_v22 }
  0xc2   :  { %2633 = vst.msk [vmem:[%s5428_s3 + $0x214] sm:$0xf] %vm2499_vm1, %v2376_v23 }
  0xc3   :  { %2697 = vst.msk [vmem:[%s5428_s3 + $0x314] sm:$0xf] %vm2499_vm1, %v2440_v24  ;;  %v1682_v27 = vpop.f32.mrf.mxu2  ;;  %v1842_v28 = vpop.f32.mrf.mxu3  ;;  %v3483_v24 = vld [vmem:[%s5425_s0 + $0x268] sm:$0xff] }
  0xc4   :  { %2506 = vst.msk [vmem:[%s5428_s3 + $0x18] sm:$0xf] %vm2499_vm1, %v2249_v25  ;;  %v1683_v29 = vadd.f32 %v3755_v33, %v1682_v27  ;;  %v1843_v30 = vadd.f32 %v3755_v33, %v1842_v28  ;;  %v1364_v31 = vpop.f32.mrf.mxu0  ;;  %v1524_v32 = vpop.f32.mrf.mxu1  ;;  %v3515_v25 = vld [vmem:[%s5425_s0 + $0x368] sm:$0xff] }
  0xc5   :  { %2570 = vst.msk [vmem:[%s5428_s3 + $0x118] sm:$0xf] %vm2499_vm1, %v2313_v26  ;;  %v1365_v34 = vadd.f32 %v3755_v33, %v1364_v31  ;;  %v1525_v35 = vadd.f32 %v3755_v33, %v1524_v32 }
  0xc6   :  { %v2121_v36 = vmax.f32 %v1683_v29, 0.0  ;;  %v2185_v37 = vmax.f32 %v1843_v30, 0.0 }
  0xc7   :  { %v1994_v38 = vmax.f32 %v1365_v34, 0.0  ;;  %v2058_v39 = vmax.f32 %v1525_v35, 0.0 }
  0xc8   :  { %v2377_v40 = vpack.c.bf16 %v2121_v36, %v2121_v36  ;;  %v2441_v41 = vpack.c.bf16 %v2185_v37, %v2185_v37 }
  0xc9   :  { %v2250_v42 = vpack.c.bf16 %v1994_v38, %v1994_v38  ;;  %v2314_v43 = vpack.c.bf16 %v2058_v39, %v2058_v39 }
  0xca   :  { %2634 = vst.msk [vmem:[%s5428_s3 + $0x218] sm:$0xf] %vm2499_vm1, %v2377_v40 }
  0xcb   :  { %2698 = vst.msk [vmem:[%s5428_s3 + $0x318] sm:$0xf] %vm2499_vm1, %v2441_v41  ;;  %v1684_v44 = vpop.f32.mrf.mxu2  ;;  %v1844_v45 = vpop.f32.mrf.mxu3 }
  0xcc   :  { %2507 = vst.msk [vmem:[%s5428_s3 + $0x1c] sm:$0xf] %vm2499_vm1, %v2250_v42  ;;  %v1685_v48 = vadd.f32 %v3755_v33, %v1684_v44  ;;  %v1845_v49 = vadd.f32 %v3755_v33, %v1844_v45  ;;  %v1367_v50 = vpop.f32.mrf.mxu0  ;;  %v1527_v51 = vpop.f32.mrf.mxu1 }
  0xcd   :  { %2571 = vst.msk [vmem:[%s5428_s3 + $0x11c] sm:$0xf] %vm2499_vm1, %v2314_v43  ;;  %v1368_v54 = vadd.f32 %v3755_v33, %v1367_v50  ;;  %v1528_v55 = vadd.f32 %v3755_v33, %v1527_v51 }
  0xce   :  { %v2122_v56 = vmax.f32 %v1685_v48, 0.0  ;;  %v2186_v57 = vmax.f32 %v1845_v49, 0.0 }
  0xcf   :  { %v1995_v58 = vmax.f32 %v1368_v54, 0.0  ;;  %v2059_v59 = vmax.f32 %v1528_v55, 0.0  ;;  %3290 = vmatmul.msk.bf16.gmra.mxu0 %vm953_vm0, %v3418_v46  ;;  %3322 = vmatmul.msk.bf16.gmra.mxu1 %vm953_vm0, %v3450_v47  ;;  %v3420_v55 = vld [vmem:[%s5425_s0 + $0x70] sm:$0xff] }
  0xd0   :  { %v2378_v60 = vpack.c.bf16 %v2122_v56, %v2122_v56  ;;  %v2442_v61 = vpack.c.bf16 %v2186_v57, %v2186_v57  ;;  %3354 = vmatmul.msk.bf16.gmra.mxu2 %vm953_vm0, %v3482_v52  ;;  %3386 = vmatmul.msk.bf16.gmra.mxu3 %vm953_vm0, %v3514_v53  ;;  %v3452_v56 = vld [vmem:[%s5425_s0 + $0x170] sm:$0xff] }
  0xd1   :  { %v2251_v62 = vpack.c.bf16 %v1995_v58, %v1995_v58  ;;  %v2315_v63 = vpack.c.bf16 %v2059_v59, %v2059_v59 }
  0xd2   :  { %2635 = vst.msk [vmem:[%s5428_s3 + $0x21c] sm:$0xf] %vm2499_vm1, %v2378_v60 }
  0xd3   :  { %2699 = vst.msk [vmem:[%s5428_s3 + $0x31c] sm:$0xf] %vm2499_vm1, %v2442_v61  ;;  %v1687_v0 = vpop.f32.mrf.mxu2  ;;  %v1847_v1 = vpop.f32.mrf.mxu3  ;;  %v3484_v61 = vld [vmem:[%s5425_s0 + $0x270] sm:$0xff] }
  0xd4   :  { %2508 = vst.msk [vmem:[%s5428_s3 + $0x20] sm:$0xf] %vm2499_vm1, %v2251_v62  ;;  %v1688_v2 = vadd.f32 %v3755_v33, %v1687_v0  ;;  %v1848_v3 = vadd.f32 %v3755_v33, %v1847_v1  ;;  %v1369_v4 = vpop.f32.mrf.mxu0  ;;  %v1529_v5 = vpop.f32.mrf.mxu1  ;;  %v3516_v62 = vld [vmem:[%s5425_s0 + $0x370] sm:$0xff] }
  0xd5   :  { %2572 = vst.msk [vmem:[%s5428_s3 + $0x120] sm:$0xf] %vm2499_vm1, %v2315_v63  ;;  %v1370_v6 = vadd.f32 %v3755_v33, %v1369_v4  ;;  %v1530_v7 = vadd.f32 %v3755_v33, %v1529_v5 }
  0xd6   :  { %v2123_v8 = vmax.f32 %v1688_v2, 0.0  ;;  %v2187_v9 = vmax.f32 %v1848_v3, 0.0 }
  0xd7   :  { %v1996_v10 = vmax.f32 %v1370_v6, 0.0  ;;  %v2060_v11 = vmax.f32 %v1530_v7, 0.0 }
  0xd8   :  { %v2379_v12 = vpack.c.bf16 %v2123_v8, %v2123_v8  ;;  %v2443_v13 = vpack.c.bf16 %v2187_v9, %v2187_v9 }
  0xd9   :  { %v2252_v14 = vpack.c.bf16 %v1996_v10, %v1996_v10  ;;  %v2316_v15 = vpack.c.bf16 %v2060_v11, %v2060_v11 }
  0xda   :  { %2636 = vst.msk [vmem:[%s5428_s3 + $0x220] sm:$0xf] %vm2499_vm1, %v2379_v12 }
  0xdb   :  { %2700 = vst.msk [vmem:[%s5428_s3 + $0x320] sm:$0xf] %vm2499_vm1, %v2443_v13  ;;  %v1689_v16 = vpop.f32.mrf.mxu2  ;;  %v1849_v17 = vpop.f32.mrf.mxu3 }
  0xdc   :  { %2509 = vst.msk [vmem:[%s5428_s3 + $0x24] sm:$0xf] %vm2499_vm1, %v2252_v14  ;;  %v1690_v20 = vadd.f32 %v3755_v33, %v1689_v16  ;;  %v1850_v21 = vadd.f32 %v3755_v33, %v1849_v17  ;;  %v1372_v22 = vpop.f32.mrf.mxu0  ;;  %v1532_v23 = vpop.f32.mrf.mxu1 }
  0xdd   :  { %2573 = vst.msk [vmem:[%s5428_s3 + $0x124] sm:$0xf] %vm2499_vm1, %v2316_v15  ;;  %v1373_v26 = vadd.f32 %v3755_v33, %v1372_v22  ;;  %v1533_v27 = vadd.f32 %v3755_v33, %v1532_v23 }
  0xde   :  { %v2124_v28 = vmax.f32 %v1690_v20, 0.0  ;;  %v2188_v29 = vmax.f32 %v1850_v21, 0.0 }
  0xdf   :  { %v1997_v30 = vmax.f32 %v1373_v26, 0.0  ;;  %v2061_v31 = vmax.f32 %v1533_v27, 0.0  ;;  %3291 = vmatmul.msk.bf16.gmra.mxu0 %vm953_vm0, %v3419_v18  ;;  %3323 = vmatmul.msk.bf16.gmra.mxu1 %vm953_vm0, %v3451_v19  ;;  %v3421_v27 = vld [vmem:[%s5425_s0 + $0x78] sm:$0xff] }
  0xe0   :  { %v2380_v32 = vpack.c.bf16 %v2124_v28, %v2124_v28  ;;  %v2444_v34 = vpack.c.bf16 %v2188_v29, %v2188_v29  ;;  %3355 = vmatmul.msk.bf16.gmra.mxu2 %vm953_vm0, %v3483_v24  ;;  %3387 = vmatmul.msk.bf16.gmra.mxu3 %vm953_vm0, %v3515_v25  ;;  %v3453_v28 = vld [vmem:[%s5425_s0 + $0x178] sm:$0xff] }
  0xe1   :  { %v2253_v35 = vpack.c.bf16 %v1997_v30, %v1997_v30  ;;  %v2317_v36 = vpack.c.bf16 %v2061_v31, %v2061_v31 }
  0xe2   :  { %2637 = vst.msk [vmem:[%s5428_s3 + $0x224] sm:$0xf] %vm2499_vm1, %v2380_v32 }
  0xe3   :  { %2701 = vst.msk [vmem:[%s5428_s3 + $0x324] sm:$0xf] %vm2499_vm1, %v2444_v34  ;;  %v1692_v37 = vpop.f32.mrf.mxu2  ;;  %v1852_v38 = vpop.f32.mrf.mxu3  ;;  %v3485_v34 = vld [vmem:[%s5425_s0 + $0x278] sm:$0xff] }
  0xe4   :  { %2510 = vst.msk [vmem:[%s5428_s3 + $0x28] sm:$0xf] %vm2499_vm1, %v2253_v35  ;;  %v1693_v39 = vadd.f32 %v3755_v33, %v1692_v37  ;;  %v1853_v40 = vadd.f32 %v3755_v33, %v1852_v38  ;;  %v1374_v41 = vpop.f32.mrf.mxu0  ;;  %v1534_v42 = vpop.f32.mrf.mxu1  ;;  %v3517_v35 = vld [vmem:[%s5425_s0 + $0x378] sm:$0xff] }
  0xe5   :  { %2574 = vst.msk [vmem:[%s5428_s3 + $0x128] sm:$0xf] %vm2499_vm1, %v2317_v36  ;;  %v1375_v43 = vadd.f32 %v3755_v33, %v1374_v41  ;;  %v1535_v44 = vadd.f32 %v3755_v33, %v1534_v42 }
  0xe6   :  { %v2125_v45 = vmax.f32 %v1693_v39, 0.0  ;;  %v2189_v46 = vmax.f32 %v1853_v40, 0.0 }
  0xe7   :  { %v1998_v47 = vmax.f32 %v1375_v43, 0.0  ;;  %v2062_v48 = vmax.f32 %v1535_v44, 0.0 }
  0xe8   :  { %v2381_v49 = vpack.c.bf16 %v2125_v45, %v2125_v45  ;;  %v2445_v50 = vpack.c.bf16 %v2189_v46, %v2189_v46 }
  0xe9   :  { %v2254_v51 = vpack.c.bf16 %v1998_v47, %v1998_v47  ;;  %v2318_v52 = vpack.c.bf16 %v2062_v48, %v2062_v48 }
  0xea   :  { %2638 = vst.msk [vmem:[%s5428_s3 + $0x228] sm:$0xf] %vm2499_vm1, %v2381_v49 }
  0xeb   :  { %2702 = vst.msk [vmem:[%s5428_s3 + $0x328] sm:$0xf] %vm2499_vm1, %v2445_v50  ;;  %v1694_v53 = vpop.f32.mrf.mxu2  ;;  %v1854_v54 = vpop.f32.mrf.mxu3 }
  0xec   :  { %2511 = vst.msk [vmem:[%s5428_s3 + $0x2c] sm:$0xf] %vm2499_vm1, %v2254_v51  ;;  %v1695_v57 = vadd.f32 %v3755_v33, %v1694_v53  ;;  %v1855_v58 = vadd.f32 %v3755_v33, %v1854_v54  ;;  %v1377_v59 = vpop.f32.mrf.mxu0  ;;  %v1537_v60 = vpop.f32.mrf.mxu1 }
  0xed   :  { %2575 = vst.msk [vmem:[%s5428_s3 + $0x12c] sm:$0xf] %vm2499_vm1, %v2318_v52  ;;  %v1378_v63 = vadd.f32 %v3755_v33, %v1377_v59  ;;  %v1538_v0 = vadd.f32 %v3755_v33, %v1537_v60 }
  0xee   :  { %v2126_v1 = vmax.f32 %v1695_v57, 0.0  ;;  %v2190_v2 = vmax.f32 %v1855_v58, 0.0 }
  0xef   :  { %v1999_v3 = vmax.f32 %v1378_v63, 0.0  ;;  %v2063_v4 = vmax.f32 %v1538_v0, 0.0  ;;  %3292 = vmatmul.msk.bf16.gmra.mxu0 %vm953_vm0, %v3420_v55  ;;  %3324 = vmatmul.msk.bf16.gmra.mxu1 %vm953_vm0, %v3452_v56  ;;  %v3422_v0 = vld [vmem:[%s5425_s0 + $0x80] sm:$0xff] }
  0xf0   :  { %v2382_v5 = vpack.c.bf16 %v2126_v1, %v2126_v1  ;;  %v2446_v6 = vpack.c.bf16 %v2190_v2, %v2190_v2  ;;  %3356 = vmatmul.msk.bf16.gmra.mxu2 %vm953_vm0, %v3484_v61  ;;  %3388 = vmatmul.msk.bf16.gmra.mxu3 %vm953_vm0, %v3516_v62  ;;  %v3454_v1 = vld [vmem:[%s5425_s0 + $0x180] sm:$0xff] }
  0xf1   :  { %v2255_v7 = vpack.c.bf16 %v1999_v3, %v1999_v3  ;;  %v2319_v8 = vpack.c.bf16 %v2063_v4, %v2063_v4 }
  0xf2   :  { %2639 = vst.msk [vmem:[%s5428_s3 + $0x22c] sm:$0xf] %vm2499_vm1, %v2382_v5 }
  0xf3   :  { %2703 = vst.msk [vmem:[%s5428_s3 + $0x32c] sm:$0xf] %vm2499_vm1, %v2446_v6  ;;  %v1697_v9 = vpop.f32.mrf.mxu2  ;;  %v1857_v10 = vpop.f32.mrf.mxu3  ;;  %v3486_v6 = vld [vmem:[%s5425_s0 + $0x280] sm:$0xff] }
  0xf4   :  { %2512 = vst.msk [vmem:[%s5428_s3 + $0x30] sm:$0xf] %vm2499_vm1, %v2255_v7  ;;  %v1698_v11 = vadd.f32 %v3755_v33, %v1697_v9  ;;  %v1858_v12 = vadd.f32 %v3755_v33, %v1857_v10  ;;  %v1379_v13 = vpop.f32.mrf.mxu0  ;;  %v1539_v14 = vpop.f32.mrf.mxu1  ;;  %v3518_v7 = vld [vmem:[%s5425_s0 + $0x380] sm:$0xff] }
  0xf5   :  { %2576 = vst.msk [vmem:[%s5428_s3 + $0x130] sm:$0xf] %vm2499_vm1, %v2319_v8  ;;  %v1380_v15 = vadd.f32 %v3755_v33, %v1379_v13  ;;  %v1540_v16 = vadd.f32 %v3755_v33, %v1539_v14 }
  0xf6   :  { %v2127_v17 = vmax.f32 %v1698_v11, 0.0  ;;  %v2191_v18 = vmax.f32 %v1858_v12, 0.0 }
  0xf7   :  { %v2000_v19 = vmax.f32 %v1380_v15, 0.0  ;;  %v2064_v20 = vmax.f32 %v1540_v16, 0.0 }
  0xf8   :  { %v2383_v21 = vpack.c.bf16 %v2127_v17, %v2127_v17  ;;  %v2447_v22 = vpack.c.bf16 %v2191_v18, %v2191_v18 }
  0xf9   :  { %v2256_v23 = vpack.c.bf16 %v2000_v19, %v2000_v19  ;;  %v2320_v24 = vpack.c.bf16 %v2064_v20, %v2064_v20 }
  0xfa   :  { %2640 = vst.msk [vmem:[%s5428_s3 + $0x230] sm:$0xf] %vm2499_vm1, %v2383_v21 }
  0xfb   :  { %2704 = vst.msk [vmem:[%s5428_s3 + $0x330] sm:$0xf] %vm2499_vm1, %v2447_v22  ;;  %v1699_v25 = vpop.f32.mrf.mxu2  ;;  %v1859_v26 = vpop.f32.mrf.mxu3 }
  0xfc   :  { %2513 = vst.msk [vmem:[%s5428_s3 + $0x34] sm:$0xf] %vm2499_vm1, %v2256_v23  ;;  %v1700_v29 = vadd.f32 %v3755_v33, %v1699_v25  ;;  %v1860_v30 = vadd.f32 %v3755_v33, %v1859_v26  ;;  %v1382_v31 = vpop.f32.mrf.mxu0  ;;  %v1542_v32 = vpop.f32.mrf.mxu1 }
  0xfd   :  { %2577 = vst.msk [vmem:[%s5428_s3 + $0x134] sm:$0xf] %vm2499_vm1, %v2320_v24  ;;  %v1383_v36 = vadd.f32 %v3755_v33, %v1382_v31  ;;  %v1543_v37 = vadd.f32 %v3755_v33, %v1542_v32 }
  0xfe   :  { %v2128_v38 = vmax.f32 %v1700_v29, 0.0  ;;  %v2192_v39 = vmax.f32 %v1860_v30, 0.0 }
  0xff   :  { %v2001_v40 = vmax.f32 %v1383_v36, 0.0  ;;  %v2065_v41 = vmax.f32 %v1543_v37, 0.0  ;;  %3293 = vmatmul.msk.bf16.gmra.mxu0 %vm953_vm0, %v3421_v27  ;;  %3325 = vmatmul.msk.bf16.gmra.mxu1 %vm953_vm0, %v3453_v28  ;;  %v3423_v37 = vld [vmem:[%s5425_s0 + $0x88] sm:$0xff] }
 0x100   :  { %v2384_v42 = vpack.c.bf16 %v2128_v38, %v2128_v38  ;;  %v2448_v43 = vpack.c.bf16 %v2192_v39, %v2192_v39  ;;  %3357 = vmatmul.msk.bf16.gmra.mxu2 %vm953_vm0, %v3485_v34  ;;  %3389 = vmatmul.msk.bf16.gmra.mxu3 %vm953_vm0, %v3517_v35  ;;  %v3455_v38 = vld [vmem:[%s5425_s0 + $0x188] sm:$0xff] }
 0x101   :  { %v2257_v44 = vpack.c.bf16 %v2001_v40, %v2001_v40  ;;  %v2321_v45 = vpack.c.bf16 %v2065_v41, %v2065_v41 }
 0x102   :  { %2641 = vst.msk [vmem:[%s5428_s3 + $0x234] sm:$0xf] %vm2499_vm1, %v2384_v42 }
 0x103   :  { %2705 = vst.msk [vmem:[%s5428_s3 + $0x334] sm:$0xf] %vm2499_vm1, %v2448_v43  ;;  %v1702_v46 = vpop.f32.mrf.mxu2  ;;  %v1862_v47 = vpop.f32.mrf.mxu3  ;;  %v3487_v43 = vld [vmem:[%s5425_s0 + $0x288] sm:$0xff] }
 0x104   :  { %2514 = vst.msk [vmem:[%s5428_s3 + $0x38] sm:$0xf] %vm2499_vm1, %v2257_v44  ;;  %v1703_v48 = vadd.f32 %v3755_v33, %v1702_v46  ;;  %v1863_v49 = vadd.f32 %v3755_v33, %v1862_v47  ;;  %v1384_v50 = vpop.f32.mrf.mxu0  ;;  %v1544_v51 = vpop.f32.mrf.mxu1  ;;  %v3519_v44 = vld [vmem:[%s5425_s0 + $0x388] sm:$0xff] }
 0x105   :  { %2578 = vst.msk [vmem:[%s5428_s3 + $0x138] sm:$0xf] %vm2499_vm1, %v2321_v45  ;;  %v1385_v52 = vadd.f32 %v3755_v33, %v1384_v50  ;;  %v1545_v53 = vadd.f32 %v3755_v33, %v1544_v51 }
 0x106   :  { %v2129_v54 = vmax.f32 %v1703_v48, 0.0  ;;  %v2193_v55 = vmax.f32 %v1863_v49, 0.0 }
 0x107   :  { %v2002_v56 = vmax.f32 %v1385_v52, 0.0  ;;  %v2066_v57 = vmax.f32 %v1545_v53, 0.0 }
 0x108   :  { %v2385_v58 = vpack.c.bf16 %v2129_v54, %v2129_v54  ;;  %v2449_v59 = vpack.c.bf16 %v2193_v55, %v2193_v55 }
 0x109   :  { %v2258_v60 = vpack.c.bf16 %v2002_v56, %v2002_v56  ;;  %v2322_v61 = vpack.c.bf16 %v2066_v57, %v2066_v57 }
 0x10a   :  { %2642 = vst.msk [vmem:[%s5428_s3 + $0x238] sm:$0xf] %vm2499_vm1, %v2385_v58 }
 0x10b   :  { %2706 = vst.msk [vmem:[%s5428_s3 + $0x338] sm:$0xf] %vm2499_vm1, %v2449_v59  ;;  %v1704_v62 = vpop.f32.mrf.mxu2  ;;  %v1864_v63 = vpop.f32.mrf.mxu3 }
 0x10c   :  { %2515 = vst.msk [vmem:[%s5428_s3 + $0x3c] sm:$0xf] %vm2499_vm1, %v2258_v60  ;;  %v1705_v2 = vadd.f32 %v3755_v33, %v1704_v62  ;;  %v1865_v3 = vadd.f32 %v3755_v33, %v1864_v63  ;;  %v1387_v4 = vpop.f32.mrf.mxu0  ;;  %v1547_v5 = vpop.f32.mrf.mxu1 }
 0x10d   :  { %2579 = vst.msk [vmem:[%s5428_s3 + $0x13c] sm:$0xf] %vm2499_vm1, %v2322_v61  ;;  %v1388_v8 = vadd.f32 %v3755_v33, %v1387_v4  ;;  %v1548_v9 = vadd.f32 %v3755_v33, %v1547_v5 }
 0x10e   :  { %v2130_v10 = vmax.f32 %v1705_v2, 0.0  ;;  %v2194_v11 = vmax.f32 %v1865_v3, 0.0 }
 0x10f   :  { %v2003_v12 = vmax.f32 %v1388_v8, 0.0  ;;  %v2067_v13 = vmax.f32 %v1548_v9, 0.0  ;;  %3294 = vmatmul.msk.bf16.gmra.mxu0 %vm953_vm0, %v3422_v0  ;;  %3326 = vmatmul.msk.bf16.gmra.mxu1 %vm953_vm0, %v3454_v1  ;;  %v3424_v9 = vld [vmem:[%s5425_s0 + $0x90] sm:$0xff] }
 0x110   :  { %v2386_v14 = vpack.c.bf16 %v2130_v10, %v2130_v10  ;;  %v2450_v15 = vpack.c.bf16 %v2194_v11, %v2194_v11  ;;  %3358 = vmatmul.msk.bf16.gmra.mxu2 %vm953_vm0, %v3486_v6  ;;  %3390 = vmatmul.msk.bf16.gmra.mxu3 %vm953_vm0, %v3518_v7  ;;  %v3456_v10 = vld [vmem:[%s5425_s0 + $0x190] sm:$0xff] }
 0x111   :  { %v2259_v16 = vpack.c.bf16 %v2003_v12, %v2003_v12  ;;  %v2323_v17 = vpack.c.bf16 %v2067_v13, %v2067_v13 }
 0x112   :  { %2643 = vst.msk [vmem:[%s5428_s3 + $0x23c] sm:$0xf] %vm2499_vm1, %v2386_v14 }
 0x113   :  { %2707 = vst.msk [vmem:[%s5428_s3 + $0x33c] sm:$0xf] %vm2499_vm1, %v2450_v15  ;;  %v1707_v18 = vpop.f32.mrf.mxu2  ;;  %v1867_v19 = vpop.f32.mrf.mxu3  ;;  %v3488_v15 = vld [vmem:[%s5425_s0 + $0x290] sm:$0xff] }
 0x114   :  { %2516 = vst.msk [vmem:[%s5428_s3 + $0x40] sm:$0xf] %vm2499_vm1, %v2259_v16  ;;  %v1708_v20 = vadd.f32 %v3755_v33, %v1707_v18  ;;  %v1868_v21 = vadd.f32 %v3755_v33, %v1867_v19  ;;  %v1389_v22 = vpop.f32.mrf.mxu0  ;;  %v1549_v23 = vpop.f32.mrf.mxu1  ;;  %v3520_v16 = vld [vmem:[%s5425_s0 + $0x390] sm:$0xff] }
 0x115   :  { %2580 = vst.msk [vmem:[%s5428_s3 + $0x140] sm:$0xf] %vm2499_vm1, %v2323_v17  ;;  %v1390_v24 = vadd.f32 %v3755_v33, %v1389_v22  ;;  %v1550_v25 = vadd.f32 %v3755_v33, %v1549_v23 }
 0x116   :  { %v2131_v26 = vmax.f32 %v1708_v20, 0.0  ;;  %v2195_v27 = vmax.f32 %v1868_v21, 0.0 }
 0x117   :  { %v2004_v28 = vmax.f32 %v1390_v24, 0.0  ;;  %v2068_v29 = vmax.f32 %v1550_v25, 0.0 }
 0x118   :  { %v2387_v30 = vpack.c.bf16 %v2131_v26, %v2131_v26  ;;  %v2451_v31 = vpack.c.bf16 %v2195_v27, %v2195_v27 }
 0x119   :  { %v2260_v32 = vpack.c.bf16 %v2004_v28, %v2004_v28  ;;  %v2324_v34 = vpack.c.bf16 %v2068_v29, %v2068_v29 }
 0x11a   :  { %2644 = vst.msk [vmem:[%s5428_s3 + $0x240] sm:$0xf] %vm2499_vm1, %v2387_v30 }
 0x11b   :  { %2708 = vst.msk [vmem:[%s5428_s3 + $0x340] sm:$0xf] %vm2499_vm1, %v2451_v31  ;;  %v1709_v35 = vpop.f32.mrf.mxu2  ;;  %v1869_v36 = vpop.f32.mrf.mxu3 }
 0x11c   :  { %2517 = vst.msk [vmem:[%s5428_s3 + $0x44] sm:$0xf] %vm2499_vm1, %v2260_v32  ;;  %v1710_v39 = vadd.f32 %v3755_v33, %v1709_v35  ;;  %v1870_v40 = vadd.f32 %v3755_v33, %v1869_v36  ;;  %v1392_v41 = vpop.f32.mrf.mxu0  ;;  %v1552_v42 = vpop.f32.mrf.mxu1 }
 0x11d   :  { %2581 = vst.msk [vmem:[%s5428_s3 + $0x144] sm:$0xf] %vm2499_vm1, %v2324_v34  ;;  %v1393_v45 = vadd.f32 %v3755_v33, %v1392_v41  ;;  %v1553_v46 = vadd.f32 %v3755_v33, %v1552_v42 }
 0x11e   :  { %v2132_v47 = vmax.f32 %v1710_v39, 0.0  ;;  %v2196_v48 = vmax.f32 %v1870_v40, 0.0 }
 0x11f   :  { %v2005_v49 = vmax.f32 %v1393_v45, 0.0  ;;  %v2069_v50 = vmax.f32 %v1553_v46, 0.0  ;;  %3295 = vmatmul.msk.bf16.gmra.mxu0 %vm953_vm0, %v3423_v37  ;;  %3327 = vmatmul.msk.bf16.gmra.mxu1 %vm953_vm0, %v3455_v38  ;;  %v3425_v45 = vld [vmem:[%s5425_s0 + $0x98] sm:$0xff] }
 0x120   :  { %v2388_v51 = vpack.c.bf16 %v2132_v47, %v2132_v47  ;;  %v2452_v52 = vpack.c.bf16 %v2196_v48, %v2196_v48  ;;  %3359 = vmatmul.msk.bf16.gmra.mxu2 %vm953_vm0, %v3487_v43  ;;  %3391 = vmatmul.msk.bf16.gmra.mxu3 %vm953_vm0, %v3519_v44  ;;  %v3457_v46 = vld [vmem:[%s5425_s0 + $0x198] sm:$0xff]  ;;  %v4365_v47 = vld [vmem:[#allocation4] ss:$0 sm:$0xff] }
 0x121   :  { %v2261_v53 = vpack.c.bf16 %v2005_v49, %v2005_v49  ;;  %v2325_v54 = vpack.c.bf16 %v2069_v50, %v2069_v50 }
 0x122   :  { %2645 = vst.msk [vmem:[%s5428_s3 + $0x244] sm:$0xf] %vm2499_vm1, %v2388_v51 }
 0x123   :  { %2709 = vst.msk [vmem:[%s5428_s3 + $0x344] sm:$0xf] %vm2499_vm1, %v2452_v52  ;;  %v1712_v55 = vpop.f32.mrf.mxu2  ;;  %v1872_v56 = vpop.f32.mrf.mxu3  ;;  %v3489_v52 = vld [vmem:[%s5425_s0 + $0x298] sm:$0xff] }
 0x124   :  { %2518 = vst.msk [vmem:[%s5428_s3 + $0x48] sm:$0xf] %vm2499_vm1, %v2261_v53  ;;  %v1713_v57 = vadd.f32 %v3755_v33, %v1712_v55  ;;  %v1873_v58 = vadd.f32 %v3755_v33, %v1872_v56  ;;  %v1394_v59 = vpop.f32.mrf.mxu0  ;;  %v1554_v60 = vpop.f32.mrf.mxu1  ;;  %v3521_v53 = vld [vmem:[%s5425_s0 + $0x398] sm:$0xff] }
 0x125   :  { %2582 = vst.msk [vmem:[%s5428_s3 + $0x148] sm:$0xf] %vm2499_vm1, %v2325_v54  ;;  %v1395_v61 = vadd.f32 %v3755_v33, %v1394_v59  ;;  %v1555_v62 = vadd.f32 %v3755_v33, %v1554_v60 }
 0x126   :  { %v2133_v63 = vmax.f32 %v1713_v57, 0.0  ;;  %v2197_v0 = vmax.f32 %v1873_v58, 0.0 }
 0x127   :  { %v2006_v1 = vmax.f32 %v1395_v61, 0.0  ;;  %v2070_v2 = vmax.f32 %v1555_v62, 0.0 }
 0x128   :  { %v2389_v3 = vpack.c.bf16 %v2133_v63, %v2133_v63  ;;  %v2453_v4 = vpack.c.bf16 %v2197_v0, %v2197_v0 }
 0x129   :  { %v2262_v5 = vpack.c.bf16 %v2006_v1, %v2006_v1  ;;  %v2326_v6 = vpack.c.bf16 %v2070_v2, %v2070_v2 }
 0x12a   :  { %2646 = vst.msk [vmem:[%s5428_s3 + $0x248] sm:$0xf] %vm2499_vm1, %v2389_v3 }
 0x12b   :  { %2710 = vst.msk [vmem:[%s5428_s3 + $0x348] sm:$0xf] %vm2499_vm1, %v2453_v4  ;;  %v1714_v7 = vpop.f32.mrf.mxu2  ;;  %v1874_v8 = vpop.f32.mrf.mxu3 }
 0x12c   :  { %2519 = vst.msk [vmem:[%s5428_s3 + $0x4c] sm:$0xf] %vm2499_vm1, %v2262_v5  ;;  %v1715_v11 = vadd.f32 %v3755_v33, %v1714_v7  ;;  %v1875_v12 = vadd.f32 %v3755_v33, %v1874_v8  ;;  %v1397_v13 = vpop.f32.mrf.mxu0  ;;  %v1557_v14 = vpop.f32.mrf.mxu1 }
 0x12d   :  { %2583 = vst.msk [vmem:[%s5428_s3 + $0x14c] sm:$0xf] %vm2499_vm1, %v2326_v6  ;;  %v1398_v17 = vadd.f32 %v3755_v33, %v1397_v13  ;;  %v1558_v18 = vadd.f32 %v3755_v33, %v1557_v14 }
 0x12e   :  { %v2134_v19 = vmax.f32 %v1715_v11, 0.0  ;;  %v2198_v20 = vmax.f32 %v1875_v12, 0.0 }
 0x12f   :  { %v2007_v21 = vmax.f32 %v1398_v17, 0.0  ;;  %v2071_v22 = vmax.f32 %v1558_v18, 0.0  ;;  %3296 = vmatmul.msk.bf16.gmra.mxu0 %vm953_vm0, %v3424_v9  ;;  %3328 = vmatmul.msk.bf16.gmra.mxu1 %vm953_vm0, %v3456_v10  ;;  %v3426_v18 = vld [vmem:[%s5425_s0 + $0xa0] sm:$0xff] }
 0x130   :  { %v2390_v23 = vpack.c.bf16 %v2134_v19, %v2134_v19  ;;  %v2454_v24 = vpack.c.bf16 %v2198_v20, %v2198_v20  ;;  %3360 = vmatmul.msk.bf16.gmra.mxu2 %vm953_vm0, %v3488_v15  ;;  %3392 = vmatmul.msk.bf16.gmra.mxu3 %vm953_vm0, %v3520_v16  ;;  %v3458_v19 = vld [vmem:[%s5425_s0 + $0x1a0] sm:$0xff] }
 0x131   :  { %v2263_v25 = vpack.c.bf16 %v2007_v21, %v2007_v21  ;;  %v2327_v26 = vpack.c.bf16 %v2071_v22, %v2071_v22 }
 0x132   :  { %2647 = vst.msk [vmem:[%s5428_s3 + $0x24c] sm:$0xf] %vm2499_vm1, %v2390_v23 }
 0x133   :  { %2711 = vst.msk [vmem:[%s5428_s3 + $0x34c] sm:$0xf] %vm2499_vm1, %v2454_v24  ;;  %v1717_v27 = vpop.f32.mrf.mxu2  ;;  %v1877_v28 = vpop.f32.mrf.mxu3  ;;  %v3490_v24 = vld [vmem:[%s5425_s0 + $0x2a0] sm:$0xff] }
 0x134   :  { %2520 = vst.msk [vmem:[%s5428_s3 + $0x50] sm:$0xf] %vm2499_vm1, %v2263_v25  ;;  %v1718_v29 = vadd.f32 %v3755_v33, %v1717_v27  ;;  %v1878_v30 = vadd.f32 %v3755_v33, %v1877_v28  ;;  %v1399_v31 = vpop.f32.mrf.mxu0  ;;  %v1559_v32 = vpop.f32.mrf.mxu1  ;;  %v3522_v25 = vld [vmem:[%s5425_s0 + $0x3a0] sm:$0xff] }
 0x135   :  { %2584 = vst.msk [vmem:[%s5428_s3 + $0x150] sm:$0xf] %vm2499_vm1, %v2327_v26  ;;  %v1400_v34 = vadd.f32 %v3755_v33, %v1399_v31  ;;  %v1560_v35 = vadd.f32 %v3755_v33, %v1559_v32 }
 0x136   :  { %v2135_v36 = vmax.f32 %v1718_v29, 0.0  ;;  %v2199_v37 = vmax.f32 %v1878_v30, 0.0 }
 0x137   :  { %v2008_v38 = vmax.f32 %v1400_v34, 0.0  ;;  %v2072_v39 = vmax.f32 %v1560_v35, 0.0 }
 0x138   :  { %v2391_v40 = vpack.c.bf16 %v2135_v36, %v2135_v36  ;;  %v2455_v41 = vpack.c.bf16 %v2199_v37, %v2199_v37 }
 0x139   :  { %v2264_v42 = vpack.c.bf16 %v2008_v38, %v2008_v38  ;;  %v2328_v43 = vpack.c.bf16 %v2072_v39, %v2072_v39 }
 0x13a   :  { %2648 = vst.msk [vmem:[%s5428_s3 + $0x250] sm:$0xf] %vm2499_vm1, %v2391_v40 }
 0x13b   :  { %2712 = vst.msk [vmem:[%s5428_s3 + $0x350] sm:$0xf] %vm2499_vm1, %v2455_v41  ;;  %v1719_v44 = vpop.f32.mrf.mxu2  ;;  %v1879_v33 = vpop.f32.mrf.mxu3 }
 0x13c   :  { %2521 = vst.msk [vmem:[%s5428_s3 + $0x54] sm:$0xf] %vm2499_vm1, %v2264_v42  ;;  %v1720_v48 = vadd.f32 %v4365_v47, %v1719_v44  ;;  %v1880_v49 = vadd.f32 %v4365_v47, %v1879_v33  ;;  %v1402_v50 = vpop.f32.mrf.mxu0  ;;  %v1562_v51 = vpop.f32.mrf.mxu1 }
 0x13d   :  { %2585 = vst.msk [vmem:[%s5428_s3 + $0x154] sm:$0xf] %vm2499_vm1, %v2328_v43  ;;  %v1403_v54 = vadd.f32 %v4365_v47, %v1402_v50  ;;  %v1563_v55 = vadd.f32 %v4365_v47, %v1562_v51 }
 0x13e   :  { %v2136_v56 = vmax.f32 %v1720_v48, 0.0  ;;  %v2200_v57 = vmax.f32 %v1880_v49, 0.0 }
 0x13f   :  { %v2009_v58 = vmax.f32 %v1403_v54, 0.0  ;;  %v2073_v59 = vmax.f32 %v1563_v55, 0.0  ;;  %3297 = vmatmul.msk.bf16.gmra.mxu0 %vm953_vm0, %v3425_v45  ;;  %3329 = vmatmul.msk.bf16.gmra.mxu1 %vm953_vm0, %v3457_v46  ;;  %v3427_v55 = vld [vmem:[%s5425_s0 + $0xa8] sm:$0xff] }
 0x140   :  { %v2392_v60 = vpack.c.bf16 %v2136_v56, %v2136_v56  ;;  %v2456_v61 = vpack.c.bf16 %v2200_v57, %v2200_v57  ;;  %3361 = vmatmul.msk.bf16.gmra.mxu2 %vm953_vm0, %v3489_v52  ;;  %3393 = vmatmul.msk.bf16.gmra.mxu3 %vm953_vm0, %v3521_v53  ;;  %v3459_v56 = vld [vmem:[%s5425_s0 + $0x1a8] sm:$0xff] }
 0x141   :  { %v2265_v62 = vpack.c.bf16 %v2009_v58, %v2009_v58  ;;  %v2329_v63 = vpack.c.bf16 %v2073_v59, %v2073_v59 }
 0x142   :  { %2649 = vst.msk [vmem:[%s5428_s3 + $0x254] sm:$0xf] %vm2499_vm1, %v2392_v60 }
 0x143   :  { %2713 = vst.msk [vmem:[%s5428_s3 + $0x354] sm:$0xf] %vm2499_vm1, %v2456_v61  ;;  %v1722_v0 = vpop.f32.mrf.mxu2  ;;  %v1882_v1 = vpop.f32.mrf.mxu3  ;;  %v3491_v61 = vld [vmem:[%s5425_s0 + $0x2a8] sm:$0xff] }
 0x144   :  { %2522 = vst.msk [vmem:[%s5428_s3 + $0x58] sm:$0xf] %vm2499_vm1, %v2265_v62  ;;  %v1723_v2 = vadd.f32 %v4365_v47, %v1722_v0  ;;  %v1883_v3 = vadd.f32 %v4365_v47, %v1882_v1  ;;  %v1404_v4 = vpop.f32.mrf.mxu0  ;;  %v1564_v5 = vpop.f32.mrf.mxu1  ;;  %v3523_v62 = vld [vmem:[%s5425_s0 + $0x3a8] sm:$0xff] }
 0x145   :  { %2586 = vst.msk [vmem:[%s5428_s3 + $0x158] sm:$0xf] %vm2499_vm1, %v2329_v63  ;;  %v1405_v6 = vadd.f32 %v4365_v47, %v1404_v4  ;;  %v1565_v7 = vadd.f32 %v4365_v47, %v1564_v5 }
 0x146   :  { %v2137_v8 = vmax.f32 %v1723_v2, 0.0  ;;  %v2201_v9 = vmax.f32 %v1883_v3, 0.0 }
 0x147   :  { %v2010_v10 = vmax.f32 %v1405_v6, 0.0  ;;  %v2074_v11 = vmax.f32 %v1565_v7, 0.0 }
 0x148   :  { %v2393_v12 = vpack.c.bf16 %v2137_v8, %v2137_v8  ;;  %v2457_v13 = vpack.c.bf16 %v2201_v9, %v2201_v9 }
 0x149   :  { %v2266_v14 = vpack.c.bf16 %v2010_v10, %v2010_v10  ;;  %v2330_v15 = vpack.c.bf16 %v2074_v11, %v2074_v11 }
 0x14a   :  { %2650 = vst.msk [vmem:[%s5428_s3 + $0x258] sm:$0xf] %vm2499_vm1, %v2393_v12 }
 0x14b   :  { %2714 = vst.msk [vmem:[%s5428_s3 + $0x358] sm:$0xf] %vm2499_vm1, %v2457_v13  ;;  %v1724_v16 = vpop.f32.mrf.mxu2  ;;  %v1884_v17 = vpop.f32.mrf.mxu3 }
 0x14c   :  { %2523 = vst.msk [vmem:[%s5428_s3 + $0x5c] sm:$0xf] %vm2499_vm1, %v2266_v14  ;;  %v1725_v20 = vadd.f32 %v4365_v47, %v1724_v16  ;;  %v1885_v21 = vadd.f32 %v4365_v47, %v1884_v17  ;;  %v1407_v22 = vpop.f32.mrf.mxu0  ;;  %v1567_v23 = vpop.f32.mrf.mxu1 }
 0x14d   :  { %2587 = vst.msk [vmem:[%s5428_s3 + $0x15c] sm:$0xf] %vm2499_vm1, %v2330_v15  ;;  %v1408_v26 = vadd.f32 %v4365_v47, %v1407_v22  ;;  %v1568_v27 = vadd.f32 %v4365_v47, %v1567_v23 }
 0x14e   :  { %v2138_v28 = vmax.f32 %v1725_v20, 0.0  ;;  %v2202_v29 = vmax.f32 %v1885_v21, 0.0 }
 0x14f   :  { %v2011_v30 = vmax.f32 %v1408_v26, 0.0  ;;  %v2075_v31 = vmax.f32 %v1568_v27, 0.0  ;;  %3298 = vmatmul.msk.bf16.gmra.mxu0 %vm953_vm0, %v3426_v18  ;;  %3330 = vmatmul.msk.bf16.gmra.mxu1 %vm953_vm0, %v3458_v19  ;;  %v3428_v27 = vld [vmem:[%s5425_s0 + $0xb0] sm:$0xff] }
 0x150   :  { %v2394_v32 = vpack.c.bf16 %v2138_v28, %v2138_v28  ;;  %v2458_v34 = vpack.c.bf16 %v2202_v29, %v2202_v29  ;;  %3362 = vmatmul.msk.bf16.gmra.mxu2 %vm953_vm0, %v3490_v24  ;;  %3394 = vmatmul.msk.bf16.gmra.mxu3 %vm953_vm0, %v3522_v25  ;;  %v3460_v28 = vld [vmem:[%s5425_s0 + $0x1b0] sm:$0xff] }
 0x151   :  { %v2267_v35 = vpack.c.bf16 %v2011_v30, %v2011_v30  ;;  %v2331_v36 = vpack.c.bf16 %v2075_v31, %v2075_v31 }
 0x152   :  { %2651 = vst.msk [vmem:[%s5428_s3 + $0x25c] sm:$0xf] %vm2499_vm1, %v2394_v32 }
 0x153   :  { %2715 = vst.msk [vmem:[%s5428_s3 + $0x35c] sm:$0xf] %vm2499_vm1, %v2458_v34  ;;  %v1727_v37 = vpop.f32.mrf.mxu2  ;;  %v1887_v38 = vpop.f32.mrf.mxu3  ;;  %v3492_v34 = vld [vmem:[%s5425_s0 + $0x2b0] sm:$0xff] }
 0x154   :  { %2524 = vst.msk [vmem:[%s5428_s3 + $0x60] sm:$0xf] %vm2499_vm1, %v2267_v35  ;;  %v1728_v39 = vadd.f32 %v4365_v47, %v1727_v37  ;;  %v1888_v40 = vadd.f32 %v4365_v47, %v1887_v38  ;;  %v1409_v41 = vpop.f32.mrf.mxu0  ;;  %v1569_v42 = vpop.f32.mrf.mxu1  ;;  %v3524_v35 = vld [vmem:[%s5425_s0 + $0x3b0] sm:$0xff] }
 0x155   :  { %2588 = vst.msk [vmem:[%s5428_s3 + $0x160] sm:$0xf] %vm2499_vm1, %v2331_v36  ;;  %v1410_v43 = vadd.f32 %v4365_v47, %v1409_v41  ;;  %v1570_v44 = vadd.f32 %v4365_v47, %v1569_v42 }
 0x156   :  { %v2139_v33 = vmax.f32 %v1728_v39, 0.0  ;;  %v2203_v45 = vmax.f32 %v1888_v40, 0.0 }
 0x157   :  { %v2012_v46 = vmax.f32 %v1410_v43, 0.0  ;;  %v2076_v48 = vmax.f32 %v1570_v44, 0.0 }
 0x158   :  { %v2395_v49 = vpack.c.bf16 %v2139_v33, %v2139_v33  ;;  %v2459_v50 = vpack.c.bf16 %v2203_v45, %v2203_v45 }
 0x159   :  { %v2268_v51 = vpack.c.bf16 %v2012_v46, %v2012_v46  ;;  %v2332_v52 = vpack.c.bf16 %v2076_v48, %v2076_v48 }
 0x15a   :  { %2652 = vst.msk [vmem:[%s5428_s3 + $0x260] sm:$0xf] %vm2499_vm1, %v2395_v49 }
 0x15b   :  { %2716 = vst.msk [vmem:[%s5428_s3 + $0x360] sm:$0xf] %vm2499_vm1, %v2459_v50  ;;  %v1729_v53 = vpop.f32.mrf.mxu2  ;;  %v1889_v54 = vpop.f32.mrf.mxu3 }
 0x15c   :  { %2525 = vst.msk [vmem:[%s5428_s3 + $0x64] sm:$0xf] %vm2499_vm1, %v2268_v51  ;;  %v1730_v57 = vadd.f32 %v4365_v47, %v1729_v53  ;;  %v1890_v58 = vadd.f32 %v4365_v47, %v1889_v54  ;;  %v1412_v59 = vpop.f32.mrf.mxu0  ;;  %v1572_v60 = vpop.f32.mrf.mxu1 }
 0x15d   :  { %2589 = vst.msk [vmem:[%s5428_s3 + $0x164] sm:$0xf] %vm2499_vm1, %v2332_v52  ;;  %v1413_v63 = vadd.f32 %v4365_v47, %v1412_v59  ;;  %v1573_v0 = vadd.f32 %v4365_v47, %v1572_v60 }
 0x15e   :  { %v2140_v1 = vmax.f32 %v1730_v57, 0.0  ;;  %v2204_v2 = vmax.f32 %v1890_v58, 0.0 }
 0x15f   :  { %v2013_v3 = vmax.f32 %v1413_v63, 0.0  ;;  %v2077_v4 = vmax.f32 %v1573_v0, 0.0  ;;  %3299 = vmatmul.msk.bf16.gmra.mxu0 %vm953_vm0, %v3427_v55  ;;  %3331 = vmatmul.msk.bf16.gmra.mxu1 %vm953_vm0, %v3459_v56  ;;  %v3429_v0 = vld [vmem:[%s5425_s0 + $0xb8] sm:$0xff] }
 0x160   :  { %v2396_v5 = vpack.c.bf16 %v2140_v1, %v2140_v1  ;;  %v2460_v6 = vpack.c.bf16 %v2204_v2, %v2204_v2  ;;  %3363 = vmatmul.msk.bf16.gmra.mxu2 %vm953_vm0, %v3491_v61  ;;  %3395 = vmatmul.msk.bf16.gmra.mxu3 %vm953_vm0, %v3523_v62  ;;  %v3461_v1 = vld [vmem:[%s5425_s0 + $0x1b8] sm:$0xff] }
 0x161   :  { %v2269_v7 = vpack.c.bf16 %v2013_v3, %v2013_v3  ;;  %v2333_v8 = vpack.c.bf16 %v2077_v4, %v2077_v4 }
 0x162   :  { %2653 = vst.msk [vmem:[%s5428_s3 + $0x264] sm:$0xf] %vm2499_vm1, %v2396_v5 }
 0x163   :  { %2717 = vst.msk [vmem:[%s5428_s3 + $0x364] sm:$0xf] %vm2499_vm1, %v2460_v6  ;;  %v1732_v9 = vpop.f32.mrf.mxu2  ;;  %v1892_v10 = vpop.f32.mrf.mxu3  ;;  %v3493_v6 = vld [vmem:[%s5425_s0 + $0x2b8] sm:$0xff] }
 0x164   :  { %2526 = vst.msk [vmem:[%s5428_s3 + $0x68] sm:$0xf] %vm2499_vm1, %v2269_v7  ;;  %v1733_v11 = vadd.f32 %v4365_v47, %v1732_v9  ;;  %v1893_v12 = vadd.f32 %v4365_v47, %v1892_v10  ;;  %v1414_v13 = vpop.f32.mrf.mxu0  ;;  %v1574_v14 = vpop.f32.mrf.mxu1  ;;  %v3525_v7 = vld [vmem:[%s5425_s0 + $0x3b8] sm:$0xff] }
 0x165   :  { %2590 = vst.msk [vmem:[%s5428_s3 + $0x168] sm:$0xf] %vm2499_vm1, %v2333_v8  ;;  %v1415_v15 = vadd.f32 %v4365_v47, %v1414_v13  ;;  %v1575_v16 = vadd.f32 %v4365_v47, %v1574_v14 }
 0x166   :  { %v2141_v17 = vmax.f32 %v1733_v11, 0.0  ;;  %v2205_v18 = vmax.f32 %v1893_v12, 0.0 }
 0x167   :  { %v2014_v19 = vmax.f32 %v1415_v15, 0.0  ;;  %v2078_v20 = vmax.f32 %v1575_v16, 0.0 }
 0x168   :  { %v2397_v21 = vpack.c.bf16 %v2141_v17, %v2141_v17  ;;  %v2461_v22 = vpack.c.bf16 %v2205_v18, %v2205_v18 }
 0x169   :  { %v2270_v23 = vpack.c.bf16 %v2014_v19, %v2014_v19  ;;  %v2334_v24 = vpack.c.bf16 %v2078_v20, %v2078_v20 }
 0x16a   :  { %2654 = vst.msk [vmem:[%s5428_s3 + $0x268] sm:$0xf] %vm2499_vm1, %v2397_v21 }
 0x16b   :  { %2718 = vst.msk [vmem:[%s5428_s3 + $0x368] sm:$0xf] %vm2499_vm1, %v2461_v22  ;;  %v1734_v25 = vpop.f32.mrf.mxu2  ;;  %v1894_v26 = vpop.f32.mrf.mxu3 }
 0x16c   :  { %2527 = vst.msk [vmem:[%s5428_s3 + $0x6c] sm:$0xf] %vm2499_vm1, %v2270_v23  ;;  %v1735_v29 = vadd.f32 %v4365_v47, %v1734_v25  ;;  %v1895_v30 = vadd.f32 %v4365_v47, %v1894_v26  ;;  %v1417_v31 = vpop.f32.mrf.mxu0  ;;  %v1577_v32 = vpop.f32.mrf.mxu1 }
 0x16d   :  { %2591 = vst.msk [vmem:[%s5428_s3 + $0x16c] sm:$0xf] %vm2499_vm1, %v2334_v24  ;;  %v1418_v36 = vadd.f32 %v4365_v47, %v1417_v31  ;;  %v1578_v37 = vadd.f32 %v4365_v47, %v1577_v32 }
 0x16e   :  { %v2142_v38 = vmax.f32 %v1735_v29, 0.0  ;;  %v2206_v39 = vmax.f32 %v1895_v30, 0.0 }
 0x16f   :  { %v2015_v40 = vmax.f32 %v1418_v36, 0.0  ;;  %v2079_v41 = vmax.f32 %v1578_v37, 0.0  ;;  %3300 = vmatmul.msk.bf16.gmra.mxu0 %vm953_vm0, %v3428_v27  ;;  %3332 = vmatmul.msk.bf16.gmra.mxu1 %vm953_vm0, %v3460_v28  ;;  %v3430_v37 = vld [vmem:[%s5425_s0 + $0xc0] sm:$0xff] }
 0x170   :  { %v2398_v42 = vpack.c.bf16 %v2142_v38, %v2142_v38  ;;  %v2462_v43 = vpack.c.bf16 %v2206_v39, %v2206_v39  ;;  %3364 = vmatmul.msk.bf16.gmra.mxu2 %vm953_vm0, %v3492_v34  ;;  %3396 = vmatmul.msk.bf16.gmra.mxu3 %vm953_vm0, %v3524_v35  ;;  %v3462_v38 = vld [vmem:[%s5425_s0 + $0x1c0] sm:$0xff] }
 0x171   :  { %v2271_v44 = vpack.c.bf16 %v2015_v40, %v2015_v40  ;;  %v2335_v33 = vpack.c.bf16 %v2079_v41, %v2079_v41 }
 0x172   :  { %2655 = vst.msk [vmem:[%s5428_s3 + $0x26c] sm:$0xf] %vm2499_vm1, %v2398_v42 }
 0x173   :  { %2719 = vst.msk [vmem:[%s5428_s3 + $0x36c] sm:$0xf] %vm2499_vm1, %v2462_v43  ;;  %v1737_v45 = vpop.f32.mrf.mxu2  ;;  %v1897_v46 = vpop.f32.mrf.mxu3  ;;  %v3494_v43 = vld [vmem:[%s5425_s0 + $0x2c0] sm:$0xff] }
 0x174   :  { %2528 = vst.msk [vmem:[%s5428_s3 + $0x70] sm:$0xf] %vm2499_vm1, %v2271_v44  ;;  %v1738_v48 = vadd.f32 %v4365_v47, %v1737_v45  ;;  %v1898_v49 = vadd.f32 %v4365_v47, %v1897_v46  ;;  %v1419_v50 = vpop.f32.mrf.mxu0  ;;  %v1579_v51 = vpop.f32.mrf.mxu1  ;;  %v3526_v44 = vld [vmem:[%s5425_s0 + $0x3c0] sm:$0xff] }
 0x175   :  { %2592 = vst.msk [vmem:[%s5428_s3 + $0x170] sm:$0xf] %vm2499_vm1, %v2335_v33  ;;  %v1420_v52 = vadd.f32 %v4365_v47, %v1419_v50  ;;  %v1580_v53 = vadd.f32 %v4365_v47, %v1579_v51 }
 0x176   :  { %v2143_v54 = vmax.f32 %v1738_v48, 0.0  ;;  %v2207_v55 = vmax.f32 %v1898_v49, 0.0 }
 0x177   :  { %v2016_v56 = vmax.f32 %v1420_v52, 0.0  ;;  %v2080_v57 = vmax.f32 %v1580_v53, 0.0 }
 0x178   :  { %v2399_v58 = vpack.c.bf16 %v2143_v54, %v2143_v54  ;;  %v2463_v59 = vpack.c.bf16 %v2207_v55, %v2207_v55 }
 0x179   :  { %v2272_v60 = vpack.c.bf16 %v2016_v56, %v2016_v56  ;;  %v2336_v61 = vpack.c.bf16 %v2080_v57, %v2080_v57 }
 0x17a   :  { %2656 = vst.msk [vmem:[%s5428_s3 + $0x270] sm:$0xf] %vm2499_vm1, %v2399_v58 }
 0x17b   :  { %2720 = vst.msk [vmem:[%s5428_s3 + $0x370] sm:$0xf] %vm2499_vm1, %v2463_v59  ;;  %v1739_v62 = vpop.f32.mrf.mxu2  ;;  %v1899_v63 = vpop.f32.mrf.mxu3 }
 0x17c   :  { %2529 = vst.msk [vmem:[%s5428_s3 + $0x74] sm:$0xf] %vm2499_vm1, %v2272_v60  ;;  %v1740_v2 = vadd.f32 %v4365_v47, %v1739_v62  ;;  %v1900_v3 = vadd.f32 %v4365_v47, %v1899_v63  ;;  %v1422_v4 = vpop.f32.mrf.mxu0  ;;  %v1582_v5 = vpop.f32.mrf.mxu1 }
 0x17d   :  { %2593 = vst.msk [vmem:[%s5428_s3 + $0x174] sm:$0xf] %vm2499_vm1, %v2336_v61  ;;  %v1423_v8 = vadd.f32 %v4365_v47, %v1422_v4  ;;  %v1583_v9 = vadd.f32 %v4365_v47, %v1582_v5 }
 0x17e   :  { %v2144_v10 = vmax.f32 %v1740_v2, 0.0  ;;  %v2208_v11 = vmax.f32 %v1900_v3, 0.0 }
 0x17f   :  { %v2017_v12 = vmax.f32 %v1423_v8, 0.0  ;;  %v2081_v13 = vmax.f32 %v1583_v9, 0.0  ;;  %3301 = vmatmul.msk.bf16.gmra.mxu0 %vm953_vm0, %v3429_v0  ;;  %3333 = vmatmul.msk.bf16.gmra.mxu1 %vm953_vm0, %v3461_v1  ;;  %v3431_v9 = vld [vmem:[%s5425_s0 + $0xc8] sm:$0xff] }
 0x180   :  { %v2400_v14 = vpack.c.bf16 %v2144_v10, %v2144_v10  ;;  %v2464_v15 = vpack.c.bf16 %v2208_v11, %v2208_v11  ;;  %3365 = vmatmul.msk.bf16.gmra.mxu2 %vm953_vm0, %v3493_v6  ;;  %3397 = vmatmul.msk.bf16.gmra.mxu3 %vm953_vm0, %v3525_v7  ;;  %v3463_v10 = vld [vmem:[%s5425_s0 + $0x1c8] sm:$0xff] }
 0x181   :  { %v2273_v16 = vpack.c.bf16 %v2017_v12, %v2017_v12  ;;  %v2337_v17 = vpack.c.bf16 %v2081_v13, %v2081_v13 }
 0x182   :  { %2657 = vst.msk [vmem:[%s5428_s3 + $0x274] sm:$0xf] %vm2499_vm1, %v2400_v14 }
 0x183   :  { %2721 = vst.msk [vmem:[%s5428_s3 + $0x374] sm:$0xf] %vm2499_vm1, %v2464_v15  ;;  %v1742_v18 = vpop.f32.mrf.mxu2  ;;  %v1902_v19 = vpop.f32.mrf.mxu3  ;;  %v3495_v15 = vld [vmem:[%s5425_s0 + $0x2c8] sm:$0xff] }
 0x184   :  { %2530 = vst.msk [vmem:[%s5428_s3 + $0x78] sm:$0xf] %vm2499_vm1, %v2273_v16  ;;  %v1743_v20 = vadd.f32 %v4365_v47, %v1742_v18  ;;  %v1903_v21 = vadd.f32 %v4365_v47, %v1902_v19  ;;  %v1424_v22 = vpop.f32.mrf.mxu0  ;;  %v1584_v23 = vpop.f32.mrf.mxu1  ;;  %v3527_v16 = vld [vmem:[%s5425_s0 + $0x3c8] sm:$0xff] }
 0x185   :  { %2594 = vst.msk [vmem:[%s5428_s3 + $0x178] sm:$0xf] %vm2499_vm1, %v2337_v17  ;;  %v1425_v24 = vadd.f32 %v4365_v47, %v1424_v22  ;;  %v1585_v25 = vadd.f32 %v4365_v47, %v1584_v23 }
 0x186   :  { %v2145_v26 = vmax.f32 %v1743_v20, 0.0  ;;  %v2209_v27 = vmax.f32 %v1903_v21, 0.0 }
 0x187   :  { %v2018_v28 = vmax.f32 %v1425_v24, 0.0  ;;  %v2082_v29 = vmax.f32 %v1585_v25, 0.0 }
 0x188   :  { %v2401_v30 = vpack.c.bf16 %v2145_v26, %v2145_v26  ;;  %v2465_v31 = vpack.c.bf16 %v2209_v27, %v2209_v27 }
 0x189   :  { %v2274_v32 = vpack.c.bf16 %v2018_v28, %v2018_v28  ;;  %v2338_v34 = vpack.c.bf16 %v2082_v29, %v2082_v29 }
 0x18a   :  { %2658 = vst.msk [vmem:[%s5428_s3 + $0x278] sm:$0xf] %vm2499_vm1, %v2401_v30 }
 0x18b   :  { %2722 = vst.msk [vmem:[%s5428_s3 + $0x378] sm:$0xf] %vm2499_vm1, %v2465_v31  ;;  %v1744_v35 = vpop.f32.mrf.mxu2  ;;  %v1904_v36 = vpop.f32.mrf.mxu3 }
 0x18c   :  { %2531 = vst.msk [vmem:[%s5428_s3 + $0x7c] sm:$0xf] %vm2499_vm1, %v2274_v32  ;;  %v1745_v39 = vadd.f32 %v4365_v47, %v1744_v35  ;;  %v1905_v40 = vadd.f32 %v4365_v47, %v1904_v36  ;;  %v1427_v41 = vpop.f32.mrf.mxu0  ;;  %v1587_v42 = vpop.f32.mrf.mxu1 }
 0x18d   :  { %2595 = vst.msk [vmem:[%s5428_s3 + $0x17c] sm:$0xf] %vm2499_vm1, %v2338_v34  ;;  %v1428_v33 = vadd.f32 %v4365_v47, %v1427_v41  ;;  %v1588_v45 = vadd.f32 %v4365_v47, %v1587_v42 }
 0x18e   :  { %v2146_v46 = vmax.f32 %v1745_v39, 0.0  ;;  %v2210_v48 = vmax.f32 %v1905_v40, 0.0 }
 0x18f   :  { %v2019_v49 = vmax.f32 %v1428_v33, 0.0  ;;  %v2083_v50 = vmax.f32 %v1588_v45, 0.0  ;;  %3302 = vmatmul.msk.bf16.gmra.mxu0 %vm953_vm0, %v3430_v37  ;;  %3334 = vmatmul.msk.bf16.gmra.mxu1 %vm953_vm0, %v3462_v38  ;;  %v3432_v45 = vld [vmem:[%s5425_s0 + $0xd0] sm:$0xff] }
 0x190   :  { %v2402_v51 = vpack.c.bf16 %v2146_v46, %v2146_v46  ;;  %v2466_v52 = vpack.c.bf16 %v2210_v48, %v2210_v48  ;;  %3366 = vmatmul.msk.bf16.gmra.mxu2 %vm953_vm0, %v3494_v43  ;;  %3398 = vmatmul.msk.bf16.gmra.mxu3 %vm953_vm0, %v3526_v44  ;;  %v3464_v46 = vld [vmem:[%s5425_s0 + $0x1d0] sm:$0xff] }
 0x191   :  { %v2275_v53 = vpack.c.bf16 %v2019_v49, %v2019_v49  ;;  %v2339_v54 = vpack.c.bf16 %v2083_v50, %v2083_v50 }
 0x192   :  { %2659 = vst.msk [vmem:[%s5428_s3 + $0x27c] sm:$0xf] %vm2499_vm1, %v2402_v51 }
 0x193   :  { %2723 = vst.msk [vmem:[%s5428_s3 + $0x37c] sm:$0xf] %vm2499_vm1, %v2466_v52  ;;  %v1747_v55 = vpop.f32.mrf.mxu2  ;;  %v1907_v56 = vpop.f32.mrf.mxu3  ;;  %v3496_v52 = vld [vmem:[%s5425_s0 + $0x2d0] sm:$0xff] }
 0x194   :  { %2532 = vst.msk [vmem:[%s5428_s3 + $0x80] sm:$0xf] %vm2499_vm1, %v2275_v53  ;;  %v1748_v57 = vadd.f32 %v4365_v47, %v1747_v55  ;;  %v1908_v58 = vadd.f32 %v4365_v47, %v1907_v56  ;;  %v1429_v59 = vpop.f32.mrf.mxu0  ;;  %v1589_v60 = vpop.f32.mrf.mxu1  ;;  %v3528_v53 = vld [vmem:[%s5425_s0 + $0x3d0] sm:$0xff] }
 0x195   :  { %2596 = vst.msk [vmem:[%s5428_s3 + $0x180] sm:$0xf] %vm2499_vm1, %v2339_v54  ;;  %v1430_v61 = vadd.f32 %v4365_v47, %v1429_v59  ;;  %v1590_v62 = vadd.f32 %v4365_v47, %v1589_v60 }
 0x196   :  { %v2147_v63 = vmax.f32 %v1748_v57, 0.0  ;;  %v2211_v0 = vmax.f32 %v1908_v58, 0.0 }
 0x197   :  { %v2020_v1 = vmax.f32 %v1430_v61, 0.0  ;;  %v2084_v2 = vmax.f32 %v1590_v62, 0.0 }
 0x198   :  { %v2403_v3 = vpack.c.bf16 %v2147_v63, %v2147_v63  ;;  %v2467_v4 = vpack.c.bf16 %v2211_v0, %v2211_v0 }
 0x199   :  { %v2276_v5 = vpack.c.bf16 %v2020_v1, %v2020_v1  ;;  %v2340_v6 = vpack.c.bf16 %v2084_v2, %v2084_v2 }
 0x19a   :  { %2660 = vst.msk [vmem:[%s5428_s3 + $0x280] sm:$0xf] %vm2499_vm1, %v2403_v3 }
 0x19b   :  { %2724 = vst.msk [vmem:[%s5428_s3 + $0x380] sm:$0xf] %vm2499_vm1, %v2467_v4  ;;  %v1749_v7 = vpop.f32.mrf.mxu2  ;;  %v1909_v8 = vpop.f32.mrf.mxu3 }
 0x19c   :  { %2533 = vst.msk [vmem:[%s5428_s3 + $0x84] sm:$0xf] %vm2499_vm1, %v2276_v5  ;;  %v1750_v11 = vadd.f32 %v4365_v47, %v1749_v7  ;;  %v1910_v12 = vadd.f32 %v4365_v47, %v1909_v8  ;;  %v1432_v13 = vpop.f32.mrf.mxu0  ;;  %v1592_v14 = vpop.f32.mrf.mxu1 }
 0x19d   :  { %2597 = vst.msk [vmem:[%s5428_s3 + $0x184] sm:$0xf] %vm2499_vm1, %v2340_v6  ;;  %v1433_v17 = vadd.f32 %v4365_v47, %v1432_v13  ;;  %v1593_v18 = vadd.f32 %v4365_v47, %v1592_v14 }
 0x19e   :  { %v2148_v19 = vmax.f32 %v1750_v11, 0.0  ;;  %v2212_v20 = vmax.f32 %v1910_v12, 0.0 }
 0x19f   :  { %v2021_v21 = vmax.f32 %v1433_v17, 0.0  ;;  %v2085_v22 = vmax.f32 %v1593_v18, 0.0  ;;  %3303 = vmatmul.msk.bf16.gmra.mxu0 %vm953_vm0, %v3431_v9  ;;  %3335 = vmatmul.msk.bf16.gmra.mxu1 %vm953_vm0, %v3463_v10  ;;  %v3433_v18 = vld [vmem:[%s5425_s0 + $0xd8] sm:$0xff] }
 0x1a0   :  { %v2404_v23 = vpack.c.bf16 %v2148_v19, %v2148_v19  ;;  %v2468_v24 = vpack.c.bf16 %v2212_v20, %v2212_v20  ;;  %3367 = vmatmul.msk.bf16.gmra.mxu2 %vm953_vm0, %v3495_v15  ;;  %3399 = vmatmul.msk.bf16.gmra.mxu3 %vm953_vm0, %v3527_v16  ;;  %v3465_v19 = vld [vmem:[%s5425_s0 + $0x1d8] sm:$0xff] }
 0x1a1   :  { %v2277_v25 = vpack.c.bf16 %v2021_v21, %v2021_v21  ;;  %v2341_v26 = vpack.c.bf16 %v2085_v22, %v2085_v22 }
 0x1a2   :  { %2661 = vst.msk [vmem:[%s5428_s3 + $0x284] sm:$0xf] %vm2499_vm1, %v2404_v23 }
 0x1a3   :  { %2725 = vst.msk [vmem:[%s5428_s3 + $0x384] sm:$0xf] %vm2499_vm1, %v2468_v24  ;;  %v1752_v27 = vpop.f32.mrf.mxu2  ;;  %v1912_v28 = vpop.f32.mrf.mxu3  ;;  %v3497_v24 = vld [vmem:[%s5425_s0 + $0x2d8] sm:$0xff] }
 0x1a4   :  { %2534 = vst.msk [vmem:[%s5428_s3 + $0x88] sm:$0xf] %vm2499_vm1, %v2277_v25  ;;  %v1753_v29 = vadd.f32 %v4365_v47, %v1752_v27  ;;  %v1913_v30 = vadd.f32 %v4365_v47, %v1912_v28  ;;  %v1434_v31 = vpop.f32.mrf.mxu0  ;;  %v1594_v32 = vpop.f32.mrf.mxu1  ;;  %v3529_v25 = vld [vmem:[%s5425_s0 + $0x3d8] sm:$0xff] }
 0x1a5   :  { %2598 = vst.msk [vmem:[%s5428_s3 + $0x188] sm:$0xf] %vm2499_vm1, %v2341_v26  ;;  %v1435_v34 = vadd.f32 %v4365_v47, %v1434_v31  ;;  %v1595_v35 = vadd.f32 %v4365_v47, %v1594_v32 }
 0x1a6   :  { %v2149_v36 = vmax.f32 %v1753_v29, 0.0  ;;  %v2213_v37 = vmax.f32 %v1913_v30, 0.0 }
 0x1a7   :  { %v2022_v38 = vmax.f32 %v1435_v34, 0.0  ;;  %v2086_v39 = vmax.f32 %v1595_v35, 0.0 }
 0x1a8   :  { %v2405_v40 = vpack.c.bf16 %v2149_v36, %v2149_v36  ;;  %v2469_v41 = vpack.c.bf16 %v2213_v37, %v2213_v37 }
 0x1a9   :  { %v2278_v42 = vpack.c.bf16 %v2022_v38, %v2022_v38  ;;  %v2342_v43 = vpack.c.bf16 %v2086_v39, %v2086_v39 }
 0x1aa   :  { %2662 = vst.msk [vmem:[%s5428_s3 + $0x288] sm:$0xf] %vm2499_vm1, %v2405_v40 }
 0x1ab   :  { %2726 = vst.msk [vmem:[%s5428_s3 + $0x388] sm:$0xf] %vm2499_vm1, %v2469_v41  ;;  %v1754_v44 = vpop.f32.mrf.mxu2  ;;  %v1914_v33 = vpop.f32.mrf.mxu3 }
 0x1ac   :  { %2535 = vst.msk [vmem:[%s5428_s3 + $0x8c] sm:$0xf] %vm2499_vm1, %v2278_v42  ;;  %v1755_v48 = vadd.f32 %v4365_v47, %v1754_v44  ;;  %v1915_v49 = vadd.f32 %v4365_v47, %v1914_v33  ;;  %v1437_v50 = vpop.f32.mrf.mxu0  ;;  %v1597_v51 = vpop.f32.mrf.mxu1 }
 0x1ad   :  { %2599 = vst.msk [vmem:[%s5428_s3 + $0x18c] sm:$0xf] %vm2499_vm1, %v2342_v43  ;;  %v1438_v54 = vadd.f32 %v4365_v47, %v1437_v50  ;;  %v1598_v55 = vadd.f32 %v4365_v47, %v1597_v51 }
 0x1ae   :  { %v2150_v56 = vmax.f32 %v1755_v48, 0.0  ;;  %v2214_v57 = vmax.f32 %v1915_v49, 0.0 }
 0x1af   :  { %v2023_v58 = vmax.f32 %v1438_v54, 0.0  ;;  %v2087_v59 = vmax.f32 %v1598_v55, 0.0  ;;  %3304 = vmatmul.msk.bf16.gmra.mxu0 %vm953_vm0, %v3432_v45  ;;  %3336 = vmatmul.msk.bf16.gmra.mxu1 %vm953_vm0, %v3464_v46  ;;  %v3434_v55 = vld [vmem:[%s5425_s0 + $0xe0] sm:$0xff] }
 0x1b0   :  { %v2406_v60 = vpack.c.bf16 %v2150_v56, %v2150_v56  ;;  %v2470_v61 = vpack.c.bf16 %v2214_v57, %v2214_v57  ;;  %3368 = vmatmul.msk.bf16.gmra.mxu2 %vm953_vm0, %v3496_v52  ;;  %3400 = vmatmul.msk.bf16.gmra.mxu3 %vm953_vm0, %v3528_v53  ;;  %v3466_v56 = vld [vmem:[%s5425_s0 + $0x1e0] sm:$0xff] }
 0x1b1   :  { %v2279_v62 = vpack.c.bf16 %v2023_v58, %v2023_v58  ;;  %v2343_v63 = vpack.c.bf16 %v2087_v59, %v2087_v59 }
 0x1b2   :  { %2663 = vst.msk [vmem:[%s5428_s3 + $0x28c] sm:$0xf] %vm2499_vm1, %v2406_v60 }
 0x1b3   :  { %2727 = vst.msk [vmem:[%s5428_s3 + $0x38c] sm:$0xf] %vm2499_vm1, %v2470_v61  ;;  %v1757_v0 = vpop.f32.mrf.mxu2  ;;  %v1917_v1 = vpop.f32.mrf.mxu3  ;;  %v3498_v61 = vld [vmem:[%s5425_s0 + $0x2e0] sm:$0xff] }
 0x1b4   :  { %2536 = vst.msk [vmem:[%s5428_s3 + $0x90] sm:$0xf] %vm2499_vm1, %v2279_v62  ;;  %v1758_v2 = vadd.f32 %v4365_v47, %v1757_v0  ;;  %v1918_v3 = vadd.f32 %v4365_v47, %v1917_v1  ;;  %v1439_v4 = vpop.f32.mrf.mxu0  ;;  %v1599_v5 = vpop.f32.mrf.mxu1  ;;  %v3530_v62 = vld [vmem:[%s5425_s0 + $0x3e0] sm:$0xff] }
 0x1b5   :  { %2600 = vst.msk [vmem:[%s5428_s3 + $0x190] sm:$0xf] %vm2499_vm1, %v2343_v63  ;;  %v1440_v6 = vadd.f32 %v4365_v47, %v1439_v4  ;;  %v1600_v7 = vadd.f32 %v4365_v47, %v1599_v5 }
 0x1b6   :  { %v2151_v8 = vmax.f32 %v1758_v2, 0.0  ;;  %v2215_v9 = vmax.f32 %v1918_v3, 0.0 }
 0x1b7   :  { %v2024_v10 = vmax.f32 %v1440_v6, 0.0  ;;  %v2088_v11 = vmax.f32 %v1600_v7, 0.0 }
 0x1b8   :  { %v2407_v12 = vpack.c.bf16 %v2151_v8, %v2151_v8  ;;  %v2471_v13 = vpack.c.bf16 %v2215_v9, %v2215_v9 }
 0x1b9   :  { %v2280_v14 = vpack.c.bf16 %v2024_v10, %v2024_v10  ;;  %v2344_v15 = vpack.c.bf16 %v2088_v11, %v2088_v11 }
 0x1ba   :  { %2664 = vst.msk [vmem:[%s5428_s3 + $0x290] sm:$0xf] %vm2499_vm1, %v2407_v12 }
 0x1bb   :  { %2728 = vst.msk [vmem:[%s5428_s3 + $0x390] sm:$0xf] %vm2499_vm1, %v2471_v13  ;;  %v1759_v16 = vpop.f32.mrf.mxu2  ;;  %v1919_v17 = vpop.f32.mrf.mxu3 }
 0x1bc   :  { %2537 = vst.msk [vmem:[%s5428_s3 + $0x94] sm:$0xf] %vm2499_vm1, %v2280_v14  ;;  %v1760_v20 = vadd.f32 %v4365_v47, %v1759_v16  ;;  %v1920_v21 = vadd.f32 %v4365_v47, %v1919_v17  ;;  %v1442_v22 = vpop.f32.mrf.mxu0  ;;  %v1602_v23 = vpop.f32.mrf.mxu1 }
 0x1bd   :  { %2601 = vst.msk [vmem:[%s5428_s3 + $0x194] sm:$0xf] %vm2499_vm1, %v2344_v15  ;;  %v1443_v26 = vadd.f32 %v4365_v47, %v1442_v22  ;;  %v1603_v27 = vadd.f32 %v4365_v47, %v1602_v23 }
 0x1be   :  { %v2152_v28 = vmax.f32 %v1760_v20, 0.0  ;;  %v2216_v29 = vmax.f32 %v1920_v21, 0.0 }
 0x1bf   :  { %v2025_v30 = vmax.f32 %v1443_v26, 0.0  ;;  %v2089_v31 = vmax.f32 %v1603_v27, 0.0  ;;  %3305 = vmatmul.msk.bf16.gmra.mxu0 %vm953_vm0, %v3433_v18  ;;  %3337 = vmatmul.msk.bf16.gmra.mxu1 %vm953_vm0, %v3465_v19  ;;  %v3435_v27 = vld [vmem:[%s5425_s0 + $0xe8] sm:$0xff] }
 0x1c0   :  { %v2408_v32 = vpack.c.bf16 %v2152_v28, %v2152_v28  ;;  %v2472_v34 = vpack.c.bf16 %v2216_v29, %v2216_v29  ;;  %3369 = vmatmul.msk.bf16.gmra.mxu2 %vm953_vm0, %v3497_v24  ;;  %3401 = vmatmul.msk.bf16.gmra.mxu3 %vm953_vm0, %v3529_v25  ;;  %v3467_v28 = vld [vmem:[%s5425_s0 + $0x1e8] sm:$0xff] }
 0x1c1   :  { %v2281_v35 = vpack.c.bf16 %v2025_v30, %v2025_v30  ;;  %v2345_v36 = vpack.c.bf16 %v2089_v31, %v2089_v31 }
 0x1c2   :  { %2665 = vst.msk [vmem:[%s5428_s3 + $0x294] sm:$0xf] %vm2499_vm1, %v2408_v32 }
 0x1c3   :  { %2729 = vst.msk [vmem:[%s5428_s3 + $0x394] sm:$0xf] %vm2499_vm1, %v2472_v34  ;;  %v1762_v37 = vpop.f32.mrf.mxu2  ;;  %v1922_v38 = vpop.f32.mrf.mxu3  ;;  %v3499_v34 = vld [vmem:[%s5425_s0 + $0x2e8] sm:$0xff] }
 0x1c4   :  { %2538 = vst.msk [vmem:[%s5428_s3 + $0x98] sm:$0xf] %vm2499_vm1, %v2281_v35  ;;  %v1763_v39 = vadd.f32 %v4365_v47, %v1762_v37  ;;  %v1923_v40 = vadd.f32 %v4365_v47, %v1922_v38  ;;  %v1444_v41 = vpop.f32.mrf.mxu0  ;;  %v1604_v42 = vpop.f32.mrf.mxu1  ;;  %v3531_v35 = vld [vmem:[%s5425_s0 + $0x3e8] sm:$0xff] }
 0x1c5   :  { %2602 = vst.msk [vmem:[%s5428_s3 + $0x198] sm:$0xf] %vm2499_vm1, %v2345_v36  ;;  %v1445_v43 = vadd.f32 %v4365_v47, %v1444_v41  ;;  %v1605_v44 = vadd.f32 %v4365_v47, %v1604_v42 }
 0x1c6   :  { %v2153_v33 = vmax.f32 %v1763_v39, 0.0  ;;  %v2217_v45 = vmax.f32 %v1923_v40, 0.0 }
 0x1c7   :  { %v2026_v46 = vmax.f32 %v1445_v43, 0.0  ;;  %v2090_v48 = vmax.f32 %v1605_v44, 0.0 }
 0x1c8   :  { %v2409_v49 = vpack.c.bf16 %v2153_v33, %v2153_v33  ;;  %v2473_v50 = vpack.c.bf16 %v2217_v45, %v2217_v45 }
 0x1c9   :  { %v2282_v51 = vpack.c.bf16 %v2026_v46, %v2026_v46  ;;  %v2346_v52 = vpack.c.bf16 %v2090_v48, %v2090_v48 }
 0x1ca   :  { %2666 = vst.msk [vmem:[%s5428_s3 + $0x298] sm:$0xf] %vm2499_vm1, %v2409_v49 }
 0x1cb   :  { %2730 = vst.msk [vmem:[%s5428_s3 + $0x398] sm:$0xf] %vm2499_vm1, %v2473_v50  ;;  %v1764_v53 = vpop.f32.mrf.mxu2  ;;  %v1924_v54 = vpop.f32.mrf.mxu3 }
 0x1cc   :  { %2539 = vst.msk [vmem:[%s5428_s3 + $0x9c] sm:$0xf] %vm2499_vm1, %v2282_v51  ;;  %v1765_v57 = vadd.f32 %v4365_v47, %v1764_v53  ;;  %v1925_v58 = vadd.f32 %v4365_v47, %v1924_v54  ;;  %v1447_v59 = vpop.f32.mrf.mxu0  ;;  %v1607_v60 = vpop.f32.mrf.mxu1  ;;  %v4964_v53 = vld [vmem:[#allocation4] ss:$0 sm:$0xff] }
 0x1cd   :  { %2603 = vst.msk [vmem:[%s5428_s3 + $0x19c] sm:$0xf] %vm2499_vm1, %v2346_v52  ;;  %v1448_v63 = vadd.f32 %v4365_v47, %v1447_v59  ;;  %v1608_v0 = vadd.f32 %v4365_v47, %v1607_v60 }
 0x1ce   :  { %v2154_v1 = vmax.f32 %v1765_v57, 0.0  ;;  %v2218_v2 = vmax.f32 %v1925_v58, 0.0 }
 0x1cf   :  { %v2027_v3 = vmax.f32 %v1448_v63, 0.0  ;;  %v2091_v4 = vmax.f32 %v1608_v0, 0.0  ;;  %3306 = vmatmul.msk.bf16.gmra.mxu0 %vm953_vm0, %v3434_v55  ;;  %3338 = vmatmul.msk.bf16.gmra.mxu1 %vm953_vm0, %v3466_v56  ;;  %v3436_v0 = vld [vmem:[%s5425_s0 + $0xf0] sm:$0xff] }
 0x1d0   :  { %v2410_v5 = vpack.c.bf16 %v2154_v1, %v2154_v1  ;;  %v2474_v6 = vpack.c.bf16 %v2218_v2, %v2218_v2  ;;  %3370 = vmatmul.msk.bf16.gmra.mxu2 %vm953_vm0, %v3498_v61  ;;  %3402 = vmatmul.msk.bf16.gmra.mxu3 %vm953_vm0, %v3530_v62  ;;  %v3468_v1 = vld [vmem:[%s5425_s0 + $0x1f0] sm:$0xff] }
 0x1d1   :  { %v2283_v7 = vpack.c.bf16 %v2027_v3, %v2027_v3  ;;  %v2347_v8 = vpack.c.bf16 %v2091_v4, %v2091_v4 }
 0x1d2   :  { %2667 = vst.msk [vmem:[%s5428_s3 + $0x29c] sm:$0xf] %vm2499_vm1, %v2410_v5 }
 0x1d3   :  { %2731 = vst.msk [vmem:[%s5428_s3 + $0x39c] sm:$0xf] %vm2499_vm1, %v2474_v6  ;;  %v1767_v9 = vpop.f32.mrf.mxu2  ;;  %v1927_v10 = vpop.f32.mrf.mxu3  ;;  %v3500_v6 = vld [vmem:[%s5425_s0 + $0x2f0] sm:$0xff] }
 0x1d4   :  { %2540 = vst.msk [vmem:[%s5428_s3 + $0xa0] sm:$0xf] %vm2499_vm1, %v2283_v7  ;;  %v1768_v11 = vadd.f32 %v4365_v47, %v1767_v9  ;;  %v1928_v12 = vadd.f32 %v4365_v47, %v1927_v10  ;;  %v1449_v13 = vpop.f32.mrf.mxu0  ;;  %v1609_v14 = vpop.f32.mrf.mxu1  ;;  %v3532_v7 = vld [vmem:[%s5425_s0 + $0x3f0] sm:$0xff] }
 0x1d5   :  { %2604 = vst.msk [vmem:[%s5428_s3 + $0x1a0] sm:$0xf] %vm2499_vm1, %v2347_v8  ;;  %v1450_v15 = vadd.f32 %v4365_v47, %v1449_v13  ;;  %v1610_v16 = vadd.f32 %v4365_v47, %v1609_v14 }
 0x1d6   :  { %v2155_v17 = vmax.f32 %v1768_v11, 0.0  ;;  %v2219_v18 = vmax.f32 %v1928_v12, 0.0 }
 0x1d7   :  { %v2028_v19 = vmax.f32 %v1450_v15, 0.0  ;;  %v2092_v20 = vmax.f32 %v1610_v16, 0.0 }
 0x1d8   :  { %v2411_v21 = vpack.c.bf16 %v2155_v17, %v2155_v17  ;;  %v2475_v22 = vpack.c.bf16 %v2219_v18, %v2219_v18 }
 0x1d9   :  { %v2284_v23 = vpack.c.bf16 %v2028_v19, %v2028_v19  ;;  %v2348_v24 = vpack.c.bf16 %v2092_v20, %v2092_v20 }
 0x1da   :  { %2668 = vst.msk [vmem:[%s5428_s3 + $0x2a0] sm:$0xf] %vm2499_vm1, %v2411_v21 }
 0x1db   :  { %2732 = vst.msk [vmem:[%s5428_s3 + $0x3a0] sm:$0xf] %vm2499_vm1, %v2475_v22  ;;  %v1769_v25 = vpop.f32.mrf.mxu2  ;;  %v1929_v26 = vpop.f32.mrf.mxu3 }
 0x1dc   :  { %2541 = vst.msk [vmem:[%s5428_s3 + $0xa4] sm:$0xf] %vm2499_vm1, %v2284_v23  ;;  %v1770_v29 = vadd.f32 %v4365_v47, %v1769_v25  ;;  %v1930_v30 = vadd.f32 %v4365_v47, %v1929_v26  ;;  %v1452_v31 = vpop.f32.mrf.mxu0  ;;  %v1612_v32 = vpop.f32.mrf.mxu1 }
 0x1dd   :  { %2605 = vst.msk [vmem:[%s5428_s3 + $0x1a4] sm:$0xf] %vm2499_vm1, %v2348_v24  ;;  %v1453_v36 = vadd.f32 %v4365_v47, %v1452_v31  ;;  %v1613_v37 = vadd.f32 %v4365_v47, %v1612_v32 }
 0x1de   :  { %v2156_v38 = vmax.f32 %v1770_v29, 0.0  ;;  %v2220_v39 = vmax.f32 %v1930_v30, 0.0 }
 0x1df   :  { %v2029_v40 = vmax.f32 %v1453_v36, 0.0  ;;  %v2093_v41 = vmax.f32 %v1613_v37, 0.0  ;;  %3307 = vmatmul.msk.bf16.gmra.mxu0 %vm953_vm0, %v3435_v27  ;;  %3339 = vmatmul.msk.bf16.gmra.mxu1 %vm953_vm0, %v3467_v28  ;;  %v3437_v37 = vld [vmem:[%s5425_s0 + $0xf8] sm:$0xff] }
 0x1e0   :  { %v2412_v42 = vpack.c.bf16 %v2156_v38, %v2156_v38  ;;  %v2476_v43 = vpack.c.bf16 %v2220_v39, %v2220_v39  ;;  %3371 = vmatmul.msk.bf16.gmra.mxu2 %vm953_vm0, %v3499_v34  ;;  %3403 = vmatmul.msk.bf16.gmra.mxu3 %vm953_vm0, %v3531_v35  ;;  %v3469_v38 = vld [vmem:[%s5425_s0 + $0x1f8] sm:$0xff] }
 0x1e1   :  { %v2285_v44 = vpack.c.bf16 %v2029_v40, %v2029_v40  ;;  %v2349_v33 = vpack.c.bf16 %v2093_v41, %v2093_v41 }
 0x1e2   :  { %2669 = vst.msk [vmem:[%s5428_s3 + $0x2a4] sm:$0xf] %vm2499_vm1, %v2412_v42 }
 0x1e3   :  { %2733 = vst.msk [vmem:[%s5428_s3 + $0x3a4] sm:$0xf] %vm2499_vm1, %v2476_v43  ;;  %v1772_v45 = vpop.f32.mrf.mxu2  ;;  %v1932_v46 = vpop.f32.mrf.mxu3  ;;  %v3501_v43 = vld [vmem:[%s5425_s0 + $0x2f8] sm:$0xff] }
 0x1e4   :  { %2542 = vst.msk [vmem:[%s5428_s3 + $0xa8] sm:$0xf] %vm2499_vm1, %v2285_v44  ;;  %v1773_v48 = vadd.f32 %v4365_v47, %v1772_v45  ;;  %v1933_v49 = vadd.f32 %v4365_v47, %v1932_v46  ;;  %v1454_v50 = vpop.f32.mrf.mxu0  ;;  %v1614_v51 = vpop.f32.mrf.mxu1  ;;  %v3533_v44 = vld [vmem:[%s5425_s0 + $0x3f8] sm:$0xff] }
 0x1e5   :  { %2606 = vst.msk [vmem:[%s5428_s3 + $0x1a8] sm:$0xf] %vm2499_vm1, %v2349_v33  ;;  %v1455_v52 = vadd.f32 %v4365_v47, %v1454_v50  ;;  %v1615_v54 = vadd.f32 %v4964_v53, %v1614_v51 }
 0x1e6   :  { %v2157_v55 = vmax.f32 %v1773_v48, 0.0  ;;  %v2221_v56 = vmax.f32 %v1933_v49, 0.0 }
 0x1e7   :  { %v2030_v57 = vmax.f32 %v1455_v52, 0.0  ;;  %v2094_v58 = vmax.f32 %v1615_v54, 0.0 }
 0x1e8   :  { %v2413_v59 = vpack.c.bf16 %v2157_v55, %v2157_v55  ;;  %v2477_v60 = vpack.c.bf16 %v2221_v56, %v2221_v56 }
 0x1e9   :  { %v2286_v61 = vpack.c.bf16 %v2030_v57, %v2030_v57  ;;  %v2350_v62 = vpack.c.bf16 %v2094_v58, %v2094_v58 }
 0x1ea   :  { %2670 = vst.msk [vmem:[%s5428_s3 + $0x2a8] sm:$0xf] %vm2499_vm1, %v2413_v59 }
 0x1eb   :  { %2734 = vst.msk [vmem:[%s5428_s3 + $0x3a8] sm:$0xf] %vm2499_vm1, %v2477_v60  ;;  %v1774_v47 = vpop.f32.mrf.mxu2  ;;  %v1934_v63 = vpop.f32.mrf.mxu3 }
 0x1ec   :  { %2543 = vst.msk [vmem:[%s5428_s3 + $0xac] sm:$0xf] %vm2499_vm1, %v2286_v61  ;;  %v1775_v2 = vadd.f32 %v4964_v53, %v1774_v47  ;;  %v1935_v3 = vadd.f32 %v4964_v53, %v1934_v63  ;;  %v1457_v4 = vpop.f32.mrf.mxu0  ;;  %v1617_v5 = vpop.f32.mrf.mxu1 }
 0x1ed   :  { %2607 = vst.msk [vmem:[%s5428_s3 + $0x1ac] sm:$0xf] %vm2499_vm1, %v2350_v62  ;;  %v1458_v8 = vadd.f32 %v4964_v53, %v1457_v4  ;;  %v1618_v9 = vadd.f32 %v4964_v53, %v1617_v5 }
 0x1ee   :  { %v2158_v10 = vmax.f32 %v1775_v2, 0.0  ;;  %v2222_v11 = vmax.f32 %v1935_v3, 0.0 }
 0x1ef   :  { %v2031_v12 = vmax.f32 %v1458_v8, 0.0  ;;  %v2095_v13 = vmax.f32 %v1618_v9, 0.0  ;;  %3308 = vmatmul.msk.bf16.gmra.mxu0 %vm953_vm0, %v3436_v0  ;;  %3340 = vmatmul.msk.bf16.gmra.mxu1 %vm953_vm0, %v3468_v1 }
 0x1f0   :  { %v2414_v14 = vpack.c.bf16 %v2158_v10, %v2158_v10  ;;  %v2478_v15 = vpack.c.bf16 %v2222_v11, %v2222_v11  ;;  %3372 = vmatmul.msk.bf16.gmra.mxu2 %vm953_vm0, %v3500_v6  ;;  %3404 = vmatmul.msk.bf16.gmra.mxu3 %vm953_vm0, %v3532_v7 }
 0x1f1   :  { %v2287_v16 = vpack.c.bf16 %v2031_v12, %v2031_v12  ;;  %v2351_v17 = vpack.c.bf16 %v2095_v13, %v2095_v13 }
 0x1f2   :  { %2671 = vst.msk [vmem:[%s5428_s3 + $0x2ac] sm:$0xf] %vm2499_vm1, %v2414_v14 }
 0x1f3   :  { %2735 = vst.msk [vmem:[%s5428_s3 + $0x3ac] sm:$0xf] %vm2499_vm1, %v2478_v15  ;;  %v1777_v18 = vpop.f32.mrf.mxu2  ;;  %v1937_v19 = vpop.f32.mrf.mxu3 }
 0x1f4   :  { %2544 = vst.msk [vmem:[%s5428_s3 + $0xb0] sm:$0xf] %vm2499_vm1, %v2287_v16  ;;  %v1778_v20 = vadd.f32 %v4964_v53, %v1777_v18  ;;  %v1938_v21 = vadd.f32 %v4964_v53, %v1937_v19  ;;  %v1459_v22 = vpop.f32.mrf.mxu0  ;;  %v1619_v23 = vpop.f32.mrf.mxu1 }
 0x1f5   :  { %2608 = vst.msk [vmem:[%s5428_s3 + $0x1b0] sm:$0xf] %vm2499_vm1, %v2351_v17  ;;  %v1460_v24 = vadd.f32 %v4964_v53, %v1459_v22  ;;  %v1620_v25 = vadd.f32 %v4964_v53, %v1619_v23 }
 0x1f6   :  { %v2159_v26 = vmax.f32 %v1778_v20, 0.0  ;;  %v2223_v27 = vmax.f32 %v1938_v21, 0.0 }
 0x1f7   :  { %v2032_v28 = vmax.f32 %v1460_v24, 0.0  ;;  %v2096_v29 = vmax.f32 %v1620_v25, 0.0 }
 0x1f8   :  { %v2415_v30 = vpack.c.bf16 %v2159_v26, %v2159_v26  ;;  %v2479_v31 = vpack.c.bf16 %v2223_v27, %v2223_v27 }
 0x1f9   :  { %v2288_v32 = vpack.c.bf16 %v2032_v28, %v2032_v28  ;;  %v2352_v34 = vpack.c.bf16 %v2096_v29, %v2096_v29 }
 0x1fa   :  { %2672 = vst.msk [vmem:[%s5428_s3 + $0x2b0] sm:$0xf] %vm2499_vm1, %v2415_v30 }
 0x1fb   :  { %2736 = vst.msk [vmem:[%s5428_s3 + $0x3b0] sm:$0xf] %vm2499_vm1, %v2479_v31  ;;  %v1779_v35 = vpop.f32.mrf.mxu2  ;;  %v1939_v36 = vpop.f32.mrf.mxu3 }
 0x1fc   :  { %2545 = vst.msk [vmem:[%s5428_s3 + $0xb4] sm:$0xf] %vm2499_vm1, %v2288_v32  ;;  %v1780_v39 = vadd.f32 %v4964_v53, %v1779_v35  ;;  %v1940_v40 = vadd.f32 %v4964_v53, %v1939_v36  ;;  %v1462_v41 = vpop.f32.mrf.mxu0  ;;  %v1622_v42 = vpop.f32.mrf.mxu1 }
 0x1fd   :  { %2609 = vst.msk [vmem:[%s5428_s3 + $0x1b4] sm:$0xf] %vm2499_vm1, %v2352_v34  ;;  %v1463_v33 = vadd.f32 %v4964_v53, %v1462_v41  ;;  %v1623_v45 = vadd.f32 %v4964_v53, %v1622_v42 }
 0x1fe   :  { %v2160_v46 = vmax.f32 %v1780_v39, 0.0  ;;  %v2224_v48 = vmax.f32 %v1940_v40, 0.0 }
 0x1ff   :  { %v2033_v49 = vmax.f32 %v1463_v33, 0.0  ;;  %v2097_v50 = vmax.f32 %v1623_v45, 0.0  ;;  %3309 = vmatmul.msk.bf16.gmra.mxu0 %vm953_vm0, %v3437_v37  ;;  %3341 = vmatmul.msk.bf16.gmra.mxu1 %vm953_vm0, %v3469_v38 }
 0x200   :  { %v2416_v51 = vpack.c.bf16 %v2160_v46, %v2160_v46  ;;  %v2480_v52 = vpack.c.bf16 %v2224_v48, %v2224_v48  ;;  %3373 = vmatmul.msk.bf16.gmra.mxu2 %vm953_vm0, %v3501_v43  ;;  %3405 = vmatmul.msk.bf16.gmra.mxu3 %vm953_vm0, %v3533_v44 }
 0x201   :  { %v2289_v54 = vpack.c.bf16 %v2033_v49, %v2033_v49  ;;  %v2353_v55 = vpack.c.bf16 %v2097_v50, %v2097_v50 }
 0x202   :  { %2673 = vst.msk [vmem:[%s5428_s3 + $0x2b4] sm:$0xf] %vm2499_vm1, %v2416_v51 }
 0x203   :  { %2737 = vst.msk [vmem:[%s5428_s3 + $0x3b4] sm:$0xf] %vm2499_vm1, %v2480_v52  ;;  %v1782_v56 = vpop.f32.mrf.mxu2  ;;  %v1942_v57 = vpop.f32.mrf.mxu3 }
 0x204   :  { %2546 = vst.msk [vmem:[%s5428_s3 + $0xb8] sm:$0xf] %vm2499_vm1, %v2289_v54  ;;  %v1783_v58 = vadd.f32 %v4964_v53, %v1782_v56  ;;  %v1943_v59 = vadd.f32 %v4964_v53, %v1942_v57  ;;  %v1464_v60 = vpop.f32.mrf.mxu0  ;;  %v1624_v61 = vpop.f32.mrf.mxu1 }
 0x205   :  { %2610 = vst.msk [vmem:[%s5428_s3 + $0x1b8] sm:$0xf] %vm2499_vm1, %v2353_v55  ;;  %v1465_v62 = vadd.f32 %v4964_v53, %v1464_v60  ;;  %v1625_v47 = vadd.f32 %v4964_v53, %v1624_v61 }
 0x206   :  { %v2161_v63 = vmax.f32 %v1783_v58, 0.0  ;;  %v2225_v0 = vmax.f32 %v1943_v59, 0.0 }
 0x207   :  { %v2034_v1 = vmax.f32 %v1465_v62, 0.0  ;;  %v2098_v2 = vmax.f32 %v1625_v47, 0.0 }
 0x208   :  { %v2417_v3 = vpack.c.bf16 %v2161_v63, %v2161_v63  ;;  %v2481_v4 = vpack.c.bf16 %v2225_v0, %v2225_v0 }
 0x209   :  { %v2290_v5 = vpack.c.bf16 %v2034_v1, %v2034_v1  ;;  %v2354_v6 = vpack.c.bf16 %v2098_v2, %v2098_v2 }
 0x20a   :  { %2674 = vst.msk [vmem:[%s5428_s3 + $0x2b8] sm:$0xf] %vm2499_vm1, %v2417_v3 }
 0x20b   :  { %2738 = vst.msk [vmem:[%s5428_s3 + $0x3b8] sm:$0xf] %vm2499_vm1, %v2481_v4  ;;  %v1784_v7 = vpop.f32.mrf.mxu2  ;;  %v1944_v8 = vpop.f32.mrf.mxu3 }
 0x20c   :  { %2547 = vst.msk [vmem:[%s5428_s3 + $0xbc] sm:$0xf] %vm2499_vm1, %v2290_v5  ;;  %v1785_v9 = vadd.f32 %v4964_v53, %v1784_v7  ;;  %v1945_v10 = vadd.f32 %v4964_v53, %v1944_v8  ;;  %v1467_v11 = vpop.f32.mrf.mxu0  ;;  %v1627_v12 = vpop.f32.mrf.mxu1 }
 0x20d   :  { %2611 = vst.msk [vmem:[%s5428_s3 + $0x1bc] sm:$0xf] %vm2499_vm1, %v2354_v6  ;;  %v1468_v13 = vadd.f32 %v4964_v53, %v1467_v11  ;;  %v1628_v14 = vadd.f32 %v4964_v53, %v1627_v12 }
 0x20e   :  { %v2162_v15 = vmax.f32 %v1785_v9, 0.0  ;;  %v2226_v16 = vmax.f32 %v1945_v10, 0.0 }
 0x20f   :  { %v2035_v17 = vmax.f32 %v1468_v13, 0.0  ;;  %v2099_v18 = vmax.f32 %v1628_v14, 0.0 }
 0x210   :  { %v2418_v19 = vpack.c.bf16 %v2162_v15, %v2162_v15  ;;  %v2482_v20 = vpack.c.bf16 %v2226_v16, %v2226_v16 }
 0x211   :  { %v2291_v21 = vpack.c.bf16 %v2035_v17, %v2035_v17  ;;  %v2355_v22 = vpack.c.bf16 %v2099_v18, %v2099_v18 }
 0x212   :  { %2675 = vst.msk [vmem:[%s5428_s3 + $0x2bc] sm:$0xf] %vm2499_vm1, %v2418_v19 }
 0x213   :  { %2739 = vst.msk [vmem:[%s5428_s3 + $0x3bc] sm:$0xf] %vm2499_vm1, %v2482_v20  ;;  %v1787_v23 = vpop.f32.mrf.mxu2  ;;  %v1947_v24 = vpop.f32.mrf.mxu3 }
 0x214   :  { %2548 = vst.msk [vmem:[%s5428_s3 + $0xc0] sm:$0xf] %vm2499_vm1, %v2291_v21  ;;  %v1788_v25 = vadd.f32 %v4964_v53, %v1787_v23  ;;  %v1948_v26 = vadd.f32 %v4964_v53, %v1947_v24  ;;  %v1469_v27 = vpop.f32.mrf.mxu0  ;;  %v1629_v28 = vpop.f32.mrf.mxu1 }
 0x215   :  { %2612 = vst.msk [vmem:[%s5428_s3 + $0x1c0] sm:$0xf] %vm2499_vm1, %v2355_v22  ;;  %v1470_v29 = vadd.f32 %v4964_v53, %v1469_v27  ;;  %v1630_v30 = vadd.f32 %v4964_v53, %v1629_v28 }
 0x216   :  { %v2163_v31 = vmax.f32 %v1788_v25, 0.0  ;;  %v2227_v32 = vmax.f32 %v1948_v26, 0.0 }
 0x217   :  { %v2036_v34 = vmax.f32 %v1470_v29, 0.0  ;;  %v2100_v35 = vmax.f32 %v1630_v30, 0.0 }
 0x218   :  { %v2419_v36 = vpack.c.bf16 %v2163_v31, %v2163_v31  ;;  %v2483_v37 = vpack.c.bf16 %v2227_v32, %v2227_v32 }
 0x219   :  { %v2292_v38 = vpack.c.bf16 %v2036_v34, %v2036_v34  ;;  %v2356_v39 = vpack.c.bf16 %v2100_v35, %v2100_v35 }
 0x21a   :  { %2676 = vst.msk [vmem:[%s5428_s3 + $0x2c0] sm:$0xf] %vm2499_vm1, %v2419_v36 }
 0x21b   :  { %2740 = vst.msk [vmem:[%s5428_s3 + $0x3c0] sm:$0xf] %vm2499_vm1, %v2483_v37  ;;  %v1789_v40 = vpop.f32.mrf.mxu2  ;;  %v1949_v41 = vpop.f32.mrf.mxu3 }
 0x21c   :  { %2549 = vst.msk [vmem:[%s5428_s3 + $0xc4] sm:$0xf] %vm2499_vm1, %v2292_v38  ;;  %v1790_v42 = vadd.f32 %v4964_v53, %v1789_v40  ;;  %v1950_v43 = vadd.f32 %v4964_v53, %v1949_v41  ;;  %v1472_v44 = vpop.f32.mrf.mxu0  ;;  %v1632_v33 = vpop.f32.mrf.mxu1 }
 0x21d   :  { %2613 = vst.msk [vmem:[%s5428_s3 + $0x1c4] sm:$0xf] %vm2499_vm1, %v2356_v39  ;;  %v1473_v45 = vadd.f32 %v4964_v53, %v1472_v44  ;;  %v1633_v46 = vadd.f32 %v4964_v53, %v1632_v33 }
 0x21e   :  { %v2164_v48 = vmax.f32 %v1790_v42, 0.0  ;;  %v2228_v49 = vmax.f32 %v1950_v43, 0.0 }
 0x21f   :  { %v2037_v50 = vmax.f32 %v1473_v45, 0.0  ;;  %v2101_v51 = vmax.f32 %v1633_v46, 0.0 }
 0x220   :  { %v2420_v52 = vpack.c.bf16 %v2164_v48, %v2164_v48  ;;  %v2484_v54 = vpack.c.bf16 %v2228_v49, %v2228_v49 }
 0x221   :  { %v2293_v55 = vpack.c.bf16 %v2037_v50, %v2037_v50  ;;  %v2357_v56 = vpack.c.bf16 %v2101_v51, %v2101_v51 }
 0x222   :  { %2677 = vst.msk [vmem:[%s5428_s3 + $0x2c4] sm:$0xf] %vm2499_vm1, %v2420_v52 }
 0x223   :  { %2741 = vst.msk [vmem:[%s5428_s3 + $0x3c4] sm:$0xf] %vm2499_vm1, %v2484_v54  ;;  %v1792_v57 = vpop.f32.mrf.mxu2  ;;  %v1952_v58 = vpop.f32.mrf.mxu3 }
 0x224   :  { %2550 = vst.msk [vmem:[%s5428_s3 + $0xc8] sm:$0xf] %vm2499_vm1, %v2293_v55  ;;  %v1793_v59 = vadd.f32 %v4964_v53, %v1792_v57  ;;  %v1953_v60 = vadd.f32 %v4964_v53, %v1952_v58  ;;  %v1474_v61 = vpop.f32.mrf.mxu0  ;;  %v1634_v62 = vpop.f32.mrf.mxu1 }
 0x225   :  { %2614 = vst.msk [vmem:[%s5428_s3 + $0x1c8] sm:$0xf] %vm2499_vm1, %v2357_v56  ;;  %v1475_v47 = vadd.f32 %v4964_v53, %v1474_v61  ;;  %v1635_v63 = vadd.f32 %v4964_v53, %v1634_v62 }
 0x226   :  { %v2165_v0 = vmax.f32 %v1793_v59, 0.0  ;;  %v2229_v1 = vmax.f32 %v1953_v60, 0.0 }
 0x227   :  { %v2038_v2 = vmax.f32 %v1475_v47, 0.0  ;;  %v2102_v3 = vmax.f32 %v1635_v63, 0.0 }
 0x228   :  { %v2421_v4 = vpack.c.bf16 %v2165_v0, %v2165_v0  ;;  %v2485_v5 = vpack.c.bf16 %v2229_v1, %v2229_v1 }
 0x229   :  { %v2294_v6 = vpack.c.bf16 %v2038_v2, %v2038_v2  ;;  %v2358_v7 = vpack.c.bf16 %v2102_v3, %v2102_v3 }
 0x22a   :  { %2678 = vst.msk [vmem:[%s5428_s3 + $0x2c8] sm:$0xf] %vm2499_vm1, %v2421_v4 }
 0x22b   :  { %2742 = vst.msk [vmem:[%s5428_s3 + $0x3c8] sm:$0xf] %vm2499_vm1, %v2485_v5  ;;  %v1794_v8 = vpop.f32.mrf.mxu2  ;;  %v1954_v9 = vpop.f32.mrf.mxu3 }
 0x22c   :  { %2551 = vst.msk [vmem:[%s5428_s3 + $0xcc] sm:$0xf] %vm2499_vm1, %v2294_v6  ;;  %v1795_v10 = vadd.f32 %v4964_v53, %v1794_v8  ;;  %v1955_v11 = vadd.f32 %v4964_v53, %v1954_v9  ;;  %v1477_v12 = vpop.f32.mrf.mxu0  ;;  %v1637_v13 = vpop.f32.mrf.mxu1 }
 0x22d   :  { %2615 = vst.msk [vmem:[%s5428_s3 + $0x1cc] sm:$0xf] %vm2499_vm1, %v2358_v7  ;;  %v1478_v14 = vadd.f32 %v4964_v53, %v1477_v12  ;;  %v1638_v15 = vadd.f32 %v4964_v53, %v1637_v13 }
 0x22e   :  { %v2166_v16 = vmax.f32 %v1795_v10, 0.0  ;;  %v2230_v17 = vmax.f32 %v1955_v11, 0.0 }
 0x22f   :  { %v2039_v18 = vmax.f32 %v1478_v14, 0.0  ;;  %v2103_v19 = vmax.f32 %v1638_v15, 0.0 }
 0x230   :  { %v2422_v20 = vpack.c.bf16 %v2166_v16, %v2166_v16  ;;  %v2486_v21 = vpack.c.bf16 %v2230_v17, %v2230_v17 }
 0x231   :  { %v2295_v22 = vpack.c.bf16 %v2039_v18, %v2039_v18  ;;  %v2359_v23 = vpack.c.bf16 %v2103_v19, %v2103_v19 }
 0x232   :  { %2679 = vst.msk [vmem:[%s5428_s3 + $0x2cc] sm:$0xf] %vm2499_vm1, %v2422_v20 }
 0x233   :  { %2743 = vst.msk [vmem:[%s5428_s3 + $0x3cc] sm:$0xf] %vm2499_vm1, %v2486_v21  ;;  %v1797_v24 = vpop.f32.mrf.mxu2  ;;  %v1957_v25 = vpop.f32.mrf.mxu3 }
 0x234   :  { %2552 = vst.msk [vmem:[%s5428_s3 + $0xd0] sm:$0xf] %vm2499_vm1, %v2295_v22  ;;  %v1798_v26 = vadd.f32 %v4964_v53, %v1797_v24  ;;  %v1958_v27 = vadd.f32 %v4964_v53, %v1957_v25  ;;  %v1479_v28 = vpop.f32.mrf.mxu0  ;;  %v1639_v29 = vpop.f32.mrf.mxu1 }
 0x235   :  { %2616 = vst.msk [vmem:[%s5428_s3 + $0x1d0] sm:$0xf] %vm2499_vm1, %v2359_v23  ;;  %v1480_v30 = vadd.f32 %v4964_v53, %v1479_v28  ;;  %v1640_v31 = vadd.f32 %v4964_v53, %v1639_v29 }
 0x236   :  { %v2167_v32 = vmax.f32 %v1798_v26, 0.0  ;;  %v2231_v34 = vmax.f32 %v1958_v27, 0.0 }
 0x237   :  { %v2040_v35 = vmax.f32 %v1480_v30, 0.0  ;;  %v2104_v36 = vmax.f32 %v1640_v31, 0.0 }
 0x238   :  { %v2423_v37 = vpack.c.bf16 %v2167_v32, %v2167_v32  ;;  %v2487_v38 = vpack.c.bf16 %v2231_v34, %v2231_v34 }
 0x239   :  { %v2296_v39 = vpack.c.bf16 %v2040_v35, %v2040_v35  ;;  %v2360_v40 = vpack.c.bf16 %v2104_v36, %v2104_v36 }
 0x23a   :  { %2680 = vst.msk [vmem:[%s5428_s3 + $0x2d0] sm:$0xf] %vm2499_vm1, %v2423_v37 }
 0x23b   :  { %2744 = vst.msk [vmem:[%s5428_s3 + $0x3d0] sm:$0xf] %vm2499_vm1, %v2487_v38  ;;  %v1799_v41 = vpop.f32.mrf.mxu2  ;;  %v1959_v42 = vpop.f32.mrf.mxu3 }
 0x23c   :  { %2553 = vst.msk [vmem:[%s5428_s3 + $0xd4] sm:$0xf] %vm2499_vm1, %v2296_v39  ;;  %v1800_v43 = vadd.f32 %v4964_v53, %v1799_v41  ;;  %v1960_v44 = vadd.f32 %v4964_v53, %v1959_v42  ;;  %v1482_v33 = vpop.f32.mrf.mxu0  ;;  %v1642_v45 = vpop.f32.mrf.mxu1 }
 0x23d   :  { %2617 = vst.msk [vmem:[%s5428_s3 + $0x1d4] sm:$0xf] %vm2499_vm1, %v2360_v40  ;;  %v1483_v46 = vadd.f32 %v4964_v53, %v1482_v33  ;;  %v1643_v48 = vadd.f32 %v4964_v53, %v1642_v45 }
 0x23e   :  { %v2168_v49 = vmax.f32 %v1800_v43, 0.0  ;;  %v2232_v50 = vmax.f32 %v1960_v44, 0.0 }
 0x23f   :  { %v2041_v51 = vmax.f32 %v1483_v46, 0.0  ;;  %v2105_v52 = vmax.f32 %v1643_v48, 0.0 }
 0x240   :  { %v2424_v54 = vpack.c.bf16 %v2168_v49, %v2168_v49  ;;  %v2488_v55 = vpack.c.bf16 %v2232_v50, %v2232_v50 }
 0x241   :  { %v2297_v56 = vpack.c.bf16 %v2041_v51, %v2041_v51  ;;  %v2361_v57 = vpack.c.bf16 %v2105_v52, %v2105_v52 }
 0x242   :  { %2681 = vst.msk [vmem:[%s5428_s3 + $0x2d4] sm:$0xf] %vm2499_vm1, %v2424_v54 }
 0x243   :  { %2745 = vst.msk [vmem:[%s5428_s3 + $0x3d4] sm:$0xf] %vm2499_vm1, %v2488_v55  ;;  %v1802_v58 = vpop.f32.mrf.mxu2  ;;  %v1962_v59 = vpop.f32.mrf.mxu3 }
 0x244   :  { %2554 = vst.msk [vmem:[%s5428_s3 + $0xd8] sm:$0xf] %vm2499_vm1, %v2297_v56  ;;  %v1803_v60 = vadd.f32 %v4964_v53, %v1802_v58  ;;  %v1963_v61 = vadd.f32 %v4964_v53, %v1962_v59  ;;  %v1484_v62 = vpop.f32.mrf.mxu0  ;;  %v1644_v47 = vpop.f32.mrf.mxu1 }
 0x245   :  { %2618 = vst.msk [vmem:[%s5428_s3 + $0x1d8] sm:$0xf] %vm2499_vm1, %v2361_v57  ;;  %v1485_v63 = vadd.f32 %v4964_v53, %v1484_v62  ;;  %v1645_v0 = vadd.f32 %v4964_v53, %v1644_v47 }
 0x246   :  { %v2169_v1 = vmax.f32 %v1803_v60, 0.0  ;;  %v2233_v2 = vmax.f32 %v1963_v61, 0.0 }
 0x247   :  { %v2042_v3 = vmax.f32 %v1485_v63, 0.0  ;;  %v2106_v4 = vmax.f32 %v1645_v0, 0.0 }
 0x248   :  { %v2425_v5 = vpack.c.bf16 %v2169_v1, %v2169_v1  ;;  %v2489_v6 = vpack.c.bf16 %v2233_v2, %v2233_v2 }
 0x249   :  { %v2298_v7 = vpack.c.bf16 %v2042_v3, %v2042_v3  ;;  %v2362_v8 = vpack.c.bf16 %v2106_v4, %v2106_v4 }
 0x24a   :  { %2682 = vst.msk [vmem:[%s5428_s3 + $0x2d8] sm:$0xf] %vm2499_vm1, %v2425_v5 }
 0x24b   :  { %2746 = vst.msk [vmem:[%s5428_s3 + $0x3d8] sm:$0xf] %vm2499_vm1, %v2489_v6  ;;  %v1804_v9 = vpop.f32.mrf.mxu2  ;;  %v1964_v10 = vpop.f32.mrf.mxu3 }
 0x24c   :  { %2555 = vst.msk [vmem:[%s5428_s3 + $0xdc] sm:$0xf] %vm2499_vm1, %v2298_v7  ;;  %v1805_v11 = vadd.f32 %v4964_v53, %v1804_v9  ;;  %v1965_v12 = vadd.f32 %v4964_v53, %v1964_v10  ;;  %v1487_v13 = vpop.f32.mrf.mxu0  ;;  %v1647_v14 = vpop.f32.mrf.mxu1 }
 0x24d   :  { %2619 = vst.msk [vmem:[%s5428_s3 + $0x1dc] sm:$0xf] %vm2499_vm1, %v2362_v8  ;;  %v1488_v15 = vadd.f32 %v4964_v53, %v1487_v13  ;;  %v1648_v16 = vadd.f32 %v4964_v53, %v1647_v14 }
 0x24e   :  { %v2170_v17 = vmax.f32 %v1805_v11, 0.0  ;;  %v2234_v18 = vmax.f32 %v1965_v12, 0.0 }
 0x24f   :  { %v2043_v19 = vmax.f32 %v1488_v15, 0.0  ;;  %v2107_v20 = vmax.f32 %v1648_v16, 0.0 }
 0x250   :  { %v2426_v21 = vpack.c.bf16 %v2170_v17, %v2170_v17  ;;  %v2490_v22 = vpack.c.bf16 %v2234_v18, %v2234_v18 }
 0x251   :  { %v2299_v23 = vpack.c.bf16 %v2043_v19, %v2043_v19  ;;  %v2363_v24 = vpack.c.bf16 %v2107_v20, %v2107_v20 }
 0x252   :  { %2683 = vst.msk [vmem:[%s5428_s3 + $0x2dc] sm:$0xf] %vm2499_vm1, %v2426_v21 }
 0x253   :  { %2747 = vst.msk [vmem:[%s5428_s3 + $0x3dc] sm:$0xf] %vm2499_vm1, %v2490_v22  ;;  %v1807_v25 = vpop.f32.mrf.mxu2  ;;  %v1967_v26 = vpop.f32.mrf.mxu3 }
 0x254   :  { %2556 = vst.msk [vmem:[%s5428_s3 + $0xe0] sm:$0xf] %vm2499_vm1, %v2299_v23  ;;  %v1808_v27 = vadd.f32 %v4964_v53, %v1807_v25  ;;  %v1968_v28 = vadd.f32 %v4964_v53, %v1967_v26  ;;  %v1489_v29 = vpop.f32.mrf.mxu0  ;;  %v1649_v30 = vpop.f32.mrf.mxu1 }
 0x255   :  { %2620 = vst.msk [vmem:[%s5428_s3 + $0x1e0] sm:$0xf] %vm2499_vm1, %v2363_v24  ;;  %v1490_v31 = vadd.f32 %v4964_v53, %v1489_v29  ;;  %v1650_v32 = vadd.f32 %v4964_v53, %v1649_v30 }
 0x256   :  { %v2171_v34 = vmax.f32 %v1808_v27, 0.0  ;;  %v2235_v35 = vmax.f32 %v1968_v28, 0.0 }
 0x257   :  { %v2044_v36 = vmax.f32 %v1490_v31, 0.0  ;;  %v2108_v37 = vmax.f32 %v1650_v32, 0.0 }
 0x258   :  { %v2427_v38 = vpack.c.bf16 %v2171_v34, %v2171_v34  ;;  %v2491_v39 = vpack.c.bf16 %v2235_v35, %v2235_v35 }
 0x259   :  { %v2300_v40 = vpack.c.bf16 %v2044_v36, %v2044_v36  ;;  %v2364_v41 = vpack.c.bf16 %v2108_v37, %v2108_v37 }
 0x25a   :  { %2684 = vst.msk [vmem:[%s5428_s3 + $0x2e0] sm:$0xf] %vm2499_vm1, %v2427_v38 }
 0x25b   :  { %2748 = vst.msk [vmem:[%s5428_s3 + $0x3e0] sm:$0xf] %vm2499_vm1, %v2491_v39  ;;  %v1809_v42 = vpop.f32.mrf.mxu2  ;;  %v1969_v43 = vpop.f32.mrf.mxu3 }
 0x25c   :  { %2557 = vst.msk [vmem:[%s5428_s3 + $0xe4] sm:$0xf] %vm2499_vm1, %v2300_v40  ;;  %v1810_v44 = vadd.f32 %v4964_v53, %v1809_v42  ;;  %v1970_v33 = vadd.f32 %v4964_v53, %v1969_v43  ;;  %v1492_v45 = vpop.f32.mrf.mxu0  ;;  %v1652_v46 = vpop.f32.mrf.mxu1 }
 0x25d   :  { %2621 = vst.msk [vmem:[%s5428_s3 + $0x1e4] sm:$0xf] %vm2499_vm1, %v2364_v41  ;;  %v1493_v48 = vadd.f32 %v4964_v53, %v1492_v45  ;;  %v1653_v49 = vadd.f32 %v4964_v53, %v1652_v46 }
 0x25e   :  { %v2172_v50 = vmax.f32 %v1810_v44, 0.0  ;;  %v2236_v51 = vmax.f32 %v1970_v33, 0.0 }
 0x25f   :  { %v2045_v52 = vmax.f32 %v1493_v48, 0.0  ;;  %v2109_v54 = vmax.f32 %v1653_v49, 0.0 }
 0x260   :  { %v2428_v55 = vpack.c.bf16 %v2172_v50, %v2172_v50  ;;  %v2492_v56 = vpack.c.bf16 %v2236_v51, %v2236_v51 }
 0x261   :  { %v2301_v57 = vpack.c.bf16 %v2045_v52, %v2045_v52  ;;  %v2365_v58 = vpack.c.bf16 %v2109_v54, %v2109_v54 }
 0x262   :  { %2685 = vst.msk [vmem:[%s5428_s3 + $0x2e4] sm:$0xf] %vm2499_vm1, %v2428_v55 }
 0x263   :  { %2749 = vst.msk [vmem:[%s5428_s3 + $0x3e4] sm:$0xf] %vm2499_vm1, %v2492_v56  ;;  %v1812_v59 = vpop.f32.mrf.mxu2  ;;  %v1972_v60 = vpop.f32.mrf.mxu3 }
 0x264   :  { %2558 = vst.msk [vmem:[%s5428_s3 + $0xe8] sm:$0xf] %vm2499_vm1, %v2301_v57  ;;  %v1813_v61 = vadd.f32 %v4964_v53, %v1812_v59  ;;  %v1973_v62 = vadd.f32 %v4964_v53, %v1972_v60  ;;  %v1494_v47 = vpop.f32.mrf.mxu0  ;;  %v1654_v63 = vpop.f32.mrf.mxu1 }
 0x265   :  { %2622 = vst.msk [vmem:[%s5428_s3 + $0x1e8] sm:$0xf] %vm2499_vm1, %v2365_v58  ;;  %v1495_v0 = vadd.f32 %v4964_v53, %v1494_v47  ;;  %v1655_v1 = vadd.f32 %v4964_v53, %v1654_v63 }
 0x266   :  { %v2173_v2 = vmax.f32 %v1813_v61, 0.0  ;;  %v2237_v3 = vmax.f32 %v1973_v62, 0.0 }
 0x267   :  { %v2046_v4 = vmax.f32 %v1495_v0, 0.0  ;;  %v2110_v5 = vmax.f32 %v1655_v1, 0.0 }
 0x268   :  { %v2429_v6 = vpack.c.bf16 %v2173_v2, %v2173_v2  ;;  %v2493_v7 = vpack.c.bf16 %v2237_v3, %v2237_v3 }
 0x269   :  { %v2302_v8 = vpack.c.bf16 %v2046_v4, %v2046_v4  ;;  %v2366_v9 = vpack.c.bf16 %v2110_v5, %v2110_v5 }
 0x26a   :  { %2686 = vst.msk [vmem:[%s5428_s3 + $0x2e8] sm:$0xf] %vm2499_vm1, %v2429_v6 }
 0x26b   :  { %2750 = vst.msk [vmem:[%s5428_s3 + $0x3e8] sm:$0xf] %vm2499_vm1, %v2493_v7  ;;  %v1814_v10 = vpop.f32.mrf.mxu2  ;;  %v1974_v11 = vpop.f32.mrf.mxu3 }
 0x26c   :  { %2559 = vst.msk [vmem:[%s5428_s3 + $0xec] sm:$0xf] %vm2499_vm1, %v2302_v8  ;;  %v1815_v12 = vadd.f32 %v4964_v53, %v1814_v10  ;;  %v1975_v13 = vadd.f32 %v4964_v53, %v1974_v11  ;;  %v1497_v14 = vpop.f32.mrf.mxu0  ;;  %v1657_v15 = vpop.f32.mrf.mxu1 }
 0x26d   :  { %2623 = vst.msk [vmem:[%s5428_s3 + $0x1ec] sm:$0xf] %vm2499_vm1, %v2366_v9  ;;  %v1498_v16 = vadd.f32 %v4964_v53, %v1497_v14  ;;  %v1658_v17 = vadd.f32 %v4964_v53, %v1657_v15 }
 0x26e   :  { %v2174_v18 = vmax.f32 %v1815_v12, 0.0  ;;  %v2238_v19 = vmax.f32 %v1975_v13, 0.0 }
 0x26f   :  { %v2047_v20 = vmax.f32 %v1498_v16, 0.0  ;;  %v2111_v21 = vmax.f32 %v1658_v17, 0.0 }
 0x270   :  { %v2430_v22 = vpack.c.bf16 %v2174_v18, %v2174_v18  ;;  %v2494_v23 = vpack.c.bf16 %v2238_v19, %v2238_v19 }
 0x271   :  { %v2303_v24 = vpack.c.bf16 %v2047_v20, %v2047_v20  ;;  %v2367_v25 = vpack.c.bf16 %v2111_v21, %v2111_v21 }
 0x272   :  { %2687 = vst.msk [vmem:[%s5428_s3 + $0x2ec] sm:$0xf] %vm2499_vm1, %v2430_v22 }
 0x273   :  { %2751 = vst.msk [vmem:[%s5428_s3 + $0x3ec] sm:$0xf] %vm2499_vm1, %v2494_v23  ;;  %v1817_v26 = vpop.f32.mrf.mxu2  ;;  %v1977_v27 = vpop.f32.mrf.mxu3 }
 0x274   :  { %2560 = vst.msk [vmem:[%s5428_s3 + $0xf0] sm:$0xf] %vm2499_vm1, %v2303_v24  ;;  %v1818_v28 = vadd.f32 %v4964_v53, %v1817_v26  ;;  %v1978_v29 = vadd.f32 %v4964_v53, %v1977_v27  ;;  %v1499_v30 = vpop.f32.mrf.mxu0  ;;  %v1659_v31 = vpop.f32.mrf.mxu1 }
 0x275   :  { %2624 = vst.msk [vmem:[%s5428_s3 + $0x1f0] sm:$0xf] %vm2499_vm1, %v2367_v25  ;;  %v1500_v32 = vadd.f32 %v4964_v53, %v1499_v30  ;;  %v1660_v34 = vadd.f32 %v4964_v53, %v1659_v31 }
 0x276   :  { %v2175_v35 = vmax.f32 %v1818_v28, 0.0  ;;  %v2239_v36 = vmax.f32 %v1978_v29, 0.0 }
 0x277   :  { %v2048_v37 = vmax.f32 %v1500_v32, 0.0  ;;  %v2112_v38 = vmax.f32 %v1660_v34, 0.0 }
 0x278   :  { %v2431_v39 = vpack.c.bf16 %v2175_v35, %v2175_v35  ;;  %v2495_v40 = vpack.c.bf16 %v2239_v36, %v2239_v36 }
 0x279   :  { %v2304_v41 = vpack.c.bf16 %v2048_v37, %v2048_v37  ;;  %v2368_v42 = vpack.c.bf16 %v2112_v38, %v2112_v38 }
 0x27a   :  { %2688 = vst.msk [vmem:[%s5428_s3 + $0x2f0] sm:$0xf] %vm2499_vm1, %v2431_v39 }
 0x27b   :  { %2752 = vst.msk [vmem:[%s5428_s3 + $0x3f0] sm:$0xf] %vm2499_vm1, %v2495_v40  ;;  %v1819_v43 = vpop.f32.mrf.mxu2  ;;  %v1979_v44 = vpop.f32.mrf.mxu3 }
 0x27c   :  { %2561 = vst.msk [vmem:[%s5428_s3 + $0xf4] sm:$0xf] %vm2499_vm1, %v2304_v41  ;;  %v1820_v33 = vadd.f32 %v4964_v53, %v1819_v43  ;;  %v1980_v45 = vadd.f32 %v4964_v53, %v1979_v44  ;;  %v1502_v46 = vpop.f32.mrf.mxu0  ;;  %v1662_v48 = vpop.f32.mrf.mxu1 }
 0x27d   :  { %2625 = vst.msk [vmem:[%s5428_s3 + $0x1f4] sm:$0xf] %vm2499_vm1, %v2368_v42  ;;  %v1503_v49 = vadd.f32 %v4964_v53, %v1502_v46  ;;  %v1663_v50 = vadd.f32 %v4964_v53, %v1662_v48 }
 0x27e   :  { %v2176_v51 = vmax.f32 %v1820_v33, 0.0  ;;  %v2240_v52 = vmax.f32 %v1980_v45, 0.0 }
 0x27f   :  { %v2049_v54 = vmax.f32 %v1503_v49, 0.0  ;;  %v2113_v55 = vmax.f32 %v1663_v50, 0.0 }
 0x280   :  { %v2432_v56 = vpack.c.bf16 %v2176_v51, %v2176_v51  ;;  %v2496_v57 = vpack.c.bf16 %v2240_v52, %v2240_v52 }
 0x281   :  { %v2305_v58 = vpack.c.bf16 %v2049_v54, %v2049_v54  ;;  %v2369_v59 = vpack.c.bf16 %v2113_v55, %v2113_v55 }
 0x282   :  { %2689 = vst.msk [vmem:[%s5428_s3 + $0x2f4] sm:$0xf] %vm2499_vm1, %v2432_v56 }
 0x283   :  { %2753 = vst.msk [vmem:[%s5428_s3 + $0x3f4] sm:$0xf] %vm2499_vm1, %v2496_v57  ;;  %v1822_v60 = vpop.f32.mrf.mxu2  ;;  %v1982_v61 = vpop.f32.mrf.mxu3 }
 0x284   :  { %2562 = vst.msk [vmem:[%s5428_s3 + $0xf8] sm:$0xf] %vm2499_vm1, %v2305_v58  ;;  %v1823_v62 = vadd.f32 %v4964_v53, %v1822_v60  ;;  %v1983_v47 = vadd.f32 %v4964_v53, %v1982_v61  ;;  %v1504_v63 = vpop.f32.mrf.mxu0  ;;  %v1664_v0 = vpop.f32.mrf.mxu1 }
 0x285   :  { %2626 = vst.msk [vmem:[%s5428_s3 + $0x1f8] sm:$0xf] %vm2499_vm1, %v2369_v59  ;;  %v1505_v1 = vadd.f32 %v4964_v53, %v1504_v63  ;;  %v1665_v2 = vadd.f32 %v4964_v53, %v1664_v0 }
 0x286   :  { %v2177_v3 = vmax.f32 %v1823_v62, 0.0  ;;  %v2241_v4 = vmax.f32 %v1983_v47, 0.0 }
 0x287   :  { %v2050_v5 = vmax.f32 %v1505_v1, 0.0  ;;  %v2114_v6 = vmax.f32 %v1665_v2, 0.0 }
 0x288   :  { %v2433_v7 = vpack.c.bf16 %v2177_v3, %v2177_v3  ;;  %v2497_v8 = vpack.c.bf16 %v2241_v4, %v2241_v4 }
 0x289   :  { %v2306_v9 = vpack.c.bf16 %v2050_v5, %v2050_v5  ;;  %v2370_v10 = vpack.c.bf16 %v2114_v6, %v2114_v6 }
 0x28a   :  { %2690 = vst.msk [vmem:[%s5428_s3 + $0x2f8] sm:$0xf] %vm2499_vm1, %v2433_v7 }
 0x28b   :  { %2754 = vst.msk [vmem:[%s5428_s3 + $0x3f8] sm:$0xf] %vm2499_vm1, %v2497_v8  ;;  %v1824_v11 = vpop.f32.mrf.mxu2  ;;  %v1984_v12 = vpop.f32.mrf.mxu3 }
 0x28c   :  { %2563 = vst.msk [vmem:[%s5428_s3 + $0xfc] sm:$0xf] %vm2499_vm1, %v2306_v9  ;;  %v1825_v13 = vadd.f32 %v4964_v53, %v1824_v11  ;;  %v1985_v14 = vadd.f32 %v4964_v53, %v1984_v12 }
 0x28d   :  { %2627 = vst.msk [vmem:[%s5428_s3 + $0x1fc] sm:$0xf] %vm2499_vm1, %v2370_v10 }
 0x28e   :  { %v2178_v15 = vmax.f32 %v1825_v13, 0.0  ;;  %v2242_v16 = vmax.f32 %v1985_v14, 0.0 }
 0x290   :  { %v2434_v17 = vpack.c.bf16 %v2178_v15, %v2178_v15  ;;  %v2498_v18 = vpack.c.bf16 %v2242_v16, %v2242_v16 }
 0x292   :  { %2691 = vst.msk [vmem:[%s5428_s3 + $0x2fc] sm:$0xf] %vm2499_vm1, %v2434_v17 }
 0x293   :  { %2755 = vst.msk [vmem:[%s5428_s3 + $0x3fc] sm:$0xf] %vm2499_vm1, %v2498_v18 }
 0x294   :  { %2760 = vsyncpa [#allocation3], 1 }
 0x295   :  { %2761 = vsyncpa [#allocation5], 1 }

// kernel: sent_encoder_forward.7
= control target key start
LH: loop header
LB: loop body
LE: loop exit
PB: predicated region body
PF: predicated region fallthrough
CT: control target
= control target key end

     0   :  { %vm1846_vm0 = vcmask 519168   ;;  %s3930_s1 = inlined_call_operand.vmem [shape: bf16[512,64], index: 1, kind: input, shape index: {}]   ;;  %s3931_s2 = inlined_call_operand.vmem [shape: f32[1,64], index: 2, kind: input, shape index: {}]   ;;  %s3932_s0 = inlined_call_operand.vmem [shape: bf16[512,512], index: 0, kind: input, shape index: {}]   ;;  %s3933_s3 = inlined_call_operand.vmem [shape: bf16[512,64], index: 3, kind: output, shape index: {}]  }
   0x1   :  { %v2690_v0 = vld [vmem:[%s3930_s1 + $0x38] sm:$0xff]  ;;  %v2689_v4 = vld [vmem:[%s3930_s1 + $0x30] sm:$0xff]  ;;  %v2688_v8 = vld [vmem:[%s3930_s1 + $0x28] sm:$0xff] }
   0x2   :  { %v2698_v1 = vld [vmem:[%s3930_s1 + $0x78] sm:$0xff]  ;;  %1042 = vmatpush.bf16.msra.mxu0 %v2690_v0  ;;  %v2697_v5 = vld [vmem:[%s3930_s1 + $0x70] sm:$0xff]  ;;  %v2696_v9 = vld [vmem:[%s3930_s1 + $0x68] sm:$0xff] }
   0x3   :  { %v2706_v2 = vld [vmem:[%s3930_s1 + $0xb8] sm:$0xff]  ;;  %1211 = vmatpush.bf16.msra.mxu1 %v2698_v1  ;;  %v2705_v6 = vld [vmem:[%s3930_s1 + $0xb0] sm:$0xff]  ;;  %v2704_v10 = vld [vmem:[%s3930_s1 + $0xa8] sm:$0xff] }
   0x4   :  { %v2714_v3 = vld [vmem:[%s3930_s1 + $0xf8] sm:$0xff]  ;;  %1380 = vmatpush.bf16.msra.mxu2 %v2706_v2  ;;  %v2713_v7 = vld [vmem:[%s3930_s1 + $0xf0] sm:$0xff]  ;;  %v2712_v11 = vld [vmem:[%s3930_s1 + $0xe8] sm:$0xff] }
   0x5   :  { %1549 = vmatpush.bf16.msra.mxu3 %v2714_v3  ;;  %v2687_v12 = vld [vmem:[%s3930_s1 + $0x20] sm:$0xff]  ;;  %v2686_v16 = vld [vmem:[%s3930_s1 + $0x18] sm:$0xff]  ;;  %v2685_v20 = vld [vmem:[%s3930_s1 + $0x10] sm:$0xff] }
   0x6   :  { %1043 = vmatpush.bf16.msra.mxu0 %v2689_v4  ;;  %v2695_v13 = vld [vmem:[%s3930_s1 + $0x60] sm:$0xff]  ;;  %v2694_v17 = vld [vmem:[%s3930_s1 + $0x58] sm:$0xff]  ;;  %v2693_v21 = vld [vmem:[%s3930_s1 + $0x50] sm:$0xff] }
   0x7   :  { %1212 = vmatpush.bf16.msra.mxu1 %v2697_v5  ;;  %v2703_v14 = vld [vmem:[%s3930_s1 + $0xa0] sm:$0xff]  ;;  %v2702_v18 = vld [vmem:[%s3930_s1 + $0x98] sm:$0xff]  ;;  %v2701_v22 = vld [vmem:[%s3930_s1 + $0x90] sm:$0xff] }
   0x8   :  { %1381 = vmatpush.bf16.msra.mxu2 %v2705_v6  ;;  %v2711_v15 = vld [vmem:[%s3930_s1 + $0xe0] sm:$0xff]  ;;  %v2710_v19 = vld [vmem:[%s3930_s1 + $0xd8] sm:$0xff]  ;;  %v2709_v23 = vld [vmem:[%s3930_s1 + $0xd0] sm:$0xff] }
   0x9   :  { %1550 = vmatpush.bf16.msra.mxu3 %v2713_v7  ;;  %v2684_v24 = vld [vmem:[%s3930_s1 + $0x8] sm:$0xff]  ;;  %v2683_v28 = vld [vmem:[%s3930_s1] sm:$0xff]  ;;  %v2557_v33 = vld [vmem:[%s3932_s0 + $0xc] sm:$0xf0] }
   0xa   :  { %1044 = vmatpush.bf16.msra.mxu0 %v2688_v8  ;;  %v2692_v25 = vld [vmem:[%s3930_s1 + $0x48] sm:$0xff]  ;;  %v2691_v29 = vld [vmem:[%s3930_s1 + $0x40] sm:$0xff]  ;;  %v1919_v35 = vld [vmem:[%s3932_s0 + $0x10] sm:$0xf0] }
   0xb   :  { %1213 = vmatpush.bf16.msra.mxu1 %v2696_v9  ;;  %v2700_v26 = vld [vmem:[%s3930_s1 + $0x88] sm:$0xff]  ;;  %v2699_v30 = vld [vmem:[%s3930_s1 + $0x80] sm:$0xff]  ;;  %v2558_v37 = vld [vmem:[%s3932_s0 + $0x14] sm:$0xf0] }
   0xc   :  { %1382 = vmatpush.bf16.msra.mxu2 %v2704_v10  ;;  %v2708_v27 = vld [vmem:[%s3930_s1 + $0xc8] sm:$0xff]  ;;  %v2707_v31 = vld [vmem:[%s3930_s1 + $0xc0] sm:$0xff]  ;;  %v1927_v39 = vld [vmem:[%s3932_s0 + $0x18] sm:$0xf0] }
   0xd   :  { %1551 = vmatpush.bf16.msra.mxu3 %v2712_v11  ;;  %v1917_v32 = vld [vmem:[%s3932_s0] sm:$0xf]  ;;  %v2555_v34 = vld [vmem:[%s3932_s0 + $0x4] sm:$0xf]  ;;  %v1925_v36 = vld [vmem:[%s3932_s0 + $0x8] sm:$0xf] }
   0xe   :  { %1045 = vmatpush.bf16.msra.mxu0 %v2687_v12  ;;  %v2556_v38 = vld [vmem:[%s3932_s0 + $0xc] sm:$0xf]  ;;  %v1918_v40 = vor.u32 %v2557_v33, %v1917_v32  ;;  %v1922_v41 = vor.u32 %v2555_v34, %v1919_v35  ;;  %v1926_v42 = vor.u32 %v2558_v37, %v1925_v36  ;;  %v1933_v44 = vld [vmem:[%s3932_s0 + $0x20] sm:$0xf]  ;;  %v2561_v45 = vld [vmem:[%s3932_s0 + $0x2c] sm:$0xf0] }
   0xf   :  { %1214 = vmatpush.bf16.msra.mxu1 %v2695_v13  ;;  %v1930_v43 = vor.u32 %v2556_v38, %v1927_v39  ;;  %v2559_v46 = vld [vmem:[%s3932_s0 + $0x24] sm:$0xf]  ;;  %v1935_v47 = vld [vmem:[%s3932_s0 + $0x30] sm:$0xf0]  ;;  %v1941_v48 = vld [vmem:[%s3932_s0 + $0x28] sm:$0xf]  ;;  %v1934_v52 = vor.u32 %v2561_v45, %v1933_v44 }
  0x10   :  { %1383 = vmatpush.bf16.msra.mxu2 %v2703_v14  ;;  %v2562_v49 = vld [vmem:[%s3932_s0 + $0x34] sm:$0xf0]  ;;  %v2560_v50 = vld [vmem:[%s3932_s0 + $0x2c] sm:$0xf]  ;;  %v1943_v51 = vld [vmem:[%s3932_s0 + $0x38] sm:$0xf0]  ;;  %v1938_v53 = vor.u32 %v2559_v46, %v1935_v47 }
  0x11   :  { %1552 = vmatpush.bf16.msra.mxu3 %v2711_v15  ;;  %v1942_v54 = vor.u32 %v2562_v49, %v1941_v48  ;;  %v1946_v55 = vor.u32 %v2560_v50, %v1943_v51  ;;  %v1949_v56 = vld [vmem:[%s3932_s0 + $0x40] sm:$0xf]  ;;  %v2565_v57 = vld [vmem:[%s3932_s0 + $0x4c] sm:$0xf0]  ;;  %v2563_v58 = vld [vmem:[%s3932_s0 + $0x44] sm:$0xf] }
  0x12   :  { %1046 = vmatpush.bf16.msra.mxu0 %v2686_v16  ;;  %v1951_v59 = vld [vmem:[%s3932_s0 + $0x50] sm:$0xf0]  ;;  %v1957_v60 = vld [vmem:[%s3932_s0 + $0x48] sm:$0xf]  ;;  %v2566_v61 = vld [vmem:[%s3932_s0 + $0x54] sm:$0xf0]  ;;  %v1950_v0 = vor.u32 %v2565_v57, %v1949_v56 }
  0x13   :  { %1215 = vmatpush.bf16.msra.mxu1 %v2694_v17  ;;  %v2564_v62 = vld [vmem:[%s3932_s0 + $0x4c] sm:$0xf]  ;;  %v1959_v63 = vld [vmem:[%s3932_s0 + $0x58] sm:$0xf0]  ;;  %v1954_v1 = vor.u32 %v2563_v58, %v1951_v59  ;;  %v1958_v2 = vor.u32 %v2566_v61, %v1957_v60  ;;  %v1965_v4 = vld [vmem:[%s3932_s0 + $0x60] sm:$0xf] }
  0x14   :  { %1384 = vmatpush.bf16.msra.mxu2 %v2702_v18  ;;  %v1962_v3 = vor.u32 %v2564_v62, %v1959_v63  ;;  %v2569_v5 = vld [vmem:[%s3932_s0 + $0x6c] sm:$0xf0]  ;;  %v2567_v6 = vld [vmem:[%s3932_s0 + $0x64] sm:$0xf]  ;;  %v1967_v7 = vld [vmem:[%s3932_s0 + $0x70] sm:$0xf0] }
  0x15   :  { %1553 = vmatpush.bf16.msra.mxu3 %v2710_v19  ;;  %v1973_v8 = vld [vmem:[%s3932_s0 + $0x68] sm:$0xf]  ;;  %v2570_v9 = vld [vmem:[%s3932_s0 + $0x74] sm:$0xf0]  ;;  %v2568_v10 = vld [vmem:[%s3932_s0 + $0x6c] sm:$0xf]  ;;  %v1966_v12 = vor.u32 %v2569_v5, %v1965_v4  ;;  %v1970_v13 = vor.u32 %v2567_v6, %v1967_v7 }
  0x16   :  { %1047 = vmatpush.bf16.msra.mxu0 %v2685_v20  ;;  %v1975_v11 = vld [vmem:[%s3932_s0 + $0x78] sm:$0xf0]  ;;  %v1974_v14 = vor.u32 %v2570_v9, %v1973_v8  ;;  %v1981_v16 = vld [vmem:[%s3932_s0 + $0x80] sm:$0xf]  ;;  %v2573_v17 = vld [vmem:[%s3932_s0 + $0x8c] sm:$0xf0] }
  0x17   :  { %1216 = vmatpush.bf16.msra.mxu1 %v2693_v21  ;;  %v1978_v15 = vor.u32 %v2568_v10, %v1975_v11  ;;  %v2571_v18 = vld [vmem:[%s3932_s0 + $0x84] sm:$0xf]  ;;  %v1983_v19 = vld [vmem:[%s3932_s0 + $0x90] sm:$0xf0]  ;;  %v1989_v20 = vld [vmem:[%s3932_s0 + $0x88] sm:$0xf] }
  0x18   :  { %1385 = vmatpush.bf16.msra.mxu2 %v2701_v22  ;;  %v2574_v21 = vld [vmem:[%s3932_s0 + $0x94] sm:$0xf0]  ;;  %v2572_v22 = vld [vmem:[%s3932_s0 + $0x8c] sm:$0xf]  ;;  %v2005_v32 = vld [vmem:[%s3932_s0 + $0xa8] sm:$0xf] }
  0x19   :  { %1554 = vmatpush.bf16.msra.mxu3 %v2709_v23  ;;  %v1991_v23 = vld [vmem:[%s3932_s0 + $0x98] sm:$0xf0]  ;;  %v2578_v33 = vld [vmem:[%s3932_s0 + $0xb4] sm:$0xf0]  ;;  %v2576_v34 = vld [vmem:[%s3932_s0 + $0xac] sm:$0xf] }
  0x1a   :  { %1048 = vmatpush.bf16.msra.mxu0 %v2684_v24  ;;  %v1982_v24 = vor.u32 %v2573_v17, %v1981_v16  ;;  %v2007_v35 = vld [vmem:[%s3932_s0 + $0xb8] sm:$0xf0]  ;;  %v2006_v38 = vor.u32 %v2578_v33, %v2005_v32  ;;  %v2021_v44 = vld [vmem:[%s3932_s0 + $0xc8] sm:$0xf]  ;;  %v2582_v45 = vld [vmem:[%s3932_s0 + $0xd4] sm:$0xf0] }
  0x1b   :  { %1217 = vmatpush.bf16.msra.mxu1 %v2692_v25  ;;  %v1986_v25 = vor.u32 %v2571_v18, %v1983_v19  ;;  %v2010_v39 = vor.u32 %v2576_v34, %v2007_v35  ;;  %v2580_v46 = vld [vmem:[%s3932_s0 + $0xcc] sm:$0xf]  ;;  %v2023_v47 = vld [vmem:[%s3932_s0 + $0xd8] sm:$0xf0]  ;;  %v2022_v50 = vor.u32 %v2582_v45, %v2021_v44  ;;  %v2037_v56 = vld [vmem:[%s3932_s0 + $0xe8] sm:$0xf] }
  0x1c   :  { %1386 = vmatpush.bf16.msra.mxu2 %v2700_v26  ;;  %v1990_v26 = vor.u32 %v2574_v21, %v1989_v20  ;;  %v2026_v51 = vor.u32 %v2580_v46, %v2023_v47  ;;  %v2586_v57 = vld [vmem:[%s3932_s0 + $0xf4] sm:$0xf0]  ;;  %v2584_v58 = vld [vmem:[%s3932_s0 + $0xec] sm:$0xf]  ;;  %v2039_v59 = vld [vmem:[%s3932_s0 + $0xf8] sm:$0xf0] }
  0x1d   :  { %1555 = vmatpush.bf16.msra.mxu3 %v2708_v27  ;;  %v1994_v27 = vor.u32 %v2572_v22, %v1991_v23  ;;  %v2038_v62 = vor.u32 %v2586_v57, %v2037_v56  ;;  %v2042_v63 = vor.u32 %v2584_v58, %v2039_v59  ;;  %v2047_v4 = vld [vmem:[%s3932_s0 + $0x110] sm:$0xf0]  ;;  %v2053_v5 = vld [vmem:[%s3932_s0 + $0x108] sm:$0xf]  ;;  %v2590_v6 = vld [vmem:[%s3932_s0 + $0x114] sm:$0xf0] }
  0x1e   :  { %1049 = vmatpush.bf16.msra.mxu0 %v2683_v28  ;;  %v1997_v28 = vld [vmem:[%s3932_s0 + $0xa0] sm:$0xf]  ;;  %v2588_v7 = vld [vmem:[%s3932_s0 + $0x10c] sm:$0xf]  ;;  %v2055_v8 = vld [vmem:[%s3932_s0 + $0x118] sm:$0xf0] }
  0x1f   :  { %1218 = vmatpush.bf16.msra.mxu1 %v2691_v29  ;;  %v2577_v29 = vld [vmem:[%s3932_s0 + $0xac] sm:$0xf0]  ;;  %v2071_v32 = vld [vmem:[%s3932_s0 + $0x138] sm:$0xf0]  ;;  %v2077_v56 = vld [vmem:[%s3932_s0 + $0x140] sm:$0xf] }
  0x20   :  { %1387 = vmatpush.bf16.msra.mxu2 %v2699_v30  ;;  %v2575_v30 = vld [vmem:[%s3932_s0 + $0xa4] sm:$0xf]  ;;  %v1998_v36 = vor.u32 %v2577_v29, %v1997_v28  ;;  %v2063_v28 = vld [vmem:[%s3932_s0 + $0x130] sm:$0xf0]  ;;  %v2069_v29 = vld [vmem:[%s3932_s0 + $0x128] sm:$0xf] }
  0x21   :  { %1556 = vmatpush.bf16.msra.mxu3 %v2707_v31  ;;  %1050 = vmatmul.bf16.vlgmr.msra.gmra.mxu0 %v1918_v40  ;;  %v1999_v31 = vld [vmem:[%s3932_s0 + $0xb0] sm:$0xf0]  ;;  %v2013_v40 = vld [vmem:[%s3932_s0 + $0xc0] sm:$0xf]  ;;  %v2597_v57 = vld [vmem:[%s3932_s0 + $0x14c] sm:$0xf0] }
  0x22   :  { %1219 = vmatmul.bf16.vlgmr.msra.gmra.mxu1 %v1922_v41  ;;  %v2002_v37 = vor.u32 %v2575_v30, %v1999_v31  ;;  %v2581_v41 = vld [vmem:[%s3932_s0 + $0xcc] sm:$0xf0]  ;;  %v2594_v30 = vld [vmem:[%s3932_s0 + $0x134] sm:$0xf0]  ;;  %v2592_v31 = vld [vmem:[%s3932_s0 + $0x12c] sm:$0xf] }
  0x23   :  { %1388 = vmatmul.bf16.vlgmr.msra.gmra.mxu2 %v1926_v42  ;;  %v2579_v42 = vld [vmem:[%s3932_s0 + $0xc4] sm:$0xf]  ;;  %v2014_v48 = vor.u32 %v2581_v41, %v2013_v40 }
  0x24   :  { %1557 = vmatmul.bf16.vlgmr.msra.gmra.mxu3 %v1930_v43  ;;  %v2015_v43 = vld [vmem:[%s3932_s0 + $0xd0] sm:$0xf0]  ;;  %v2595_v58 = vld [vmem:[%s3932_s0 + $0x144] sm:$0xf] }
  0x25   :  { %v2018_v49 = vor.u32 %v2579_v42, %v2015_v43  ;;  %v2070_v42 = vor.u32 %v2594_v30, %v2069_v29  ;;  %v2074_v43 = vor.u32 %v2592_v31, %v2071_v32  ;;  %v2095_v29 = vld [vmem:[%s3932_s0 + $0x170] sm:$0xf0]  ;;  %v2101_v30 = vld [vmem:[%s3932_s0 + $0x168] sm:$0xf]  ;;  %v2602_v31 = vld [vmem:[%s3932_s0 + $0x174] sm:$0xf0] }
  0x26   :  { %v2600_v32 = vld [vmem:[%s3932_s0 + $0x16c] sm:$0xf] }
  0x31   :  { %1055 = vmatmul.bf16.gmra.mxu0 %v1934_v52  ;;  %v2029_v52 = vld [vmem:[%s3932_s0 + $0xe0] sm:$0xf] }
  0x32   :  { %1224 = vmatmul.bf16.gmra.mxu1 %v1938_v53  ;;  %v2585_v53 = vld [vmem:[%s3932_s0 + $0xec] sm:$0xf0] }
  0x33   :  { %1393 = vmatmul.bf16.gmra.mxu2 %v1942_v54  ;;  %v2583_v54 = vld [vmem:[%s3932_s0 + $0xe4] sm:$0xf]  ;;  %v2030_v60 = vor.u32 %v2585_v53, %v2029_v52 }
  0x34   :  { %1562 = vmatmul.bf16.gmra.mxu3 %v1946_v55  ;;  %v2031_v55 = vld [vmem:[%s3932_s0 + $0xf0] sm:$0xf0] }
  0x35   :  { %v2034_v61 = vor.u32 %v2583_v54, %v2031_v55 }
  0x41   :  { %1060 = vmatmul.bf16.gmra.mxu0 %v1950_v0  ;;  %v3029_v0 = vld [vmem:[%s3931_s2] ss:$0 sm:$0xff] }
  0x42   :  { %1229 = vmatmul.bf16.gmra.mxu1 %v1954_v1  ;;  %v2045_v1 = vld [vmem:[%s3932_s0 + $0x100] sm:$0xf] }
  0x43   :  { %1398 = vmatmul.bf16.gmra.mxu2 %v1958_v2  ;;  %v2589_v2 = vld [vmem:[%s3932_s0 + $0x10c] sm:$0xf0] }
  0x44   :  { %1567 = vmatmul.bf16.gmra.mxu3 %v1962_v3  ;;  %v2587_v3 = vld [vmem:[%s3932_s0 + $0x104] sm:$0xf]  ;;  %v2046_v9 = vor.u32 %v2589_v2, %v2045_v1  ;;  %v2087_v1 = vld [vmem:[%s3932_s0 + $0x158] sm:$0xf0] }
  0x45   :  { %v2050_v10 = vor.u32 %v2587_v3, %v2047_v4 }
  0x51   :  { %1065 = vmatmul.bf16.gmra.mxu0 %v1966_v12 }
  0x52   :  { %1234 = vmatmul.bf16.gmra.mxu1 %v1970_v13  ;;  %v2054_v13 = vor.u32 %v2590_v6, %v2053_v5  ;;  %v2078_v6 = vor.u32 %v2597_v57, %v2077_v56  ;;  %v2109_v57 = vld [vmem:[%s3932_s0 + $0x180] sm:$0xf] }
  0x53   :  { %1403 = vmatmul.bf16.gmra.mxu2 %v1974_v14  ;;  %v2058_v14 = vor.u32 %v2588_v7, %v2055_v8 }
  0x54   :  { %1572 = vmatmul.bf16.gmra.mxu3 %v1978_v15 }
  0x61   :  { %1070 = vmatmul.bf16.gmra.mxu0 %v1982_v24  ;;  %v2061_v24 = vld [vmem:[%s3932_s0 + $0x120] sm:$0xf] }
  0x62   :  { %1239 = vmatmul.bf16.gmra.mxu1 %v1986_v25  ;;  %v2593_v25 = vld [vmem:[%s3932_s0 + $0x12c] sm:$0xf0] }
  0x63   :  { %1408 = vmatmul.bf16.gmra.mxu2 %v1990_v26  ;;  %v2591_v26 = vld [vmem:[%s3932_s0 + $0x124] sm:$0xf] }
  0x64   :  { %1577 = vmatmul.bf16.gmra.mxu3 %v1994_v27 }
  0x71   :  { %1075 = vmatmul.bf16.gmra.mxu0 %v1998_v36 }
  0x72   :  { %1244 = vmatmul.bf16.gmra.mxu1 %v2002_v37  ;;  %v2062_v37 = vor.u32 %v2593_v25, %v2061_v24  ;;  %v2093_v25 = vld [vmem:[%s3932_s0 + $0x160] sm:$0xf] }
  0x73   :  { %1413 = vmatmul.bf16.gmra.mxu2 %v2006_v38  ;;  %v2066_v38 = vor.u32 %v2591_v26, %v2063_v28  ;;  %v2601_v26 = vld [vmem:[%s3932_s0 + $0x16c] sm:$0xf0] }
  0x74   :  { %1582 = vmatmul.bf16.gmra.mxu3 %v2010_v39 }
  0x81   :  { %1080 = vmatmul.bf16.gmra.mxu0 %v2014_v48 }
  0x82   :  { %1249 = vmatmul.bf16.gmra.mxu1 %v2018_v49 }
  0x83   :  { %1418 = vmatmul.bf16.gmra.mxu2 %v2022_v50 }
  0x84   :  { %1587 = vmatmul.bf16.gmra.mxu3 %v2026_v51 }
  0x91   :  { %1085 = vmatmul.bf16.gmra.mxu0 %v2030_v60  ;;  %v2079_v60 = vld [vmem:[%s3932_s0 + $0x150] sm:$0xf0] }
  0x92   :  { %1254 = vmatmul.bf16.gmra.mxu1 %v2034_v61  ;;  %v2085_v61 = vld [vmem:[%s3932_s0 + $0x148] sm:$0xf]  ;;  %v2082_v7 = vor.u32 %v2595_v58, %v2079_v60  ;;  %v2605_v58 = vld [vmem:[%s3932_s0 + $0x18c] sm:$0xf0] }
  0x93   :  { %1423 = vmatmul.bf16.gmra.mxu2 %v2038_v62  ;;  %v2598_v62 = vld [vmem:[%s3932_s0 + $0x154] sm:$0xf0] }
  0x94   :  { %1592 = vmatmul.bf16.gmra.mxu3 %v2042_v63  ;;  %v2596_v63 = vld [vmem:[%s3932_s0 + $0x14c] sm:$0xf] }
  0x9e   :  { %v1051_v11 = vpop.f32.mrf.mxu0 }
  0x9f   :  { %v1220_v12 = vpop.f32.mrf.mxu1  ;;  %v1052_v15 = vadd.f32 %v3029_v0, %v1051_v11  ;;  %v2086_v11 = vor.u32 %v2598_v62, %v2085_v61  ;;  %v2111_v61 = vld [vmem:[%s3932_s0 + $0x190] sm:$0xf0]  ;;  %v2117_v62 = vld [vmem:[%s3932_s0 + $0x188] sm:$0xf] }
  0xa1   :  { %1090 = vmatmul.bf16.gmra.mxu0 %v2046_v9  ;;  %v1221_v16 = vadd.f32 %v1220_v12, %v1052_v15  ;;  %v2090_v12 = vor.u32 %v2596_v63, %v2087_v1  ;;  %v2606_v63 = vld [vmem:[%s3932_s0 + $0x194] sm:$0xf0]  ;;  %v2604_v1 = vld [vmem:[%s3932_s0 + $0x18c] sm:$0xf] }
  0xa2   :  { %1259 = vmatmul.bf16.gmra.mxu1 %v2050_v10 }
  0xa3   :  { %1428 = vmatmul.bf16.gmra.mxu2 %v2054_v13 }
  0xa4   :  { %1597 = vmatmul.bf16.gmra.mxu3 %v2058_v14 }
  0xa6   :  { %v1389_v17 = vpop.f32.mrf.mxu2  ;;  %v1053_v20 = vpop.f32.mrf.mxu0 }
  0xa7   :  { %v1558_v18 = vpop.f32.mrf.mxu3  ;;  %v1390_v19 = vadd.f32 %v1389_v17, %v1221_v16  ;;  %v1222_v21 = vpop.f32.mrf.mxu1  ;;  %v1054_v23 = vadd.f32 %v3029_v0, %v1053_v20 }
  0xa9   :  { %v1559_v22 = vadd.f32 %v1558_v18, %v1390_v19  ;;  %v1223_v34 = vadd.f32 %v1222_v21, %v1054_v23 }
  0xab   :  { %v1718_v27 = vmax.f32 %v1559_v22, 0.0 }
  0xad   :  { %v1782_v33 = vpack.c.bf16 %v1718_v27, %v1718_v27  ;;  %v2599_v27 = vld [vmem:[%s3932_s0 + $0x164] sm:$0xf] }
  0xae   :  { %v1391_v35 = vpop.f32.mrf.mxu2  ;;  %v1056_v40 = vpop.f32.mrf.mxu0 }
  0xaf   :  { %v1560_v36 = vpop.f32.mrf.mxu3  ;;  %1847 = vst.msk [vmem:[%s3933_s3] sm:$0xf] %vm1846_vm0, %v1782_v33  ;;  %v1392_v39 = vadd.f32 %v1391_v35, %v1223_v34  ;;  %v1225_v41 = vpop.f32.mrf.mxu1  ;;  %v1057_v44 = vadd.f32 %v3029_v0, %v1056_v40  ;;  %v2103_v33 = vld [vmem:[%s3932_s0 + $0x178] sm:$0xf0] }
  0xb1   :  { %v1561_v45 = vadd.f32 %v1560_v36, %v1392_v39  ;;  %1095 = vmatmul.bf16.gmra.mxu0 %v2062_v37  ;;  %v1226_v47 = vadd.f32 %v1225_v41, %v1057_v44  ;;  %v2098_v39 = vor.u32 %v2599_v27, %v2095_v29  ;;  %v2106_v44 = vor.u32 %v2600_v32, %v2103_v33  ;;  %v2609_v27 = vld [vmem:[%s3932_s0 + $0x1ac] sm:$0xf0]  ;;  %v2610_v32 = vld [vmem:[%s3932_s0 + $0x1b4] sm:$0xf0]  ;;  %v2608_v33 = vld [vmem:[%s3932_s0 + $0x1ac] sm:$0xf] }
  0xb2   :  { %1264 = vmatmul.bf16.gmra.mxu1 %v2066_v38  ;;  %v2094_v38 = vor.u32 %v2601_v26, %v2093_v25  ;;  %v2125_v26 = vld [vmem:[%s3932_s0 + $0x1a0] sm:$0xf] }
  0xb3   :  { %v1719_v46 = vmax.f32 %v1561_v45, 0.0  ;;  %1433 = vmatmul.bf16.gmra.mxu2 %v2070_v42 }
  0xb4   :  { %1602 = vmatmul.bf16.gmra.mxu3 %v2074_v43  ;;  %v2102_v43 = vor.u32 %v2602_v31, %v2101_v30  ;;  %v2127_v30 = vld [vmem:[%s3932_s0 + $0x1b0] sm:$0xf0]  ;;  %v2133_v31 = vld [vmem:[%s3932_s0 + $0x1a8] sm:$0xf] }
  0xb5   :  { %v1783_v48 = vpack.c.bf16 %v1719_v46, %v1719_v46 }
  0xb6   :  { %v1394_v49 = vpop.f32.mrf.mxu2  ;;  %v1058_v52 = vpop.f32.mrf.mxu0 }
  0xb7   :  { %v1563_v50 = vpop.f32.mrf.mxu3  ;;  %1848 = vst.msk [vmem:[%s3933_s3 + $0x4] sm:$0xf] %vm1846_vm0, %v1783_v48  ;;  %v1395_v51 = vadd.f32 %v1394_v49, %v1226_v47  ;;  %v1227_v53 = vpop.f32.mrf.mxu1  ;;  %v1059_v55 = vadd.f32 %v3029_v0, %v1058_v52 }
  0xb9   :  { %v1564_v54 = vadd.f32 %v1563_v50, %v1395_v51  ;;  %v1228_v3 = vadd.f32 %v1227_v53, %v1059_v55 }
  0xbb   :  { %v1720_v59 = vmax.f32 %v1564_v54, 0.0 }
  0xbd   :  { %v1784_v2 = vpack.c.bf16 %v1720_v59, %v1720_v59  ;;  %v2603_v59 = vld [vmem:[%s3932_s0 + $0x184] sm:$0xf] }
  0xbe   :  { %v1396_v4 = vpop.f32.mrf.mxu2  ;;  %v1061_v9 = vpop.f32.mrf.mxu0 }
  0xbf   :  { %v1565_v5 = vpop.f32.mrf.mxu3  ;;  %1849 = vst.msk [vmem:[%s3933_s3 + $0x8] sm:$0xf] %vm1846_vm0, %v1784_v2  ;;  %v1397_v8 = vadd.f32 %v1396_v4, %v1228_v3  ;;  %v1230_v10 = vpop.f32.mrf.mxu1  ;;  %v1062_v13 = vadd.f32 %v3029_v0, %v1061_v9  ;;  %v2119_v2 = vld [vmem:[%s3932_s0 + $0x198] sm:$0xf0] }
  0xc1   :  { %v1566_v14 = vadd.f32 %v1565_v5, %v1397_v8  ;;  %1100 = vmatmul.bf16.gmra.mxu0 %v2078_v6  ;;  %v1231_v16 = vadd.f32 %v1230_v10, %v1062_v13  ;;  %v2114_v8 = vor.u32 %v2603_v59, %v2111_v61  ;;  %v2122_v13 = vor.u32 %v2604_v1, %v2119_v2  ;;  %v2613_v59 = vld [vmem:[%s3932_s0 + $0x1cc] sm:$0xf0]  ;;  %v2614_v1 = vld [vmem:[%s3932_s0 + $0x1d4] sm:$0xf0]  ;;  %v2612_v2 = vld [vmem:[%s3932_s0 + $0x1cc] sm:$0xf] }
  0xc2   :  { %1269 = vmatmul.bf16.gmra.mxu1 %v2082_v7  ;;  %v2110_v7 = vor.u32 %v2605_v58, %v2109_v57  ;;  %v2141_v58 = vld [vmem:[%s3932_s0 + $0x1c0] sm:$0xf] }
  0xc3   :  { %v1721_v15 = vmax.f32 %v1566_v14, 0.0  ;;  %1438 = vmatmul.bf16.gmra.mxu2 %v2086_v11 }
  0xc4   :  { %1607 = vmatmul.bf16.gmra.mxu3 %v2090_v12  ;;  %v2118_v12 = vor.u32 %v2606_v63, %v2117_v62  ;;  %v2143_v62 = vld [vmem:[%s3932_s0 + $0x1d0] sm:$0xf0]  ;;  %v2149_v63 = vld [vmem:[%s3932_s0 + $0x1c8] sm:$0xf] }
  0xc5   :  { %v1785_v17 = vpack.c.bf16 %v1721_v15, %v1721_v15 }
  0xc6   :  { %v1399_v18 = vpop.f32.mrf.mxu2  ;;  %v1063_v21 = vpop.f32.mrf.mxu0 }
  0xc7   :  { %v1568_v19 = vpop.f32.mrf.mxu3  ;;  %1850 = vst.msk [vmem:[%s3933_s3 + $0xc] sm:$0xf] %vm1846_vm0, %v1785_v17  ;;  %v1400_v20 = vadd.f32 %v1399_v18, %v1231_v16  ;;  %v1232_v22 = vpop.f32.mrf.mxu1  ;;  %v1064_v24 = vadd.f32 %v3029_v0, %v1063_v21 }
  0xc9   :  { %v1569_v23 = vadd.f32 %v1568_v19, %v1400_v20  ;;  %v1233_v35 = vadd.f32 %v1232_v22, %v1064_v24 }
  0xcb   :  { %v1722_v28 = vmax.f32 %v1569_v23, 0.0 }
  0xcd   :  { %v1786_v34 = vpack.c.bf16 %v1722_v28, %v1722_v28  ;;  %v2607_v28 = vld [vmem:[%s3932_s0 + $0x1a4] sm:$0xf] }
  0xce   :  { %v1401_v36 = vpop.f32.mrf.mxu2  ;;  %v1066_v41 = vpop.f32.mrf.mxu0 }
  0xcf   :  { %v1570_v37 = vpop.f32.mrf.mxu3  ;;  %1851 = vst.msk [vmem:[%s3933_s3 + $0x10] sm:$0xf] %vm1846_vm0, %v1786_v34  ;;  %v1402_v40 = vadd.f32 %v1401_v36, %v1233_v35  ;;  %v1235_v42 = vpop.f32.mrf.mxu1  ;;  %v1067_v45 = vadd.f32 %v3029_v0, %v1066_v41  ;;  %v2135_v34 = vld [vmem:[%s3932_s0 + $0x1b8] sm:$0xf0] }
  0xd1   :  { %v1571_v46 = vadd.f32 %v1570_v37, %v1402_v40  ;;  %1105 = vmatmul.bf16.gmra.mxu0 %v2094_v38  ;;  %v1236_v48 = vadd.f32 %v1235_v42, %v1067_v45  ;;  %v2130_v40 = vor.u32 %v2607_v28, %v2127_v30  ;;  %v2138_v45 = vor.u32 %v2608_v33, %v2135_v34  ;;  %v2617_v28 = vld [vmem:[%s3932_s0 + $0x1ec] sm:$0xf0]  ;;  %v2618_v33 = vld [vmem:[%s3932_s0 + $0x1f4] sm:$0xf0]  ;;  %v2616_v34 = vld [vmem:[%s3932_s0 + $0x1ec] sm:$0xf] }
  0xd2   :  { %1274 = vmatmul.bf16.gmra.mxu1 %v2098_v39  ;;  %v2126_v39 = vor.u32 %v2609_v27, %v2125_v26  ;;  %v2157_v27 = vld [vmem:[%s3932_s0 + $0x1e0] sm:$0xf] }
  0xd3   :  { %v1723_v47 = vmax.f32 %v1571_v46, 0.0  ;;  %1443 = vmatmul.bf16.gmra.mxu2 %v2102_v43 }
  0xd4   :  { %1612 = vmatmul.bf16.gmra.mxu3 %v2106_v44  ;;  %v2134_v44 = vor.u32 %v2610_v32, %v2133_v31  ;;  %v2159_v31 = vld [vmem:[%s3932_s0 + $0x1f0] sm:$0xf0]  ;;  %v2165_v32 = vld [vmem:[%s3932_s0 + $0x1e8] sm:$0xf] }
  0xd5   :  { %v1787_v49 = vpack.c.bf16 %v1723_v47, %v1723_v47 }
  0xd6   :  { %v1404_v50 = vpop.f32.mrf.mxu2  ;;  %v1068_v53 = vpop.f32.mrf.mxu0 }
  0xd7   :  { %v1573_v51 = vpop.f32.mrf.mxu3  ;;  %1852 = vst.msk [vmem:[%s3933_s3 + $0x14] sm:$0xf] %vm1846_vm0, %v1787_v49  ;;  %v1405_v52 = vadd.f32 %v1404_v50, %v1236_v48  ;;  %v1237_v54 = vpop.f32.mrf.mxu1  ;;  %v1069_v56 = vadd.f32 %v3029_v0, %v1068_v53 }
  0xd9   :  { %v1574_v55 = vadd.f32 %v1573_v51, %v1405_v52  ;;  %v1238_v4 = vadd.f32 %v1237_v54, %v1069_v56 }
  0xdb   :  { %v1724_v60 = vmax.f32 %v1574_v55, 0.0 }
  0xdd   :  { %v1788_v3 = vpack.c.bf16 %v1724_v60, %v1724_v60  ;;  %v2611_v60 = vld [vmem:[%s3932_s0 + $0x1c4] sm:$0xf] }
  0xde   :  { %v1406_v5 = vpop.f32.mrf.mxu2  ;;  %v1071_v10 = vpop.f32.mrf.mxu0 }
  0xdf   :  { %v1575_v6 = vpop.f32.mrf.mxu3  ;;  %1853 = vst.msk [vmem:[%s3933_s3 + $0x18] sm:$0xf] %vm1846_vm0, %v1788_v3  ;;  %v1407_v9 = vadd.f32 %v1406_v5, %v1238_v4  ;;  %v1240_v11 = vpop.f32.mrf.mxu1  ;;  %v1072_v14 = vadd.f32 %v3029_v0, %v1071_v10  ;;  %v2151_v3 = vld [vmem:[%s3932_s0 + $0x1d8] sm:$0xf0] }
  0xe1   :  { %v1576_v15 = vadd.f32 %v1575_v6, %v1407_v9  ;;  %1110 = vmatmul.bf16.gmra.mxu0 %v2110_v7  ;;  %v1241_v17 = vadd.f32 %v1240_v11, %v1072_v14  ;;  %v2146_v9 = vor.u32 %v2611_v60, %v2143_v62  ;;  %v2154_v14 = vor.u32 %v2612_v2, %v2151_v3  ;;  %v2621_v60 = vld [vmem:[%s3932_s0 + $0x20c] sm:$0xf0]  ;;  %v2622_v2 = vld [vmem:[%s3932_s0 + $0x214] sm:$0xf0]  ;;  %v2620_v3 = vld [vmem:[%s3932_s0 + $0x20c] sm:$0xf] }
  0xe2   :  { %1279 = vmatmul.bf16.gmra.mxu1 %v2114_v8  ;;  %v2142_v8 = vor.u32 %v2613_v59, %v2141_v58  ;;  %v2173_v59 = vld [vmem:[%s3932_s0 + $0x200] sm:$0xf] }
  0xe3   :  { %v1725_v16 = vmax.f32 %v1576_v15, 0.0  ;;  %1448 = vmatmul.bf16.gmra.mxu2 %v2118_v12 }
  0xe4   :  { %1617 = vmatmul.bf16.gmra.mxu3 %v2122_v13  ;;  %v2150_v13 = vor.u32 %v2614_v1, %v2149_v63  ;;  %v2175_v63 = vld [vmem:[%s3932_s0 + $0x210] sm:$0xf0]  ;;  %v2181_v1 = vld [vmem:[%s3932_s0 + $0x208] sm:$0xf] }
  0xe5   :  { %v1789_v18 = vpack.c.bf16 %v1725_v16, %v1725_v16 }
  0xe6   :  { %v1409_v19 = vpop.f32.mrf.mxu2  ;;  %v1073_v22 = vpop.f32.mrf.mxu0 }
  0xe7   :  { %v1578_v20 = vpop.f32.mrf.mxu3  ;;  %1854 = vst.msk [vmem:[%s3933_s3 + $0x1c] sm:$0xf] %vm1846_vm0, %v1789_v18  ;;  %v1410_v21 = vadd.f32 %v1409_v19, %v1241_v17  ;;  %v1242_v23 = vpop.f32.mrf.mxu1  ;;  %v1074_v25 = vadd.f32 %v3029_v0, %v1073_v22 }
  0xe9   :  { %v1579_v24 = vadd.f32 %v1578_v20, %v1410_v21  ;;  %v1243_v36 = vadd.f32 %v1242_v23, %v1074_v25 }
  0xeb   :  { %v1726_v29 = vmax.f32 %v1579_v24, 0.0 }
  0xed   :  { %v1790_v35 = vpack.c.bf16 %v1726_v29, %v1726_v29  ;;  %v2615_v29 = vld [vmem:[%s3932_s0 + $0x1e4] sm:$0xf] }
  0xee   :  { %v1411_v37 = vpop.f32.mrf.mxu2  ;;  %v1076_v42 = vpop.f32.mrf.mxu0 }
  0xef   :  { %v1580_v38 = vpop.f32.mrf.mxu3  ;;  %1855 = vst.msk [vmem:[%s3933_s3 + $0x20] sm:$0xf] %vm1846_vm0, %v1790_v35  ;;  %v1412_v41 = vadd.f32 %v1411_v37, %v1243_v36  ;;  %v1245_v43 = vpop.f32.mrf.mxu1  ;;  %v1077_v46 = vadd.f32 %v3029_v0, %v1076_v42  ;;  %v2167_v35 = vld [vmem:[%s3932_s0 + $0x1f8] sm:$0xf0] }
  0xf1   :  { %v1581_v47 = vadd.f32 %v1580_v38, %v1412_v41  ;;  %1115 = vmatmul.bf16.gmra.mxu0 %v2126_v39  ;;  %v1246_v49 = vadd.f32 %v1245_v43, %v1077_v46  ;;  %v2162_v41 = vor.u32 %v2615_v29, %v2159_v31  ;;  %v2170_v46 = vor.u32 %v2616_v34, %v2167_v35  ;;  %v2625_v29 = vld [vmem:[%s3932_s0 + $0x22c] sm:$0xf0]  ;;  %v2626_v34 = vld [vmem:[%s3932_s0 + $0x234] sm:$0xf0]  ;;  %v2624_v35 = vld [vmem:[%s3932_s0 + $0x22c] sm:$0xf] }
  0xf2   :  { %1284 = vmatmul.bf16.gmra.mxu1 %v2130_v40  ;;  %v2158_v40 = vor.u32 %v2617_v28, %v2157_v27  ;;  %v2189_v28 = vld [vmem:[%s3932_s0 + $0x220] sm:$0xf] }
  0xf3   :  { %v1727_v48 = vmax.f32 %v1581_v47, 0.0  ;;  %1453 = vmatmul.bf16.gmra.mxu2 %v2134_v44 }
  0xf4   :  { %1622 = vmatmul.bf16.gmra.mxu3 %v2138_v45  ;;  %v2166_v45 = vor.u32 %v2618_v33, %v2165_v32  ;;  %v2191_v32 = vld [vmem:[%s3932_s0 + $0x230] sm:$0xf0]  ;;  %v2197_v33 = vld [vmem:[%s3932_s0 + $0x228] sm:$0xf] }
  0xf5   :  { %v1791_v50 = vpack.c.bf16 %v1727_v48, %v1727_v48 }
  0xf6   :  { %v1414_v51 = vpop.f32.mrf.mxu2  ;;  %v1078_v54 = vpop.f32.mrf.mxu0 }
  0xf7   :  { %v1583_v52 = vpop.f32.mrf.mxu3  ;;  %1856 = vst.msk [vmem:[%s3933_s3 + $0x24] sm:$0xf] %vm1846_vm0, %v1791_v50  ;;  %v1415_v53 = vadd.f32 %v1414_v51, %v1246_v49  ;;  %v1247_v55 = vpop.f32.mrf.mxu1  ;;  %v1079_v57 = vadd.f32 %v3029_v0, %v1078_v54 }
  0xf9   :  { %v1584_v56 = vadd.f32 %v1583_v52, %v1415_v53  ;;  %v1248_v5 = vadd.f32 %v1247_v55, %v1079_v57 }
  0xfb   :  { %v1728_v61 = vmax.f32 %v1584_v56, 0.0 }
  0xfd   :  { %v1792_v4 = vpack.c.bf16 %v1728_v61, %v1728_v61  ;;  %v2619_v61 = vld [vmem:[%s3932_s0 + $0x204] sm:$0xf] }
  0xfe   :  { %v1416_v6 = vpop.f32.mrf.mxu2  ;;  %v1081_v11 = vpop.f32.mrf.mxu0 }
  0xff   :  { %v1585_v7 = vpop.f32.mrf.mxu3  ;;  %1857 = vst.msk [vmem:[%s3933_s3 + $0x28] sm:$0xf] %vm1846_vm0, %v1792_v4  ;;  %v1417_v10 = vadd.f32 %v1416_v6, %v1248_v5  ;;  %v1250_v12 = vpop.f32.mrf.mxu1  ;;  %v1082_v15 = vadd.f32 %v3029_v0, %v1081_v11  ;;  %v2183_v4 = vld [vmem:[%s3932_s0 + $0x218] sm:$0xf0] }
 0x101   :  { %v1586_v16 = vadd.f32 %v1585_v7, %v1417_v10  ;;  %1120 = vmatmul.bf16.gmra.mxu0 %v2142_v8  ;;  %v1251_v18 = vadd.f32 %v1250_v12, %v1082_v15  ;;  %v2178_v10 = vor.u32 %v2619_v61, %v2175_v63  ;;  %v2186_v15 = vor.u32 %v2620_v3, %v2183_v4  ;;  %v2629_v61 = vld [vmem:[%s3932_s0 + $0x24c] sm:$0xf0]  ;;  %v2630_v3 = vld [vmem:[%s3932_s0 + $0x254] sm:$0xf0]  ;;  %v2628_v4 = vld [vmem:[%s3932_s0 + $0x24c] sm:$0xf] }
 0x102   :  { %1289 = vmatmul.bf16.gmra.mxu1 %v2146_v9  ;;  %v2174_v9 = vor.u32 %v2621_v60, %v2173_v59  ;;  %v2205_v60 = vld [vmem:[%s3932_s0 + $0x240] sm:$0xf] }
 0x103   :  { %v1729_v17 = vmax.f32 %v1586_v16, 0.0  ;;  %1458 = vmatmul.bf16.gmra.mxu2 %v2150_v13 }
 0x104   :  { %1627 = vmatmul.bf16.gmra.mxu3 %v2154_v14  ;;  %v2182_v14 = vor.u32 %v2622_v2, %v2181_v1  ;;  %v2207_v1 = vld [vmem:[%s3932_s0 + $0x250] sm:$0xf0]  ;;  %v2213_v2 = vld [vmem:[%s3932_s0 + $0x248] sm:$0xf] }
 0x105   :  { %v1793_v19 = vpack.c.bf16 %v1729_v17, %v1729_v17 }
 0x106   :  { %v1419_v20 = vpop.f32.mrf.mxu2  ;;  %v1083_v23 = vpop.f32.mrf.mxu0 }
 0x107   :  { %v1588_v21 = vpop.f32.mrf.mxu3  ;;  %1858 = vst.msk [vmem:[%s3933_s3 + $0x2c] sm:$0xf] %vm1846_vm0, %v1793_v19  ;;  %v1420_v22 = vadd.f32 %v1419_v20, %v1251_v18  ;;  %v1252_v24 = vpop.f32.mrf.mxu1  ;;  %v1084_v26 = vadd.f32 %v3029_v0, %v1083_v23 }
 0x109   :  { %v1589_v25 = vadd.f32 %v1588_v21, %v1420_v22  ;;  %v1253_v37 = vadd.f32 %v1252_v24, %v1084_v26 }
 0x10b   :  { %v1730_v30 = vmax.f32 %v1589_v25, 0.0 }
 0x10d   :  { %v1794_v36 = vpack.c.bf16 %v1730_v30, %v1730_v30  ;;  %v2623_v30 = vld [vmem:[%s3932_s0 + $0x224] sm:$0xf] }
 0x10e   :  { %v1421_v38 = vpop.f32.mrf.mxu2  ;;  %v1086_v43 = vpop.f32.mrf.mxu0 }
 0x10f   :  { %v1590_v39 = vpop.f32.mrf.mxu3  ;;  %1859 = vst.msk [vmem:[%s3933_s3 + $0x30] sm:$0xf] %vm1846_vm0, %v1794_v36  ;;  %v1422_v42 = vadd.f32 %v1421_v38, %v1253_v37  ;;  %v1255_v44 = vpop.f32.mrf.mxu1  ;;  %v1087_v47 = vadd.f32 %v3029_v0, %v1086_v43  ;;  %v2199_v36 = vld [vmem:[%s3932_s0 + $0x238] sm:$0xf0] }
 0x111   :  { %v1591_v48 = vadd.f32 %v1590_v39, %v1422_v42  ;;  %1125 = vmatmul.bf16.gmra.mxu0 %v2158_v40  ;;  %v1256_v50 = vadd.f32 %v1255_v44, %v1087_v47  ;;  %v2194_v42 = vor.u32 %v2623_v30, %v2191_v32  ;;  %v2202_v47 = vor.u32 %v2624_v35, %v2199_v36  ;;  %v2633_v30 = vld [vmem:[%s3932_s0 + $0x26c] sm:$0xf0]  ;;  %v2634_v35 = vld [vmem:[%s3932_s0 + $0x274] sm:$0xf0]  ;;  %v2632_v36 = vld [vmem:[%s3932_s0 + $0x26c] sm:$0xf] }
 0x112   :  { %1294 = vmatmul.bf16.gmra.mxu1 %v2162_v41  ;;  %v2190_v41 = vor.u32 %v2625_v29, %v2189_v28  ;;  %v2221_v29 = vld [vmem:[%s3932_s0 + $0x260] sm:$0xf] }
 0x113   :  { %v1731_v49 = vmax.f32 %v1591_v48, 0.0  ;;  %1463 = vmatmul.bf16.gmra.mxu2 %v2166_v45 }
 0x114   :  { %1632 = vmatmul.bf16.gmra.mxu3 %v2170_v46  ;;  %v2198_v46 = vor.u32 %v2626_v34, %v2197_v33  ;;  %v2223_v33 = vld [vmem:[%s3932_s0 + $0x270] sm:$0xf0]  ;;  %v2229_v34 = vld [vmem:[%s3932_s0 + $0x268] sm:$0xf] }
 0x115   :  { %v1795_v51 = vpack.c.bf16 %v1731_v49, %v1731_v49 }
 0x116   :  { %v1424_v52 = vpop.f32.mrf.mxu2  ;;  %v1088_v55 = vpop.f32.mrf.mxu0 }
 0x117   :  { %v1593_v53 = vpop.f32.mrf.mxu3  ;;  %1860 = vst.msk [vmem:[%s3933_s3 + $0x34] sm:$0xf] %vm1846_vm0, %v1795_v51  ;;  %v1425_v54 = vadd.f32 %v1424_v52, %v1256_v50  ;;  %v1257_v56 = vpop.f32.mrf.mxu1  ;;  %v1089_v58 = vadd.f32 %v3029_v0, %v1088_v55 }
 0x119   :  { %v1594_v57 = vadd.f32 %v1593_v53, %v1425_v54  ;;  %v1258_v6 = vadd.f32 %v1257_v56, %v1089_v58 }
 0x11b   :  { %v1732_v62 = vmax.f32 %v1594_v57, 0.0 }
 0x11d   :  { %v1796_v5 = vpack.c.bf16 %v1732_v62, %v1732_v62  ;;  %v2627_v62 = vld [vmem:[%s3932_s0 + $0x244] sm:$0xf] }
 0x11e   :  { %v1426_v7 = vpop.f32.mrf.mxu2  ;;  %v1091_v12 = vpop.f32.mrf.mxu0 }
 0x11f   :  { %v1595_v8 = vpop.f32.mrf.mxu3  ;;  %1861 = vst.msk [vmem:[%s3933_s3 + $0x38] sm:$0xf] %vm1846_vm0, %v1796_v5  ;;  %v1427_v11 = vadd.f32 %v1426_v7, %v1258_v6  ;;  %v1260_v13 = vpop.f32.mrf.mxu1  ;;  %v1092_v16 = vadd.f32 %v3029_v0, %v1091_v12  ;;  %v2215_v5 = vld [vmem:[%s3932_s0 + $0x258] sm:$0xf0] }
 0x121   :  { %v1596_v17 = vadd.f32 %v1595_v8, %v1427_v11  ;;  %1130 = vmatmul.bf16.gmra.mxu0 %v2174_v9  ;;  %v1261_v19 = vadd.f32 %v1260_v13, %v1092_v16  ;;  %v2210_v11 = vor.u32 %v2627_v62, %v2207_v1  ;;  %v2218_v16 = vor.u32 %v2628_v4, %v2215_v5  ;;  %v2637_v62 = vld [vmem:[%s3932_s0 + $0x28c] sm:$0xf0]  ;;  %v2638_v4 = vld [vmem:[%s3932_s0 + $0x294] sm:$0xf0]  ;;  %v2636_v5 = vld [vmem:[%s3932_s0 + $0x28c] sm:$0xf] }
 0x122   :  { %1299 = vmatmul.bf16.gmra.mxu1 %v2178_v10  ;;  %v2206_v10 = vor.u32 %v2629_v61, %v2205_v60  ;;  %v2237_v61 = vld [vmem:[%s3932_s0 + $0x280] sm:$0xf] }
 0x123   :  { %v1733_v18 = vmax.f32 %v1596_v17, 0.0  ;;  %1468 = vmatmul.bf16.gmra.mxu2 %v2182_v14 }
 0x124   :  { %1637 = vmatmul.bf16.gmra.mxu3 %v2186_v15  ;;  %v2214_v15 = vor.u32 %v2630_v3, %v2213_v2  ;;  %v2239_v2 = vld [vmem:[%s3932_s0 + $0x290] sm:$0xf0]  ;;  %v2245_v3 = vld [vmem:[%s3932_s0 + $0x288] sm:$0xf] }
 0x125   :  { %v1797_v20 = vpack.c.bf16 %v1733_v18, %v1733_v18 }
 0x126   :  { %v1429_v21 = vpop.f32.mrf.mxu2  ;;  %v1093_v24 = vpop.f32.mrf.mxu0 }
 0x127   :  { %v1598_v22 = vpop.f32.mrf.mxu3  ;;  %1862 = vst.msk [vmem:[%s3933_s3 + $0x3c] sm:$0xf] %vm1846_vm0, %v1797_v20  ;;  %v1430_v23 = vadd.f32 %v1429_v21, %v1261_v19  ;;  %v1262_v25 = vpop.f32.mrf.mxu1  ;;  %v1094_v27 = vadd.f32 %v3029_v0, %v1093_v24 }
 0x129   :  { %v1599_v26 = vadd.f32 %v1598_v22, %v1430_v23  ;;  %v1263_v38 = vadd.f32 %v1262_v25, %v1094_v27 }
 0x12b   :  { %v1734_v31 = vmax.f32 %v1599_v26, 0.0 }
 0x12d   :  { %v1798_v37 = vpack.c.bf16 %v1734_v31, %v1734_v31  ;;  %v2631_v31 = vld [vmem:[%s3932_s0 + $0x264] sm:$0xf] }
 0x12e   :  { %v1431_v39 = vpop.f32.mrf.mxu2  ;;  %v1096_v44 = vpop.f32.mrf.mxu0 }
 0x12f   :  { %v1600_v40 = vpop.f32.mrf.mxu3  ;;  %1863 = vst.msk [vmem:[%s3933_s3 + $0x40] sm:$0xf] %vm1846_vm0, %v1798_v37  ;;  %v1432_v43 = vadd.f32 %v1431_v39, %v1263_v38  ;;  %v1265_v45 = vpop.f32.mrf.mxu1  ;;  %v1097_v48 = vadd.f32 %v3029_v0, %v1096_v44  ;;  %v2231_v37 = vld [vmem:[%s3932_s0 + $0x278] sm:$0xf0] }
 0x131   :  { %v1601_v49 = vadd.f32 %v1600_v40, %v1432_v43  ;;  %1135 = vmatmul.bf16.gmra.mxu0 %v2190_v41  ;;  %v1266_v51 = vadd.f32 %v1265_v45, %v1097_v48  ;;  %v2226_v43 = vor.u32 %v2631_v31, %v2223_v33  ;;  %v2234_v48 = vor.u32 %v2632_v36, %v2231_v37  ;;  %v2641_v31 = vld [vmem:[%s3932_s0 + $0x2ac] sm:$0xf0]  ;;  %v2642_v36 = vld [vmem:[%s3932_s0 + $0x2b4] sm:$0xf0]  ;;  %v2640_v37 = vld [vmem:[%s3932_s0 + $0x2ac] sm:$0xf] }
 0x132   :  { %1304 = vmatmul.bf16.gmra.mxu1 %v2194_v42  ;;  %v2222_v42 = vor.u32 %v2633_v30, %v2221_v29  ;;  %v2253_v30 = vld [vmem:[%s3932_s0 + $0x2a0] sm:$0xf] }
 0x133   :  { %v1735_v50 = vmax.f32 %v1601_v49, 0.0  ;;  %1473 = vmatmul.bf16.gmra.mxu2 %v2198_v46 }
 0x134   :  { %1642 = vmatmul.bf16.gmra.mxu3 %v2202_v47  ;;  %v2230_v47 = vor.u32 %v2634_v35, %v2229_v34  ;;  %v2255_v34 = vld [vmem:[%s3932_s0 + $0x2b0] sm:$0xf0]  ;;  %v2261_v35 = vld [vmem:[%s3932_s0 + $0x2a8] sm:$0xf] }
 0x135   :  { %v1799_v52 = vpack.c.bf16 %v1735_v50, %v1735_v50 }
 0x136   :  { %v1434_v53 = vpop.f32.mrf.mxu2  ;;  %v1098_v56 = vpop.f32.mrf.mxu0 }
 0x137   :  { %v1603_v54 = vpop.f32.mrf.mxu3  ;;  %1864 = vst.msk [vmem:[%s3933_s3 + $0x44] sm:$0xf] %vm1846_vm0, %v1799_v52  ;;  %v1435_v55 = vadd.f32 %v1434_v53, %v1266_v51  ;;  %v1267_v57 = vpop.f32.mrf.mxu1  ;;  %v1099_v59 = vadd.f32 %v3029_v0, %v1098_v56 }
 0x139   :  { %v1604_v58 = vadd.f32 %v1603_v54, %v1435_v55  ;;  %v1268_v7 = vadd.f32 %v1267_v57, %v1099_v59 }
 0x13b   :  { %v1736_v63 = vmax.f32 %v1604_v58, 0.0 }
 0x13d   :  { %v1800_v6 = vpack.c.bf16 %v1736_v63, %v1736_v63  ;;  %v2635_v63 = vld [vmem:[%s3932_s0 + $0x284] sm:$0xf] }
 0x13e   :  { %v1436_v8 = vpop.f32.mrf.mxu2  ;;  %v1101_v13 = vpop.f32.mrf.mxu0 }
 0x13f   :  { %v1605_v9 = vpop.f32.mrf.mxu3  ;;  %1865 = vst.msk [vmem:[%s3933_s3 + $0x48] sm:$0xf] %vm1846_vm0, %v1800_v6  ;;  %v1437_v12 = vadd.f32 %v1436_v8, %v1268_v7  ;;  %v1270_v14 = vpop.f32.mrf.mxu1  ;;  %v1102_v17 = vadd.f32 %v3029_v0, %v1101_v13  ;;  %v2247_v6 = vld [vmem:[%s3932_s0 + $0x298] sm:$0xf0] }
 0x141   :  { %v1606_v18 = vadd.f32 %v1605_v9, %v1437_v12  ;;  %1140 = vmatmul.bf16.gmra.mxu0 %v2206_v10  ;;  %v1271_v20 = vadd.f32 %v1270_v14, %v1102_v17  ;;  %v2242_v12 = vor.u32 %v2635_v63, %v2239_v2  ;;  %v2250_v17 = vor.u32 %v2636_v5, %v2247_v6  ;;  %v2645_v63 = vld [vmem:[%s3932_s0 + $0x2cc] sm:$0xf0]  ;;  %v2646_v5 = vld [vmem:[%s3932_s0 + $0x2d4] sm:$0xf0]  ;;  %v2644_v6 = vld [vmem:[%s3932_s0 + $0x2cc] sm:$0xf] }
 0x142   :  { %1309 = vmatmul.bf16.gmra.mxu1 %v2210_v11  ;;  %v2238_v11 = vor.u32 %v2637_v62, %v2237_v61  ;;  %v2269_v62 = vld [vmem:[%s3932_s0 + $0x2c0] sm:$0xf] }
 0x143   :  { %v1737_v19 = vmax.f32 %v1606_v18, 0.0  ;;  %1478 = vmatmul.bf16.gmra.mxu2 %v2214_v15 }
 0x144   :  { %1647 = vmatmul.bf16.gmra.mxu3 %v2218_v16  ;;  %v2246_v16 = vor.u32 %v2638_v4, %v2245_v3  ;;  %v2271_v3 = vld [vmem:[%s3932_s0 + $0x2d0] sm:$0xf0]  ;;  %v2277_v4 = vld [vmem:[%s3932_s0 + $0x2c8] sm:$0xf] }
 0x145   :  { %v1801_v21 = vpack.c.bf16 %v1737_v19, %v1737_v19 }
 0x146   :  { %v1439_v22 = vpop.f32.mrf.mxu2  ;;  %v1103_v25 = vpop.f32.mrf.mxu0 }
 0x147   :  { %v1608_v23 = vpop.f32.mrf.mxu3  ;;  %1866 = vst.msk [vmem:[%s3933_s3 + $0x4c] sm:$0xf] %vm1846_vm0, %v1801_v21  ;;  %v1440_v24 = vadd.f32 %v1439_v22, %v1271_v20  ;;  %v1272_v26 = vpop.f32.mrf.mxu1  ;;  %v1104_v28 = vadd.f32 %v3029_v0, %v1103_v25 }
 0x149   :  { %v1609_v27 = vadd.f32 %v1608_v23, %v1440_v24  ;;  %v1273_v39 = vadd.f32 %v1272_v26, %v1104_v28 }
 0x14b   :  { %v1738_v32 = vmax.f32 %v1609_v27, 0.0 }
 0x14d   :  { %v1802_v38 = vpack.c.bf16 %v1738_v32, %v1738_v32  ;;  %v2639_v32 = vld [vmem:[%s3932_s0 + $0x2a4] sm:$0xf] }
 0x14e   :  { %v1441_v40 = vpop.f32.mrf.mxu2  ;;  %v1106_v45 = vpop.f32.mrf.mxu0 }
 0x14f   :  { %v1610_v41 = vpop.f32.mrf.mxu3  ;;  %1867 = vst.msk [vmem:[%s3933_s3 + $0x50] sm:$0xf] %vm1846_vm0, %v1802_v38  ;;  %v1442_v44 = vadd.f32 %v1441_v40, %v1273_v39  ;;  %v1275_v46 = vpop.f32.mrf.mxu1  ;;  %v1107_v49 = vadd.f32 %v3029_v0, %v1106_v45  ;;  %v2263_v38 = vld [vmem:[%s3932_s0 + $0x2b8] sm:$0xf0] }
 0x151   :  { %v1611_v50 = vadd.f32 %v1610_v41, %v1442_v44  ;;  %1145 = vmatmul.bf16.gmra.mxu0 %v2222_v42  ;;  %v1276_v52 = vadd.f32 %v1275_v46, %v1107_v49  ;;  %v2258_v44 = vor.u32 %v2639_v32, %v2255_v34  ;;  %v2266_v49 = vor.u32 %v2640_v37, %v2263_v38  ;;  %v2649_v32 = vld [vmem:[%s3932_s0 + $0x2ec] sm:$0xf0]  ;;  %v2650_v37 = vld [vmem:[%s3932_s0 + $0x2f4] sm:$0xf0]  ;;  %v2648_v38 = vld [vmem:[%s3932_s0 + $0x2ec] sm:$0xf] }
 0x152   :  { %1314 = vmatmul.bf16.gmra.mxu1 %v2226_v43  ;;  %v2254_v43 = vor.u32 %v2641_v31, %v2253_v30  ;;  %v2285_v31 = vld [vmem:[%s3932_s0 + $0x2e0] sm:$0xf] }
 0x153   :  { %v1739_v51 = vmax.f32 %v1611_v50, 0.0  ;;  %1483 = vmatmul.bf16.gmra.mxu2 %v2230_v47 }
 0x154   :  { %1652 = vmatmul.bf16.gmra.mxu3 %v2234_v48  ;;  %v2262_v48 = vor.u32 %v2642_v36, %v2261_v35  ;;  %v2287_v35 = vld [vmem:[%s3932_s0 + $0x2f0] sm:$0xf0]  ;;  %v2293_v36 = vld [vmem:[%s3932_s0 + $0x2e8] sm:$0xf] }
 0x155   :  { %v1803_v53 = vpack.c.bf16 %v1739_v51, %v1739_v51 }
 0x156   :  { %v1444_v54 = vpop.f32.mrf.mxu2  ;;  %v1108_v57 = vpop.f32.mrf.mxu0 }
 0x157   :  { %v1613_v55 = vpop.f32.mrf.mxu3  ;;  %1868 = vst.msk [vmem:[%s3933_s3 + $0x54] sm:$0xf] %vm1846_vm0, %v1803_v53  ;;  %v1445_v56 = vadd.f32 %v1444_v54, %v1276_v52  ;;  %v1277_v58 = vpop.f32.mrf.mxu1  ;;  %v1109_v60 = vadd.f32 %v3029_v0, %v1108_v57 }
 0x159   :  { %v1614_v59 = vadd.f32 %v1613_v55, %v1445_v56  ;;  %v1278_v8 = vadd.f32 %v1277_v58, %v1109_v60 }
 0x15b   :  { %v1740_v1 = vmax.f32 %v1614_v59, 0.0 }
 0x15d   :  { %v1804_v7 = vpack.c.bf16 %v1740_v1, %v1740_v1  ;;  %v2643_v1 = vld [vmem:[%s3932_s0 + $0x2c4] sm:$0xf] }
 0x15e   :  { %v1446_v9 = vpop.f32.mrf.mxu2  ;;  %v1111_v14 = vpop.f32.mrf.mxu0 }
 0x15f   :  { %v1615_v10 = vpop.f32.mrf.mxu3  ;;  %1869 = vst.msk [vmem:[%s3933_s3 + $0x58] sm:$0xf] %vm1846_vm0, %v1804_v7  ;;  %v1447_v13 = vadd.f32 %v1446_v9, %v1278_v8  ;;  %v1280_v15 = vpop.f32.mrf.mxu1  ;;  %v1112_v18 = vadd.f32 %v3029_v0, %v1111_v14  ;;  %v2279_v7 = vld [vmem:[%s3932_s0 + $0x2d8] sm:$0xf0] }
 0x161   :  { %v1616_v19 = vadd.f32 %v1615_v10, %v1447_v13  ;;  %1150 = vmatmul.bf16.gmra.mxu0 %v2238_v11  ;;  %v1281_v21 = vadd.f32 %v1280_v15, %v1112_v18  ;;  %v2274_v13 = vor.u32 %v2643_v1, %v2271_v3  ;;  %v2282_v18 = vor.u32 %v2644_v6, %v2279_v7  ;;  %v2653_v1 = vld [vmem:[%s3932_s0 + $0x30c] sm:$0xf0]  ;;  %v2654_v6 = vld [vmem:[%s3932_s0 + $0x314] sm:$0xf0]  ;;  %v2652_v7 = vld [vmem:[%s3932_s0 + $0x30c] sm:$0xf] }
 0x162   :  { %1319 = vmatmul.bf16.gmra.mxu1 %v2242_v12  ;;  %v2270_v12 = vor.u32 %v2645_v63, %v2269_v62  ;;  %v2301_v63 = vld [vmem:[%s3932_s0 + $0x300] sm:$0xf] }
 0x163   :  { %v1741_v20 = vmax.f32 %v1616_v19, 0.0  ;;  %1488 = vmatmul.bf16.gmra.mxu2 %v2246_v16 }
 0x164   :  { %1657 = vmatmul.bf16.gmra.mxu3 %v2250_v17  ;;  %v2278_v17 = vor.u32 %v2646_v5, %v2277_v4  ;;  %v2303_v4 = vld [vmem:[%s3932_s0 + $0x310] sm:$0xf0]  ;;  %v2309_v5 = vld [vmem:[%s3932_s0 + $0x308] sm:$0xf] }
 0x165   :  { %v1805_v22 = vpack.c.bf16 %v1741_v20, %v1741_v20 }
 0x166   :  { %v1449_v23 = vpop.f32.mrf.mxu2  ;;  %v1113_v26 = vpop.f32.mrf.mxu0 }
 0x167   :  { %v1618_v24 = vpop.f32.mrf.mxu3  ;;  %1870 = vst.msk [vmem:[%s3933_s3 + $0x5c] sm:$0xf] %vm1846_vm0, %v1805_v22  ;;  %v1450_v25 = vadd.f32 %v1449_v23, %v1281_v21  ;;  %v1282_v27 = vpop.f32.mrf.mxu1  ;;  %v1114_v29 = vadd.f32 %v3029_v0, %v1113_v26 }
 0x169   :  { %v1619_v28 = vadd.f32 %v1618_v24, %v1450_v25  ;;  %v1283_v40 = vadd.f32 %v1282_v27, %v1114_v29 }
 0x16b   :  { %v1742_v33 = vmax.f32 %v1619_v28, 0.0 }
 0x16d   :  { %v1806_v39 = vpack.c.bf16 %v1742_v33, %v1742_v33  ;;  %v2647_v33 = vld [vmem:[%s3932_s0 + $0x2e4] sm:$0xf] }
 0x16e   :  { %v1451_v41 = vpop.f32.mrf.mxu2  ;;  %v1116_v46 = vpop.f32.mrf.mxu0 }
 0x16f   :  { %v1620_v42 = vpop.f32.mrf.mxu3  ;;  %1871 = vst.msk [vmem:[%s3933_s3 + $0x60] sm:$0xf] %vm1846_vm0, %v1806_v39  ;;  %v1452_v45 = vadd.f32 %v1451_v41, %v1283_v40  ;;  %v1285_v47 = vpop.f32.mrf.mxu1  ;;  %v1117_v50 = vadd.f32 %v3029_v0, %v1116_v46  ;;  %v3501_v0 = vld [vmem:[%s3931_s2] ss:$0 sm:$0xff]  ;;  %v2295_v39 = vld [vmem:[%s3932_s0 + $0x2f8] sm:$0xf0] }
 0x171   :  { %v1621_v51 = vadd.f32 %v1620_v42, %v1452_v45  ;;  %1155 = vmatmul.bf16.gmra.mxu0 %v2254_v43  ;;  %v1286_v53 = vadd.f32 %v1285_v47, %v1117_v50  ;;  %v2290_v45 = vor.u32 %v2647_v33, %v2287_v35  ;;  %v2298_v50 = vor.u32 %v2648_v38, %v2295_v39  ;;  %v2657_v33 = vld [vmem:[%s3932_s0 + $0x32c] sm:$0xf0]  ;;  %v2658_v38 = vld [vmem:[%s3932_s0 + $0x334] sm:$0xf0]  ;;  %v2656_v39 = vld [vmem:[%s3932_s0 + $0x32c] sm:$0xf] }
 0x172   :  { %1324 = vmatmul.bf16.gmra.mxu1 %v2258_v44  ;;  %v2286_v44 = vor.u32 %v2649_v32, %v2285_v31  ;;  %v2317_v32 = vld [vmem:[%s3932_s0 + $0x320] sm:$0xf] }
 0x173   :  { %v1743_v52 = vmax.f32 %v1621_v51, 0.0  ;;  %1493 = vmatmul.bf16.gmra.mxu2 %v2262_v48 }
 0x174   :  { %1662 = vmatmul.bf16.gmra.mxu3 %v2266_v49  ;;  %v2294_v49 = vor.u32 %v2650_v37, %v2293_v36  ;;  %v2319_v36 = vld [vmem:[%s3932_s0 + $0x330] sm:$0xf0]  ;;  %v2325_v37 = vld [vmem:[%s3932_s0 + $0x328] sm:$0xf] }
 0x175   :  { %v1807_v54 = vpack.c.bf16 %v1743_v52, %v1743_v52 }
 0x176   :  { %v1454_v55 = vpop.f32.mrf.mxu2  ;;  %v1118_v58 = vpop.f32.mrf.mxu0 }
 0x177   :  { %v1623_v56 = vpop.f32.mrf.mxu3  ;;  %1872 = vst.msk [vmem:[%s3933_s3 + $0x64] sm:$0xf] %vm1846_vm0, %v1807_v54  ;;  %v1455_v57 = vadd.f32 %v1454_v55, %v1286_v53  ;;  %v1287_v59 = vpop.f32.mrf.mxu1  ;;  %v1119_v61 = vadd.f32 %v3501_v0, %v1118_v58 }
 0x179   :  { %v1624_v60 = vadd.f32 %v1623_v56, %v1455_v57  ;;  %v1288_v9 = vadd.f32 %v1287_v59, %v1119_v61 }
 0x17b   :  { %v1744_v2 = vmax.f32 %v1624_v60, 0.0 }
 0x17d   :  { %v1808_v8 = vpack.c.bf16 %v1744_v2, %v1744_v2  ;;  %v2651_v2 = vld [vmem:[%s3932_s0 + $0x304] sm:$0xf] }
 0x17e   :  { %v1456_v10 = vpop.f32.mrf.mxu2  ;;  %v1121_v15 = vpop.f32.mrf.mxu0 }
 0x17f   :  { %v1625_v11 = vpop.f32.mrf.mxu3  ;;  %1873 = vst.msk [vmem:[%s3933_s3 + $0x68] sm:$0xf] %vm1846_vm0, %v1808_v8  ;;  %v1457_v14 = vadd.f32 %v1456_v10, %v1288_v9  ;;  %v1290_v16 = vpop.f32.mrf.mxu1  ;;  %v1122_v19 = vadd.f32 %v3501_v0, %v1121_v15  ;;  %v2311_v8 = vld [vmem:[%s3932_s0 + $0x318] sm:$0xf0] }
 0x181   :  { %v1626_v20 = vadd.f32 %v1625_v11, %v1457_v14  ;;  %1160 = vmatmul.bf16.gmra.mxu0 %v2270_v12  ;;  %v1291_v22 = vadd.f32 %v1290_v16, %v1122_v19  ;;  %v2306_v14 = vor.u32 %v2651_v2, %v2303_v4  ;;  %v2314_v19 = vor.u32 %v2652_v7, %v2311_v8  ;;  %v2661_v2 = vld [vmem:[%s3932_s0 + $0x34c] sm:$0xf0]  ;;  %v2662_v7 = vld [vmem:[%s3932_s0 + $0x354] sm:$0xf0]  ;;  %v2660_v8 = vld [vmem:[%s3932_s0 + $0x34c] sm:$0xf] }
 0x182   :  { %1329 = vmatmul.bf16.gmra.mxu1 %v2274_v13  ;;  %v2302_v13 = vor.u32 %v2653_v1, %v2301_v63  ;;  %v2333_v1 = vld [vmem:[%s3932_s0 + $0x340] sm:$0xf] }
 0x183   :  { %v1745_v21 = vmax.f32 %v1626_v20, 0.0  ;;  %1498 = vmatmul.bf16.gmra.mxu2 %v2278_v17 }
 0x184   :  { %1667 = vmatmul.bf16.gmra.mxu3 %v2282_v18  ;;  %v2310_v18 = vor.u32 %v2654_v6, %v2309_v5  ;;  %v2335_v5 = vld [vmem:[%s3932_s0 + $0x350] sm:$0xf0]  ;;  %v2341_v6 = vld [vmem:[%s3932_s0 + $0x348] sm:$0xf] }
 0x185   :  { %v1809_v23 = vpack.c.bf16 %v1745_v21, %v1745_v21 }
 0x186   :  { %v1459_v24 = vpop.f32.mrf.mxu2  ;;  %v1123_v27 = vpop.f32.mrf.mxu0 }
 0x187   :  { %v1628_v25 = vpop.f32.mrf.mxu3  ;;  %1874 = vst.msk [vmem:[%s3933_s3 + $0x6c] sm:$0xf] %vm1846_vm0, %v1809_v23  ;;  %v1460_v26 = vadd.f32 %v1459_v24, %v1291_v22  ;;  %v1292_v28 = vpop.f32.mrf.mxu1  ;;  %v1124_v30 = vadd.f32 %v3501_v0, %v1123_v27 }
 0x189   :  { %v1629_v29 = vadd.f32 %v1628_v25, %v1460_v26  ;;  %v1293_v41 = vadd.f32 %v1292_v28, %v1124_v30 }
 0x18b   :  { %v1746_v34 = vmax.f32 %v1629_v29, 0.0 }
 0x18d   :  { %v1810_v40 = vpack.c.bf16 %v1746_v34, %v1746_v34  ;;  %v2655_v34 = vld [vmem:[%s3932_s0 + $0x324] sm:$0xf] }
 0x18e   :  { %v1461_v42 = vpop.f32.mrf.mxu2  ;;  %v1126_v47 = vpop.f32.mrf.mxu0 }
 0x18f   :  { %v1630_v43 = vpop.f32.mrf.mxu3  ;;  %1875 = vst.msk [vmem:[%s3933_s3 + $0x70] sm:$0xf] %vm1846_vm0, %v1810_v40  ;;  %v1462_v46 = vadd.f32 %v1461_v42, %v1293_v41  ;;  %v1295_v48 = vpop.f32.mrf.mxu1  ;;  %v1127_v51 = vadd.f32 %v3501_v0, %v1126_v47  ;;  %v2327_v40 = vld [vmem:[%s3932_s0 + $0x338] sm:$0xf0] }
 0x191   :  { %v1631_v52 = vadd.f32 %v1630_v43, %v1462_v46  ;;  %1165 = vmatmul.bf16.gmra.mxu0 %v2286_v44  ;;  %v1296_v54 = vadd.f32 %v1295_v48, %v1127_v51  ;;  %v2322_v46 = vor.u32 %v2655_v34, %v2319_v36  ;;  %v2330_v51 = vor.u32 %v2656_v39, %v2327_v40  ;;  %v2665_v34 = vld [vmem:[%s3932_s0 + $0x36c] sm:$0xf0]  ;;  %v2666_v39 = vld [vmem:[%s3932_s0 + $0x374] sm:$0xf0]  ;;  %v2664_v40 = vld [vmem:[%s3932_s0 + $0x36c] sm:$0xf] }
 0x192   :  { %1334 = vmatmul.bf16.gmra.mxu1 %v2290_v45  ;;  %v2318_v45 = vor.u32 %v2657_v33, %v2317_v32  ;;  %v2349_v33 = vld [vmem:[%s3932_s0 + $0x360] sm:$0xf] }
 0x193   :  { %v1747_v53 = vmax.f32 %v1631_v52, 0.0  ;;  %1503 = vmatmul.bf16.gmra.mxu2 %v2294_v49 }
 0x194   :  { %1672 = vmatmul.bf16.gmra.mxu3 %v2298_v50  ;;  %v2326_v50 = vor.u32 %v2658_v38, %v2325_v37  ;;  %v2351_v37 = vld [vmem:[%s3932_s0 + $0x370] sm:$0xf0]  ;;  %v2357_v38 = vld [vmem:[%s3932_s0 + $0x368] sm:$0xf] }
 0x195   :  { %v1811_v55 = vpack.c.bf16 %v1747_v53, %v1747_v53 }
 0x196   :  { %v1464_v56 = vpop.f32.mrf.mxu2  ;;  %v1128_v59 = vpop.f32.mrf.mxu0 }
 0x197   :  { %v1633_v57 = vpop.f32.mrf.mxu3  ;;  %1876 = vst.msk [vmem:[%s3933_s3 + $0x74] sm:$0xf] %vm1846_vm0, %v1811_v55  ;;  %v1465_v58 = vadd.f32 %v1464_v56, %v1296_v54  ;;  %v1297_v60 = vpop.f32.mrf.mxu1  ;;  %v1129_v62 = vadd.f32 %v3501_v0, %v1128_v59 }
 0x199   :  { %v1634_v61 = vadd.f32 %v1633_v57, %v1465_v58  ;;  %v1298_v10 = vadd.f32 %v1297_v60, %v1129_v62 }
 0x19b   :  { %v1748_v3 = vmax.f32 %v1634_v61, 0.0 }
 0x19d   :  { %v1812_v9 = vpack.c.bf16 %v1748_v3, %v1748_v3  ;;  %v2659_v3 = vld [vmem:[%s3932_s0 + $0x344] sm:$0xf] }
 0x19e   :  { %v1466_v11 = vpop.f32.mrf.mxu2  ;;  %v1131_v16 = vpop.f32.mrf.mxu0 }
 0x19f   :  { %v1635_v12 = vpop.f32.mrf.mxu3  ;;  %1877 = vst.msk [vmem:[%s3933_s3 + $0x78] sm:$0xf] %vm1846_vm0, %v1812_v9  ;;  %v1467_v15 = vadd.f32 %v1466_v11, %v1298_v10  ;;  %v1300_v17 = vpop.f32.mrf.mxu1  ;;  %v1132_v20 = vadd.f32 %v3501_v0, %v1131_v16  ;;  %v2343_v9 = vld [vmem:[%s3932_s0 + $0x358] sm:$0xf0] }
 0x1a1   :  { %v1636_v21 = vadd.f32 %v1635_v12, %v1467_v15  ;;  %1170 = vmatmul.bf16.gmra.mxu0 %v2302_v13  ;;  %v1301_v23 = vadd.f32 %v1300_v17, %v1132_v20  ;;  %v2338_v15 = vor.u32 %v2659_v3, %v2335_v5  ;;  %v2346_v20 = vor.u32 %v2660_v8, %v2343_v9  ;;  %v2669_v3 = vld [vmem:[%s3932_s0 + $0x38c] sm:$0xf0]  ;;  %v2670_v8 = vld [vmem:[%s3932_s0 + $0x394] sm:$0xf0]  ;;  %v2668_v9 = vld [vmem:[%s3932_s0 + $0x38c] sm:$0xf] }
 0x1a2   :  { %1339 = vmatmul.bf16.gmra.mxu1 %v2306_v14  ;;  %v2334_v14 = vor.u32 %v2661_v2, %v2333_v1  ;;  %v2365_v2 = vld [vmem:[%s3932_s0 + $0x380] sm:$0xf] }
 0x1a3   :  { %v1749_v22 = vmax.f32 %v1636_v21, 0.0  ;;  %1508 = vmatmul.bf16.gmra.mxu2 %v2310_v18 }
 0x1a4   :  { %1677 = vmatmul.bf16.gmra.mxu3 %v2314_v19  ;;  %v2342_v19 = vor.u32 %v2662_v7, %v2341_v6  ;;  %v2367_v6 = vld [vmem:[%s3932_s0 + $0x390] sm:$0xf0]  ;;  %v2373_v7 = vld [vmem:[%s3932_s0 + $0x388] sm:$0xf] }
 0x1a5   :  { %v1813_v24 = vpack.c.bf16 %v1749_v22, %v1749_v22 }
 0x1a6   :  { %v1469_v25 = vpop.f32.mrf.mxu2  ;;  %v1133_v28 = vpop.f32.mrf.mxu0 }
 0x1a7   :  { %v1638_v26 = vpop.f32.mrf.mxu3  ;;  %1878 = vst.msk [vmem:[%s3933_s3 + $0x7c] sm:$0xf] %vm1846_vm0, %v1813_v24  ;;  %v1470_v27 = vadd.f32 %v1469_v25, %v1301_v23  ;;  %v1302_v29 = vpop.f32.mrf.mxu1  ;;  %v1134_v31 = vadd.f32 %v3501_v0, %v1133_v28 }
 0x1a9   :  { %v1639_v30 = vadd.f32 %v1638_v26, %v1470_v27  ;;  %v1303_v42 = vadd.f32 %v1302_v29, %v1134_v31 }
 0x1ab   :  { %v1750_v35 = vmax.f32 %v1639_v30, 0.0 }
 0x1ad   :  { %v1814_v41 = vpack.c.bf16 %v1750_v35, %v1750_v35  ;;  %v2663_v35 = vld [vmem:[%s3932_s0 + $0x364] sm:$0xf] }
 0x1ae   :  { %v1471_v43 = vpop.f32.mrf.mxu2  ;;  %v1136_v48 = vpop.f32.mrf.mxu0 }
 0x1af   :  { %v1640_v44 = vpop.f32.mrf.mxu3  ;;  %1879 = vst.msk [vmem:[%s3933_s3 + $0x80] sm:$0xf] %vm1846_vm0, %v1814_v41  ;;  %v1472_v47 = vadd.f32 %v1471_v43, %v1303_v42  ;;  %v1305_v49 = vpop.f32.mrf.mxu1  ;;  %v1137_v52 = vadd.f32 %v3501_v0, %v1136_v48  ;;  %v2359_v41 = vld [vmem:[%s3932_s0 + $0x378] sm:$0xf0] }
 0x1b1   :  { %v1641_v53 = vadd.f32 %v1640_v44, %v1472_v47  ;;  %1175 = vmatmul.bf16.gmra.mxu0 %v2318_v45  ;;  %v1306_v55 = vadd.f32 %v1305_v49, %v1137_v52  ;;  %v2354_v47 = vor.u32 %v2663_v35, %v2351_v37  ;;  %v2362_v52 = vor.u32 %v2664_v40, %v2359_v41  ;;  %v2673_v35 = vld [vmem:[%s3932_s0 + $0x3ac] sm:$0xf0]  ;;  %v2674_v40 = vld [vmem:[%s3932_s0 + $0x3b4] sm:$0xf0]  ;;  %v2672_v41 = vld [vmem:[%s3932_s0 + $0x3ac] sm:$0xf] }
 0x1b2   :  { %1344 = vmatmul.bf16.gmra.mxu1 %v2322_v46  ;;  %v2350_v46 = vor.u32 %v2665_v34, %v2349_v33  ;;  %v2381_v34 = vld [vmem:[%s3932_s0 + $0x3a0] sm:$0xf] }
 0x1b3   :  { %v1751_v54 = vmax.f32 %v1641_v53, 0.0  ;;  %1513 = vmatmul.bf16.gmra.mxu2 %v2326_v50 }
 0x1b4   :  { %1682 = vmatmul.bf16.gmra.mxu3 %v2330_v51  ;;  %v2358_v51 = vor.u32 %v2666_v39, %v2357_v38  ;;  %v2383_v38 = vld [vmem:[%s3932_s0 + $0x3b0] sm:$0xf0]  ;;  %v2389_v39 = vld [vmem:[%s3932_s0 + $0x3a8] sm:$0xf] }
 0x1b5   :  { %v1815_v56 = vpack.c.bf16 %v1751_v54, %v1751_v54 }
 0x1b6   :  { %v1474_v57 = vpop.f32.mrf.mxu2  ;;  %v1138_v60 = vpop.f32.mrf.mxu0 }
 0x1b7   :  { %v1643_v58 = vpop.f32.mrf.mxu3  ;;  %1880 = vst.msk [vmem:[%s3933_s3 + $0x84] sm:$0xf] %vm1846_vm0, %v1815_v56  ;;  %v1475_v59 = vadd.f32 %v1474_v57, %v1306_v55  ;;  %v1307_v61 = vpop.f32.mrf.mxu1  ;;  %v1139_v63 = vadd.f32 %v3501_v0, %v1138_v60 }
 0x1b9   :  { %v1644_v62 = vadd.f32 %v1643_v58, %v1475_v59  ;;  %v1308_v11 = vadd.f32 %v1307_v61, %v1139_v63 }
 0x1bb   :  { %v1752_v4 = vmax.f32 %v1644_v62, 0.0 }
 0x1bd   :  { %v1816_v10 = vpack.c.bf16 %v1752_v4, %v1752_v4  ;;  %v2667_v4 = vld [vmem:[%s3932_s0 + $0x384] sm:$0xf] }
 0x1be   :  { %v1476_v12 = vpop.f32.mrf.mxu2  ;;  %v1141_v17 = vpop.f32.mrf.mxu0 }
 0x1bf   :  { %v1645_v13 = vpop.f32.mrf.mxu3  ;;  %1881 = vst.msk [vmem:[%s3933_s3 + $0x88] sm:$0xf] %vm1846_vm0, %v1816_v10  ;;  %v1477_v16 = vadd.f32 %v1476_v12, %v1308_v11  ;;  %v1310_v18 = vpop.f32.mrf.mxu1  ;;  %v1142_v21 = vadd.f32 %v3501_v0, %v1141_v17  ;;  %v2375_v10 = vld [vmem:[%s3932_s0 + $0x398] sm:$0xf0] }
 0x1c1   :  { %v1646_v22 = vadd.f32 %v1645_v13, %v1477_v16  ;;  %1180 = vmatmul.bf16.gmra.mxu0 %v2334_v14  ;;  %v1311_v24 = vadd.f32 %v1310_v18, %v1142_v21  ;;  %v2370_v16 = vor.u32 %v2667_v4, %v2367_v6  ;;  %v2378_v21 = vor.u32 %v2668_v9, %v2375_v10  ;;  %v2677_v4 = vld [vmem:[%s3932_s0 + $0x3cc] sm:$0xf0]  ;;  %v2678_v9 = vld [vmem:[%s3932_s0 + $0x3d4] sm:$0xf0]  ;;  %v2676_v10 = vld [vmem:[%s3932_s0 + $0x3cc] sm:$0xf] }
 0x1c2   :  { %1349 = vmatmul.bf16.gmra.mxu1 %v2338_v15  ;;  %v2366_v15 = vor.u32 %v2669_v3, %v2365_v2  ;;  %v2397_v3 = vld [vmem:[%s3932_s0 + $0x3c0] sm:$0xf] }
 0x1c3   :  { %v1753_v23 = vmax.f32 %v1646_v22, 0.0  ;;  %1518 = vmatmul.bf16.gmra.mxu2 %v2342_v19 }
 0x1c4   :  { %1687 = vmatmul.bf16.gmra.mxu3 %v2346_v20  ;;  %v2374_v20 = vor.u32 %v2670_v8, %v2373_v7  ;;  %v2399_v7 = vld [vmem:[%s3932_s0 + $0x3d0] sm:$0xf0]  ;;  %v2405_v8 = vld [vmem:[%s3932_s0 + $0x3c8] sm:$0xf] }
 0x1c5   :  { %v1817_v25 = vpack.c.bf16 %v1753_v23, %v1753_v23 }
 0x1c6   :  { %v1479_v26 = vpop.f32.mrf.mxu2  ;;  %v1143_v29 = vpop.f32.mrf.mxu0 }
 0x1c7   :  { %v1648_v27 = vpop.f32.mrf.mxu3  ;;  %1882 = vst.msk [vmem:[%s3933_s3 + $0x8c] sm:$0xf] %vm1846_vm0, %v1817_v25  ;;  %v1480_v28 = vadd.f32 %v1479_v26, %v1311_v24  ;;  %v1312_v30 = vpop.f32.mrf.mxu1  ;;  %v1144_v32 = vadd.f32 %v3501_v0, %v1143_v29 }
 0x1c9   :  { %v1649_v31 = vadd.f32 %v1648_v27, %v1480_v28  ;;  %v1313_v43 = vadd.f32 %v1312_v30, %v1144_v32 }
 0x1cb   :  { %v1754_v36 = vmax.f32 %v1649_v31, 0.0 }
 0x1cd   :  { %v1818_v42 = vpack.c.bf16 %v1754_v36, %v1754_v36  ;;  %v2671_v36 = vld [vmem:[%s3932_s0 + $0x3a4] sm:$0xf] }
 0x1ce   :  { %v1481_v44 = vpop.f32.mrf.mxu2  ;;  %v1146_v49 = vpop.f32.mrf.mxu0 }
 0x1cf   :  { %v1650_v45 = vpop.f32.mrf.mxu3  ;;  %1883 = vst.msk [vmem:[%s3933_s3 + $0x90] sm:$0xf] %vm1846_vm0, %v1818_v42  ;;  %v1482_v48 = vadd.f32 %v1481_v44, %v1313_v43  ;;  %v1315_v50 = vpop.f32.mrf.mxu1  ;;  %v1147_v53 = vadd.f32 %v3501_v0, %v1146_v49  ;;  %v2391_v42 = vld [vmem:[%s3932_s0 + $0x3b8] sm:$0xf0] }
 0x1d1   :  { %v1651_v54 = vadd.f32 %v1650_v45, %v1482_v48  ;;  %1185 = vmatmul.bf16.gmra.mxu0 %v2350_v46  ;;  %v1316_v56 = vadd.f32 %v1315_v50, %v1147_v53  ;;  %v2386_v48 = vor.u32 %v2671_v36, %v2383_v38  ;;  %v2394_v53 = vor.u32 %v2672_v41, %v2391_v42  ;;  %v2681_v36 = vld [vmem:[%s3932_s0 + $0x3ec] sm:$0xf0]  ;;  %v2682_v41 = vld [vmem:[%s3932_s0 + $0x3f4] sm:$0xf0]  ;;  %v2680_v42 = vld [vmem:[%s3932_s0 + $0x3ec] sm:$0xf] }
 0x1d2   :  { %1354 = vmatmul.bf16.gmra.mxu1 %v2354_v47  ;;  %v2382_v47 = vor.u32 %v2673_v35, %v2381_v34  ;;  %v2413_v35 = vld [vmem:[%s3932_s0 + $0x3e0] sm:$0xf] }
 0x1d3   :  { %v1755_v55 = vmax.f32 %v1651_v54, 0.0  ;;  %1523 = vmatmul.bf16.gmra.mxu2 %v2358_v51 }
 0x1d4   :  { %1692 = vmatmul.bf16.gmra.mxu3 %v2362_v52  ;;  %v2390_v52 = vor.u32 %v2674_v40, %v2389_v39  ;;  %v2415_v39 = vld [vmem:[%s3932_s0 + $0x3f0] sm:$0xf0]  ;;  %v2421_v40 = vld [vmem:[%s3932_s0 + $0x3e8] sm:$0xf] }
 0x1d5   :  { %v1819_v57 = vpack.c.bf16 %v1755_v55, %v1755_v55 }
 0x1d6   :  { %v1484_v58 = vpop.f32.mrf.mxu2  ;;  %v1148_v61 = vpop.f32.mrf.mxu0 }
 0x1d7   :  { %v1653_v59 = vpop.f32.mrf.mxu3  ;;  %1884 = vst.msk [vmem:[%s3933_s3 + $0x94] sm:$0xf] %vm1846_vm0, %v1819_v57  ;;  %v1485_v60 = vadd.f32 %v1484_v58, %v1316_v56  ;;  %v1317_v62 = vpop.f32.mrf.mxu1  ;;  %v1149_v1 = vadd.f32 %v3501_v0, %v1148_v61 }
 0x1d9   :  { %v1654_v63 = vadd.f32 %v1653_v59, %v1485_v60  ;;  %v1318_v12 = vadd.f32 %v1317_v62, %v1149_v1 }
 0x1db   :  { %v1756_v5 = vmax.f32 %v1654_v63, 0.0 }
 0x1dd   :  { %v1820_v11 = vpack.c.bf16 %v1756_v5, %v1756_v5  ;;  %v2675_v5 = vld [vmem:[%s3932_s0 + $0x3c4] sm:$0xf] }
 0x1de   :  { %v1486_v13 = vpop.f32.mrf.mxu2  ;;  %v1151_v18 = vpop.f32.mrf.mxu0 }
 0x1df   :  { %v1655_v14 = vpop.f32.mrf.mxu3  ;;  %1885 = vst.msk [vmem:[%s3933_s3 + $0x98] sm:$0xf] %vm1846_vm0, %v1820_v11  ;;  %v1487_v17 = vadd.f32 %v1486_v13, %v1318_v12  ;;  %v1320_v19 = vpop.f32.mrf.mxu1  ;;  %v1152_v22 = vadd.f32 %v3501_v0, %v1151_v18  ;;  %v2407_v11 = vld [vmem:[%s3932_s0 + $0x3d8] sm:$0xf0] }
 0x1e1   :  { %v1656_v23 = vadd.f32 %v1655_v14, %v1487_v17  ;;  %1190 = vmatmul.bf16.gmra.mxu0 %v2366_v15  ;;  %v1321_v25 = vadd.f32 %v1320_v19, %v1152_v22  ;;  %v2402_v17 = vor.u32 %v2675_v5, %v2399_v7  ;;  %v2410_v22 = vor.u32 %v2676_v10, %v2407_v11 }
 0x1e2   :  { %1359 = vmatmul.bf16.gmra.mxu1 %v2370_v16  ;;  %v2398_v16 = vor.u32 %v2677_v4, %v2397_v3 }
 0x1e3   :  { %v1757_v24 = vmax.f32 %v1656_v23, 0.0  ;;  %1528 = vmatmul.bf16.gmra.mxu2 %v2374_v20 }
 0x1e4   :  { %1697 = vmatmul.bf16.gmra.mxu3 %v2378_v21  ;;  %v2406_v21 = vor.u32 %v2678_v9, %v2405_v8 }
 0x1e5   :  { %v1821_v26 = vpack.c.bf16 %v1757_v24, %v1757_v24 }
 0x1e6   :  { %v1489_v27 = vpop.f32.mrf.mxu2  ;;  %v1153_v30 = vpop.f32.mrf.mxu0 }
 0x1e7   :  { %v1658_v28 = vpop.f32.mrf.mxu3  ;;  %1886 = vst.msk [vmem:[%s3933_s3 + $0x9c] sm:$0xf] %vm1846_vm0, %v1821_v26  ;;  %v1490_v29 = vadd.f32 %v1489_v27, %v1321_v25  ;;  %v1322_v31 = vpop.f32.mrf.mxu1  ;;  %v1154_v33 = vadd.f32 %v3501_v0, %v1153_v30 }
 0x1e9   :  { %v1659_v32 = vadd.f32 %v1658_v28, %v1490_v29  ;;  %v1323_v44 = vadd.f32 %v1322_v31, %v1154_v33 }
 0x1eb   :  { %v1758_v37 = vmax.f32 %v1659_v32, 0.0 }
 0x1ed   :  { %v1822_v43 = vpack.c.bf16 %v1758_v37, %v1758_v37  ;;  %v2679_v37 = vld [vmem:[%s3932_s0 + $0x3e4] sm:$0xf] }
 0x1ee   :  { %v1491_v45 = vpop.f32.mrf.mxu2  ;;  %v1156_v50 = vpop.f32.mrf.mxu0 }
 0x1ef   :  { %v1660_v46 = vpop.f32.mrf.mxu3  ;;  %1887 = vst.msk [vmem:[%s3933_s3 + $0xa0] sm:$0xf] %vm1846_vm0, %v1822_v43  ;;  %v1492_v49 = vadd.f32 %v1491_v45, %v1323_v44  ;;  %v1325_v51 = vpop.f32.mrf.mxu1  ;;  %v1157_v54 = vadd.f32 %v3501_v0, %v1156_v50  ;;  %v2423_v43 = vld [vmem:[%s3932_s0 + $0x3f8] sm:$0xf0] }
 0x1f1   :  { %v1661_v55 = vadd.f32 %v1660_v46, %v1492_v49  ;;  %1195 = vmatmul.bf16.gmra.mxu0 %v2382_v47  ;;  %v1326_v57 = vadd.f32 %v1325_v51, %v1157_v54  ;;  %v2418_v49 = vor.u32 %v2679_v37, %v2415_v39  ;;  %v2426_v54 = vor.u32 %v2680_v42, %v2423_v43 }
 0x1f2   :  { %1364 = vmatmul.bf16.gmra.mxu1 %v2386_v48  ;;  %v2414_v48 = vor.u32 %v2681_v36, %v2413_v35 }
 0x1f3   :  { %v1759_v56 = vmax.f32 %v1661_v55, 0.0  ;;  %1533 = vmatmul.bf16.gmra.mxu2 %v2390_v52 }
 0x1f4   :  { %1702 = vmatmul.bf16.gmra.mxu3 %v2394_v53  ;;  %v2422_v53 = vor.u32 %v2682_v41, %v2421_v40 }
 0x1f5   :  { %v1823_v58 = vpack.c.bf16 %v1759_v56, %v1759_v56 }
 0x1f6   :  { %v1494_v59 = vpop.f32.mrf.mxu2  ;;  %v1158_v62 = vpop.f32.mrf.mxu0 }
 0x1f7   :  { %v1663_v60 = vpop.f32.mrf.mxu3  ;;  %1888 = vst.msk [vmem:[%s3933_s3 + $0xa4] sm:$0xf] %vm1846_vm0, %v1823_v58  ;;  %v1495_v61 = vadd.f32 %v1494_v59, %v1326_v57  ;;  %v1327_v63 = vpop.f32.mrf.mxu1  ;;  %v1159_v2 = vadd.f32 %v3501_v0, %v1158_v62 }
 0x1f9   :  { %v1664_v1 = vadd.f32 %v1663_v60, %v1495_v61  ;;  %v1328_v13 = vadd.f32 %v1327_v63, %v1159_v2 }
 0x1fb   :  { %v1760_v6 = vmax.f32 %v1664_v1, 0.0 }
 0x1fd   :  { %v1824_v12 = vpack.c.bf16 %v1760_v6, %v1760_v6 }
 0x1fe   :  { %v1496_v14 = vpop.f32.mrf.mxu2  ;;  %v1161_v19 = vpop.f32.mrf.mxu0 }
 0x1ff   :  { %v1665_v15 = vpop.f32.mrf.mxu3  ;;  %1889 = vst.msk [vmem:[%s3933_s3 + $0xa8] sm:$0xf] %vm1846_vm0, %v1824_v12  ;;  %v1497_v18 = vadd.f32 %v1496_v14, %v1328_v13  ;;  %v1330_v20 = vpop.f32.mrf.mxu1  ;;  %v1162_v23 = vadd.f32 %v3501_v0, %v1161_v19 }
 0x201   :  { %v1666_v24 = vadd.f32 %v1665_v15, %v1497_v18  ;;  %1200 = vmatmul.bf16.gmra.mxu0 %v2398_v16  ;;  %v1331_v26 = vadd.f32 %v1330_v20, %v1162_v23 }
 0x202   :  { %1369 = vmatmul.bf16.gmra.mxu1 %v2402_v17 }
 0x203   :  { %v1761_v25 = vmax.f32 %v1666_v24, 0.0  ;;  %1538 = vmatmul.bf16.gmra.mxu2 %v2406_v21 }
 0x204   :  { %1707 = vmatmul.bf16.gmra.mxu3 %v2410_v22 }
 0x205   :  { %v1825_v27 = vpack.c.bf16 %v1761_v25, %v1761_v25 }
 0x206   :  { %v1499_v28 = vpop.f32.mrf.mxu2  ;;  %v1163_v31 = vpop.f32.mrf.mxu0 }
 0x207   :  { %v1668_v29 = vpop.f32.mrf.mxu3  ;;  %1890 = vst.msk [vmem:[%s3933_s3 + $0xac] sm:$0xf] %vm1846_vm0, %v1825_v27  ;;  %v1500_v30 = vadd.f32 %v1499_v28, %v1331_v26  ;;  %v1332_v32 = vpop.f32.mrf.mxu1  ;;  %v1164_v34 = vadd.f32 %v3501_v0, %v1163_v31 }
 0x209   :  { %v1669_v33 = vadd.f32 %v1668_v29, %v1500_v30  ;;  %v1333_v45 = vadd.f32 %v1332_v32, %v1164_v34 }
 0x20b   :  { %v1762_v38 = vmax.f32 %v1669_v33, 0.0 }
 0x20d   :  { %v1826_v44 = vpack.c.bf16 %v1762_v38, %v1762_v38 }
 0x20e   :  { %v1501_v46 = vpop.f32.mrf.mxu2  ;;  %v1166_v51 = vpop.f32.mrf.mxu0 }
 0x20f   :  { %v1670_v47 = vpop.f32.mrf.mxu3  ;;  %1891 = vst.msk [vmem:[%s3933_s3 + $0xb0] sm:$0xf] %vm1846_vm0, %v1826_v44  ;;  %v1502_v50 = vadd.f32 %v1501_v46, %v1333_v45  ;;  %v1335_v52 = vpop.f32.mrf.mxu1  ;;  %v1167_v55 = vadd.f32 %v3501_v0, %v1166_v51 }
 0x211   :  { %v1671_v56 = vadd.f32 %v1670_v47, %v1502_v50  ;;  %1205 = vmatmul.bf16.gmra.mxu0 %v2414_v48  ;;  %v1336_v58 = vadd.f32 %v1335_v52, %v1167_v55 }
 0x212   :  { %1374 = vmatmul.bf16.gmra.mxu1 %v2418_v49 }
 0x213   :  { %v1763_v57 = vmax.f32 %v1671_v56, 0.0  ;;  %1543 = vmatmul.bf16.gmra.mxu2 %v2422_v53 }
 0x214   :  { %1712 = vmatmul.bf16.gmra.mxu3 %v2426_v54 }
 0x215   :  { %v1827_v59 = vpack.c.bf16 %v1763_v57, %v1763_v57 }
 0x216   :  { %v1504_v60 = vpop.f32.mrf.mxu2  ;;  %v1168_v63 = vpop.f32.mrf.mxu0 }
 0x217   :  { %v1673_v61 = vpop.f32.mrf.mxu3  ;;  %1892 = vst.msk [vmem:[%s3933_s3 + $0xb4] sm:$0xf] %vm1846_vm0, %v1827_v59  ;;  %v1505_v62 = vadd.f32 %v1504_v60, %v1336_v58  ;;  %v1337_v1 = vpop.f32.mrf.mxu1  ;;  %v1169_v3 = vadd.f32 %v3501_v0, %v1168_v63 }
 0x219   :  { %v1674_v2 = vadd.f32 %v1673_v61, %v1505_v62  ;;  %v1338_v6 = vadd.f32 %v1337_v1, %v1169_v3 }
 0x21b   :  { %v1764_v4 = vmax.f32 %v1674_v2, 0.0 }
 0x21d   :  { %v1828_v5 = vpack.c.bf16 %v1764_v4, %v1764_v4 }
 0x21e   :  { %v1506_v7 = vpop.f32.mrf.mxu2  ;;  %v1171_v10 = vpop.f32.mrf.mxu0 }
 0x21f   :  { %v1675_v8 = vpop.f32.mrf.mxu3  ;;  %1893 = vst.msk [vmem:[%s3933_s3 + $0xb8] sm:$0xf] %vm1846_vm0, %v1828_v5  ;;  %v1507_v9 = vadd.f32 %v1506_v7, %v1338_v6  ;;  %v1340_v11 = vpop.f32.mrf.mxu1  ;;  %v1172_v12 = vadd.f32 %v3501_v0, %v1171_v10 }
 0x221   :  { %v1676_v13 = vadd.f32 %v1675_v8, %v1507_v9  ;;  %v1341_v15 = vadd.f32 %v1340_v11, %v1172_v12 }
 0x223   :  { %v1765_v14 = vmax.f32 %v1676_v13, 0.0 }
 0x225   :  { %v1829_v16 = vpack.c.bf16 %v1765_v14, %v1765_v14 }
 0x226   :  { %v1509_v17 = vpop.f32.mrf.mxu2  ;;  %v1173_v20 = vpop.f32.mrf.mxu0 }
 0x227   :  { %v1678_v18 = vpop.f32.mrf.mxu3  ;;  %1894 = vst.msk [vmem:[%s3933_s3 + $0xbc] sm:$0xf] %vm1846_vm0, %v1829_v16  ;;  %v1510_v19 = vadd.f32 %v1509_v17, %v1341_v15  ;;  %v1342_v21 = vpop.f32.mrf.mxu1  ;;  %v1174_v23 = vadd.f32 %v3501_v0, %v1173_v20 }
 0x229   :  { %v1679_v22 = vadd.f32 %v1678_v18, %v1510_v19  ;;  %v1343_v26 = vadd.f32 %v1342_v21, %v1174_v23 }
 0x22b   :  { %v1766_v24 = vmax.f32 %v1679_v22, 0.0 }
 0x22d   :  { %v1830_v25 = vpack.c.bf16 %v1766_v24, %v1766_v24 }
 0x22e   :  { %v1511_v27 = vpop.f32.mrf.mxu2  ;;  %v1176_v30 = vpop.f32.mrf.mxu0 }
 0x22f   :  { %v1680_v28 = vpop.f32.mrf.mxu3  ;;  %1895 = vst.msk [vmem:[%s3933_s3 + $0xc0] sm:$0xf] %vm1846_vm0, %v1830_v25  ;;  %v1512_v29 = vadd.f32 %v1511_v27, %v1343_v26  ;;  %v1345_v31 = vpop.f32.mrf.mxu1  ;;  %v1177_v32 = vadd.f32 %v3501_v0, %v1176_v30 }
 0x231   :  { %v1681_v33 = vadd.f32 %v1680_v28, %v1512_v29  ;;  %v1346_v35 = vadd.f32 %v1345_v31, %v1177_v32 }
 0x233   :  { %v1767_v34 = vmax.f32 %v1681_v33, 0.0 }
 0x235   :  { %v1831_v36 = vpack.c.bf16 %v1767_v34, %v1767_v34 }
 0x236   :  { %v1514_v37 = vpop.f32.mrf.mxu2  ;;  %v1178_v40 = vpop.f32.mrf.mxu0 }
 0x237   :  { %v1683_v38 = vpop.f32.mrf.mxu3  ;;  %1896 = vst.msk [vmem:[%s3933_s3 + $0xc4] sm:$0xf] %vm1846_vm0, %v1831_v36  ;;  %v1515_v39 = vadd.f32 %v1514_v37, %v1346_v35  ;;  %v1347_v41 = vpop.f32.mrf.mxu1  ;;  %v1179_v43 = vadd.f32 %v3501_v0, %v1178_v40 }
 0x239   :  { %v1684_v42 = vadd.f32 %v1683_v38, %v1515_v39  ;;  %v1348_v46 = vadd.f32 %v1347_v41, %v1179_v43 }
 0x23b   :  { %v1768_v44 = vmax.f32 %v1684_v42, 0.0 }
 0x23d   :  { %v1832_v45 = vpack.c.bf16 %v1768_v44, %v1768_v44 }
 0x23e   :  { %v1516_v47 = vpop.f32.mrf.mxu2  ;;  %v1181_v50 = vpop.f32.mrf.mxu0 }
 0x23f   :  { %v1685_v48 = vpop.f32.mrf.mxu3  ;;  %1897 = vst.msk [vmem:[%s3933_s3 + $0xc8] sm:$0xf] %vm1846_vm0, %v1832_v45  ;;  %v1517_v49 = vadd.f32 %v1516_v47, %v1348_v46  ;;  %v1350_v51 = vpop.f32.mrf.mxu1  ;;  %v1182_v52 = vadd.f32 %v3501_v0, %v1181_v50 }
 0x241   :  { %v1686_v53 = vadd.f32 %v1685_v48, %v1517_v49  ;;  %v1351_v55 = vadd.f32 %v1350_v51, %v1182_v52 }
 0x243   :  { %v1769_v54 = vmax.f32 %v1686_v53, 0.0 }
 0x245   :  { %v1833_v56 = vpack.c.bf16 %v1769_v54, %v1769_v54 }
 0x246   :  { %v1519_v57 = vpop.f32.mrf.mxu2  ;;  %v1183_v60 = vpop.f32.mrf.mxu0 }
 0x247   :  { %v1688_v58 = vpop.f32.mrf.mxu3  ;;  %1898 = vst.msk [vmem:[%s3933_s3 + $0xcc] sm:$0xf] %vm1846_vm0, %v1833_v56  ;;  %v1520_v59 = vadd.f32 %v1519_v57, %v1351_v55  ;;  %v1352_v61 = vpop.f32.mrf.mxu1  ;;  %v1184_v63 = vadd.f32 %v3501_v0, %v1183_v60  ;;  %v2717_v60 = vld [vmem:[%s3931_s2] ss:$0 sm:$0xff] }
 0x249   :  { %v1689_v62 = vadd.f32 %v1688_v58, %v1520_v59  ;;  %v1353_v3 = vadd.f32 %v1352_v61, %v1184_v63 }
 0x24b   :  { %v1770_v1 = vmax.f32 %v1689_v62, 0.0 }
 0x24d   :  { %v1834_v2 = vpack.c.bf16 %v1770_v1, %v1770_v1 }
 0x24e   :  { %v1521_v4 = vpop.f32.mrf.mxu2  ;;  %v1186_v7 = vpop.f32.mrf.mxu0 }
 0x24f   :  { %v1690_v5 = vpop.f32.mrf.mxu3  ;;  %1899 = vst.msk [vmem:[%s3933_s3 + $0xd0] sm:$0xf] %vm1846_vm0, %v1834_v2  ;;  %v1522_v6 = vadd.f32 %v1521_v4, %v1353_v3  ;;  %v1355_v8 = vpop.f32.mrf.mxu1  ;;  %v1187_v9 = vadd.f32 %v3501_v0, %v1186_v7 }
 0x251   :  { %v1691_v10 = vadd.f32 %v1690_v5, %v1522_v6  ;;  %v1356_v12 = vadd.f32 %v1355_v8, %v1187_v9 }
 0x253   :  { %v1771_v11 = vmax.f32 %v1691_v10, 0.0 }
 0x255   :  { %v1835_v13 = vpack.c.bf16 %v1771_v11, %v1771_v11 }
 0x256   :  { %v1524_v14 = vpop.f32.mrf.mxu2  ;;  %v1188_v17 = vpop.f32.mrf.mxu0 }
 0x257   :  { %v1693_v15 = vpop.f32.mrf.mxu3  ;;  %1900 = vst.msk [vmem:[%s3933_s3 + $0xd4] sm:$0xf] %vm1846_vm0, %v1835_v13  ;;  %v1525_v16 = vadd.f32 %v1524_v14, %v1356_v12  ;;  %v1357_v18 = vpop.f32.mrf.mxu1  ;;  %v1189_v20 = vadd.f32 %v3501_v0, %v1188_v17 }
 0x259   :  { %v1694_v19 = vadd.f32 %v1693_v15, %v1525_v16  ;;  %v1358_v23 = vadd.f32 %v1357_v18, %v1189_v20 }
 0x25b   :  { %v1772_v21 = vmax.f32 %v1694_v19, 0.0 }
 0x25d   :  { %v1836_v22 = vpack.c.bf16 %v1772_v21, %v1772_v21 }
 0x25e   :  { %v1526_v24 = vpop.f32.mrf.mxu2  ;;  %v1191_v27 = vpop.f32.mrf.mxu0 }
 0x25f   :  { %v1695_v25 = vpop.f32.mrf.mxu3  ;;  %1901 = vst.msk [vmem:[%s3933_s3 + $0xd8] sm:$0xf] %vm1846_vm0, %v1836_v22  ;;  %v1527_v26 = vadd.f32 %v1526_v24, %v1358_v23  ;;  %v1360_v28 = vpop.f32.mrf.mxu1  ;;  %v1192_v29 = vadd.f32 %v3501_v0, %v1191_v27 }
 0x261   :  { %v1696_v30 = vadd.f32 %v1695_v25, %v1527_v26  ;;  %v1361_v32 = vadd.f32 %v1360_v28, %v1192_v29 }
 0x263   :  { %v1773_v31 = vmax.f32 %v1696_v30, 0.0 }
 0x265   :  { %v1837_v33 = vpack.c.bf16 %v1773_v31, %v1773_v31 }
 0x266   :  { %v1529_v34 = vpop.f32.mrf.mxu2  ;;  %v1193_v37 = vpop.f32.mrf.mxu0 }
 0x267   :  { %v1698_v35 = vpop.f32.mrf.mxu3  ;;  %1902 = vst.msk [vmem:[%s3933_s3 + $0xdc] sm:$0xf] %vm1846_vm0, %v1837_v33  ;;  %v1530_v36 = vadd.f32 %v1529_v34, %v1361_v32  ;;  %v1362_v38 = vpop.f32.mrf.mxu1  ;;  %v1194_v40 = vadd.f32 %v3501_v0, %v1193_v37 }
 0x269   :  { %v1699_v39 = vadd.f32 %v1698_v35, %v1530_v36  ;;  %v1363_v43 = vadd.f32 %v1362_v38, %v1194_v40 }
 0x26b   :  { %v1774_v41 = vmax.f32 %v1699_v39, 0.0 }
 0x26d   :  { %v1838_v42 = vpack.c.bf16 %v1774_v41, %v1774_v41 }
 0x26e   :  { %v1531_v44 = vpop.f32.mrf.mxu2  ;;  %v1196_v47 = vpop.f32.mrf.mxu0 }
 0x26f   :  { %v1700_v45 = vpop.f32.mrf.mxu3  ;;  %1903 = vst.msk [vmem:[%s3933_s3 + $0xe0] sm:$0xf] %vm1846_vm0, %v1838_v42  ;;  %v1532_v46 = vadd.f32 %v1531_v44, %v1363_v43  ;;  %v1365_v48 = vpop.f32.mrf.mxu1  ;;  %v1197_v49 = vadd.f32 %v3501_v0, %v1196_v47 }
 0x271   :  { %v1701_v50 = vadd.f32 %v1700_v45, %v1532_v46  ;;  %v1366_v52 = vadd.f32 %v1365_v48, %v1197_v49 }
 0x273   :  { %v1775_v51 = vmax.f32 %v1701_v50, 0.0 }
 0x275   :  { %v1839_v53 = vpack.c.bf16 %v1775_v51, %v1775_v51 }
 0x276   :  { %v1534_v54 = vpop.f32.mrf.mxu2  ;;  %v1198_v57 = vpop.f32.mrf.mxu0 }
 0x277   :  { %v1703_v55 = vpop.f32.mrf.mxu3  ;;  %1904 = vst.msk [vmem:[%s3933_s3 + $0xe4] sm:$0xf] %vm1846_vm0, %v1839_v53  ;;  %v1535_v56 = vadd.f32 %v1534_v54, %v1366_v52  ;;  %v1367_v58 = vpop.f32.mrf.mxu1  ;;  %v1199_v0 = vadd.f32 %v2717_v60, %v1198_v57 }
 0x279   :  { %v1704_v59 = vadd.f32 %v1703_v55, %v1535_v56  ;;  %v1368_v63 = vadd.f32 %v1367_v58, %v1199_v0 }
 0x27b   :  { %v1776_v61 = vmax.f32 %v1704_v59, 0.0 }
 0x27d   :  { %v1840_v62 = vpack.c.bf16 %v1776_v61, %v1776_v61 }
 0x27e   :  { %v1536_v1 = vpop.f32.mrf.mxu2  ;;  %v1201_v4 = vpop.f32.mrf.mxu0 }
 0x27f   :  { %v1705_v2 = vpop.f32.mrf.mxu3  ;;  %1905 = vst.msk [vmem:[%s3933_s3 + $0xe8] sm:$0xf] %vm1846_vm0, %v1840_v62  ;;  %v1537_v3 = vadd.f32 %v1536_v1, %v1368_v63  ;;  %v1370_v5 = vpop.f32.mrf.mxu1  ;;  %v1202_v6 = vadd.f32 %v2717_v60, %v1201_v4 }
 0x281   :  { %v1706_v7 = vadd.f32 %v1705_v2, %v1537_v3  ;;  %v1371_v9 = vadd.f32 %v1370_v5, %v1202_v6 }
 0x283   :  { %v1777_v8 = vmax.f32 %v1706_v7, 0.0 }
 0x285   :  { %v1841_v10 = vpack.c.bf16 %v1777_v8, %v1777_v8 }
 0x286   :  { %v1539_v11 = vpop.f32.mrf.mxu2  ;;  %v1203_v14 = vpop.f32.mrf.mxu0 }
 0x287   :  { %v1708_v12 = vpop.f32.mrf.mxu3  ;;  %1906 = vst.msk [vmem:[%s3933_s3 + $0xec] sm:$0xf] %vm1846_vm0, %v1841_v10  ;;  %v1540_v13 = vadd.f32 %v1539_v11, %v1371_v9  ;;  %v1372_v15 = vpop.f32.mrf.mxu1  ;;  %v1204_v17 = vadd.f32 %v2717_v60, %v1203_v14 }
 0x289   :  { %v1709_v16 = vadd.f32 %v1708_v12, %v1540_v13  ;;  %v1373_v20 = vadd.f32 %v1372_v15, %v1204_v17 }
 0x28b   :  { %v1778_v18 = vmax.f32 %v1709_v16, 0.0 }
 0x28d   :  { %v1842_v19 = vpack.c.bf16 %v1778_v18, %v1778_v18 }
 0x28e   :  { %v1541_v21 = vpop.f32.mrf.mxu2  ;;  %v1206_v24 = vpop.f32.mrf.mxu0 }
 0x28f   :  { %v1710_v22 = vpop.f32.mrf.mxu3  ;;  %1907 = vst.msk [vmem:[%s3933_s3 + $0xf0] sm:$0xf] %vm1846_vm0, %v1842_v19  ;;  %v1542_v23 = vadd.f32 %v1541_v21, %v1373_v20  ;;  %v1207_v25 = vadd.f32 %v2717_v60, %v1206_v24  ;;  %v1375_v27 = vpop.f32.mrf.mxu1 }
 0x291   :  { %v1711_v26 = vadd.f32 %v1710_v22, %v1542_v23  ;;  %v1376_v29 = vadd.f32 %v1375_v27, %v1207_v25 }
 0x293   :  { %v1779_v28 = vmax.f32 %v1711_v26, 0.0 }
 0x295   :  { %v1843_v30 = vpack.c.bf16 %v1779_v28, %v1779_v28 }
 0x296   :  { %v1544_v31 = vpop.f32.mrf.mxu2  ;;  %v1208_v34 = vpop.f32.mrf.mxu0 }
 0x297   :  { %v1713_v32 = vpop.f32.mrf.mxu3  ;;  %1908 = vst.msk [vmem:[%s3933_s3 + $0xf4] sm:$0xf] %vm1846_vm0, %v1843_v30  ;;  %v1545_v33 = vadd.f32 %v1544_v31, %v1376_v29  ;;  %v1209_v36 = vadd.f32 %v2717_v60, %v1208_v34  ;;  %v1377_v38 = vpop.f32.mrf.mxu1 }
 0x299   :  { %v1714_v35 = vadd.f32 %v1713_v32, %v1545_v33  ;;  %v1378_v40 = vadd.f32 %v1377_v38, %v1209_v36 }
 0x29b   :  { %v1780_v37 = vmax.f32 %v1714_v35, 0.0 }
 0x29d   :  { %v1844_v39 = vpack.c.bf16 %v1780_v37, %v1780_v37 }
 0x29e   :  { %v1546_v41 = vpop.f32.mrf.mxu2 }
 0x29f   :  { %1909 = vst.msk [vmem:[%s3933_s3 + $0xf8] sm:$0xf] %vm1846_vm0, %v1844_v39  ;;  %v1547_v42 = vadd.f32 %v1546_v41, %v1378_v40  ;;  %v1715_v43 = vpop.f32.mrf.mxu3 }
 0x2a1   :  { %v1716_v44 = vadd.f32 %v1715_v43, %v1547_v42 }
 0x2a3   :  { %v1781_v45 = vmax.f32 %v1716_v44, 0.0 }
 0x2a5   :  { %v1845_v46 = vpack.c.bf16 %v1781_v45, %v1781_v45 }
 0x2a7   :  { %1910 = vst.msk [vmem:[%s3933_s3 + $0xfc] sm:$0xf] %vm1846_vm0, %v1845_v46 }

// kernel: sent_encoder_forward.8
= control target key start
LH: loop header
LB: loop body
LE: loop exit
PB: predicated region body
PF: predicated region fallthrough
CT: control target
= control target key end

     0   :  { %s2735_s1 = inlined_call_operand.vmem [shape: bf16[1024,128], index: 1, kind: input, shape index: {}]   ;;  %s2736_s2 = inlined_call_operand.vmem [shape: f32[1,128], index: 2, kind: input, shape index: {}]   ;;  %s2737_s0 = inlined_call_operand.vmem [shape: bf16[128,1024], index: 0, kind: input, shape index: {}]   ;;  %s2738_s3 = inlined_call_operand.vmem [shape: bf16[128,128], index: 3, kind: output, shape index: {}]  }
   0x1   :  { %v1941_v0 = vld [vmem:[%s2735_s1 + $0x38] sm:$0xff]  ;;  %v1940_v4 = vld [vmem:[%s2735_s1 + $0x30] sm:$0xff]  ;;  %v1939_v8 = vld [vmem:[%s2735_s1 + $0x28] sm:$0xff] }
   0x2   :  { %v1949_v1 = vld [vmem:[%s2735_s1 + $0x78] sm:$0xff]  ;;  %914 = vmatpush.bf16.msra.mxu0 %v1941_v0  ;;  %v1948_v5 = vld [vmem:[%s2735_s1 + $0x70] sm:$0xff]  ;;  %v1947_v9 = vld [vmem:[%s2735_s1 + $0x68] sm:$0xff] }
   0x3   :  { %v1957_v2 = vld [vmem:[%s2735_s1 + $0xb8] sm:$0xff]  ;;  %963 = vmatpush.bf16.msra.mxu1 %v1949_v1  ;;  %v1956_v6 = vld [vmem:[%s2735_s1 + $0xb0] sm:$0xff]  ;;  %v1955_v10 = vld [vmem:[%s2735_s1 + $0xa8] sm:$0xff] }
   0x4   :  { %v1965_v3 = vld [vmem:[%s2735_s1 + $0xf8] sm:$0xff]  ;;  %1012 = vmatpush.bf16.msra.mxu2 %v1957_v2  ;;  %v1964_v7 = vld [vmem:[%s2735_s1 + $0xf0] sm:$0xff]  ;;  %v1963_v11 = vld [vmem:[%s2735_s1 + $0xe8] sm:$0xff] }
   0x5   :  { %1061 = vmatpush.bf16.msra.mxu3 %v1965_v3  ;;  %v1938_v12 = vld [vmem:[%s2735_s1 + $0x20] sm:$0xff]  ;;  %v1937_v16 = vld [vmem:[%s2735_s1 + $0x18] sm:$0xff]  ;;  %v1936_v20 = vld [vmem:[%s2735_s1 + $0x10] sm:$0xff] }
   0x6   :  { %915 = vmatpush.bf16.msra.mxu0 %v1940_v4  ;;  %v1946_v13 = vld [vmem:[%s2735_s1 + $0x60] sm:$0xff]  ;;  %v1945_v17 = vld [vmem:[%s2735_s1 + $0x58] sm:$0xff]  ;;  %v1944_v21 = vld [vmem:[%s2735_s1 + $0x50] sm:$0xff] }
   0x7   :  { %964 = vmatpush.bf16.msra.mxu1 %v1948_v5  ;;  %v1954_v14 = vld [vmem:[%s2735_s1 + $0xa0] sm:$0xff]  ;;  %v1953_v18 = vld [vmem:[%s2735_s1 + $0x98] sm:$0xff]  ;;  %v1952_v22 = vld [vmem:[%s2735_s1 + $0x90] sm:$0xff] }
   0x8   :  { %1013 = vmatpush.bf16.msra.mxu2 %v1956_v6  ;;  %v1962_v15 = vld [vmem:[%s2735_s1 + $0xe0] sm:$0xff]  ;;  %v1961_v19 = vld [vmem:[%s2735_s1 + $0xd8] sm:$0xff]  ;;  %v1960_v23 = vld [vmem:[%s2735_s1 + $0xd0] sm:$0xff] }
   0x9   :  { %1062 = vmatpush.bf16.msra.mxu3 %v1964_v7  ;;  %v1935_v24 = vld [vmem:[%s2735_s1 + $0x8] sm:$0xff]  ;;  %v1934_v28 = vld [vmem:[%s2735_s1] sm:$0xff]  ;;  %v1989_v40 = vld [vmem:[%s2735_s1 + $0x1b8] sm:$0xff] }
   0xa   :  { %916 = vmatpush.bf16.msra.mxu0 %v1939_v8  ;;  %v1943_v25 = vld [vmem:[%s2735_s1 + $0x48] sm:$0xff]  ;;  %v1942_v29 = vld [vmem:[%s2735_s1 + $0x40] sm:$0xff]  ;;  %v1973_v41 = vld [vmem:[%s2735_s1 + $0x138] sm:$0xff] }
   0xb   :  { %965 = vmatpush.bf16.msra.mxu1 %v1947_v9  ;;  %v1951_v26 = vld [vmem:[%s2735_s1 + $0x88] sm:$0xff]  ;;  %v1950_v30 = vld [vmem:[%s2735_s1 + $0x80] sm:$0xff]  ;;  %v1997_v46 = vld [vmem:[%s2735_s1 + $0x1f8] sm:$0xff] }
   0xc   :  { %1014 = vmatpush.bf16.msra.mxu2 %v1955_v10  ;;  %v1959_v27 = vld [vmem:[%s2735_s1 + $0xc8] sm:$0xff]  ;;  %v1958_v31 = vld [vmem:[%s2735_s1 + $0xc0] sm:$0xff]  ;;  %v1981_v47 = vld [vmem:[%s2735_s1 + $0x178] sm:$0xff] }
   0xd   :  { %1063 = vmatpush.bf16.msra.mxu3 %v1963_v11  ;;  %v1360_v32 = vld [vmem:[%s2737_s0] sm:$0xf]  ;;  %v1870_v34 = vld [vmem:[%s2737_s0 + $0x4] sm:$0xf]  ;;  %v1368_v36 = vld [vmem:[%s2737_s0 + $0x8] sm:$0xf] }
   0xe   :  { %917 = vmatpush.bf16.msra.mxu0 %v1938_v12  ;;  %v1874_v33 = vld [vmem:[%s2737_s0 + $0x1c] sm:$0xf0]  ;;  %v1362_v35 = vld [vmem:[%s2737_s0 + $0x20] sm:$0xf0]  ;;  %v1875_v37 = vld [vmem:[%s2737_s0 + $0x24] sm:$0xf0] }
   0xf   :  { %966 = vmatpush.bf16.msra.mxu1 %v1946_v13  ;;  %v1871_v38 = vld [vmem:[%s2737_s0 + $0xc] sm:$0xf]  ;;  %v1361_v42 = vor.u32 %v1874_v33, %v1360_v32  ;;  %v1365_v43 = vor.u32 %v1870_v34, %v1362_v35  ;;  %v1369_v44 = vor.u32 %v1875_v37, %v1368_v36  ;;  %v1988_v48 = vld [vmem:[%s2735_s1 + $0x1b0] sm:$0xff]  ;;  %v1392_v56 = vld [vmem:[%s2737_s0 + $0x40] sm:$0xf] }
  0x10   :  { %1015 = vmatpush.bf16.msra.mxu2 %v1954_v14  ;;  %v1370_v39 = vld [vmem:[%s2737_s0 + $0x28] sm:$0xf0]  ;;  %v1972_v49 = vld [vmem:[%s2735_s1 + $0x130] sm:$0xff]  ;;  %v1882_v57 = vld [vmem:[%s2737_s0 + $0x5c] sm:$0xf0] }
  0x11   :  { %1064 = vmatpush.bf16.msra.mxu3 %v1962_v15  ;;  %v1373_v45 = vor.u32 %v1871_v38, %v1370_v39  ;;  %v1996_v50 = vld [vmem:[%s2735_s1 + $0x1f0] sm:$0xff]  ;;  %v1987_v52 = vld [vmem:[%s2735_s1 + $0x1a8] sm:$0xff]  ;;  %v1878_v58 = vld [vmem:[%s2737_s0 + $0x44] sm:$0xf]  ;;  %v1393_v0 = vor.u32 %v1882_v57, %v1392_v56 }
  0x12   :  { %918 = vmatpush.bf16.msra.mxu0 %v1937_v16  ;;  %v1980_v51 = vld [vmem:[%s2735_s1 + $0x170] sm:$0xff]  ;;  %v1971_v53 = vld [vmem:[%s2735_s1 + $0x128] sm:$0xff]  ;;  %v1394_v59 = vld [vmem:[%s2737_s0 + $0x60] sm:$0xf0] }
  0x13   :  { %967 = vmatpush.bf16.msra.mxu1 %v1945_v17  ;;  %v1995_v54 = vld [vmem:[%s2735_s1 + $0x1e8] sm:$0xff]  ;;  %v1397_v1 = vor.u32 %v1878_v58, %v1394_v59  ;;  %v1986_v4 = vld [vmem:[%s2735_s1 + $0x1a0] sm:$0xff]  ;;  %v1984_v36 = vld [vmem:[%s2735_s1 + $0x190] sm:$0xff] }
  0x14   :  { %1016 = vmatpush.bf16.msra.mxu2 %v1953_v18  ;;  %v1979_v55 = vld [vmem:[%s2735_s1 + $0x168] sm:$0xff]  ;;  %v1970_v5 = vld [vmem:[%s2735_s1 + $0x120] sm:$0xff]  ;;  %v1968_v37 = vld [vmem:[%s2735_s1 + $0x110] sm:$0xff] }
  0x15   :  { %1065 = vmatpush.bf16.msra.mxu3 %v1961_v19  ;;  %v1400_v60 = vld [vmem:[%s2737_s0 + $0x48] sm:$0xf]  ;;  %v1879_v62 = vld [vmem:[%s2737_s0 + $0x4c] sm:$0xf]  ;;  %v1994_v6 = vld [vmem:[%s2735_s1 + $0x1e0] sm:$0xff] }
  0x16   :  { %919 = vmatpush.bf16.msra.mxu0 %v1936_v20  ;;  %v1883_v61 = vld [vmem:[%s2737_s0 + $0x64] sm:$0xf0]  ;;  %v1402_v63 = vld [vmem:[%s2737_s0 + $0x68] sm:$0xf0]  ;;  %v1978_v7 = vld [vmem:[%s2735_s1 + $0x160] sm:$0xff] }
  0x17   :  { %968 = vmatpush.bf16.msra.mxu1 %v1944_v21  ;;  %v1401_v2 = vor.u32 %v1883_v61, %v1400_v60  ;;  %v1405_v3 = vor.u32 %v1879_v62, %v1402_v63  ;;  %v1424_v8 = vld [vmem:[%s2737_s0 + $0x80] sm:$0xf]  ;;  %v1886_v10 = vld [vmem:[%s2737_s0 + $0x84] sm:$0xf]  ;;  %v1432_v12 = vld [vmem:[%s2737_s0 + $0x88] sm:$0xf] }
  0x18   :  { %1017 = vmatpush.bf16.msra.mxu2 %v1952_v22  ;;  %v1890_v9 = vld [vmem:[%s2737_s0 + $0x9c] sm:$0xf0]  ;;  %v1426_v11 = vld [vmem:[%s2737_s0 + $0xa0] sm:$0xf0]  ;;  %v1891_v13 = vld [vmem:[%s2737_s0 + $0xa4] sm:$0xf0] }
  0x19   :  { %1066 = vmatpush.bf16.msra.mxu3 %v1960_v23  ;;  %v1887_v14 = vld [vmem:[%s2737_s0 + $0x8c] sm:$0xf]  ;;  %v1425_v16 = vor.u32 %v1890_v9, %v1424_v8  ;;  %v1429_v17 = vor.u32 %v1886_v10, %v1426_v11  ;;  %v1433_v18 = vor.u32 %v1891_v13, %v1432_v12  ;;  %v1985_v20 = vld [vmem:[%s2735_s1 + $0x198] sm:$0xff]  ;;  %v1992_v38 = vld [vmem:[%s2735_s1 + $0x1d0] sm:$0xff] }
  0x1a   :  { %920 = vmatpush.bf16.msra.mxu0 %v1935_v24  ;;  %v1434_v15 = vld [vmem:[%s2737_s0 + $0xa8] sm:$0xf0]  ;;  %v1969_v21 = vld [vmem:[%s2735_s1 + $0x118] sm:$0xff]  ;;  %v1456_v24 = vld [vmem:[%s2737_s0 + $0xc0] sm:$0xf] }
  0x1b   :  { %969 = vmatpush.bf16.msra.mxu1 %v1943_v25  ;;  %v1437_v19 = vor.u32 %v1887_v14, %v1434_v15  ;;  %v1993_v22 = vld [vmem:[%s2735_s1 + $0x1d8] sm:$0xff]  ;;  %v1898_v25 = vld [vmem:[%s2737_s0 + $0xdc] sm:$0xf0]  ;;  %v1976_v39 = vld [vmem:[%s2735_s1 + $0x150] sm:$0xff] }
  0x1c   :  { %1018 = vmatpush.bf16.msra.mxu2 %v1951_v26  ;;  %v1977_v23 = vld [vmem:[%s2735_s1 + $0x158] sm:$0xff]  ;;  %v1894_v26 = vld [vmem:[%s2737_s0 + $0xc4] sm:$0xf]  ;;  %v1457_v32 = vor.u32 %v1898_v25, %v1456_v24  ;;  %v1520_v56 = vld [vmem:[%s2737_s0 + $0x140] sm:$0xf] }
  0x1d   :  { %1067 = vmatpush.bf16.msra.mxu3 %v1959_v27  ;;  %v1458_v27 = vld [vmem:[%s2737_s0 + $0xe0] sm:$0xf0]  ;;  %v1914_v57 = vld [vmem:[%s2737_s0 + $0x15c] sm:$0xf0]  ;;  %v1528_v60 = vld [vmem:[%s2737_s0 + $0x148] sm:$0xf] }
  0x1e   :  { %921 = vmatpush.bf16.msra.mxu0 %v1934_v28  ;;  %v1464_v28 = vld [vmem:[%s2737_s0 + $0xc8] sm:$0xf]  ;;  %v1461_v33 = vor.u32 %v1894_v26, %v1458_v27  ;;  %v1910_v58 = vld [vmem:[%s2737_s0 + $0x144] sm:$0xf]  ;;  %v1911_v62 = vld [vmem:[%s2737_s0 + $0x14c] sm:$0xf] }
  0x1f   :  { %970 = vmatpush.bf16.msra.mxu1 %v1942_v29  ;;  %v1899_v29 = vld [vmem:[%s2737_s0 + $0xe4] sm:$0xf0]  ;;  %v1522_v59 = vld [vmem:[%s2737_s0 + $0x160] sm:$0xf0]  ;;  %v1530_v63 = vld [vmem:[%s2737_s0 + $0x168] sm:$0xf0] }
  0x20   :  { %1019 = vmatpush.bf16.msra.mxu2 %v1950_v30  ;;  %v1895_v30 = vld [vmem:[%s2737_s0 + $0xcc] sm:$0xf]  ;;  %v1465_v34 = vor.u32 %v1899_v29, %v1464_v28  ;;  %v1915_v61 = vld [vmem:[%s2737_s0 + $0x164] sm:$0xf0]  ;;  %v1552_v8 = vld [vmem:[%s2737_s0 + $0x180] sm:$0xf] }
  0x21   :  { %1068 = vmatpush.bf16.msra.mxu3 %v1958_v31  ;;  %922 = vmatmul.bf16.vlgmr.msra.gmra.mxu0 %v1361_v42  ;;  %v1466_v31 = vld [vmem:[%s2737_s0 + $0xe8] sm:$0xf0]  ;;  %v1902_v42 = vld [vmem:[%s2737_s0 + $0x104] sm:$0xf]  ;;  %v1922_v9 = vld [vmem:[%s2737_s0 + $0x19c] sm:$0xf0] }
  0x22   :  { %1110 = vmatpush.bf16.msrb.mxu0 %v1973_v41  ;;  %971 = vmatmul.bf16.vlgmr.msra.gmra.mxu1 %v1365_v43  ;;  %v1469_v35 = vor.u32 %v1895_v30, %v1466_v31  ;;  %v1906_v41 = vld [vmem:[%s2737_s0 + $0x11c] sm:$0xf0]  ;;  %v1490_v43 = vld [vmem:[%s2737_s0 + $0x120] sm:$0xf0]  ;;  %v1560_v12 = vld [vmem:[%s2737_s0 + $0x188] sm:$0xf] }
  0x23   :  { %1020 = vmatmul.bf16.vlgmr.msra.gmra.mxu2 %v1369_v44  ;;  %1159 = vmatpush.bf16.msrb.mxu1 %v1981_v47  ;;  %v1496_v44 = vld [vmem:[%s2737_s0 + $0x108] sm:$0xf]  ;;  %v1498_v47 = vld [vmem:[%s2737_s0 + $0x128] sm:$0xf0]  ;;  %v1918_v10 = vld [vmem:[%s2737_s0 + $0x184] sm:$0xf] }
  0x24   :  { %1208 = vmatpush.bf16.msrb.mxu2 %v1989_v40  ;;  %1069 = vmatmul.bf16.vlgmr.msra.gmra.mxu3 %v1373_v45  ;;  %v1488_v40 = vld [vmem:[%s2737_s0 + $0x100] sm:$0xf]  ;;  %v1907_v45 = vld [vmem:[%s2737_s0 + $0x124] sm:$0xf0]  ;;  %v1554_v11 = vld [vmem:[%s2737_s0 + $0x1a0] sm:$0xf0] }
  0x25   :  { %1257 = vmatpush.bf16.msrb.mxu3 %v1997_v46  ;;  %v1903_v46 = vld [vmem:[%s2737_s0 + $0x10c] sm:$0xf]  ;;  %v1923_v13 = vld [vmem:[%s2737_s0 + $0x1a4] sm:$0xf0] }
  0x26   :  { %1111 = vmatpush.bf16.msrb.mxu0 %v1972_v49  ;;  %v1493_v49 = vor.u32 %v1902_v42, %v1490_v43  ;;  %v1919_v14 = vld [vmem:[%s2737_s0 + $0x18c] sm:$0xf]  ;;  %v1592_v24 = vld [vmem:[%s2737_s0 + $0x1c8] sm:$0xf] }
  0x27   :  { %1160 = vmatpush.bf16.msrb.mxu1 %v1980_v51  ;;  %v1501_v51 = vor.u32 %v1903_v46, %v1498_v47  ;;  %v1562_v15 = vld [vmem:[%s2737_s0 + $0x1a8] sm:$0xf0]  ;;  %v1931_v25 = vld [vmem:[%s2737_s0 + $0x1e4] sm:$0xf0] }
  0x28   :  { %1209 = vmatpush.bf16.msrb.mxu2 %v1988_v48  ;;  %v1489_v48 = vor.u32 %v1906_v41, %v1488_v40  ;;  %v1927_v26 = vld [vmem:[%s2737_s0 + $0x1cc] sm:$0xf]  ;;  %v1593_v30 = vor.u32 %v1931_v25, %v1592_v24  ;;  %v1386_v40 = vld [vmem:[%s2737_s0 + $0x38] sm:$0xf0]  ;;  %v1442_v24 = vld [vmem:[%s2737_s0 + $0xb0] sm:$0xf0] }
  0x29   :  { %1258 = vmatpush.bf16.msrb.mxu3 %v1996_v50  ;;  %v1497_v50 = vor.u32 %v1907_v45, %v1496_v44  ;;  %v1594_v27 = vld [vmem:[%s2737_s0 + $0x1e8] sm:$0xf0]  ;;  %v1448_v25 = vld [vmem:[%s2737_s0 + $0x98] sm:$0xf] }
  0x2a   :  { %1112 = vmatpush.bf16.msrb.mxu0 %v1971_v53  ;;  %v1967_v53 = vld [vmem:[%s2735_s1 + $0x108] sm:$0xff]  ;;  %v1597_v31 = vor.u32 %v1927_v26, %v1594_v27  ;;  %v1893_v26 = vld [vmem:[%s2737_s0 + $0xb4] sm:$0xf0]  ;;  %v1889_v27 = vld [vmem:[%s2737_s0 + $0x9c] sm:$0xf] }
  0x2b   :  { %1161 = vmatpush.bf16.msrb.mxu1 %v1979_v55  ;;  %v1975_v55 = vld [vmem:[%s2735_s1 + $0x148] sm:$0xff] }
  0x2c   :  { %1210 = vmatpush.bf16.msrb.mxu2 %v1987_v52  ;;  %v1983_v52 = vld [vmem:[%s2735_s1 + $0x188] sm:$0xff] }
  0x2d   :  { %1259 = vmatpush.bf16.msrb.mxu3 %v1995_v54  ;;  %v1991_v54 = vld [vmem:[%s2735_s1 + $0x1c8] sm:$0xff] }
  0x2e   :  { %1113 = vmatpush.bf16.msrb.mxu0 %v1970_v5  ;;  %v1966_v5 = vld [vmem:[%s2735_s1 + $0x100] sm:$0xff] }
  0x2f   :  { %1162 = vmatpush.bf16.msrb.mxu1 %v1978_v7  ;;  %v1974_v7 = vld [vmem:[%s2735_s1 + $0x140] sm:$0xff] }
  0x30   :  { %1211 = vmatpush.bf16.msrb.mxu2 %v1986_v4  ;;  %v1982_v4 = vld [vmem:[%s2735_s1 + $0x180] sm:$0xff] }
  0x31   :  { %927 = vmatmul.bf16.gmra.mxu0 %v1393_v0  ;;  %1260 = vmatpush.bf16.msrb.mxu3 %v1994_v6  ;;  %v1521_v0 = vor.u32 %v1914_v57, %v1520_v56  ;;  %v1990_v6 = vld [vmem:[%s2735_s1 + $0x1c0] sm:$0xff]  ;;  %v1408_v57 = vld [vmem:[%s2737_s0 + $0x50] sm:$0xf] }
  0x32   :  { %976 = vmatmul.bf16.gmra.mxu1 %v1397_v1  ;;  %1114 = vmatpush.bf16.msrb.mxu0 %v1969_v21  ;;  %v1525_v1 = vor.u32 %v1910_v58, %v1522_v59  ;;  %v1930_v21 = vld [vmem:[%s2737_s0 + $0x1dc] sm:$0xf0]  ;;  %v1884_v58 = vld [vmem:[%s2737_s0 + $0x6c] sm:$0xf0]  ;;  %v1880_v59 = vld [vmem:[%s2737_s0 + $0x54] sm:$0xf] }
  0x33   :  { %1025 = vmatmul.bf16.gmra.mxu2 %v1401_v2  ;;  %1163 = vmatpush.bf16.msrb.mxu1 %v1977_v23  ;;  %v1529_v2 = vor.u32 %v1915_v61, %v1528_v60  ;;  %v1586_v23 = vld [vmem:[%s2737_s0 + $0x1e0] sm:$0xf0]  ;;  %v1410_v60 = vld [vmem:[%s2737_s0 + $0x70] sm:$0xf0]  ;;  %v1416_v61 = vld [vmem:[%s2737_s0 + $0x58] sm:$0xf] }
  0x34   :  { %1074 = vmatmul.bf16.gmra.mxu3 %v1405_v3  ;;  %1212 = vmatpush.bf16.msrb.mxu2 %v1985_v20  ;;  %v1533_v3 = vor.u32 %v1911_v62, %v1530_v63  ;;  %v1584_v20 = vld [vmem:[%s2737_s0 + $0x1c0] sm:$0xf]  ;;  %v1885_v62 = vld [vmem:[%s2737_s0 + $0x74] sm:$0xf0]  ;;  %v1881_v63 = vld [vmem:[%s2737_s0 + $0x5c] sm:$0xf] }
  0x35   :  { %1261 = vmatpush.bf16.msrb.mxu3 %v1993_v22  ;;  %v1926_v22 = vld [vmem:[%s2737_s0 + $0x1c4] sm:$0xf]  ;;  %v1585_v28 = vor.u32 %v1930_v21, %v1584_v20  ;;  %v1440_v21 = vld [vmem:[%s2737_s0 + $0x90] sm:$0xf] }
  0x36   :  { %1115 = vmatpush.bf16.msrb.mxu0 %v1968_v37  ;;  %v1589_v29 = vor.u32 %v1926_v22, %v1586_v23  ;;  %v1384_v37 = vld [vmem:[%s2737_s0 + $0x18] sm:$0xf]  ;;  %v1892_v22 = vld [vmem:[%s2737_s0 + $0xac] sm:$0xf0]  ;;  %v1888_v23 = vld [vmem:[%s2737_s0 + $0x94] sm:$0xf] }
  0x37   :  { %1164 = vmatpush.bf16.msrb.mxu1 %v1976_v39  ;;  %v1873_v39 = vld [vmem:[%s2737_s0 + $0x1c] sm:$0xf] }
  0x38   :  { %1213 = vmatpush.bf16.msrb.mxu2 %v1984_v36  ;;  %v1378_v36 = vld [vmem:[%s2737_s0 + $0x30] sm:$0xf0]  ;;  %v1389_v46 = vor.u32 %v1873_v39, %v1386_v40 }
  0x39   :  { %1262 = vmatpush.bf16.msrb.mxu3 %v1992_v38  ;;  %v1877_v38 = vld [vmem:[%s2737_s0 + $0x34] sm:$0xf0] }
  0x3a   :  { %1116 = vmatpush.bf16.msrb.mxu0 %v1967_v53  ;;  %v1385_v45 = vor.u32 %v1877_v38, %v1384_v37  ;;  %v1449_v37 = vor.u32 %v1893_v26, %v1448_v25 }
  0x3b   :  { %1165 = vmatpush.bf16.msrb.mxu1 %v1975_v55 }
  0x3c   :  { %1214 = vmatpush.bf16.msrb.mxu2 %v1983_v52 }
  0x3d   :  { %1263 = vmatpush.bf16.msrb.mxu3 %v1991_v54 }
  0x3e   :  { %1117 = vmatpush.bf16.msrb.mxu0 %v1966_v5 }
  0x3f   :  { %1166 = vmatpush.bf16.msrb.mxu1 %v1974_v7 }
  0x40   :  { %1215 = vmatpush.bf16.msrb.mxu2 %v1982_v4  ;;  %v1413_v4 = vor.u32 %v1880_v59, %v1410_v60 }
  0x41   :  { %932 = vmatmul.bf16.gmra.mxu0 %v1425_v16  ;;  %1264 = vmatpush.bf16.msrb.mxu3 %v1990_v6  ;;  %v1553_v16 = vor.u32 %v1922_v9, %v1552_v8  ;;  %v1417_v8 = vor.u32 %v1885_v62, %v1416_v61 }
  0x42   :  { %981 = vmatmul.bf16.gmra.mxu1 %v1429_v17  ;;  %v1557_v17 = vor.u32 %v1918_v10, %v1554_v11 }
  0x43   :  { %1030 = vmatmul.bf16.gmra.mxu2 %v1433_v18  ;;  %v1561_v18 = vor.u32 %v1923_v13, %v1560_v12 }
  0x44   :  { %1079 = vmatmul.bf16.gmra.mxu3 %v1437_v19  ;;  %v1565_v19 = vor.u32 %v1919_v14, %v1562_v15 }
  0x51   :  { %937 = vmatmul.bf16.gmra.mxu0 %v1457_v32  ;;  %v2453_v32 = vld [vmem:[%s2736_s2] ss:$0 sm:$0xff] }
  0x52   :  { %986 = vmatmul.bf16.gmra.mxu1 %v1461_v33  ;;  %v1376_v33 = vld [vmem:[%s2737_s0 + $0x10] sm:$0xf] }
  0x53   :  { %1035 = vmatmul.bf16.gmra.mxu2 %v1465_v34  ;;  %v1876_v34 = vld [vmem:[%s2737_s0 + $0x2c] sm:$0xf0] }
  0x54   :  { %1084 = vmatmul.bf16.gmra.mxu3 %v1469_v35  ;;  %v1872_v35 = vld [vmem:[%s2737_s0 + $0x14] sm:$0xf]  ;;  %v1377_v41 = vor.u32 %v1876_v34, %v1376_v33  ;;  %v1445_v33 = vor.u32 %v1888_v23, %v1442_v24  ;;  %v1905_v23 = vld [vmem:[%s2737_s0 + $0x11c] sm:$0xf] }
  0x55   :  { %v1381_v42 = vor.u32 %v1872_v35, %v1378_v36  ;;  %v1514_v24 = vld [vmem:[%s2737_s0 + $0x138] sm:$0xf0] }
  0x61   :  { %942 = vmatmul.bf16.gmra.mxu0 %v1489_v48 }
  0x62   :  { %991 = vmatmul.bf16.gmra.mxu1 %v1493_v49 }
  0x63   :  { %1040 = vmatmul.bf16.gmra.mxu2 %v1497_v50 }
  0x64   :  { %1089 = vmatmul.bf16.gmra.mxu3 %v1501_v51 }
  0x71   :  { %947 = vmatmul.bf16.gmra.mxu0 %v1521_v0  ;;  %v1418_v0 = vld [vmem:[%s2737_s0 + $0x78] sm:$0xf0] }
  0x72   :  { %996 = vmatmul.bf16.gmra.mxu1 %v1525_v1  ;;  %v1421_v9 = vor.u32 %v1881_v63, %v1418_v0 }
  0x73   :  { %1045 = vmatmul.bf16.gmra.mxu2 %v1529_v2 }
  0x74   :  { %1094 = vmatmul.bf16.gmra.mxu3 %v1533_v3  ;;  %v1409_v3 = vor.u32 %v1884_v58, %v1408_v57  ;;  %v1897_v57 = vld [vmem:[%s2737_s0 + $0xdc] sm:$0xf] }
  0x75   :  { %v1482_v58 = vld [vmem:[%s2737_s0 + $0xf8] sm:$0xf0] }
  0x81   :  { %952 = vmatmul.bf16.gmra.mxu0 %v1553_v16 }
  0x82   :  { %1001 = vmatmul.bf16.gmra.mxu1 %v1557_v17 }
  0x83   :  { %1050 = vmatmul.bf16.gmra.mxu2 %v1561_v18 }
  0x84   :  { %1099 = vmatmul.bf16.gmra.mxu3 %v1565_v19 }
  0x91   :  { %957 = vmatmul.bf16.gmra.mxu0 %v1585_v28  ;;  %v1450_v28 = vld [vmem:[%s2737_s0 + $0xb8] sm:$0xf0] }
  0x92   :  { %1006 = vmatmul.bf16.gmra.mxu1 %v1589_v29  ;;  %v1453_v38 = vor.u32 %v1889_v27, %v1450_v28 }
  0x93   :  { %1055 = vmatmul.bf16.gmra.mxu2 %v1593_v30 }
  0x94   :  { %1104 = vmatmul.bf16.gmra.mxu3 %v1597_v31  ;;  %v1441_v31 = vor.u32 %v1892_v22, %v1440_v21  ;;  %v1512_v21 = vld [vmem:[%s2737_s0 + $0x118] sm:$0xf] }
  0x95   :  { %v1909_v22 = vld [vmem:[%s2737_s0 + $0x134] sm:$0xf0] }
  0x9e   :  { %v923_v43 = vpop.f32.mrf.mxu0 }
  0x9f   :  { %v972_v44 = vpop.f32.mrf.mxu1  ;;  %v924_v47 = vadd.f32 %v2453_v32, %v923_v43 }
  0xa1   :  { %v973_v48 = vadd.f32 %v972_v44, %v924_v47  ;;  %1118 = vmatmul.bf16.vlgmr.msrb.gmra.mxu0 %v1377_v41 }
  0xa2   :  { %1167 = vmatmul.bf16.vlgmr.msrb.gmra.mxu1 %v1381_v42 }
  0xa3   :  { %1216 = vmatmul.bf16.vlgmr.msrb.gmra.mxu2 %v1385_v45 }
  0xa4   :  { %1265 = vmatmul.bf16.vlgmr.msrb.gmra.mxu3 %v1389_v46 }
  0xa6   :  { %v1021_v49 = vpop.f32.mrf.mxu2  ;;  %v925_v52 = vpop.f32.mrf.mxu0 }
  0xa7   :  { %v1070_v50 = vpop.f32.mrf.mxu3  ;;  %v1022_v51 = vadd.f32 %v1021_v49, %v973_v48  ;;  %v974_v53 = vpop.f32.mrf.mxu1  ;;  %v926_v54 = vadd.f32 %v2453_v32, %v925_v52  ;;  %v1896_v52 = vld [vmem:[%s2737_s0 + $0xd4] sm:$0xf] }
  0xa9   :  { %v2481_v55 = vadd.f32 %v1070_v50, %v1022_v51  ;;  %v975_v56 = vadd.f32 %v974_v53, %v926_v54  ;;  %v1472_v50 = vld [vmem:[%s2737_s0 + $0xd0] sm:$0xf]  ;;  %v1474_v53 = vld [vmem:[%s2737_s0 + $0xf0] sm:$0xf0]  ;;  %v1480_v54 = vld [vmem:[%s2737_s0 + $0xd8] sm:$0xf] }
  0xaa   :  { %v1900_v51 = vld [vmem:[%s2737_s0 + $0xec] sm:$0xf0]  ;;  %v1477_v62 = vor.u32 %v1896_v52, %v1474_v53  ;;  %v1544_v52 = vld [vmem:[%s2737_s0 + $0x158] sm:$0xf] }
  0xab   :  { %v1473_v61 = vor.u32 %v1900_v51, %v1472_v50  ;;  %v1912_v50 = vld [vmem:[%s2737_s0 + $0x154] sm:$0xf]  ;;  %v1917_v53 = vld [vmem:[%s2737_s0 + $0x174] sm:$0xf0] }
  0xac   :  { %v1538_v51 = vld [vmem:[%s2737_s0 + $0x170] sm:$0xf0] }
  0xae   :  { %v1023_v1 = vpop.f32.mrf.mxu2  ;;  %v928_v6 = vpop.f32.mrf.mxu0 }
  0xaf   :  { %v1072_v2 = vpop.f32.mrf.mxu3  ;;  %v1024_v5 = vadd.f32 %v1023_v1, %v975_v56  ;;  %v977_v7 = vpop.f32.mrf.mxu1  ;;  %v929_v10 = vadd.f32 %v2453_v32, %v928_v6  ;;  %v1901_v56 = vld [vmem:[%s2737_s0 + $0xf4] sm:$0xf0] }
  0xb1   :  { %v2508_v11 = vadd.f32 %v1072_v2, %v1024_v5  ;;  %v978_v12 = vadd.f32 %v977_v7, %v929_v10  ;;  %1123 = vmatmul.bf16.gmra.mxu0 %v1409_v3  ;;  %v1481_v2 = vor.u32 %v1901_v56, %v1480_v54  ;;  %v1485_v3 = vor.u32 %v1897_v57, %v1482_v58  ;;  %v1913_v54 = vld [vmem:[%s2737_s0 + $0x15c] sm:$0xf] }
  0xb2   :  { %1172 = vmatmul.bf16.gmra.mxu1 %v1413_v4  ;;  %v1546_v56 = vld [vmem:[%s2737_s0 + $0x178] sm:$0xf0] }
  0xb3   :  { %1221 = vmatmul.bf16.gmra.mxu2 %v1417_v8 }
  0xb4   :  { %1270 = vmatmul.bf16.gmra.mxu3 %v1421_v9 }
  0xb6   :  { %v1026_v13 = vpop.f32.mrf.mxu2  ;;  %v930_v16 = vpop.f32.mrf.mxu0 }
  0xb7   :  { %v1075_v14 = vpop.f32.mrf.mxu3  ;;  %v1027_v15 = vadd.f32 %v1026_v13, %v978_v12  ;;  %v979_v17 = vpop.f32.mrf.mxu1  ;;  %v931_v18 = vadd.f32 %v2453_v32, %v930_v16  ;;  %v1504_v16 = vld [vmem:[%s2737_s0 + $0x110] sm:$0xf] }
  0xb9   :  { %v2511_v19 = vadd.f32 %v1075_v14, %v1027_v15  ;;  %v980_v20 = vadd.f32 %v979_v17, %v931_v18  ;;  %v1908_v17 = vld [vmem:[%s2737_s0 + $0x12c] sm:$0xf0]  ;;  %v1904_v18 = vld [vmem:[%s2737_s0 + $0x114] sm:$0xf] }
  0xba   :  { %v1505_v27 = vor.u32 %v1908_v17, %v1504_v16  ;;  %v1568_v16 = vld [vmem:[%s2737_s0 + $0x190] sm:$0xf] }
  0xbb   :  { %v1924_v17 = vld [vmem:[%s2737_s0 + $0x1ac] sm:$0xf0] }
  0xbe   :  { %v1028_v29 = vpop.f32.mrf.mxu2  ;;  %v933_v35 = vpop.f32.mrf.mxu0 }
  0xbf   :  { %v1077_v30 = vpop.f32.mrf.mxu3  ;;  %v1029_v34 = vadd.f32 %v1028_v29, %v980_v20  ;;  %v982_v36 = vpop.f32.mrf.mxu1  ;;  %v934_v39 = vadd.f32 %v2453_v32, %v933_v35  ;;  %v1506_v20 = vld [vmem:[%s2737_s0 + $0x130] sm:$0xf0] }
  0xc0   :  { %v1509_v28 = vor.u32 %v1904_v18, %v1506_v20  ;;  %v1920_v18 = vld [vmem:[%s2737_s0 + $0x194] sm:$0xf] }
  0xc1   :  { %v2538_v40 = vadd.f32 %v1077_v30, %v1029_v34  ;;  %v983_v41 = vadd.f32 %v982_v36, %v934_v39  ;;  %1128 = vmatmul.bf16.gmra.mxu0 %v1441_v31  ;;  %v1517_v34 = vor.u32 %v1905_v23, %v1514_v24  ;;  %v1570_v20 = vld [vmem:[%s2737_s0 + $0x1b0] sm:$0xf0]  ;;  %v1921_v23 = vld [vmem:[%s2737_s0 + $0x19c] sm:$0xf] }
  0xc2   :  { %1177 = vmatmul.bf16.gmra.mxu1 %v1445_v33  ;;  %v1513_v33 = vor.u32 %v1909_v22, %v1512_v21  ;;  %v1576_v21 = vld [vmem:[%s2737_s0 + $0x198] sm:$0xf]  ;;  %v1578_v24 = vld [vmem:[%s2737_s0 + $0x1b8] sm:$0xf0] }
  0xc3   :  { %1226 = vmatmul.bf16.gmra.mxu2 %v1449_v37  ;;  %v1925_v22 = vld [vmem:[%s2737_s0 + $0x1b4] sm:$0xf0] }
  0xc4   :  { %1275 = vmatmul.bf16.gmra.mxu3 %v1453_v38 }
  0xc6   :  { %v1031_v42 = vpop.f32.mrf.mxu2  ;;  %v935_v45 = vpop.f32.mrf.mxu0 }
  0xc7   :  { %v1080_v43 = vpop.f32.mrf.mxu3  ;;  %v1032_v44 = vadd.f32 %v1031_v42, %v983_v41  ;;  %v984_v46 = vpop.f32.mrf.mxu1  ;;  %v936_v47 = vadd.f32 %v2453_v32, %v935_v45 }
  0xc9   :  { %v2541_v48 = vadd.f32 %v1080_v43, %v1032_v44  ;;  %v985_v49 = vadd.f32 %v984_v46, %v936_v47  ;;  %v1536_v47 = vld [vmem:[%s2737_s0 + $0x150] sm:$0xf] }
  0xce   :  { %v1033_v59 = vpop.f32.mrf.mxu2  ;;  %v938_v0 = vpop.f32.mrf.mxu0 }
  0xcf   :  { %v1082_v60 = vpop.f32.mrf.mxu3  ;;  %v1034_v63 = vadd.f32 %v1033_v59, %v985_v49  ;;  %v987_v1 = vpop.f32.mrf.mxu1  ;;  %v939_v4 = vadd.f32 %v2453_v32, %v938_v0  ;;  %v1916_v49 = vld [vmem:[%s2737_s0 + $0x16c] sm:$0xf0]  ;;  %v1545_v0 = vor.u32 %v1917_v53, %v1544_v52  ;;  %v1928_v52 = vld [vmem:[%s2737_s0 + $0x1d4] sm:$0xf] }
  0xd0   :  { %v1537_v59 = vor.u32 %v1916_v49, %v1536_v47  ;;  %v1602_v53 = vld [vmem:[%s2737_s0 + $0x1f0] sm:$0xf0] }
  0xd1   :  { %v2568_v5 = vadd.f32 %v1082_v60, %v1034_v63  ;;  %v988_v6 = vadd.f32 %v987_v1, %v939_v4  ;;  %1133 = vmatmul.bf16.gmra.mxu0 %v1473_v61  ;;  %v1541_v60 = vor.u32 %v1912_v50, %v1538_v51  ;;  %v1549_v1 = vor.u32 %v1913_v54, %v1546_v56  ;;  %v1600_v50 = vld [vmem:[%s2737_s0 + $0x1d0] sm:$0xf]  ;;  %v1608_v54 = vld [vmem:[%s2737_s0 + $0x1d8] sm:$0xf] }
  0xd2   :  { %1182 = vmatmul.bf16.gmra.mxu1 %v1477_v62  ;;  %v1932_v51 = vld [vmem:[%s2737_s0 + $0x1ec] sm:$0xf0]  ;;  %v1933_v56 = vld [vmem:[%s2737_s0 + $0x1f4] sm:$0xf0] }
  0xd3   :  { %1231 = vmatmul.bf16.gmra.mxu2 %v1481_v2 }
  0xd4   :  { %1280 = vmatmul.bf16.gmra.mxu3 %v1485_v3 }
  0xd6   :  { %v1036_v7 = vpop.f32.mrf.mxu2  ;;  %v940_v10 = vpop.f32.mrf.mxu0 }
  0xd7   :  { %v1085_v8 = vpop.f32.mrf.mxu3  ;;  %v1037_v9 = vadd.f32 %v1036_v7, %v988_v6  ;;  %v989_v12 = vpop.f32.mrf.mxu1  ;;  %v941_v13 = vadd.f32 %v2453_v32, %v940_v10 }
  0xd9   :  { %v2571_v14 = vadd.f32 %v1085_v8, %v1037_v9  ;;  %v990_v15 = vadd.f32 %v989_v12, %v941_v13 }
  0xde   :  { %v1038_v25 = vpop.f32.mrf.mxu2  ;;  %v943_v30 = vpop.f32.mrf.mxu0 }
  0xdf   :  { %v1087_v26 = vpop.f32.mrf.mxu3  ;;  %v1039_v29 = vadd.f32 %v1038_v25, %v990_v15  ;;  %v992_v31 = vpop.f32.mrf.mxu1  ;;  %v944_v35 = vadd.f32 %v2453_v32, %v943_v30 }
  0xe1   :  { %v2598_v36 = vadd.f32 %v1087_v26, %v1039_v29  ;;  %v993_v37 = vadd.f32 %v992_v31, %v944_v35  ;;  %1138 = vmatmul.bf16.gmra.mxu0 %v1505_v27  ;;  %v1569_v27 = vor.u32 %v1924_v17, %v1568_v16 }
  0xe2   :  { %1187 = vmatmul.bf16.gmra.mxu1 %v1509_v28  ;;  %v1573_v28 = vor.u32 %v1920_v18, %v1570_v20 }
  0xe3   :  { %1236 = vmatmul.bf16.gmra.mxu2 %v1513_v33  ;;  %v1577_v33 = vor.u32 %v1925_v22, %v1576_v21 }
  0xe4   :  { %1285 = vmatmul.bf16.gmra.mxu3 %v1517_v34  ;;  %v1581_v34 = vor.u32 %v1921_v23, %v1578_v24 }
  0xe6   :  { %v1041_v38 = vpop.f32.mrf.mxu2  ;;  %v945_v42 = vpop.f32.mrf.mxu0 }
  0xe7   :  { %v1090_v39 = vpop.f32.mrf.mxu3  ;;  %v1042_v41 = vadd.f32 %v1041_v38, %v993_v37  ;;  %v994_v43 = vpop.f32.mrf.mxu1  ;;  %v946_v44 = vadd.f32 %v2453_v32, %v945_v42 }
  0xe9   :  { %v2601_v45 = vadd.f32 %v1090_v39, %v1042_v41  ;;  %v995_v46 = vadd.f32 %v994_v43, %v946_v44 }
  0xee   :  { %v1043_v57 = vpop.f32.mrf.mxu2  ;;  %v948_v62 = vpop.f32.mrf.mxu0 }
  0xef   :  { %v1092_v58 = vpop.f32.mrf.mxu3  ;;  %v1044_v61 = vadd.f32 %v1043_v57, %v995_v46  ;;  %v997_v63 = vpop.f32.mrf.mxu1  ;;  %v949_v2 = vadd.f32 %v2453_v32, %v948_v62  ;;  %v1929_v57 = vld [vmem:[%s2737_s0 + $0x1dc] sm:$0xf]  ;;  %v1605_v62 = vor.u32 %v1928_v52, %v1602_v53 }
  0xf1   :  { %v2628_v3 = vadd.f32 %v1092_v58, %v1044_v61  ;;  %v998_v4 = vadd.f32 %v997_v63, %v949_v2  ;;  %1143 = vmatmul.bf16.gmra.mxu0 %v1537_v59  ;;  %v1610_v58 = vld [vmem:[%s2737_s0 + $0x1f8] sm:$0xf0]  ;;  %v1601_v61 = vor.u32 %v1932_v51, %v1600_v50  ;;  %v1609_v2 = vor.u32 %v1933_v56, %v1608_v54 }
  0xf2   :  { %1192 = vmatmul.bf16.gmra.mxu1 %v1541_v60 }
  0xf3   :  { %1241 = vmatmul.bf16.gmra.mxu2 %v1545_v0 }
  0xf4   :  { %1290 = vmatmul.bf16.gmra.mxu3 %v1549_v1 }
  0xf6   :  { %v1046_v6 = vpop.f32.mrf.mxu2  ;;  %v950_v9 = vpop.f32.mrf.mxu0 }
  0xf7   :  { %v1095_v7 = vpop.f32.mrf.mxu3  ;;  %v1047_v8 = vadd.f32 %v1046_v6, %v998_v4  ;;  %v999_v10 = vpop.f32.mrf.mxu1  ;;  %v951_v12 = vadd.f32 %v2453_v32, %v950_v9  ;;  %v1613_v4 = vor.u32 %v1929_v57, %v1610_v58 }
  0xf9   :  { %v2631_v13 = vadd.f32 %v1095_v7, %v1047_v8  ;;  %v1000_v15 = vadd.f32 %v999_v10, %v951_v12 }
  0xfe   :  { %v1048_v25 = vpop.f32.mrf.mxu2  ;;  %v953_v30 = vpop.f32.mrf.mxu0 }
  0xff   :  { %v1097_v26 = vpop.f32.mrf.mxu3  ;;  %v1049_v29 = vadd.f32 %v1048_v25, %v1000_v15  ;;  %v1002_v31 = vpop.f32.mrf.mxu1  ;;  %v954_v35 = vadd.f32 %v2453_v32, %v953_v30 }
 0x101   :  { %v2658_v37 = vadd.f32 %v1097_v26, %v1049_v29  ;;  %v1003_v38 = vadd.f32 %v1002_v31, %v954_v35  ;;  %1148 = vmatmul.bf16.gmra.mxu0 %v1569_v27 }
 0x102   :  { %1197 = vmatmul.bf16.gmra.mxu1 %v1573_v28 }
 0x103   :  { %1246 = vmatmul.bf16.gmra.mxu2 %v1577_v33 }
 0x104   :  { %1295 = vmatmul.bf16.gmra.mxu3 %v1581_v34 }
 0x106   :  { %v1051_v39 = vpop.f32.mrf.mxu2  ;;  %v955_v43 = vpop.f32.mrf.mxu0 }
 0x107   :  { %v1100_v41 = vpop.f32.mrf.mxu3  ;;  %v1052_v42 = vadd.f32 %v1051_v39, %v1003_v38  ;;  %v1004_v44 = vpop.f32.mrf.mxu1  ;;  %v956_v46 = vadd.f32 %v2453_v32, %v955_v43 }
 0x109   :  { %v2661_v47 = vadd.f32 %v1100_v41, %v1052_v42  ;;  %v1005_v49 = vadd.f32 %v1004_v44, %v956_v46 }
 0x10e   :  { %v1053_v59 = vpop.f32.mrf.mxu2  ;;  %v958_v0 = vpop.f32.mrf.mxu0 }
 0x10f   :  { %v1102_v60 = vpop.f32.mrf.mxu3  ;;  %v1054_v63 = vadd.f32 %v1053_v59, %v1005_v49  ;;  %v1007_v1 = vpop.f32.mrf.mxu1  ;;  %v959_v6 = vadd.f32 %v2453_v32, %v958_v0 }
 0x111   :  { %v2688_v7 = vadd.f32 %v1102_v60, %v1054_v63  ;;  %v1008_v8 = vadd.f32 %v1007_v1, %v959_v6  ;;  %1153 = vmatmul.bf16.gmra.mxu0 %v1601_v61 }
 0x112   :  { %1202 = vmatmul.bf16.gmra.mxu1 %v1605_v62 }
 0x113   :  { %1251 = vmatmul.bf16.gmra.mxu2 %v1609_v2 }
 0x114   :  { %1300 = vmatmul.bf16.gmra.mxu3 %v1613_v4 }
 0x116   :  { %v1056_v9 = vpop.f32.mrf.mxu2  ;;  %v960_v15 = vpop.f32.mrf.mxu0 }
 0x117   :  { %v1105_v10 = vpop.f32.mrf.mxu3  ;;  %v1057_v12 = vadd.f32 %v1056_v9, %v1008_v8  ;;  %v1009_v16 = vpop.f32.mrf.mxu1  ;;  %v961_v17 = vadd.f32 %v2453_v32, %v960_v15 }
 0x119   :  { %v2691_v18 = vadd.f32 %v1105_v10, %v1057_v12  ;;  %v1010_v20 = vadd.f32 %v1009_v16, %v961_v17 }
 0x11e   :  { %v1058_v21 = vpop.f32.mrf.mxu2  ;;  %v1119_v24 = vpop.f32.mrf.mxu0 }
 0x11f   :  { %v1107_v22 = vpop.f32.mrf.mxu3  ;;  %v1059_v23 = vadd.f32 %v1058_v21, %v1010_v20  ;;  %v1168_v25 = vpop.f32.mrf.mxu1  ;;  %v1120_v27 = vadd.f32 %v1119_v24, %v2481_v55 }
 0x121   :  { %v2693_v26 = vadd.f32 %v1107_v22, %v1059_v23  ;;  %v1169_v33 = vadd.f32 %v1168_v25, %v1120_v27 }
 0x126   :  { %v1217_v28 = vpop.f32.mrf.mxu2  ;;  %v1121_v30 = vpop.f32.mrf.mxu0 }
 0x127   :  { %v1266_v29 = vpop.f32.mrf.mxu3  ;;  %v1170_v31 = vpop.f32.mrf.mxu1  ;;  %v1122_v34 = vadd.f32 %v1121_v30, %v2508_v11  ;;  %v1218_v32 = vadd.f32 %v1217_v28, %v1169_v33 }
 0x129   :  { %v1171_v35 = vadd.f32 %v1170_v31, %v1122_v34  ;;  %v1267_v41 = vadd.f32 %v1266_v29, %v1218_v32 }
 0x12b   :  { %v1306_v49 = vmax.f32 %v1267_v41, 0.0 }
 0x12e   :  { %v1219_v38 = vpop.f32.mrf.mxu2  ;;  %v1124_v43 = vpop.f32.mrf.mxu0 }
 0x12f   :  { %v1268_v39 = vpop.f32.mrf.mxu3  ;;  %v1220_v42 = vadd.f32 %v1219_v38, %v1171_v35  ;;  %v1173_v44 = vpop.f32.mrf.mxu1  ;;  %v1125_v55 = vadd.f32 %v1124_v43, %v2511_v19 }
 0x131   :  { %v1269_v46 = vadd.f32 %v1268_v39, %v1220_v42  ;;  %v1174_v56 = vadd.f32 %v1173_v44, %v1125_v55 }
 0x133   :  { %v1307_v50 = vmax.f32 %v1269_v46, 0.0 }
 0x135   :  { %v2001_v51 = vpack.c.bf16 %v1307_v50, %v1306_v49 }
 0x136   :  { %v1222_v52 = vpop.f32.mrf.mxu2  ;;  %v1126_v11 = vpop.f32.mrf.mxu0 }
 0x137   :  { %v1271_v53 = vpop.f32.mrf.mxu3  ;;  %2002 = vst [vmem:[%s2738_s3] sm:$0xff] %v2001_v51   ;;  %v1175_v54 = vpop.f32.mrf.mxu1  ;;  %v1127_v57 = vadd.f32 %v1126_v11, %v2538_v40  ;;  %v1223_v58 = vadd.f32 %v1222_v52, %v1174_v56 }
 0x139   :  { %v1176_v59 = vadd.f32 %v1175_v54, %v1127_v57  ;;  %v1272_v62 = vadd.f32 %v1271_v53, %v1223_v58 }
 0x13b   :  { %v1308_v2 = vmax.f32 %v1272_v62, 0.0 }
 0x13e   :  { %v1224_v60 = vpop.f32.mrf.mxu2  ;;  %v1129_v0 = vpop.f32.mrf.mxu0 }
 0x13f   :  { %v1273_v61 = vpop.f32.mrf.mxu3  ;;  %v1225_v63 = vadd.f32 %v1224_v60, %v1176_v59  ;;  %v1178_v1 = vpop.f32.mrf.mxu1  ;;  %v1130_v8 = vadd.f32 %v1129_v0, %v2541_v48 }
 0x141   :  { %v1274_v19 = vadd.f32 %v1273_v61, %v1225_v63  ;;  %v1179_v15 = vadd.f32 %v1178_v1, %v1130_v8 }
 0x143   :  { %v1309_v4 = vmax.f32 %v1274_v19, 0.0 }
 0x145   :  { %v2006_v6 = vpack.c.bf16 %v1309_v4, %v1308_v2 }
 0x146   :  { %v1227_v9 = vpop.f32.mrf.mxu2  ;;  %v1131_v40 = vpop.f32.mrf.mxu0 }
 0x147   :  { %v1276_v10 = vpop.f32.mrf.mxu3  ;;  %2038 = vst [vmem:[%s2738_s3 + $0x8] sm:$0xff] %v2006_v6   ;;  %v1180_v12 = vpop.f32.mrf.mxu1  ;;  %v1132_v16 = vadd.f32 %v1131_v40, %v2568_v5  ;;  %v1228_v17 = vadd.f32 %v1227_v9, %v1179_v15 }
 0x149   :  { %v1181_v20 = vadd.f32 %v1180_v12, %v1132_v16  ;;  %v1277_v23 = vadd.f32 %v1276_v10, %v1228_v17 }
 0x14b   :  { %v1310_v28 = vmax.f32 %v1277_v23, 0.0 }
 0x14e   :  { %v1229_v21 = vpop.f32.mrf.mxu2  ;;  %v1134_v25 = vpop.f32.mrf.mxu0 }
 0x14f   :  { %v1278_v22 = vpop.f32.mrf.mxu3  ;;  %v1230_v24 = vadd.f32 %v1229_v21, %v1181_v20  ;;  %v1183_v27 = vpop.f32.mrf.mxu1  ;;  %v1135_v31 = vadd.f32 %v1134_v25, %v2571_v14 }
 0x151   :  { %v1279_v48 = vadd.f32 %v1278_v22, %v1230_v24  ;;  %v1184_v35 = vadd.f32 %v1183_v27, %v1135_v31 }
 0x153   :  { %v1311_v29 = vmax.f32 %v1279_v48, 0.0 }
 0x155   :  { %v2011_v30 = vpack.c.bf16 %v1311_v29, %v1310_v28 }
 0x156   :  { %v1232_v33 = vpop.f32.mrf.mxu2  ;;  %v1136_v5 = vpop.f32.mrf.mxu0 }
 0x157   :  { %v1281_v34 = vpop.f32.mrf.mxu3  ;;  %2039 = vst [vmem:[%s2738_s3 + $0x10] sm:$0xff] %v2011_v30   ;;  %v1185_v32 = vpop.f32.mrf.mxu1  ;;  %v1137_v38 = vadd.f32 %v1136_v5, %v2598_v36  ;;  %v1233_v39 = vadd.f32 %v1232_v33, %v1184_v35 }
 0x159   :  { %v1186_v41 = vadd.f32 %v1185_v32, %v1137_v38  ;;  %v1282_v44 = vadd.f32 %v1281_v34, %v1233_v39 }
 0x15b   :  { %v1312_v51 = vmax.f32 %v1282_v44, 0.0 }
 0x15e   :  { %v1234_v42 = vpop.f32.mrf.mxu2  ;;  %v1139_v49 = vpop.f32.mrf.mxu0 }
 0x15f   :  { %v1283_v43 = vpop.f32.mrf.mxu3  ;;  %v1235_v46 = vadd.f32 %v1234_v42, %v1186_v41  ;;  %v1188_v50 = vpop.f32.mrf.mxu1  ;;  %v1140_v53 = vadd.f32 %v1139_v49, %v2601_v45 }
 0x161   :  { %v1284_v14 = vadd.f32 %v1283_v43, %v1235_v46  ;;  %v1189_v57 = vadd.f32 %v1188_v50, %v1140_v53 }
 0x163   :  { %v1313_v55 = vmax.f32 %v1284_v14, 0.0 }
 0x165   :  { %v2016_v52 = vpack.c.bf16 %v1313_v55, %v1312_v51 }
 0x166   :  { %v1237_v11 = vpop.f32.mrf.mxu2  ;;  %v1141_v36 = vpop.f32.mrf.mxu0 }
 0x167   :  { %v1286_v54 = vpop.f32.mrf.mxu3  ;;  %2040 = vst [vmem:[%s2738_s3 + $0x18] sm:$0xff] %v2016_v52   ;;  %v1190_v56 = vpop.f32.mrf.mxu1  ;;  %v1142_v58 = vadd.f32 %v1141_v36, %v2628_v3  ;;  %v1238_v59 = vadd.f32 %v1237_v11, %v1189_v57 }
 0x169   :  { %v1191_v60 = vadd.f32 %v1190_v56, %v1142_v58  ;;  %v1287_v63 = vadd.f32 %v1286_v54, %v1238_v59 }
 0x16b   :  { %v1314_v2 = vmax.f32 %v1287_v63, 0.0 }
 0x16e   :  { %v1239_v61 = vpop.f32.mrf.mxu2  ;;  %v1144_v1 = vpop.f32.mrf.mxu0 }
 0x16f   :  { %v1288_v62 = vpop.f32.mrf.mxu3  ;;  %v1240_v0 = vadd.f32 %v1239_v61, %v1191_v60  ;;  %v1193_v19 = vpop.f32.mrf.mxu1  ;;  %v1145_v8 = vadd.f32 %v1144_v1, %v2631_v13 }
 0x171   :  { %v1289_v45 = vadd.f32 %v1288_v62, %v1240_v0  ;;  %v1194_v12 = vadd.f32 %v1193_v19, %v1145_v8 }
 0x173   :  { %v1315_v4 = vmax.f32 %v1289_v45, 0.0 }
 0x175   :  { %v2021_v6 = vpack.c.bf16 %v1315_v4, %v1314_v2 }
 0x176   :  { %v1242_v9 = vpop.f32.mrf.mxu2  ;;  %v1146_v3 = vpop.f32.mrf.mxu0 }
 0x177   :  { %v1291_v10 = vpop.f32.mrf.mxu3  ;;  %2041 = vst [vmem:[%s2738_s3 + $0x20] sm:$0xff] %v2021_v6   ;;  %v1195_v40 = vpop.f32.mrf.mxu1  ;;  %v1147_v15 = vadd.f32 %v1146_v3, %v2658_v37  ;;  %v1243_v16 = vadd.f32 %v1242_v9, %v1194_v12 }
 0x179   :  { %v1196_v17 = vadd.f32 %v1195_v40, %v1147_v15  ;;  %v1292_v22 = vadd.f32 %v1291_v10, %v1243_v16 }
 0x17b   :  { %v1316_v27 = vmax.f32 %v1292_v22, 0.0 }
 0x17e   :  { %v1244_v20 = vpop.f32.mrf.mxu2  ;;  %v1149_v24 = vpop.f32.mrf.mxu0 }
 0x17f   :  { %v1293_v21 = vpop.f32.mrf.mxu3  ;;  %v1245_v23 = vadd.f32 %v1244_v20, %v1196_v17  ;;  %v1198_v25 = vpop.f32.mrf.mxu1  ;;  %v1150_v29 = vadd.f32 %v1149_v24, %v2661_v47 }
 0x181   :  { %v1294_v13 = vadd.f32 %v1293_v21, %v1245_v23  ;;  %v1199_v34 = vadd.f32 %v1198_v25, %v1150_v29 }
 0x183   :  { %v1317_v48 = vmax.f32 %v1294_v13, 0.0 }
 0x185   :  { %v2026_v28 = vpack.c.bf16 %v1317_v48, %v1316_v27 }
 0x186   :  { %v1247_v30 = vpop.f32.mrf.mxu2  ;;  %v1151_v37 = vpop.f32.mrf.mxu0 }
 0x187   :  { %v1296_v31 = vpop.f32.mrf.mxu3  ;;  %2042 = vst [vmem:[%s2738_s3 + $0x28] sm:$0xff] %v2026_v28   ;;  %v1200_v33 = vpop.f32.mrf.mxu1  ;;  %v1152_v5 = vadd.f32 %v1151_v37, %v2688_v7  ;;  %v1248_v32 = vadd.f32 %v1247_v30, %v1199_v34 }
 0x189   :  { %v1201_v35 = vadd.f32 %v1200_v33, %v1152_v5  ;;  %v1297_v41 = vadd.f32 %v1296_v31, %v1248_v32 }
 0x18b   :  { %v1318_v46 = vmax.f32 %v1297_v41, 0.0 }
 0x18e   :  { %v1249_v38 = vpop.f32.mrf.mxu2  ;;  %v1154_v43 = vpop.f32.mrf.mxu0 }
 0x18f   :  { %v1298_v39 = vpop.f32.mrf.mxu3  ;;  %v1250_v42 = vadd.f32 %v1249_v38, %v1201_v35  ;;  %v1203_v47 = vpop.f32.mrf.mxu1  ;;  %v1155_v14 = vadd.f32 %v1154_v43, %v2691_v18 }
 0x191   :  { %v1299_v44 = vadd.f32 %v1298_v39, %v1250_v42  ;;  %v1204_v52 = vadd.f32 %v1203_v47, %v1155_v14 }
 0x193   :  { %v1319_v49 = vmax.f32 %v1299_v44, 0.0 }
 0x195   :  { %v2031_v50 = vpack.c.bf16 %v1319_v49, %v1318_v46 }
 0x196   :  { %v1252_v51 = vpop.f32.mrf.mxu2  ;;  %v1156_v7 = vpop.f32.mrf.mxu0 }
 0x197   :  { %v1301_v55 = vpop.f32.mrf.mxu3  ;;  %2043 = vst [vmem:[%s2738_s3 + $0x30] sm:$0xff] %v2031_v50   ;;  %v1157_v53 = vadd.f32 %v1156_v7, %v2693_v26  ;;  %v1253_v11 = vadd.f32 %v1252_v51, %v1204_v52  ;;  %v1205_v54 = vpop.f32.mrf.mxu1 }
 0x199   :  { %v1206_v36 = vadd.f32 %v1205_v54, %v1157_v53  ;;  %v1302_v57 = vadd.f32 %v1301_v55, %v1253_v11 }
 0x19b   :  { %v1320_v61 = vmax.f32 %v1302_v57, 0.0 }
 0x19e   :  { %v1254_v56 = vpop.f32.mrf.mxu2 }
 0x19f   :  { %v1255_v58 = vadd.f32 %v1254_v56, %v1206_v36  ;;  %v1303_v59 = vpop.f32.mrf.mxu3 }
 0x1a1   :  { %v1304_v60 = vadd.f32 %v1303_v59, %v1255_v58 }
 0x1a3   :  { %v1321_v18 = vmax.f32 %v1304_v60, 0.0 }
 0x1a5   :  { %v2036_v62 = vpack.c.bf16 %v1321_v18, %v1320_v61 }
 0x1a7   :  { %2044 = vst [vmem:[%s2738_s3 + $0x38] sm:$0xff] %v2036_v62  }

// kernel: sent_encoder_forward.9
= control target key start
LH: loop header
LB: loop body
LE: loop exit
PB: predicated region body
PF: predicated region fallthrough
CT: control target
= control target key end

     0   :  { %s1761_s1 = inlined_call_operand.vmem [shape: bf16[512,256], index: 1, kind: input, shape index: {}]   ;;  %s1762_s0 = inlined_call_operand.vmem [shape: bf16[64,512], index: 0, kind: input, shape index: {}]   ;;  %s1763_s2 = inlined_call_operand.vmem [shape: f32[1,256], index: 2, kind: input, shape index: {}]   ;;  %s1764_s3 = inlined_call_operand.vmem [shape: bf16[64,256], index: 3, kind: output, shape index: {}]  }
   0x1   :  { %v890_v0 = vld [vmem:[%s1761_s1 + $0x70] sm:$0xf]  ;;  %v1119_v1 = vld [vmem:[%s1761_s1 + $0x74] sm:$0xf0]  ;;  %v882_v11 = vld [vmem:[%s1761_s1 + $0x60] sm:$0xf] }
   0x2   :  { %v954_v2 = vld [vmem:[%s1761_s1 + $0xf0] sm:$0xf]  ;;  %v891_v3 = vor.u32 %v1119_v1, %v890_v0  ;;  %v1135_v4 = vld [vmem:[%s1761_s1 + $0xf4] sm:$0xf0]  ;;  %v1117_v13 = vld [vmem:[%s1761_s1 + $0x64] sm:$0xf0] }
   0x3   :  { %v1018_v5 = vld [vmem:[%s1761_s1 + $0x170] sm:$0xf]  ;;  %v1151_v6 = vld [vmem:[%s1761_s1 + $0x174] sm:$0xf0]  ;;  %v955_v7 = vor.u32 %v1135_v4, %v954_v2  ;;  %v946_v14 = vld [vmem:[%s1761_s1 + $0xe0] sm:$0xf]  ;;  %v883_v16 = vor.u32 %v1117_v13, %v882_v11 }
   0x4   :  { %v1019_v8 = vor.u32 %v1151_v6, %v1018_v5  ;;  %v1082_v9 = vld [vmem:[%s1761_s1 + $0x1f0] sm:$0xf]  ;;  %v1167_v10 = vld [vmem:[%s1761_s1 + $0x1f4] sm:$0xf0]  ;;  %500 = vmatpush.bf16.msra.mxu0 %v891_v3  ;;  %v1133_v15 = vld [vmem:[%s1761_s1 + $0xe4] sm:$0xf0] }
   0x5   :  { %v1083_v12 = vor.u32 %v1167_v10, %v1082_v9  ;;  %529 = vmatpush.bf16.msra.mxu1 %v955_v7  ;;  %v947_v17 = vor.u32 %v1133_v15, %v946_v14  ;;  %v1010_v18 = vld [vmem:[%s1761_s1 + $0x160] sm:$0xf]  ;;  %v1149_v19 = vld [vmem:[%s1761_s1 + $0x164] sm:$0xf0]  ;;  %v874_v23 = vld [vmem:[%s1761_s1 + $0x50] sm:$0xf] }
   0x6   :  { %558 = vmatpush.bf16.msra.mxu2 %v1019_v8  ;;  %v1074_v20 = vld [vmem:[%s1761_s1 + $0x1e0] sm:$0xf]  ;;  %v1011_v21 = vor.u32 %v1149_v19, %v1010_v18  ;;  %v1165_v22 = vld [vmem:[%s1761_s1 + $0x1e4] sm:$0xf0]  ;;  %v1115_v24 = vld [vmem:[%s1761_s1 + $0x54] sm:$0xf0] }
   0x7   :  { %587 = vmatpush.bf16.msra.mxu3 %v1083_v12  ;;  %v1075_v25 = vor.u32 %v1165_v22, %v1074_v20  ;;  %v938_v26 = vld [vmem:[%s1761_s1 + $0xd0] sm:$0xf]  ;;  %v1131_v27 = vld [vmem:[%s1761_s1 + $0xd4] sm:$0xf0]  ;;  %v875_v29 = vor.u32 %v1115_v24, %v874_v23  ;;  %v866_v35 = vld [vmem:[%s1761_s1 + $0x40] sm:$0xf] }
   0x8   :  { %v1002_v28 = vld [vmem:[%s1761_s1 + $0x150] sm:$0xf]  ;;  %501 = vmatpush.bf16.msra.mxu0 %v883_v16  ;;  %v1147_v30 = vld [vmem:[%s1761_s1 + $0x154] sm:$0xf0]  ;;  %v939_v33 = vor.u32 %v1131_v27, %v938_v26  ;;  %v1113_v36 = vld [vmem:[%s1761_s1 + $0x44] sm:$0xf0] }
   0x9   :  { %v1066_v31 = vld [vmem:[%s1761_s1 + $0x1d0] sm:$0xf]  ;;  %v1163_v32 = vld [vmem:[%s1761_s1 + $0x1d4] sm:$0xf0]  ;;  %530 = vmatpush.bf16.msra.mxu1 %v947_v17  ;;  %v1003_v34 = vor.u32 %v1147_v30, %v1002_v28  ;;  %v930_v37 = vld [vmem:[%s1761_s1 + $0xc0] sm:$0xf]  ;;  %v867_v44 = vor.u32 %v1113_v36, %v866_v35 }
   0xa   :  { %559 = vmatpush.bf16.msra.mxu2 %v1011_v21  ;;  %v1067_v38 = vor.u32 %v1163_v32, %v1066_v31  ;;  %v1129_v39 = vld [vmem:[%s1761_s1 + $0xc4] sm:$0xf0]  ;;  %v994_v40 = vld [vmem:[%s1761_s1 + $0x140] sm:$0xf]  ;;  %v858_v47 = vld [vmem:[%s1761_s1 + $0x30] sm:$0xf] }
   0xb   :  { %588 = vmatpush.bf16.msra.mxu3 %v1075_v25  ;;  %v1145_v41 = vld [vmem:[%s1761_s1 + $0x144] sm:$0xf0]  ;;  %v1058_v42 = vld [vmem:[%s1761_s1 + $0x1c0] sm:$0xf]  ;;  %v931_v45 = vor.u32 %v1129_v39, %v930_v37  ;;  %v1111_v48 = vld [vmem:[%s1761_s1 + $0x34] sm:$0xf0] }
   0xc   :  { %v1161_v43 = vld [vmem:[%s1761_s1 + $0x1c4] sm:$0xf0]  ;;  %502 = vmatpush.bf16.msra.mxu0 %v875_v29  ;;  %v995_v46 = vor.u32 %v1145_v41, %v994_v40  ;;  %v922_v49 = vld [vmem:[%s1761_s1 + $0xb0] sm:$0xf]  ;;  %v1127_v51 = vld [vmem:[%s1761_s1 + $0xb4] sm:$0xf0]  ;;  %v859_v56 = vor.u32 %v1111_v48, %v858_v47 }
   0xd   :  { %531 = vmatpush.bf16.msra.mxu1 %v939_v33  ;;  %v1059_v50 = vor.u32 %v1161_v43, %v1058_v42  ;;  %v986_v52 = vld [vmem:[%s1761_s1 + $0x130] sm:$0xf]  ;;  %v1143_v53 = vld [vmem:[%s1761_s1 + $0x134] sm:$0xf0]  ;;  %v923_v57 = vor.u32 %v1127_v51, %v922_v49  ;;  %v850_v59 = vld [vmem:[%s1761_s1 + $0x20] sm:$0xf] }
   0xe   :  { %560 = vmatpush.bf16.msra.mxu2 %v1003_v34  ;;  %v1050_v54 = vld [vmem:[%s1761_s1 + $0x1b0] sm:$0xf]  ;;  %v1159_v55 = vld [vmem:[%s1761_s1 + $0x1b4] sm:$0xf0]  ;;  %v987_v58 = vor.u32 %v1143_v53, %v986_v52  ;;  %v1109_v60 = vld [vmem:[%s1761_s1 + $0x24] sm:$0xf0] }
   0xf   :  { %589 = vmatpush.bf16.msra.mxu3 %v1067_v38  ;;  %v914_v61 = vld [vmem:[%s1761_s1 + $0xa0] sm:$0xf]  ;;  %v1051_v62 = vor.u32 %v1159_v55, %v1050_v54  ;;  %v1125_v63 = vld [vmem:[%s1761_s1 + $0xa4] sm:$0xf0]  ;;  %v851_v4 = vor.u32 %v1109_v60, %v850_v59  ;;  %v842_v7 = vld [vmem:[%s1761_s1 + $0x10] sm:$0xf] }
  0x10   :  { %503 = vmatpush.bf16.msra.mxu0 %v867_v44  ;;  %v978_v0 = vld [vmem:[%s1761_s1 + $0x120] sm:$0xf]  ;;  %v1141_v1 = vld [vmem:[%s1761_s1 + $0x124] sm:$0xf0]  ;;  %v915_v5 = vor.u32 %v1125_v63, %v914_v61  ;;  %v1107_v8 = vld [vmem:[%s1761_s1 + $0x14] sm:$0xf0] }
  0x11   :  { %532 = vmatpush.bf16.msra.mxu1 %v931_v45  ;;  %v1042_v2 = vld [vmem:[%s1761_s1 + $0x1a0] sm:$0xf]  ;;  %v1157_v3 = vld [vmem:[%s1761_s1 + $0x1a4] sm:$0xf0]  ;;  %v979_v6 = vor.u32 %v1141_v1, %v978_v0  ;;  %v906_v9 = vld [vmem:[%s1761_s1 + $0x90] sm:$0xf]  ;;  %v843_v17 = vor.u32 %v1107_v8, %v842_v7 }
  0x12   :  { %561 = vmatpush.bf16.msra.mxu2 %v995_v46  ;;  %v1043_v10 = vor.u32 %v1157_v3, %v1042_v2  ;;  %v1123_v11 = vld [vmem:[%s1761_s1 + $0x94] sm:$0xf0]  ;;  %v970_v12 = vld [vmem:[%s1761_s1 + $0x110] sm:$0xf]  ;;  %v834_v16 = vld [vmem:[%s1761_s1] sm:$0xf] }
  0x13   :  { %590 = vmatpush.bf16.msra.mxu3 %v1059_v50  ;;  %v1139_v13 = vld [vmem:[%s1761_s1 + $0x114] sm:$0xf0]  ;;  %v1034_v14 = vld [vmem:[%s1761_s1 + $0x190] sm:$0xf]  ;;  %v1105_v18 = vld [vmem:[%s1761_s1 + $0x4] sm:$0xf0]  ;;  %v907_v21 = vor.u32 %v1123_v11, %v906_v9 }
  0x14   :  { %504 = vmatpush.bf16.msra.mxu0 %v859_v56  ;;  %v1155_v15 = vld [vmem:[%s1761_s1 + $0x194] sm:$0xf0]  ;;  %v898_v19 = vld [vmem:[%s1761_s1 + $0x80] sm:$0xf]  ;;  %v1121_v20 = vld [vmem:[%s1761_s1 + $0x84] sm:$0xf0]  ;;  %v971_v22 = vor.u32 %v1139_v13, %v970_v12  ;;  %v835_v34 = vor.u32 %v1105_v18, %v834_v16 }
  0x15   :  { %533 = vmatpush.bf16.msra.mxu1 %v923_v57  ;;  %v962_v23 = vld [vmem:[%s1761_s1 + $0x100] sm:$0xf]  ;;  %v1137_v24 = vld [vmem:[%s1761_s1 + $0x104] sm:$0xf0]  ;;  %v1035_v26 = vor.u32 %v1155_v15, %v1034_v14  ;;  %v1090_v29 = vld [vmem:[%s1762_s0 + $0xc] sm:$0xf0]  ;;  %v899_v38 = vor.u32 %v1121_v20, %v898_v19 }
  0x16   :  { %562 = vmatpush.bf16.msra.mxu2 %v987_v58  ;;  %v1026_v25 = vld [vmem:[%s1761_s1 + $0x180] sm:$0xf]  ;;  %v1153_v27 = vld [vmem:[%s1761_s1 + $0x184] sm:$0xf0]  ;;  %v1088_v30 = vld [vmem:[%s1762_s0 + $0x4] sm:$0xf]  ;;  %v963_v39 = vor.u32 %v1137_v24, %v962_v23 }
  0x17   :  { %591 = vmatpush.bf16.msra.mxu3 %v1051_v62  ;;  %v770_v28 = vld [vmem:[%s1762_s0] sm:$0xf]  ;;  %v772_v31 = vld [vmem:[%s1762_s0 + $0x10] sm:$0xf0]  ;;  %v1020_v33 = vld [vmem:[%s1761_s1 + $0x178] sm:$0xf0]  ;;  %v1027_v43 = vor.u32 %v1153_v27, %v1026_v25 }
  0x18   :  { %505 = vmatpush.bf16.msra.mxu0 %v851_v4  ;;  %v1150_v32 = vld [vmem:[%s1761_s1 + $0x174] sm:$0xf]  ;;  %v778_v35 = vld [vmem:[%s1762_s0 + $0x8] sm:$0xf]  ;;  %v1084_v37 = vld [vmem:[%s1761_s1 + $0x1f8] sm:$0xf0]  ;;  %v1425_v48 = vor.u32 %v1090_v29, %v770_v28  ;;  %v1436_v53 = vor.u32 %v1088_v30, %v772_v31 }
  0x19   :  { %534 = vmatpush.bf16.msra.mxu1 %v915_v5  ;;  %v1166_v36 = vld [vmem:[%s1761_s1 + $0x1f4] sm:$0xf]  ;;  %v1091_v40 = vld [vmem:[%s1762_s0 + $0x14] sm:$0xf0]  ;;  %v1089_v41 = vld [vmem:[%s1762_s0 + $0xc] sm:$0xf]  ;;  %v1023_v44 = vor.u32 %v1150_v32, %v1020_v33 }
  0x1a   :  { %563 = vmatpush.bf16.msra.mxu2 %v979_v6  ;;  %v780_v42 = vld [vmem:[%s1762_s0 + $0x18] sm:$0xf0]  ;;  %v1118_v45 = vld [vmem:[%s1761_s1 + $0x74] sm:$0xf]  ;;  %v1087_v49 = vor.u32 %v1166_v36, %v1084_v37  ;;  %v1148_v51 = vld [vmem:[%s1761_s1 + $0x164] sm:$0xf]  ;;  %v1438_v54 = vor.u32 %v1091_v40, %v778_v35 }
  0x1b   :  { %592 = vmatpush.bf16.msra.mxu3 %v1043_v10  ;;  %v892_v46 = vld [vmem:[%s1761_s1 + $0x78] sm:$0xf0]  ;;  %v1134_v47 = vld [vmem:[%s1761_s1 + $0xf4] sm:$0xf]  ;;  %v1012_v52 = vld [vmem:[%s1761_s1 + $0x168] sm:$0xf0]  ;;  %v1446_v57 = vor.u32 %v1089_v41, %v780_v42 }
  0x1c   :  { %506 = vmatpush.bf16.msra.mxu0 %v843_v17  ;;  %v956_v50 = vld [vmem:[%s1761_s1 + $0xf8] sm:$0xf0]  ;;  %v1164_v55 = vld [vmem:[%s1761_s1 + $0x1e4] sm:$0xf]  ;;  %v1076_v56 = vld [vmem:[%s1761_s1 + $0x1e8] sm:$0xf0]  ;;  %v895_v58 = vor.u32 %v1118_v45, %v892_v46  ;;  %v1015_v60 = vor.u32 %v1148_v51, %v1012_v52 }
  0x1d   :  { %535 = vmatpush.bf16.msra.mxu1 %v907_v21  ;;  %v959_v59 = vor.u32 %v1134_v47, %v956_v50  ;;  %v1116_v61 = vld [vmem:[%s1761_s1 + $0x64] sm:$0xf]  ;;  %v884_v62 = vld [vmem:[%s1761_s1 + $0x68] sm:$0xf0]  ;;  %v1079_v0 = vor.u32 %v1164_v55, %v1076_v56  ;;  %v1146_v2 = vld [vmem:[%s1761_s1 + $0x154] sm:$0xf] }
  0x1e   :  { %564 = vmatpush.bf16.msra.mxu2 %v971_v22  ;;  %v1132_v63 = vld [vmem:[%s1761_s1 + $0xe4] sm:$0xf]  ;;  %v948_v1 = vld [vmem:[%s1761_s1 + $0xe8] sm:$0xf0]  ;;  %v1004_v3 = vld [vmem:[%s1761_s1 + $0x158] sm:$0xf0]  ;;  %v887_v6 = vor.u32 %v1116_v61, %v884_v62 }
  0x1f   :  { %593 = vmatpush.bf16.msra.mxu3 %v1035_v26  ;;  %v1162_v4 = vld [vmem:[%s1761_s1 + $0x1d4] sm:$0xf]  ;;  %v1068_v5 = vld [vmem:[%s1761_s1 + $0x1d8] sm:$0xf0]  ;;  %v951_v7 = vor.u32 %v1132_v63, %v948_v1  ;;  %v1007_v8 = vor.u32 %v1146_v2, %v1004_v3  ;;  %v1144_v14 = vld [vmem:[%s1761_s1 + $0x144] sm:$0xf] }
  0x20   :  { %507 = vmatpush.bf16.msra.mxu0 %v835_v34  ;;  %v1114_v9 = vld [vmem:[%s1761_s1 + $0x54] sm:$0xf]  ;;  %v876_v10 = vld [vmem:[%s1761_s1 + $0x58] sm:$0xf0]  ;;  %v1071_v12 = vor.u32 %v1162_v4, %v1068_v5  ;;  %v996_v15 = vld [vmem:[%s1761_s1 + $0x148] sm:$0xf0] }
  0x21   :  { %536 = vmatpush.bf16.msra.mxu1 %v899_v38  ;;  %v1130_v11 = vld [vmem:[%s1761_s1 + $0xd4] sm:$0xf]  ;;  %v940_v13 = vld [vmem:[%s1761_s1 + $0xd8] sm:$0xf0]  ;;  %v1160_v16 = vld [vmem:[%s1761_s1 + $0x1c4] sm:$0xf]  ;;  %v879_v18 = vor.u32 %v1114_v9, %v876_v10  ;;  %v999_v22 = vor.u32 %v1144_v14, %v996_v15 }
  0x22   :  { %565 = vmatpush.bf16.msra.mxu2 %v963_v39  ;;  %v1060_v17 = vld [vmem:[%s1761_s1 + $0x1c8] sm:$0xf0]  ;;  %v786_v19 = vld [vmem:[%s1762_s0 + $0x20] sm:$0xf]  ;;  %v1094_v20 = vld [vmem:[%s1762_s0 + $0x2c] sm:$0xf0]  ;;  %v943_v21 = vor.u32 %v1130_v11, %v940_v13 }
  0x23   :  { %594 = vmatpush.bf16.msra.mxu3 %v1027_v43  ;;  %508 = vmatmul.bf16.vlgmr.msra.gmra.mxu0 %v1425_v48  ;;  %v1112_v23 = vld [vmem:[%s1761_s1 + $0x44] sm:$0xf]  ;;  %v868_v24 = vld [vmem:[%s1761_s1 + $0x48] sm:$0xf0]  ;;  %v788_v27 = vld [vmem:[%s1762_s0 + $0x30] sm:$0xf0]  ;;  %v1063_v28 = vor.u32 %v1160_v16, %v1060_v17 }
  0x24   :  { %537 = vmatmul.bf16.vlgmr.msra.gmra.mxu1 %v1436_v53  ;;  %616 = vmatpush.bf16.msrb.mxu0 %v895_v58  ;;  %v1128_v25 = vld [vmem:[%s1761_s1 + $0xc4] sm:$0xf]  ;;  %v932_v29 = vld [vmem:[%s1761_s1 + $0xc8] sm:$0xf0]  ;;  %v1142_v30 = vld [vmem:[%s1761_s1 + $0x134] sm:$0xf]  ;;  %v871_v38 = vor.u32 %v1112_v23, %v868_v24 }
  0x25   :  { %566 = vmatmul.bf16.vlgmr.msra.gmra.mxu2 %v1438_v54  ;;  %645 = vmatpush.bf16.msrb.mxu1 %v959_v59  ;;  %v1092_v26 = vld [vmem:[%s1762_s0 + $0x24] sm:$0xf]  ;;  %v988_v31 = vld [vmem:[%s1761_s1 + $0x138] sm:$0xf0]  ;;  %v794_v32 = vld [vmem:[%s1762_s0 + $0x28] sm:$0xf]  ;;  %v935_v39 = vor.u32 %v1128_v25, %v932_v29 }
  0x26   :  { %674 = vmatpush.bf16.msrb.mxu2 %v1023_v44  ;;  %595 = vmatmul.bf16.vlgmr.msra.gmra.mxu3 %v1446_v57  ;;  %v1158_v33 = vld [vmem:[%s1761_s1 + $0x1b4] sm:$0xf]  ;;  %v1052_v34 = vld [vmem:[%s1761_s1 + $0x1b8] sm:$0xf0]  ;;  %v1095_v35 = vld [vmem:[%s1762_s0 + $0x34] sm:$0xf0]  ;;  %v991_v40 = vor.u32 %v1142_v30, %v988_v31  ;;  %v1557_v44 = vor.u32 %v1094_v20, %v786_v19  ;;  %v1568_v50 = vor.u32 %v1092_v26, %v788_v27 }
  0x27   :  { %703 = vmatpush.bf16.msrb.mxu3 %v1087_v49  ;;  %v1093_v36 = vld [vmem:[%s1762_s0 + $0x2c] sm:$0xf]  ;;  %v796_v37 = vld [vmem:[%s1762_s0 + $0x38] sm:$0xf0]  ;;  %v1110_v41 = vld [vmem:[%s1761_s1 + $0x34] sm:$0xf]  ;;  %v1055_v45 = vor.u32 %v1158_v33, %v1052_v34  ;;  %v1570_v51 = vor.u32 %v1095_v35, %v794_v32 }
  0x28   :  { %617 = vmatpush.bf16.msrb.mxu0 %v887_v6  ;;  %v860_v42 = vld [vmem:[%s1761_s1 + $0x38] sm:$0xf0]  ;;  %v1126_v43 = vld [vmem:[%s1761_s1 + $0xb4] sm:$0xf]  ;;  %v1140_v47 = vld [vmem:[%s1761_s1 + $0x124] sm:$0xf]  ;;  %v1578_v56 = vor.u32 %v1093_v36, %v796_v37 }
  0x29   :  { %646 = vmatpush.bf16.msrb.mxu1 %v951_v7  ;;  %v924_v46 = vld [vmem:[%s1761_s1 + $0xb8] sm:$0xf0]  ;;  %v980_v49 = vld [vmem:[%s1761_s1 + $0x128] sm:$0xf0]  ;;  %v1156_v52 = vld [vmem:[%s1761_s1 + $0x1a4] sm:$0xf]  ;;  %v863_v58 = vor.u32 %v1110_v41, %v860_v42 }
  0x2a   :  { %675 = vmatpush.bf16.msrb.mxu2 %v1015_v60  ;;  %v1044_v55 = vld [vmem:[%s1761_s1 + $0x1a8] sm:$0xf0]  ;;  %v927_v59 = vor.u32 %v1126_v43, %v924_v46  ;;  %v983_v60 = vor.u32 %v1140_v47, %v980_v49  ;;  %v1108_v61 = vld [vmem:[%s1761_s1 + $0x24] sm:$0xf]  ;;  %v1138_v3 = vld [vmem:[%s1761_s1 + $0x114] sm:$0xf] }
  0x2b   :  { %704 = vmatpush.bf16.msrb.mxu3 %v1079_v0  ;;  %v852_v62 = vld [vmem:[%s1761_s1 + $0x28] sm:$0xf0]  ;;  %v1047_v63 = vor.u32 %v1156_v52, %v1044_v55  ;;  %v1124_v0 = vld [vmem:[%s1761_s1 + $0xa4] sm:$0xf]  ;;  %v972_v4 = vld [vmem:[%s1761_s1 + $0x118] sm:$0xf0] }
  0x2c   :  { %618 = vmatpush.bf16.msrb.mxu0 %v879_v18  ;;  %v916_v1 = vld [vmem:[%s1761_s1 + $0xa8] sm:$0xf0]  ;;  %v855_v2 = vor.u32 %v1108_v61, %v852_v62  ;;  %v1106_v5 = vld [vmem:[%s1761_s1 + $0x14] sm:$0xf]  ;;  %v975_v7 = vor.u32 %v1138_v3, %v972_v4  ;;  %v1036_v10 = vld [vmem:[%s1761_s1 + $0x198] sm:$0xf0] }
  0x2d   :  { %647 = vmatpush.bf16.msrb.mxu1 %v943_v21  ;;  %v919_v6 = vor.u32 %v1124_v0, %v916_v1  ;;  %v1154_v9 = vld [vmem:[%s1761_s1 + $0x194] sm:$0xf]  ;;  %v908_v13 = vld [vmem:[%s1761_s1 + $0x98] sm:$0xf0]  ;;  %v1136_v14 = vld [vmem:[%s1761_s1 + $0x104] sm:$0xf] }
  0x2e   :  { %676 = vmatpush.bf16.msrb.mxu2 %v1007_v8  ;;  %v844_v8 = vld [vmem:[%s1761_s1 + $0x18] sm:$0xf0]  ;;  %v1039_v11 = vor.u32 %v1154_v9, %v1036_v10  ;;  %v964_v15 = vld [vmem:[%s1761_s1 + $0x108] sm:$0xf0]  ;;  %v1152_v17 = vld [vmem:[%s1761_s1 + $0x184] sm:$0xf] }
  0x2f   :  { %705 = vmatpush.bf16.msrb.mxu3 %v1071_v12  ;;  %v1122_v12 = vld [vmem:[%s1761_s1 + $0x94] sm:$0xf]  ;;  %v847_v16 = vor.u32 %v1106_v5, %v844_v8  ;;  %v1028_v18 = vld [vmem:[%s1761_s1 + $0x188] sm:$0xf0]  ;;  %v967_v20 = vor.u32 %v1136_v14, %v964_v15  ;;  %v1104_v21 = vld [vmem:[%s1761_s1 + $0x4] sm:$0xf] }
  0x30   :  { %619 = vmatpush.bf16.msrb.mxu0 %v871_v38  ;;  %v911_v19 = vor.u32 %v1122_v12, %v908_v13  ;;  %v1031_v23 = vor.u32 %v1152_v17, %v1028_v18  ;;  %v1120_v24 = vld [vmem:[%s1761_s1 + $0x84] sm:$0xf]  ;;  %v900_v25 = vld [vmem:[%s1761_s1 + $0x88] sm:$0xf0]  ;;  %v802_v26 = vld [vmem:[%s1762_s0 + $0x40] sm:$0xf] }
  0x31   :  { %648 = vmatpush.bf16.msrb.mxu1 %v935_v39  ;;  %v1098_v27 = vld [vmem:[%s1762_s0 + $0x4c] sm:$0xf0]  ;;  %v804_v29 = vld [vmem:[%s1762_s0 + $0x50] sm:$0xf0]  ;;  %v810_v30 = vld [vmem:[%s1762_s0 + $0x48] sm:$0xf]  ;;  %v903_v35 = vor.u32 %v1120_v24, %v900_v25 }
  0x32   :  { %677 = vmatpush.bf16.msrb.mxu2 %v999_v22  ;;  %v836_v22 = vld [vmem:[%s1761_s1 + $0x8] sm:$0xf0]  ;;  %v1099_v31 = vld [vmem:[%s1762_s0 + $0x54] sm:$0xf0]  ;;  %v812_v34 = vld [vmem:[%s1762_s0 + $0x58] sm:$0xf0]  ;;  %v803_v36 = vor.u32 %v1098_v27, %v802_v26 }
  0x33   :  { %706 = vmatpush.bf16.msrb.mxu3 %v1063_v28  ;;  %513 = vmatmul.bf16.gmra.mxu0 %v1557_v44  ;;  %v1096_v28 = vld [vmem:[%s1762_s0 + $0x44] sm:$0xf]  ;;  %v839_v32 = vor.u32 %v1104_v21, %v836_v22  ;;  %v1097_v33 = vld [vmem:[%s1762_s0 + $0x4c] sm:$0xf]  ;;  %v811_v38 = vor.u32 %v1099_v31, %v810_v30  ;;  %v1102_v41 = vld [vmem:[%s1762_s0 + $0x6c] sm:$0xf0] }
  0x34   :  { %542 = vmatmul.bf16.gmra.mxu1 %v1568_v50  ;;  %620 = vmatpush.bf16.msrb.mxu0 %v863_v58  ;;  %v807_v37 = vor.u32 %v1096_v28, %v804_v29  ;;  %v815_v39 = vor.u32 %v1097_v33, %v812_v34  ;;  %v1100_v42 = vld [vmem:[%s1762_s0 + $0x64] sm:$0xf]  ;;  %v820_v43 = vld [vmem:[%s1762_s0 + $0x70] sm:$0xf0]  ;;  %v1103_v46 = vld [vmem:[%s1762_s0 + $0x74] sm:$0xf0] }
  0x35   :  { %571 = vmatmul.bf16.gmra.mxu2 %v1570_v51  ;;  %649 = vmatpush.bf16.msrb.mxu1 %v927_v59  ;;  %v1101_v47 = vld [vmem:[%s1762_s0 + $0x6c] sm:$0xf]  ;;  %v828_v49 = vld [vmem:[%s1762_s0 + $0x78] sm:$0xf0]  ;;  %v823_v55 = vor.u32 %v1100_v42, %v820_v43 }
  0x36   :  { %678 = vmatpush.bf16.msrb.mxu2 %v991_v40  ;;  %600 = vmatmul.bf16.gmra.mxu3 %v1578_v56  ;;  %v818_v40 = vld [vmem:[%s1762_s0 + $0x60] sm:$0xf]  ;;  %v831_v59 = vor.u32 %v1101_v47, %v828_v49 }
  0x37   :  { %707 = vmatpush.bf16.msrb.mxu3 %v1055_v45  ;;  %v826_v45 = vld [vmem:[%s1762_s0 + $0x68] sm:$0xf]  ;;  %v819_v52 = vor.u32 %v1102_v41, %v818_v40 }
  0x38   :  { %621 = vmatpush.bf16.msrb.mxu0 %v855_v2  ;;  %v827_v58 = vor.u32 %v1103_v46, %v826_v45 }
  0x39   :  { %650 = vmatpush.bf16.msrb.mxu1 %v919_v6 }
  0x3a   :  { %679 = vmatpush.bf16.msrb.mxu2 %v983_v60 }
  0x3b   :  { %708 = vmatpush.bf16.msrb.mxu3 %v1047_v63 }
  0x3c   :  { %622 = vmatpush.bf16.msrb.mxu0 %v847_v16 }
  0x3d   :  { %651 = vmatpush.bf16.msrb.mxu1 %v911_v19 }
  0x3e   :  { %680 = vmatpush.bf16.msrb.mxu2 %v975_v7 }
  0x3f   :  { %709 = vmatpush.bf16.msrb.mxu3 %v1039_v11 }
  0x40   :  { %623 = vmatpush.bf16.msrb.mxu0 %v839_v32 }
  0x41   :  { %652 = vmatpush.bf16.msrb.mxu1 %v903_v35 }
  0x42   :  { %681 = vmatpush.bf16.msrb.mxu2 %v967_v20 }
  0x43   :  { %710 = vmatpush.bf16.msrb.mxu3 %v1031_v23  ;;  %518 = vmatmul.bf16.gmra.mxu0 %v803_v36 }
  0x44   :  { %547 = vmatmul.bf16.gmra.mxu1 %v807_v37 }
  0x45   :  { %576 = vmatmul.bf16.gmra.mxu2 %v811_v38 }
  0x46   :  { %605 = vmatmul.bf16.gmra.mxu3 %v815_v39 }
  0x53   :  { %523 = vmatmul.bf16.gmra.mxu0 %v819_v52 }
  0x54   :  { %552 = vmatmul.bf16.gmra.mxu1 %v823_v55 }
  0x55   :  { %581 = vmatmul.bf16.gmra.mxu2 %v827_v58 }
  0x56   :  { %610 = vmatmul.bf16.gmra.mxu3 %v831_v59 }
  0x63   :  { %624 = vmatmul.bf16.vlgmr.msrb.gmra.mxu0 %v1425_v48  ;;  %v94_v48 = vld [vmem:[%s1763_s2] sm:$0x3] }
  0x64   :  { %653 = vmatmul.bf16.vlgmr.msrb.gmra.mxu1 %v1436_v53  ;;  %v96_v53 = vperm.slane %v94_v48, 0 }
  0x65   :  { %682 = vmatmul.bf16.vlgmr.msrb.gmra.mxu2 %v1438_v54 }
  0x66   :  { %711 = vmatmul.bf16.vlgmr.msrb.gmra.mxu3 %v1446_v57 }
  0x73   :  { %629 = vmatmul.bf16.gmra.mxu0 %v1557_v44 }
  0x74   :  { %658 = vmatmul.bf16.gmra.mxu1 %v1568_v50 }
  0x75   :  { %687 = vmatmul.bf16.gmra.mxu2 %v1570_v51 }
  0x76   :  { %716 = vmatmul.bf16.gmra.mxu3 %v1578_v56 }
  0x83   :  { %634 = vmatmul.bf16.gmra.mxu0 %v803_v36 }
  0x84   :  { %663 = vmatmul.bf16.gmra.mxu1 %v807_v37 }
  0x85   :  { %692 = vmatmul.bf16.gmra.mxu2 %v811_v38 }
  0x86   :  { %721 = vmatmul.bf16.gmra.mxu3 %v815_v39 }
  0x93   :  { %639 = vmatmul.bf16.gmra.mxu0 %v819_v52 }
  0x94   :  { %668 = vmatmul.bf16.gmra.mxu1 %v823_v55 }
  0x95   :  { %697 = vmatmul.bf16.gmra.mxu2 %v827_v58  ;;  %v1717_v58 = vperm.slane %v94_v48, 1 }
  0x96   :  { %726 = vmatmul.bf16.gmra.mxu3 %v831_v59 }
  0xa0   :  { %v509_v54 = vpop.f32.mrf.mxu0 }
  0xa1   :  { %v510_v57 = vadd.f32 %v509_v54, %v96_v53  ;;  %v538_v44 = vpop.f32.mrf.mxu1 }
  0xa3   :  { %v539_v50 = vadd.f32 %v538_v44, %v510_v57 }
  0xa8   :  { %v567_v51 = vpop.f32.mrf.mxu2  ;;  %v511_v61 = vpop.f32.mrf.mxu0 }
  0xa9   :  { %v568_v60 = vadd.f32 %v567_v51, %v539_v50  ;;  %v596_v56 = vpop.f32.mrf.mxu3  ;;  %v512_v62 = vadd.f32 %v511_v61, %v96_v53  ;;  %v540_v63 = vpop.f32.mrf.mxu1 }
  0xab   :  { %v1703_v0 = vadd.f32 %v596_v56, %v568_v60  ;;  %v541_v1 = vadd.f32 %v540_v63, %v512_v62 }
  0xad   :  { %v732_v48 = vmax.f32 %v1703_v0, 0.0 }
  0xb0   :  { %v569_v2 = vpop.f32.mrf.mxu2  ;;  %v514_v5 = vpop.f32.mrf.mxu0 }
  0xb1   :  { %v570_v3 = vadd.f32 %v569_v2, %v541_v1  ;;  %v598_v4 = vpop.f32.mrf.mxu3  ;;  %v515_v6 = vadd.f32 %v514_v5, %v96_v53  ;;  %v543_v7 = vpop.f32.mrf.mxu1 }
  0xb3   :  { %v1705_v8 = vadd.f32 %v598_v4, %v570_v3  ;;  %v544_v9 = vadd.f32 %v543_v7, %v515_v6 }
  0xb8   :  { %v572_v10 = vpop.f32.mrf.mxu2  ;;  %v516_v13 = vpop.f32.mrf.mxu0 }
  0xb9   :  { %v573_v11 = vadd.f32 %v572_v10, %v544_v9  ;;  %v601_v12 = vpop.f32.mrf.mxu3  ;;  %v517_v14 = vadd.f32 %v516_v13, %v96_v53  ;;  %v545_v15 = vpop.f32.mrf.mxu1 }
  0xbb   :  { %v1707_v16 = vadd.f32 %v601_v12, %v573_v11  ;;  %v546_v17 = vadd.f32 %v545_v15, %v517_v14  ;;  %v734_v15 = vmax.f32 %v1705_v8, 0.0 }
  0xc0   :  { %v574_v18 = vpop.f32.mrf.mxu2  ;;  %v519_v21 = vpop.f32.mrf.mxu0 }
  0xc1   :  { %v575_v19 = vadd.f32 %v574_v18, %v546_v17  ;;  %v603_v20 = vpop.f32.mrf.mxu3  ;;  %v520_v22 = vadd.f32 %v519_v21, %v96_v53  ;;  %v548_v23 = vpop.f32.mrf.mxu1 }
  0xc3   :  { %v1709_v24 = vadd.f32 %v603_v20, %v575_v19  ;;  %v549_v25 = vadd.f32 %v548_v23, %v520_v22 }
  0xc8   :  { %v577_v26 = vpop.f32.mrf.mxu2  ;;  %v521_v29 = vpop.f32.mrf.mxu0 }
  0xc9   :  { %v578_v27 = vadd.f32 %v577_v26, %v549_v25  ;;  %v606_v28 = vpop.f32.mrf.mxu3  ;;  %v522_v30 = vadd.f32 %v521_v29, %v96_v53  ;;  %v550_v31 = vpop.f32.mrf.mxu1 }
  0xcb   :  { %v1711_v32 = vadd.f32 %v606_v28, %v578_v27  ;;  %v551_v33 = vadd.f32 %v550_v31, %v522_v30  ;;  %v736_v27 = vmax.f32 %v1707_v16, 0.0 }
  0xd0   :  { %v579_v34 = vpop.f32.mrf.mxu2  ;;  %v524_v37 = vpop.f32.mrf.mxu0 }
  0xd1   :  { %v580_v35 = vadd.f32 %v579_v34, %v551_v33  ;;  %v608_v36 = vpop.f32.mrf.mxu3  ;;  %v525_v38 = vadd.f32 %v524_v37, %v96_v53  ;;  %v553_v39 = vpop.f32.mrf.mxu1 }
  0xd3   :  { %v1713_v40 = vadd.f32 %v608_v36, %v580_v35  ;;  %v554_v41 = vadd.f32 %v553_v39, %v525_v38  ;;  %v738_v38 = vmax.f32 %v1709_v24, 0.0 }
  0xd8   :  { %v582_v42 = vpop.f32.mrf.mxu2  ;;  %v526_v46 = vpop.f32.mrf.mxu0 }
  0xd9   :  { %v583_v43 = vadd.f32 %v582_v42, %v554_v41  ;;  %v611_v45 = vpop.f32.mrf.mxu3  ;;  %v527_v47 = vadd.f32 %v526_v46, %v96_v53  ;;  %v555_v49 = vpop.f32.mrf.mxu1 }
  0xdb   :  { %v1715_v52 = vadd.f32 %v611_v45, %v583_v43  ;;  %v556_v55 = vadd.f32 %v555_v49, %v527_v47 }
  0xe0   :  { %v584_v59 = vpop.f32.mrf.mxu2  ;;  %v625_v44 = vpop.f32.mrf.mxu0 }
  0xe1   :  { %v585_v54 = vadd.f32 %v584_v59, %v556_v55  ;;  %v613_v57 = vpop.f32.mrf.mxu3  ;;  %v626_v50 = vadd.f32 %v625_v44, %v1717_v58  ;;  %v654_v51 = vpop.f32.mrf.mxu1  ;;  %v740_v59 = vmax.f32 %v1711_v32, 0.0 }
  0xe3   :  { %v1720_v60 = vadd.f32 %v613_v57, %v585_v54  ;;  %v655_v56 = vadd.f32 %v654_v51, %v626_v50 }
  0xe8   :  { %v683_v61 = vpop.f32.mrf.mxu2  ;;  %v627_v53 = vpop.f32.mrf.mxu0 }
  0xe9   :  { %v684_v62 = vadd.f32 %v683_v61, %v655_v56  ;;  %v712_v63 = vpop.f32.mrf.mxu3  ;;  %v656_v1 = vpop.f32.mrf.mxu1  ;;  %v628_v3 = vadd.f32 %v627_v53, %v1717_v58  ;;  %v742_v53 = vmax.f32 %v1713_v40, 0.0 }
  0xeb   :  { %v713_v2 = vadd.f32 %v712_v63, %v684_v62  ;;  %v657_v6 = vadd.f32 %v656_v1, %v628_v3 }
  0xed   :  { %v733_v4 = vmax.f32 %v713_v2, 0.0 }
  0xef   :  { %v748_v5 = vpack.c.bf16 %v733_v4, %v732_v48 }
  0xf0   :  { %v685_v7 = vpop.f32.mrf.mxu2  ;;  %v630_v11 = vpop.f32.mrf.mxu0 }
  0xf1   :  { %756 = vst [vmem:[%s1764_s3] sm:$0xff] %v748_v5  ;;  %v686_v9 = vadd.f32 %v685_v7, %v657_v6  ;;  %v714_v10 = vpop.f32.mrf.mxu3  ;;  %v631_v12 = vadd.f32 %v630_v11, %v1717_v58  ;;  %v659_v13 = vpop.f32.mrf.mxu1 }
  0xf3   :  { %v715_v14 = vadd.f32 %v714_v10, %v686_v9  ;;  %v660_v18 = vadd.f32 %v659_v13, %v631_v12  ;;  %v744_v9 = vmax.f32 %v1715_v52, 0.0 }
  0xf5   :  { %v735_v17 = vmax.f32 %v715_v14, 0.0 }
  0xf7   :  { %v749_v0 = vpack.c.bf16 %v735_v17, %v734_v15 }
  0xf8   :  { %v688_v19 = vpop.f32.mrf.mxu2  ;;  %v632_v22 = vpop.f32.mrf.mxu0 }
  0xf9   :  { %757 = vst [vmem:[%s1764_s3 + $0x8] sm:$0xff] %v749_v0  ;;  %v689_v20 = vadd.f32 %v688_v19, %v660_v18  ;;  %v717_v21 = vpop.f32.mrf.mxu3  ;;  %v661_v23 = vpop.f32.mrf.mxu1  ;;  %v633_v26 = vadd.f32 %v632_v22, %v1717_v58  ;;  %v746_v18 = vmax.f32 %v1720_v60, 0.0 }
  0xfb   :  { %v718_v25 = vadd.f32 %v717_v21, %v689_v20  ;;  %v662_v8 = vadd.f32 %v661_v23, %v633_v26 }
  0xfd   :  { %v737_v28 = vmax.f32 %v718_v25, 0.0 }
  0xff   :  { %v750_v29 = vpack.c.bf16 %v737_v28, %v736_v27 }
 0x100   :  { %v690_v30 = vpop.f32.mrf.mxu2  ;;  %v635_v34 = vpop.f32.mrf.mxu0 }
 0x101   :  { %758 = vst [vmem:[%s1764_s3 + $0x10] sm:$0xff] %v750_v29  ;;  %v691_v31 = vadd.f32 %v690_v30, %v662_v8  ;;  %v719_v33 = vpop.f32.mrf.mxu3  ;;  %v636_v35 = vadd.f32 %v635_v34, %v1717_v58  ;;  %v664_v36 = vpop.f32.mrf.mxu1 }
 0x103   :  { %v720_v37 = vadd.f32 %v719_v33, %v691_v31  ;;  %v665_v41 = vadd.f32 %v664_v36, %v636_v35 }
 0x105   :  { %v739_v39 = vmax.f32 %v720_v37, 0.0 }
 0x107   :  { %v751_v16 = vpack.c.bf16 %v739_v39, %v738_v38 }
 0x108   :  { %v693_v42 = vpop.f32.mrf.mxu2  ;;  %v637_v46 = vpop.f32.mrf.mxu0 }
 0x109   :  { %759 = vst [vmem:[%s1764_s3 + $0x18] sm:$0xff] %v751_v16  ;;  %v694_v43 = vadd.f32 %v693_v42, %v665_v41  ;;  %v722_v45 = vpop.f32.mrf.mxu3  ;;  %v666_v47 = vpop.f32.mrf.mxu1  ;;  %v638_v55 = vadd.f32 %v637_v46, %v1717_v58 }
 0x10b   :  { %v723_v49 = vadd.f32 %v722_v45, %v694_v43  ;;  %v667_v24 = vadd.f32 %v666_v47, %v638_v55 }
 0x10d   :  { %v741_v54 = vmax.f32 %v723_v49, 0.0 }
 0x10f   :  { %v752_v57 = vpack.c.bf16 %v741_v54, %v740_v59 }
 0x110   :  { %v695_v44 = vpop.f32.mrf.mxu2  ;;  %v640_v56 = vpop.f32.mrf.mxu0 }
 0x111   :  { %760 = vst [vmem:[%s1764_s3 + $0x20] sm:$0xff] %v752_v57  ;;  %v696_v50 = vadd.f32 %v695_v44, %v667_v24  ;;  %v724_v51 = vpop.f32.mrf.mxu3  ;;  %v641_v61 = vadd.f32 %v640_v56, %v1717_v58  ;;  %v669_v63 = vpop.f32.mrf.mxu1 }
 0x113   :  { %v725_v62 = vadd.f32 %v724_v51, %v696_v50  ;;  %v670_v2 = vadd.f32 %v669_v63, %v641_v61 }
 0x115   :  { %v743_v1 = vmax.f32 %v725_v62, 0.0 }
 0x117   :  { %v753_v32 = vpack.c.bf16 %v743_v1, %v742_v53 }
 0x118   :  { %v698_v3 = vpop.f32.mrf.mxu2  ;;  %v642_v5 = vpop.f32.mrf.mxu0 }
 0x119   :  { %761 = vst [vmem:[%s1764_s3 + $0x28] sm:$0xff] %v753_v32  ;;  %v699_v48 = vadd.f32 %v698_v3, %v670_v2  ;;  %v727_v4 = vpop.f32.mrf.mxu3  ;;  %v643_v7 = vadd.f32 %v642_v5, %v1717_v58  ;;  %v671_v11 = vpop.f32.mrf.mxu1 }
 0x11b   :  { %v728_v6 = vadd.f32 %v727_v4, %v699_v48  ;;  %v672_v40 = vadd.f32 %v671_v11, %v643_v7 }
 0x11d   :  { %v745_v10 = vmax.f32 %v728_v6, 0.0 }
 0x11f   :  { %v754_v12 = vpack.c.bf16 %v745_v10, %v744_v9 }
 0x120   :  { %v700_v13 = vpop.f32.mrf.mxu2 }
 0x121   :  { %762 = vst [vmem:[%s1764_s3 + $0x30] sm:$0xff] %v754_v12  ;;  %v701_v14 = vadd.f32 %v700_v13, %v672_v40  ;;  %v729_v15 = vpop.f32.mrf.mxu3 }
 0x123   :  { %v730_v17 = vadd.f32 %v729_v15, %v701_v14 }
 0x125   :  { %v747_v0 = vmax.f32 %v730_v17, 0.0 }
 0x127   :  { %v755_v19 = vpack.c.bf16 %v747_v0, %v746_v18 }
 0x129   :  { %763 = vst [vmem:[%s1764_s3 + $0x38] sm:$0xff] %v755_v19 }

// kernel: sent_encoder_forward.10
= control target key start
LH: loop header
LB: loop body
LE: loop exit
PB: predicated region body
PF: predicated region fallthrough
CT: control target
= control target key end

     0   :  { %s5516_s1 = inlined_call_operand.vmem [shape: bf16[1024,512], index: 1, kind: input, shape index: {}]   ;;  %s5517_s0 = inlined_call_operand.vmem [shape: bf16[32,1024], index: 0, kind: input, shape index: {}]   ;;  %s5518_s2 = inlined_call_operand.vmem [shape: f32[1,512], index: 2, kind: input, shape index: {}]   ;;  %s5519_s3 = inlined_call_operand.vmem [shape: bf16[32,512], index: 3, kind: output, shape index: {}]  }
   0x1   :  { %v2478_v0 = vld [vmem:[%s5516_s1 + $0xe0] sm:$0xf]  ;;  %v3434_v1 = vld [vmem:[%s5516_s1 + $0xec] sm:$0xf0] }
   0x2   :  { %v2606_v2 = vld [vmem:[%s5516_s1 + $0x1e0] sm:$0xf]  ;;  %v2479_v3 = vor.u32 %v3434_v1, %v2478_v0  ;;  %v3466_v4 = vld [vmem:[%s5516_s1 + $0x1ec] sm:$0xf0] }
   0x3   :  { %v2734_v5 = vld [vmem:[%s5516_s1 + $0x2e0] sm:$0xf]  ;;  %v3498_v6 = vld [vmem:[%s5516_s1 + $0x2ec] sm:$0xf0]  ;;  %v2607_v7 = vor.u32 %v3466_v4, %v2606_v2 }
   0x4   :  { %v2735_v8 = vor.u32 %v3498_v6, %v2734_v5  ;;  %v2862_v9 = vld [vmem:[%s5516_s1 + $0x3e0] sm:$0xf]  ;;  %v3530_v10 = vld [vmem:[%s5516_s1 + $0x3ec] sm:$0xf0]  ;;  %1656 = vmatpush.bf16.msra.mxu0 %v2479_v3 }
   0x5   :  { %v2462_v11 = vld [vmem:[%s5516_s1 + $0xc0] sm:$0xf]  ;;  %v2863_v12 = vor.u32 %v3530_v10, %v2862_v9  ;;  %v3430_v13 = vld [vmem:[%s5516_s1 + $0xcc] sm:$0xf0]  ;;  %1675 = vmatpush.bf16.msra.mxu1 %v2607_v7 }
   0x6   :  { %v2590_v14 = vld [vmem:[%s5516_s1 + $0x1c0] sm:$0xf]  ;;  %v3462_v15 = vld [vmem:[%s5516_s1 + $0x1cc] sm:$0xf0]  ;;  %1694 = vmatpush.bf16.msra.mxu2 %v2735_v8  ;;  %v2463_v16 = vor.u32 %v3430_v13, %v2462_v11 }
   0x7   :  { %v2591_v17 = vor.u32 %v3462_v15, %v2590_v14  ;;  %v2718_v18 = vld [vmem:[%s5516_s1 + $0x2c0] sm:$0xf]  ;;  %v3494_v19 = vld [vmem:[%s5516_s1 + $0x2cc] sm:$0xf0]  ;;  %1713 = vmatpush.bf16.msra.mxu3 %v2863_v12 }
   0x8   :  { %v2846_v20 = vld [vmem:[%s5516_s1 + $0x3c0] sm:$0xf]  ;;  %v2719_v21 = vor.u32 %v3494_v19, %v2718_v18  ;;  %v3526_v22 = vld [vmem:[%s5516_s1 + $0x3cc] sm:$0xf0]  ;;  %1657 = vmatpush.bf16.msra.mxu0 %v2463_v16 }
   0x9   :  { %v2446_v23 = vld [vmem:[%s5516_s1 + $0xa0] sm:$0xf]  ;;  %v3426_v24 = vld [vmem:[%s5516_s1 + $0xac] sm:$0xf0]  ;;  %v2847_v25 = vor.u32 %v3526_v22, %v2846_v20  ;;  %1676 = vmatpush.bf16.msra.mxu1 %v2591_v17 }
   0xa   :  { %v2574_v26 = vld [vmem:[%s5516_s1 + $0x1a0] sm:$0xf]  ;;  %v3458_v27 = vld [vmem:[%s5516_s1 + $0x1ac] sm:$0xf0]  ;;  %v2447_v29 = vor.u32 %v3426_v24, %v2446_v23  ;;  %1695 = vmatpush.bf16.msra.mxu2 %v2719_v21 }
   0xb   :  { %v2702_v28 = vld [vmem:[%s5516_s1 + $0x2a0] sm:$0xf]  ;;  %v3490_v30 = vld [vmem:[%s5516_s1 + $0x2ac] sm:$0xf0]  ;;  %v2575_v33 = vor.u32 %v3458_v27, %v2574_v26  ;;  %1714 = vmatpush.bf16.msra.mxu3 %v2847_v25 }
   0xc   :  { %v2830_v31 = vld [vmem:[%s5516_s1 + $0x3a0] sm:$0xf]  ;;  %v3522_v32 = vld [vmem:[%s5516_s1 + $0x3ac] sm:$0xf0]  ;;  %v2703_v34 = vor.u32 %v3490_v30, %v2702_v28  ;;  %1658 = vmatpush.bf16.msra.mxu0 %v2447_v29  ;;  %v3388_v30 = vld [vmem:[%s5517_s0 + $0x4] sm:$0xf] }
   0xd   :  { %v2430_v35 = vld [vmem:[%s5516_s1 + $0x80] sm:$0xf]  ;;  %v3422_v36 = vld [vmem:[%s5516_s1 + $0x8c] sm:$0xf0]  ;;  %v2831_v38 = vor.u32 %v3522_v32, %v2830_v31  ;;  %1677 = vmatpush.bf16.msra.mxu1 %v2575_v33  ;;  %v2304_v31 = vld [vmem:[%s5517_s0 + $0x20] sm:$0xf0] }
   0xe   :  { %v2558_v37 = vld [vmem:[%s5516_s1 + $0x180] sm:$0xf]  ;;  %v3454_v39 = vld [vmem:[%s5516_s1 + $0x18c] sm:$0xf0]  ;;  %v2431_v44 = vor.u32 %v3422_v36, %v2430_v35  ;;  %1696 = vmatpush.bf16.msra.mxu2 %v2703_v34  ;;  %v2310_v35 = vld [vmem:[%s5517_s0 + $0x8] sm:$0xf] }
   0xf   :  { %v2686_v40 = vld [vmem:[%s5516_s1 + $0x280] sm:$0xf]  ;;  %v3486_v41 = vld [vmem:[%s5516_s1 + $0x28c] sm:$0xf0]  ;;  %v2559_v45 = vor.u32 %v3454_v39, %v2558_v37  ;;  %1715 = vmatpush.bf16.msra.mxu3 %v2831_v38 }
  0x10   :  { %v2814_v42 = vld [vmem:[%s5516_s1 + $0x380] sm:$0xf]  ;;  %v3518_v43 = vld [vmem:[%s5516_s1 + $0x38c] sm:$0xf0]  ;;  %v2687_v46 = vor.u32 %v3486_v41, %v2686_v40  ;;  %1659 = vmatpush.bf16.msra.mxu0 %v2431_v44  ;;  %v3393_v40 = vld [vmem:[%s5517_s0 + $0x24] sm:$0xf0] }
  0x11   :  { %v2414_v47 = vld [vmem:[%s5516_s1 + $0x60] sm:$0xf]  ;;  %v3418_v48 = vld [vmem:[%s5516_s1 + $0x6c] sm:$0xf0]  ;;  %v2815_v50 = vor.u32 %v3518_v43, %v2814_v42  ;;  %1678 = vmatpush.bf16.msra.mxu1 %v2559_v45  ;;  %v3389_v41 = vld [vmem:[%s5517_s0 + $0xc] sm:$0xf] }
  0x12   :  { %v2542_v49 = vld [vmem:[%s5516_s1 + $0x160] sm:$0xf]  ;;  %v3450_v51 = vld [vmem:[%s5516_s1 + $0x16c] sm:$0xf0]  ;;  %v2415_v56 = vor.u32 %v3418_v48, %v2414_v47  ;;  %1697 = vmatpush.bf16.msra.mxu2 %v2687_v46  ;;  %v2312_v42 = vld [vmem:[%s5517_s0 + $0x28] sm:$0xf0] }
  0x13   :  { %v2670_v52 = vld [vmem:[%s5516_s1 + $0x260] sm:$0xf]  ;;  %v3482_v53 = vld [vmem:[%s5516_s1 + $0x26c] sm:$0xf0]  ;;  %v2543_v57 = vor.u32 %v3450_v51, %v2542_v49  ;;  %1716 = vmatpush.bf16.msra.mxu3 %v2815_v50 }
  0x14   :  { %v2798_v54 = vld [vmem:[%s5516_s1 + $0x360] sm:$0xf]  ;;  %v3514_v55 = vld [vmem:[%s5516_s1 + $0x36c] sm:$0xf0]  ;;  %v2671_v58 = vor.u32 %v3482_v53, %v2670_v52  ;;  %1660 = vmatpush.bf16.msra.mxu0 %v2415_v56  ;;  %v3929_v53 = vor.u32 %v3388_v30, %v2304_v31 }
  0x15   :  { %v2398_v59 = vld [vmem:[%s5516_s1 + $0x40] sm:$0xf]  ;;  %v3414_v60 = vld [vmem:[%s5516_s1 + $0x4c] sm:$0xf0]  ;;  %v2799_v62 = vor.u32 %v3514_v55, %v2798_v54  ;;  %1679 = vmatpush.bf16.msra.mxu1 %v2543_v57  ;;  %v3931_v54 = vor.u32 %v3393_v40, %v2310_v35  ;;  %v3939_v57 = vor.u32 %v3389_v41, %v2312_v42 }
  0x16   :  { %v2526_v61 = vld [vmem:[%s5516_s1 + $0x140] sm:$0xf]  ;;  %v3446_v63 = vld [vmem:[%s5516_s1 + $0x14c] sm:$0xf0]  ;;  %v2399_v4 = vor.u32 %v3414_v60, %v2398_v59  ;;  %1698 = vmatpush.bf16.msra.mxu2 %v2671_v58 }
  0x17   :  { %v2654_v0 = vld [vmem:[%s5516_s1 + $0x240] sm:$0xf]  ;;  %v3478_v1 = vld [vmem:[%s5516_s1 + $0x24c] sm:$0xf0]  ;;  %v2527_v5 = vor.u32 %v3446_v63, %v2526_v61  ;;  %1717 = vmatpush.bf16.msra.mxu3 %v2799_v62 }
  0x18   :  { %v2782_v2 = vld [vmem:[%s5516_s1 + $0x340] sm:$0xf]  ;;  %v3510_v3 = vld [vmem:[%s5516_s1 + $0x34c] sm:$0xf0]  ;;  %v2655_v6 = vor.u32 %v3478_v1, %v2654_v0  ;;  %1661 = vmatpush.bf16.msra.mxu0 %v2399_v4 }
  0x19   :  { %v2382_v7 = vld [vmem:[%s5516_s1 + $0x20] sm:$0xf]  ;;  %v3410_v8 = vld [vmem:[%s5516_s1 + $0x2c] sm:$0xf0]  ;;  %v2783_v10 = vor.u32 %v3510_v3, %v2782_v2  ;;  %1680 = vmatpush.bf16.msra.mxu1 %v2527_v5 }
  0x1a   :  { %v2510_v9 = vld [vmem:[%s5516_s1 + $0x120] sm:$0xf]  ;;  %v3442_v11 = vld [vmem:[%s5516_s1 + $0x12c] sm:$0xf0]  ;;  %v2383_v17 = vor.u32 %v3410_v8, %v2382_v7  ;;  %1699 = vmatpush.bf16.msra.mxu2 %v2655_v6 }
  0x1b   :  { %v2638_v12 = vld [vmem:[%s5516_s1 + $0x220] sm:$0xf]  ;;  %v3474_v13 = vld [vmem:[%s5516_s1 + $0x22c] sm:$0xf0]  ;;  %v2511_v21 = vor.u32 %v3442_v11, %v2510_v9  ;;  %1718 = vmatpush.bf16.msra.mxu3 %v2783_v10 }
  0x1c   :  { %v2766_v14 = vld [vmem:[%s5516_s1 + $0x320] sm:$0xf]  ;;  %v3506_v15 = vld [vmem:[%s5516_s1 + $0x32c] sm:$0xf0]  ;;  %v2639_v22 = vor.u32 %v3474_v13, %v2638_v12  ;;  %1662 = vmatpush.bf16.msra.mxu0 %v2383_v17 }
  0x1d   :  { %v2366_v16 = vld [vmem:[%s5516_s1] sm:$0xf]  ;;  %v3406_v18 = vld [vmem:[%s5516_s1 + $0xc] sm:$0xf0]  ;;  %v2767_v26 = vor.u32 %v3506_v15, %v2766_v14  ;;  %1681 = vmatpush.bf16.msra.mxu1 %v2511_v21 }
  0x1e   :  { %v2494_v19 = vld [vmem:[%s5516_s1 + $0x100] sm:$0xf]  ;;  %v3438_v20 = vld [vmem:[%s5516_s1 + $0x10c] sm:$0xf0]  ;;  %v2367_v34 = vor.u32 %v3406_v18, %v2366_v16  ;;  %1700 = vmatpush.bf16.msra.mxu2 %v2639_v22 }
  0x1f   :  { %v2622_v23 = vld [vmem:[%s5516_s1 + $0x200] sm:$0xf]  ;;  %v3470_v24 = vld [vmem:[%s5516_s1 + $0x20c] sm:$0xf0]  ;;  %v2495_v38 = vor.u32 %v3438_v20, %v2494_v19  ;;  %1719 = vmatpush.bf16.msra.mxu3 %v2767_v26 }
  0x20   :  { %v2750_v25 = vld [vmem:[%s5516_s1 + $0x300] sm:$0xf]  ;;  %v3502_v27 = vld [vmem:[%s5516_s1 + $0x30c] sm:$0xf0]  ;;  %v2623_v39 = vor.u32 %v3470_v24, %v2622_v23  ;;  %1663 = vmatpush.bf16.msra.mxu0 %v2367_v34 }
  0x21   :  { %v2302_v28 = vld [vmem:[%s5517_s0] sm:$0xf]  ;;  %v3626_v33 = vld [vmem:[%s5516_s1 + $0x6ec] sm:$0xf0]  ;;  %v2751_v43 = vor.u32 %v3502_v27, %v2750_v25  ;;  %1682 = vmatpush.bf16.msra.mxu1 %v2495_v38  ;;  %v2344_v38 = vld [vmem:[%s5517_s0 + $0x68] sm:$0xf0] }
  0x22   :  { %v3392_v29 = vld [vmem:[%s5517_s0 + $0x1c] sm:$0xf0]  ;;  %v3594_v37 = vld [vmem:[%s5516_s1 + $0x5ec] sm:$0xf0]  ;;  %1701 = vmatpush.bf16.msra.mxu2 %v2623_v39 }
  0x23   :  { %v3246_v32 = vld [vmem:[%s5516_s1 + $0x6e0] sm:$0xf]  ;;  %v3562_v46 = vld [vmem:[%s5516_s1 + $0x4ec] sm:$0xf0]  ;;  %v3918_v48 = vor.u32 %v3392_v29, %v2302_v28  ;;  %1720 = vmatpush.bf16.msra.mxu3 %v2751_v43  ;;  %v3396_v28 = vld [vmem:[%s5517_s0 + $0x44] sm:$0xf] }
  0x24   :  { %v3118_v36 = vld [vmem:[%s5516_s1 + $0x5e0] sm:$0xf]  ;;  %v3247_v44 = vor.u32 %v3626_v33, %v3246_v32  ;;  %v3658_v50 = vld [vmem:[%s5516_s1 + $0x7ec] sm:$0xf0]  ;;  %1683 = vmatmul.bf16.vlgmr.msra.gmra.mxu1 %v3929_v53  ;;  %v2336_v29 = vld [vmem:[%s5517_s0 + $0x60] sm:$0xf0] }
  0x25   :  { %v2990_v45 = vld [vmem:[%s5516_s1 + $0x4e0] sm:$0xf]  ;;  %v3119_v49 = vor.u32 %v3594_v37, %v3118_v36  ;;  %v3622_v52 = vld [vmem:[%s5516_s1 + $0x6cc] sm:$0xf0]  ;;  %1664 = vmatmul.bf16.vlgmr.msra.gmra.mxu0 %v3918_v48  ;;  %1702 = vmatmul.bf16.vlgmr.msra.gmra.mxu2 %v3931_v54  ;;  %v2342_v32 = vld [vmem:[%s5517_s0 + $0x48] sm:$0xf] }
  0x26   :  { %v3374_v47 = vld [vmem:[%s5516_s1 + $0x7e0] sm:$0xf]  ;;  %v3590_v56 = vld [vmem:[%s5516_s1 + $0x5cc] sm:$0xf0]  ;;  %v2991_v58 = vor.u32 %v3562_v46, %v2990_v45  ;;  %1770 = vmatpush.bf16.msrb.mxu2 %v3247_v44  ;;  %1721 = vmatmul.bf16.vlgmr.msra.gmra.mxu3 %v3939_v57  ;;  %v3401_v36 = vld [vmem:[%s5517_s0 + $0x64] sm:$0xf0] }
  0x27   :  { %v3230_v51 = vld [vmem:[%s5516_s1 + $0x6c0] sm:$0xf]  ;;  %v3375_v59 = vor.u32 %v3658_v50, %v3374_v47  ;;  %v3558_v62 = vld [vmem:[%s5516_s1 + $0x4cc] sm:$0xf0]  ;;  %1751 = vmatpush.bf16.msrb.mxu1 %v3119_v49  ;;  %v3397_v37 = vld [vmem:[%s5517_s0 + $0x4c] sm:$0xf]  ;;  %v4061_v50 = vor.u32 %v3396_v28, %v2336_v29 }
  0x28   :  { %v3102_v55 = vld [vmem:[%s5516_s1 + $0x5c0] sm:$0xf]  ;;  %v3231_v60 = vor.u32 %v3622_v52, %v3230_v51  ;;  %v3654_v1 = vld [vmem:[%s5516_s1 + $0x7cc] sm:$0xf0]  ;;  %1732 = vmatpush.bf16.msrb.mxu0 %v2991_v58  ;;  %v4063_v51 = vor.u32 %v3401_v36, %v2342_v32  ;;  %v3390_v32 = vld [vmem:[%s5517_s0 + $0x14] sm:$0xf] }
  0x29   :  { %v2974_v61 = vld [vmem:[%s5516_s1 + $0x4c0] sm:$0xf]  ;;  %v3103_v0 = vor.u32 %v3590_v56, %v3102_v55  ;;  %v3618_v3 = vld [vmem:[%s5516_s1 + $0x6ac] sm:$0xf0]  ;;  %1789 = vmatpush.bf16.msrb.mxu3 %v3375_v59  ;;  %v4071_v56 = vor.u32 %v3397_v37, %v2344_v38  ;;  %v2480_v36 = vld [vmem:[%s5516_s1 + $0xf0] sm:$0xf0] }
  0x2a   :  { %v3358_v63 = vld [vmem:[%s5516_s1 + $0x7c0] sm:$0xf]  ;;  %v3586_v5 = vld [vmem:[%s5516_s1 + $0x5ac] sm:$0xf0]  ;;  %v2975_v6 = vor.u32 %v3558_v62, %v2974_v61  ;;  %1771 = vmatpush.bf16.msrb.mxu2 %v3231_v60  ;;  %v3528_v37 = vld [vmem:[%s5516_s1 + $0x3e4] sm:$0xf] }
  0x2b   :  { %v3214_v2 = vld [vmem:[%s5516_s1 + $0x6a0] sm:$0xf]  ;;  %v3359_v7 = vor.u32 %v3654_v1, %v3358_v63  ;;  %v3554_v10 = vld [vmem:[%s5516_s1 + $0x4ac] sm:$0xf0]  ;;  %1752 = vmatpush.bf16.msrb.mxu1 %v3103_v0 }
  0x2c   :  { %v3086_v4 = vld [vmem:[%s5516_s1 + $0x5a0] sm:$0xf]  ;;  %v3215_v8 = vor.u32 %v3618_v3, %v3214_v2  ;;  %v3650_v13 = vld [vmem:[%s5516_s1 + $0x7ac] sm:$0xf0]  ;;  %1733 = vmatpush.bf16.msrb.mxu0 %v2975_v6 }
  0x2d   :  { %v2958_v9 = vld [vmem:[%s5516_s1 + $0x4a0] sm:$0xf]  ;;  %v3087_v12 = vor.u32 %v3586_v5, %v3086_v4  ;;  %v3614_v15 = vld [vmem:[%s5516_s1 + $0x68c] sm:$0xf0]  ;;  %1790 = vmatpush.bf16.msrb.mxu3 %v3359_v7 }
  0x2e   :  { %v3342_v11 = vld [vmem:[%s5516_s1 + $0x7a0] sm:$0xf]  ;;  %v3582_v17 = vld [vmem:[%s5516_s1 + $0x58c] sm:$0xf0]  ;;  %v2959_v18 = vor.u32 %v3554_v10, %v2958_v9  ;;  %1772 = vmatpush.bf16.msrb.mxu2 %v3215_v8 }
  0x2f   :  { %v3198_v14 = vld [vmem:[%s5516_s1 + $0x680] sm:$0xf]  ;;  %v3550_v20 = vld [vmem:[%s5516_s1 + $0x48c] sm:$0xf0]  ;;  %v3343_v22 = vor.u32 %v3650_v13, %v3342_v11  ;;  %1753 = vmatpush.bf16.msrb.mxu1 %v3087_v12 }
  0x30   :  { %v3070_v16 = vld [vmem:[%s5516_s1 + $0x580] sm:$0xf]  ;;  %v3199_v23 = vor.u32 %v3614_v15, %v3198_v14  ;;  %v3646_v24 = vld [vmem:[%s5516_s1 + $0x78c] sm:$0xf0]  ;;  %1734 = vmatpush.bf16.msrb.mxu0 %v2959_v18  ;;  %v3496_v18 = vld [vmem:[%s5516_s1 + $0x2e4] sm:$0xf] }
  0x31   :  { %v2942_v19 = vld [vmem:[%s5516_s1 + $0x480] sm:$0xf]  ;;  %v3071_v27 = vor.u32 %v3582_v17, %v3070_v16  ;;  %v3610_v31 = vld [vmem:[%s5516_s1 + $0x66c] sm:$0xf0]  ;;  %1791 = vmatpush.bf16.msrb.mxu3 %v3343_v22  ;;  %v3464_v22 = vld [vmem:[%s5516_s1 + $0x1e4] sm:$0xf] }
  0x32   :  { %v3326_v21 = vld [vmem:[%s5516_s1 + $0x780] sm:$0xf]  ;;  %v3578_v34 = vld [vmem:[%s5516_s1 + $0x56c] sm:$0xf0]  ;;  %v2943_v35 = vor.u32 %v3550_v20, %v2942_v19  ;;  %1773 = vmatpush.bf16.msrb.mxu2 %v3199_v23  ;;  %v2736_v19 = vld [vmem:[%s5516_s1 + $0x2f0] sm:$0xf0] }
  0x33   :  { %v2334_v25 = vld [vmem:[%s5517_s0 + $0x40] sm:$0xf]  ;;  %v3327_v39 = vor.u32 %v3646_v24, %v3326_v21  ;;  %v3546_v42 = vld [vmem:[%s5516_s1 + $0x46c] sm:$0xf0]  ;;  %1754 = vmatpush.bf16.msrb.mxu1 %v3071_v27  ;;  %v2608_v23 = vld [vmem:[%s5516_s1 + $0x1f0] sm:$0xf0] }
  0x34   :  { %v3400_v26 = vld [vmem:[%s5517_s0 + $0x5c] sm:$0xf0]  ;;  %v3642_v46 = vld [vmem:[%s5516_s1 + $0x76c] sm:$0xf0]  ;;  %1735 = vmatpush.bf16.msrb.mxu0 %v2943_v35  ;;  %1688 = vmatmul.bf16.gmra.mxu1 %v4061_v50  ;;  %v3432_v35 = vld [vmem:[%s5516_s1 + $0xe4] sm:$0xf]  ;;  %v2611_v38 = vor.u32 %v3464_v22, %v2608_v23 }
  0x35   :  { %v3182_v30 = vld [vmem:[%s5516_s1 + $0x660] sm:$0xf]  ;;  %v4050_v44 = vor.u32 %v3400_v26, %v2334_v25  ;;  %v3606_v49 = vld [vmem:[%s5516_s1 + $0x64c] sm:$0xf0]  ;;  %1792 = vmatpush.bf16.msrb.mxu3 %v3327_v39  ;;  %1707 = vmatmul.bf16.gmra.mxu2 %v4063_v51  ;;  %v2864_v39 = vld [vmem:[%s5516_s1 + $0x3f0] sm:$0xf0] }
  0x36   :  { %v3054_v33 = vld [vmem:[%s5516_s1 + $0x560] sm:$0xf]  ;;  %v3183_v40 = vor.u32 %v3610_v31, %v3182_v30  ;;  %v3574_v55 = vld [vmem:[%s5516_s1 + $0x54c] sm:$0xf0]  ;;  %1726 = vmatmul.bf16.gmra.mxu3 %v4071_v56  ;;  %v2432_v22 = vld [vmem:[%s5516_s1 + $0x90] sm:$0xf0] }
  0x37   :  { %v2926_v41 = vld [vmem:[%s5516_s1 + $0x460] sm:$0xf]  ;;  %v3055_v45 = vor.u32 %v3578_v34, %v3054_v33  ;;  %v3542_v62 = vld [vmem:[%s5516_s1 + $0x44c] sm:$0xf0]  ;;  %1669 = vmatmul.bf16.gmra.mxu0 %v4050_v44  ;;  %v2320_v33 = vld [vmem:[%s5517_s0 + $0x30] sm:$0xf0]  ;;  %v2739_v34 = vor.u32 %v3496_v18, %v2736_v19 }
  0x38   :  { %v3310_v43 = vld [vmem:[%s5516_s1 + $0x760] sm:$0xf]  ;;  %v2927_v58 = vor.u32 %v3546_v42, %v2926_v41  ;;  %1774 = vmatpush.bf16.msrb.mxu2 %v3183_v40  ;;  %v3638_v1 = vld [vmem:[%s5516_s1 + $0x74c] sm:$0xf0]  ;;  %v3492_v40 = vld [vmem:[%s5516_s1 + $0x2c4] sm:$0xf] }
  0x39   :  { %v3166_v47 = vld [vmem:[%s5516_s1 + $0x640] sm:$0xf]  ;;  %v3311_v59 = vor.u32 %v3642_v46, %v3310_v43  ;;  %1755 = vmatpush.bf16.msrb.mxu1 %v3055_v45  ;;  %v3602_v3 = vld [vmem:[%s5516_s1 + $0x62c] sm:$0xf0]  ;;  %v2720_v41 = vld [vmem:[%s5516_s1 + $0x2d0] sm:$0xf0] }
  0x3a   :  { %v3038_v52 = vld [vmem:[%s5516_s1 + $0x540] sm:$0xf]  ;;  %v3167_v60 = vor.u32 %v3606_v49, %v3166_v47  ;;  %v3570_v5 = vld [vmem:[%s5516_s1 + $0x52c] sm:$0xf0]  ;;  %1736 = vmatpush.bf16.msrb.mxu0 %v2927_v58  ;;  %v2326_v43 = vld [vmem:[%s5517_s0 + $0x18] sm:$0xf] }
  0x3b   :  { %v2910_v61 = vld [vmem:[%s5516_s1 + $0x440] sm:$0xf]  ;;  %v3039_v0 = vor.u32 %v3574_v55, %v3038_v52  ;;  %1793 = vmatpush.bf16.msrb.mxu3 %v3311_v59  ;;  %v3538_v10 = vld [vmem:[%s5516_s1 + $0x42c] sm:$0xf0]  ;;  %v3395_v45 = vld [vmem:[%s5517_s0 + $0x34] sm:$0xf0]  ;;  %v2483_v52 = vor.u32 %v3432_v35, %v2480_v36  ;;  %v2867_v59 = vor.u32 %v3528_v37, %v2864_v39 }
  0x3c   :  { %v3294_v63 = vld [vmem:[%s5516_s1 + $0x740] sm:$0xf]  ;;  %v2911_v6 = vor.u32 %v3542_v62, %v2910_v61  ;;  %1775 = vmatpush.bf16.msrb.mxu2 %v3167_v60  ;;  %v3634_v12 = vld [vmem:[%s5516_s1 + $0x72c] sm:$0xf0]  ;;  %v3391_v46 = vld [vmem:[%s5517_s0 + $0x1c] sm:$0xf]  ;;  %v2723_v60 = vor.u32 %v3492_v40, %v2720_v41 }
  0x3d   :  { %v3150_v2 = vld [vmem:[%s5516_s1 + $0x620] sm:$0xf]  ;;  %v3295_v8 = vor.u32 %v3638_v1, %v3294_v63  ;;  %1756 = vmatpush.bf16.msrb.mxu1 %v3039_v0  ;;  %v3598_v15 = vld [vmem:[%s5516_s1 + $0x60c] sm:$0xf0]  ;;  %v2328_v49 = vld [vmem:[%s5517_s0 + $0x38] sm:$0xf0]  ;;  %v4208_v1 = vor.u32 %v3390_v32, %v2320_v33 }
  0x3e   :  { %v3022_v4 = vld [vmem:[%s5516_s1 + $0x520] sm:$0xf]  ;;  %v3151_v9 = vor.u32 %v3602_v3, %v3150_v2  ;;  %v3566_v17 = vld [vmem:[%s5516_s1 + $0x50c] sm:$0xf0]  ;;  %1737 = vmatpush.bf16.msrb.mxu0 %v2911_v6  ;;  %v3428_v55 = vld [vmem:[%s5516_s1 + $0xc4] sm:$0xf]  ;;  %v4221_v6 = vor.u32 %v3391_v46, %v2328_v49 }
  0x3f   :  { %v2894_v7 = vld [vmem:[%s5516_s1 + $0x420] sm:$0xf]  ;;  %v3023_v13 = vor.u32 %v3570_v5, %v3022_v4  ;;  %1794 = vmatpush.bf16.msrb.mxu3 %v3295_v8  ;;  %v3534_v26 = vld [vmem:[%s5516_s1 + $0x40c] sm:$0xf0]  ;;  %v2464_v58 = vld [vmem:[%s5516_s1 + $0xd0] sm:$0xf0]  ;;  %v4219_v5 = vor.u32 %v3395_v45, %v2326_v43 }
  0x40   :  { %v3278_v11 = vld [vmem:[%s5516_s1 + $0x720] sm:$0xf]  ;;  %v2895_v20 = vor.u32 %v3538_v10, %v2894_v7  ;;  %1776 = vmatpush.bf16.msrb.mxu2 %v3151_v9  ;;  %v3630_v28 = vld [vmem:[%s5516_s1 + $0x70c] sm:$0xf0]  ;;  %v3460_v61 = vld [vmem:[%s5516_s1 + $0x1c4] sm:$0xf]  ;;  %v2467_v7 = vor.u32 %v3428_v55, %v2464_v58 }
  0x41   :  { %v3134_v14 = vld [vmem:[%s5516_s1 + $0x600] sm:$0xf]  ;;  %v3279_v24 = vor.u32 %v3634_v12, %v3278_v11  ;;  %1757 = vmatpush.bf16.msrb.mxu1 %v3023_v13  ;;  %v2318_v30 = vld [vmem:[%s5517_s0 + $0x10] sm:$0xf]  ;;  %v2592_v62 = vld [vmem:[%s5516_s1 + $0x1d0] sm:$0xf0] }
  0x42   :  { %v3006_v16 = vld [vmem:[%s5516_s1 + $0x500] sm:$0xf]  ;;  %v3135_v25 = vor.u32 %v3598_v15, %v3134_v14  ;;  %v3394_v31 = vld [vmem:[%s5517_s0 + $0x2c] sm:$0xf0]  ;;  %1738 = vmatpush.bf16.msrb.mxu0 %v2895_v20  ;;  %v3524_v63 = vld [vmem:[%s5516_s1 + $0x3c4] sm:$0xf]  ;;  %v2595_v8 = vor.u32 %v3460_v61, %v2592_v62 }
  0x43   :  { %v2878_v21 = vld [vmem:[%s5516_s1 + $0x400] sm:$0xf]  ;;  %v3007_v29 = vor.u32 %v3566_v17, %v3006_v16  ;;  %1795 = vmatpush.bf16.msrb.mxu3 %v3279_v24  ;;  %v4206_v0 = vor.u32 %v3394_v31, %v2318_v30  ;;  %v2848_v2 = vld [vmem:[%s5516_s1 + $0x3d0] sm:$0xf0]  ;;  %v3488_v3 = vld [vmem:[%s5516_s1 + $0x2a4] sm:$0xf] }
  0x44   :  { %v3262_v27 = vld [vmem:[%s5516_s1 + $0x700] sm:$0xf]  ;;  %v2879_v42 = vor.u32 %v3534_v26, %v2878_v21  ;;  %1777 = vmatpush.bf16.msrb.mxu2 %v3135_v25  ;;  %v2704_v4 = vld [vmem:[%s5516_s1 + $0x2b0] sm:$0xf0]  ;;  %v3424_v9 = vld [vmem:[%s5516_s1 + $0xa4] sm:$0xf]  ;;  %v2851_v11 = vor.u32 %v3524_v63, %v2848_v2 }
  0x45   :  { %v3263_v47 = vor.u32 %v3630_v28, %v3262_v27  ;;  %1758 = vmatpush.bf16.msrb.mxu1 %v3007_v29  ;;  %v2448_v10 = vld [vmem:[%s5516_s1 + $0xb0] sm:$0xf0]  ;;  %v2707_v12 = vor.u32 %v3488_v3, %v2704_v4  ;;  %v3456_v13 = vld [vmem:[%s5516_s1 + $0x1a4] sm:$0xf]  ;;  %v2350_v36 = vld [vmem:[%s5517_s0 + $0x50] sm:$0xf] }
  0x46   :  { %1739 = vmatpush.bf16.msrb.mxu0 %v2879_v42  ;;  %v2576_v14 = vld [vmem:[%s5516_s1 + $0x1b0] sm:$0xf0]  ;;  %v3520_v15 = vld [vmem:[%s5516_s1 + $0x3a4] sm:$0xf]  ;;  %v2451_v19 = vor.u32 %v3424_v9, %v2448_v10  ;;  %v3402_v37 = vld [vmem:[%s5517_s0 + $0x6c] sm:$0xf0] }
  0x47   :  { %1796 = vmatpush.bf16.msrb.mxu3 %v3263_v47  ;;  %v2832_v16 = vld [vmem:[%s5516_s1 + $0x3b0] sm:$0xf0]  ;;  %v3484_v17 = vld [vmem:[%s5516_s1 + $0x284] sm:$0xf]  ;;  %1778 = vmatmul.bf16.vlgmr.msrb.gmra.mxu2 %v4219_v5  ;;  %v2579_v20 = vor.u32 %v3456_v13, %v2576_v14  ;;  %v2358_v49 = vld [vmem:[%s5517_s0 + $0x58] sm:$0xf] }
  0x48   :  { %1846 = vmatpush.bf16.msra.mxu2 %v2739_v34  ;;  %1759 = vmatmul.bf16.vlgmr.msrb.gmra.mxu1 %v4208_v1  ;;  %v2688_v18 = vld [vmem:[%s5516_s1 + $0x290] sm:$0xf0]  ;;  %v3420_v21 = vld [vmem:[%s5516_s1 + $0x84] sm:$0xf]  ;;  %v2835_v23 = vor.u32 %v3520_v15, %v2832_v16  ;;  %v3399_v55 = vld [vmem:[%s5517_s0 + $0x5c] sm:$0xf] }
  0x49   :  { %1827 = vmatpush.bf16.msra.mxu1 %v2611_v38  ;;  %1740 = vmatmul.bf16.vlgmr.msrb.gmra.mxu0 %v4206_v0  ;;  %v2691_v24 = vor.u32 %v3484_v17, %v2688_v18  ;;  %v3452_v25 = vld [vmem:[%s5516_s1 + $0x184] sm:$0xf]  ;;  %v2560_v26 = vld [vmem:[%s5516_s1 + $0x190] sm:$0xf0]  ;;  %v2435_v31 = vor.u32 %v3420_v21, %v2432_v22  ;;  %v2360_v58 = vld [vmem:[%s5517_s0 + $0x78] sm:$0xf0] }
  0x4a   :  { %1808 = vmatpush.bf16.msra.mxu0 %v2483_v52  ;;  %1797 = vmatmul.bf16.vlgmr.msrb.gmra.mxu3 %v4221_v6  ;;  %v3516_v27 = vld [vmem:[%s5516_s1 + $0x384] sm:$0xf]  ;;  %v2816_v28 = vld [vmem:[%s5516_s1 + $0x390] sm:$0xf0]  ;;  %v2563_v32 = vor.u32 %v3452_v25, %v2560_v26  ;;  %v3403_v52 = vld [vmem:[%s5517_s0 + $0x74] sm:$0xf0]  ;;  %v4353_v14 = vor.u32 %v3399_v55, %v2360_v58 }
  0x4b   :  { %1865 = vmatpush.bf16.msra.mxu3 %v2867_v59  ;;  %v3480_v29 = vld [vmem:[%s5516_s1 + $0x264] sm:$0xf]  ;;  %v2672_v30 = vld [vmem:[%s5516_s1 + $0x270] sm:$0xf0]  ;;  %v2819_v35 = vor.u32 %v3516_v27, %v2816_v28  ;;  %v4351_v13 = vor.u32 %v3403_v52, %v2358_v49 }
  0x4c   :  { %1847 = vmatpush.bf16.msra.mxu2 %v2723_v60  ;;  %v3416_v33 = vld [vmem:[%s5516_s1 + $0x64] sm:$0xf]  ;;  %v2416_v34 = vld [vmem:[%s5516_s1 + $0x70] sm:$0xf0]  ;;  %v2675_v40 = vor.u32 %v3480_v29, %v2672_v30 }
  0x4d   :  { %1828 = vmatpush.bf16.msra.mxu1 %v2595_v8  ;;  %v3398_v38 = vld [vmem:[%s5517_s0 + $0x54] sm:$0xf]  ;;  %v3448_v41 = vld [vmem:[%s5516_s1 + $0x164] sm:$0xf]  ;;  %v2419_v59 = vor.u32 %v3416_v33, %v2416_v34  ;;  %v4338_v8 = vor.u32 %v3402_v37, %v2350_v36 }
  0x4e   :  { %1809 = vmatpush.bf16.msra.mxu0 %v2467_v7  ;;  %v2352_v39 = vld [vmem:[%s5517_s0 + $0x70] sm:$0xf0]  ;;  %v3512_v43 = vld [vmem:[%s5516_s1 + $0x364] sm:$0xf] }
  0x4f   :  { %1866 = vmatpush.bf16.msra.mxu3 %v2851_v11  ;;  %v2544_v42 = vld [vmem:[%s5516_s1 + $0x170] sm:$0xf0]  ;;  %v3476_v46 = vld [vmem:[%s5516_s1 + $0x244] sm:$0xf]  ;;  %v4340_v9 = vor.u32 %v3398_v38, %v2352_v39 }
  0x50   :  { %1848 = vmatpush.bf16.msra.mxu2 %v2707_v12  ;;  %v2800_v45 = vld [vmem:[%s5516_s1 + $0x370] sm:$0xf0]  ;;  %v2547_v60 = vor.u32 %v3448_v41, %v2544_v42  ;;  %v3412_v61 = vld [vmem:[%s5516_s1 + $0x44] sm:$0xf] }
  0x51   :  { %1829 = vmatpush.bf16.msra.mxu1 %v2579_v20  ;;  %v2656_v47 = vld [vmem:[%s5516_s1 + $0x250] sm:$0xf0]  ;;  %v2803_v63 = vor.u32 %v3512_v43, %v2800_v45  ;;  %v3444_v3 = vld [vmem:[%s5516_s1 + $0x144] sm:$0xf] }
  0x52   :  { %1810 = vmatpush.bf16.msra.mxu0 %v2451_v19  ;;  %v2400_v62 = vld [vmem:[%s5516_s1 + $0x50] sm:$0xf0]  ;;  %v2659_v2 = vor.u32 %v3476_v46, %v2656_v47  ;;  %v3508_v7 = vld [vmem:[%s5516_s1 + $0x344] sm:$0xf] }
  0x53   :  { %1867 = vmatpush.bf16.msra.mxu3 %v2835_v23  ;;  %v2528_v4 = vld [vmem:[%s5516_s1 + $0x150] sm:$0xf0]  ;;  %v3472_v11 = vld [vmem:[%s5516_s1 + $0x224] sm:$0xf]  ;;  %v2403_v15 = vor.u32 %v3412_v61, %v2400_v62 }
  0x54   :  { %1849 = vmatpush.bf16.msra.mxu2 %v2691_v24  ;;  %v2784_v10 = vld [vmem:[%s5516_s1 + $0x350] sm:$0xf0]  ;;  %v2531_v16 = vor.u32 %v3444_v3, %v2528_v4  ;;  %v3408_v17 = vld [vmem:[%s5516_s1 + $0x24] sm:$0xf] }
  0x55   :  { %1830 = vmatpush.bf16.msra.mxu1 %v2563_v32  ;;  %v2640_v12 = vld [vmem:[%s5516_s1 + $0x230] sm:$0xf0]  ;;  %v2787_v19 = vor.u32 %v3508_v7, %v2784_v10  ;;  %v3440_v21 = vld [vmem:[%s5516_s1 + $0x124] sm:$0xf] }
  0x56   :  { %1811 = vmatpush.bf16.msra.mxu0 %v2435_v31  ;;  %v2384_v18 = vld [vmem:[%s5516_s1 + $0x30] sm:$0xf0]  ;;  %v2643_v20 = vor.u32 %v3472_v11, %v2640_v12  ;;  %v3504_v23 = vld [vmem:[%s5516_s1 + $0x324] sm:$0xf] }
  0x57   :  { %1868 = vmatpush.bf16.msra.mxu3 %v2819_v35  ;;  %v2512_v22 = vld [vmem:[%s5516_s1 + $0x130] sm:$0xf0]  ;;  %v3468_v25 = vld [vmem:[%s5516_s1 + $0x204] sm:$0xf]  ;;  %1783 = vmatmul.bf16.gmra.mxu2 %v4351_v13  ;;  %v2387_v29 = vor.u32 %v3408_v17, %v2384_v18 }
  0x58   :  { %1850 = vmatpush.bf16.msra.mxu2 %v2675_v40  ;;  %1764 = vmatmul.bf16.gmra.mxu1 %v4340_v9  ;;  %v2768_v24 = vld [vmem:[%s5516_s1 + $0x330] sm:$0xf0]  ;;  %v3624_v27 = vld [vmem:[%s5516_s1 + $0x6e4] sm:$0xf]  ;;  %v2515_v30 = vor.u32 %v3440_v21, %v2512_v22 }
  0x59   :  { %1831 = vmatpush.bf16.msra.mxu1 %v2547_v60  ;;  %1745 = vmatmul.bf16.gmra.mxu0 %v4338_v8  ;;  %v2624_v26 = vld [vmem:[%s5516_s1 + $0x210] sm:$0xf0]  ;;  %v3404_v31 = vld [vmem:[%s5516_s1 + $0x4] sm:$0xf]  ;;  %v2771_v34 = vor.u32 %v3504_v23, %v2768_v24 }
  0x5a   :  { %1812 = vmatpush.bf16.msra.mxu0 %v2419_v59  ;;  %1802 = vmatmul.bf16.gmra.mxu3 %v4353_v14  ;;  %v3248_v28 = vld [vmem:[%s5516_s1 + $0x6f0] sm:$0xf0]  ;;  %v3436_v33 = vld [vmem:[%s5516_s1 + $0x104] sm:$0xf]  ;;  %v2627_v35 = vor.u32 %v3468_v25, %v2624_v26 }
  0x5b   :  { %1869 = vmatpush.bf16.msra.mxu3 %v2803_v63  ;;  %v2368_v32 = vld [vmem:[%s5516_s1 + $0x10] sm:$0xf0]  ;;  %v3500_v37 = vld [vmem:[%s5516_s1 + $0x304] sm:$0xf]  ;;  %v3251_v39 = vor.u32 %v3624_v27, %v3248_v28 }
  0x5c   :  { %1851 = vmatpush.bf16.msra.mxu2 %v2659_v2  ;;  %v2496_v36 = vld [vmem:[%s5516_s1 + $0x110] sm:$0xf0]  ;;  %v3560_v40 = vld [vmem:[%s5516_s1 + $0x4e4] sm:$0xf]  ;;  %v2371_v47 = vor.u32 %v3404_v31, %v2368_v32 }
  0x5d   :  { %1832 = vmatpush.bf16.msra.mxu1 %v2531_v16  ;;  %v2752_v38 = vld [vmem:[%s5516_s1 + $0x310] sm:$0xf0]  ;;  %v3592_v42 = vld [vmem:[%s5516_s1 + $0x5e4] sm:$0xf]  ;;  %v2499_v49 = vor.u32 %v3436_v33, %v2496_v36 }
  0x5e   :  { %1813 = vmatpush.bf16.msra.mxu0 %v2403_v15  ;;  %v2992_v41 = vld [vmem:[%s5516_s1 + $0x4f0] sm:$0xf0]  ;;  %v3656_v45 = vld [vmem:[%s5516_s1 + $0x7e4] sm:$0xf]  ;;  %v2755_v58 = vor.u32 %v3500_v37, %v2752_v38 }
  0x5f   :  { %1870 = vmatpush.bf16.msra.mxu3 %v2787_v19  ;;  %v3120_v43 = vld [vmem:[%s5516_s1 + $0x5f0] sm:$0xf0]  ;;  %v3620_v52 = vld [vmem:[%s5516_s1 + $0x6c4] sm:$0xf]  ;;  %v2995_v59 = vor.u32 %v3560_v40, %v2992_v41 }
  0x60   :  { %1852 = vmatpush.bf16.msra.mxu2 %v2643_v20  ;;  %v3376_v46 = vld [vmem:[%s5516_s1 + $0x7f0] sm:$0xf0]  ;;  %v3123_v60 = vor.u32 %v3592_v42, %v3120_v43  ;;  %v3556_v62 = vld [vmem:[%s5516_s1 + $0x4c4] sm:$0xf] }
  0x61   :  { %1833 = vmatpush.bf16.msra.mxu1 %v2515_v30  ;;  %v3232_v55 = vld [vmem:[%s5516_s1 + $0x6d0] sm:$0xf0]  ;;  %v3379_v61 = vor.u32 %v3656_v45, %v3376_v46  ;;  %v3588_v3 = vld [vmem:[%s5516_s1 + $0x5c4] sm:$0xf] }
  0x62   :  { %1814 = vmatpush.bf16.msra.mxu0 %v2387_v29  ;;  %v2976_v63 = vld [vmem:[%s5516_s1 + $0x4d0] sm:$0xf0]  ;;  %v3235_v2 = vor.u32 %v3620_v52, %v3232_v55  ;;  %v3652_v10 = vld [vmem:[%s5516_s1 + $0x7c4] sm:$0xf] }
  0x63   :  { %1871 = vmatpush.bf16.msra.mxu3 %v2771_v34  ;;  %v3104_v4 = vld [vmem:[%s5516_s1 + $0x5d0] sm:$0xf0]  ;;  %v2979_v7 = vor.u32 %v3556_v62, %v2976_v63  ;;  %v3616_v12 = vld [vmem:[%s5516_s1 + $0x6a4] sm:$0xf] }
  0x64   :  { %1853 = vmatpush.bf16.msra.mxu2 %v2627_v35  ;;  %v3360_v11 = vld [vmem:[%s5516_s1 + $0x7d0] sm:$0xf0]  ;;  %v3552_v16 = vld [vmem:[%s5516_s1 + $0x4a4] sm:$0xf]  ;;  %v3107_v18 = vor.u32 %v3588_v3, %v3104_v4 }
  0x65   :  { %1834 = vmatpush.bf16.msra.mxu1 %v2499_v49  ;;  %v3216_v15 = vld [vmem:[%s5516_s1 + $0x6b0] sm:$0xf0]  ;;  %v3363_v19 = vor.u32 %v3652_v10, %v3360_v11  ;;  %v3584_v20 = vld [vmem:[%s5516_s1 + $0x5a4] sm:$0xf] }
  0x66   :  { %1815 = vmatpush.bf16.msra.mxu0 %v2371_v47  ;;  %v2960_v17 = vld [vmem:[%s5516_s1 + $0x4b0] sm:$0xf0]  ;;  %v3219_v22 = vor.u32 %v3616_v12, %v3216_v15  ;;  %v3648_v24 = vld [vmem:[%s5516_s1 + $0x7a4] sm:$0xf] }
  0x67   :  { %1872 = vmatpush.bf16.msra.mxu3 %v2755_v58  ;;  %v3088_v21 = vld [vmem:[%s5516_s1 + $0x5b0] sm:$0xf0]  ;;  %v2963_v23 = vor.u32 %v3552_v16, %v2960_v17  ;;  %v3612_v26 = vld [vmem:[%s5516_s1 + $0x684] sm:$0xf]  ;;  %1854 = vmatmul.bf16.vlgmr.msra.gmra.mxu2 %v3931_v54 }
  0x68   :  { %1922 = vmatpush.bf16.msrb.mxu2 %v3251_v39  ;;  %v3344_v25 = vld [vmem:[%s5516_s1 + $0x7b0] sm:$0xf0]  ;;  %1835 = vmatmul.bf16.vlgmr.msra.gmra.mxu1 %v3929_v53  ;;  %v3548_v28 = vld [vmem:[%s5516_s1 + $0x484] sm:$0xf]  ;;  %v3091_v30 = vor.u32 %v3584_v20, %v3088_v21 }
  0x69   :  { %1903 = vmatpush.bf16.msrb.mxu1 %v3123_v60  ;;  %1816 = vmatmul.bf16.vlgmr.msra.gmra.mxu0 %v3918_v48  ;;  %v3200_v27 = vld [vmem:[%s5516_s1 + $0x690] sm:$0xf0]  ;;  %v3347_v31 = vor.u32 %v3648_v24, %v3344_v25  ;;  %v3580_v32 = vld [vmem:[%s5516_s1 + $0x584] sm:$0xf] }
  0x6a   :  { %1884 = vmatpush.bf16.msrb.mxu0 %v2995_v59  ;;  %v2944_v29 = vld [vmem:[%s5516_s1 + $0x490] sm:$0xf0]  ;;  %1873 = vmatmul.bf16.vlgmr.msra.gmra.mxu3 %v3939_v57  ;;  %v3203_v34 = vor.u32 %v3612_v26, %v3200_v27  ;;  %v3644_v36 = vld [vmem:[%s5516_s1 + $0x784] sm:$0xf] }
  0x6b   :  { %1941 = vmatpush.bf16.msrb.mxu3 %v3379_v61  ;;  %v3072_v33 = vld [vmem:[%s5516_s1 + $0x590] sm:$0xf0]  ;;  %v2947_v35 = vor.u32 %v3548_v28, %v2944_v29  ;;  %v3608_v38 = vld [vmem:[%s5516_s1 + $0x664] sm:$0xf] }
  0x6c   :  { %1923 = vmatpush.bf16.msrb.mxu2 %v3235_v2  ;;  %v3328_v37 = vld [vmem:[%s5516_s1 + $0x790] sm:$0xf0]  ;;  %v3544_v40 = vld [vmem:[%s5516_s1 + $0x464] sm:$0xf]  ;;  %v3075_v42 = vor.u32 %v3580_v32, %v3072_v33  ;;  %v2486_v32 = vld [vmem:[%s5516_s1 + $0xe8] sm:$0xf] }
  0x6d   :  { %1904 = vmatpush.bf16.msrb.mxu1 %v3107_v18  ;;  %v3184_v39 = vld [vmem:[%s5516_s1 + $0x670] sm:$0xf0]  ;;  %v3331_v43 = vor.u32 %v3644_v36, %v3328_v37  ;;  %v3576_v45 = vld [vmem:[%s5516_s1 + $0x564] sm:$0xf]  ;;  %v3435_v33 = vld [vmem:[%s5516_s1 + $0xf4] sm:$0xf0] }
  0x6e   :  { %1885 = vmatpush.bf16.msrb.mxu0 %v2979_v7  ;;  %v2928_v41 = vld [vmem:[%s5516_s1 + $0x470] sm:$0xf0]  ;;  %v3187_v47 = vor.u32 %v3608_v38, %v3184_v39  ;;  %v3640_v52 = vld [vmem:[%s5516_s1 + $0x764] sm:$0xf] }
  0x6f   :  { %1942 = vmatpush.bf16.msrb.mxu3 %v3363_v19  ;;  %v3056_v46 = vld [vmem:[%s5516_s1 + $0x570] sm:$0xf0]  ;;  %v2931_v49 = vor.u32 %v3544_v40, %v2928_v41  ;;  %v3604_v58 = vld [vmem:[%s5516_s1 + $0x644] sm:$0xf] }
  0x70   :  { %1924 = vmatpush.bf16.msrb.mxu2 %v3219_v22  ;;  %v3312_v55 = vld [vmem:[%s5516_s1 + $0x770] sm:$0xf0]  ;;  %v3540_v60 = vld [vmem:[%s5516_s1 + $0x444] sm:$0xf]  ;;  %v3059_v62 = vor.u32 %v3576_v45, %v3056_v46  ;;  %v2487_v46 = vor.u32 %v3435_v33, %v2486_v32  ;;  %v2566_v32 = vld [vmem:[%s5516_s1 + $0x188] sm:$0xf] }
  0x71   :  { %1905 = vmatpush.bf16.msrb.mxu1 %v3091_v30  ;;  %v3168_v59 = vld [vmem:[%s5516_s1 + $0x650] sm:$0xf0]  ;;  %v3315_v63 = vor.u32 %v3640_v52, %v3312_v55  ;;  %v3572_v2 = vld [vmem:[%s5516_s1 + $0x544] sm:$0xf]  ;;  %v2742_v30 = vld [vmem:[%s5516_s1 + $0x2e8] sm:$0xf] }
  0x72   :  { %1886 = vmatpush.bf16.msrb.mxu0 %v2963_v23  ;;  %v2912_v61 = vld [vmem:[%s5516_s1 + $0x450] sm:$0xf0]  ;;  %v3171_v4 = vor.u32 %v3604_v58, %v3168_v59  ;;  %v3636_v10 = vld [vmem:[%s5516_s1 + $0x744] sm:$0xf]  ;;  %v2726_v52 = vld [vmem:[%s5516_s1 + $0x2c8] sm:$0xf] }
  0x73   :  { %1943 = vmatpush.bf16.msrb.mxu3 %v3347_v31  ;;  %v3040_v3 = vld [vmem:[%s5516_s1 + $0x550] sm:$0xf0]  ;;  %v2915_v7 = vor.u32 %v3540_v60, %v2912_v61  ;;  %v3600_v12 = vld [vmem:[%s5516_s1 + $0x624] sm:$0xf]  ;;  %v3499_v31 = vld [vmem:[%s5516_s1 + $0x2f4] sm:$0xf0] }
  0x74   :  { %1925 = vmatpush.bf16.msrb.mxu2 %v3203_v34  ;;  %v3296_v11 = vld [vmem:[%s5516_s1 + $0x750] sm:$0xf0]  ;;  %v3536_v16 = vld [vmem:[%s5516_s1 + $0x424] sm:$0xf]  ;;  %v3043_v18 = vor.u32 %v3572_v2, %v3040_v3  ;;  %v2743_v45 = vor.u32 %v3499_v31, %v2742_v30  ;;  %v3495_v55 = vld [vmem:[%s5516_s1 + $0x2d4] sm:$0xf0] }
  0x75   :  { %1906 = vmatpush.bf16.msrb.mxu1 %v3075_v42  ;;  %v3152_v15 = vld [vmem:[%s5516_s1 + $0x630] sm:$0xf0]  ;;  %v3299_v19 = vor.u32 %v3636_v10, %v3296_v11  ;;  %v3568_v20 = vld [vmem:[%s5516_s1 + $0x524] sm:$0xf]  ;;  %v2614_v42 = vld [vmem:[%s5516_s1 + $0x1e8] sm:$0xf]  ;;  %v2727_v3 = vor.u32 %v3495_v55, %v2726_v52 }
  0x76   :  { %1887 = vmatpush.bf16.msrb.mxu0 %v2947_v35  ;;  %v2896_v17 = vld [vmem:[%s5516_s1 + $0x430] sm:$0xf0]  ;;  %v3632_v22 = vld [vmem:[%s5516_s1 + $0x724] sm:$0xf]  ;;  %v3155_v23 = vor.u32 %v3600_v12, %v3152_v15  ;;  %v2470_v58 = vld [vmem:[%s5516_s1 + $0xc8] sm:$0xf] }
  0x77   :  { %1944 = vmatpush.bf16.msrb.mxu3 %v3331_v43  ;;  %v3024_v21 = vld [vmem:[%s5516_s1 + $0x530] sm:$0xf0]  ;;  %v2899_v24 = vor.u32 %v3536_v16, %v2896_v17  ;;  %v3596_v26 = vld [vmem:[%s5516_s1 + $0x604] sm:$0xf]  ;;  %1859 = vmatmul.bf16.gmra.mxu2 %v4063_v51  ;;  %v3467_v43 = vld [vmem:[%s5516_s1 + $0x1f4] sm:$0xf0] }
  0x78   :  { %1926 = vmatpush.bf16.msrb.mxu2 %v3187_v47  ;;  %v3280_v25 = vld [vmem:[%s5516_s1 + $0x730] sm:$0xf0]  ;;  %1840 = vmatmul.bf16.gmra.mxu1 %v4061_v50  ;;  %v3532_v28 = vld [vmem:[%s5516_s1 + $0x404] sm:$0xf]  ;;  %v3027_v34 = vor.u32 %v3568_v20, %v3024_v21  ;;  %v2870_v47 = vld [vmem:[%s5516_s1 + $0x3e8] sm:$0xf] }
  0x79   :  { %1907 = vmatpush.bf16.msrb.mxu1 %v3059_v62  ;;  %v3136_v27 = vld [vmem:[%s5516_s1 + $0x610] sm:$0xf0]  ;;  %1821 = vmatmul.bf16.gmra.mxu0 %v4050_v44  ;;  %v3283_v35 = vor.u32 %v3632_v22, %v3280_v25  ;;  %v3564_v36 = vld [vmem:[%s5516_s1 + $0x504] sm:$0xf]  ;;  %v3431_v59 = vld [vmem:[%s5516_s1 + $0xd4] sm:$0xf0]  ;;  %v2615_v62 = vor.u32 %v3467_v43, %v2614_v42 }
  0x7a   :  { %1888 = vmatpush.bf16.msrb.mxu0 %v2931_v49  ;;  %v2880_v29 = vld [vmem:[%s5516_s1 + $0x410] sm:$0xf0]  ;;  %1878 = vmatmul.bf16.gmra.mxu3 %v4071_v56  ;;  %v3628_v38 = vld [vmem:[%s5516_s1 + $0x704] sm:$0xf]  ;;  %v3139_v39 = vor.u32 %v3596_v26, %v3136_v27  ;;  %v3531_v49 = vld [vmem:[%s5516_s1 + $0x3f4] sm:$0xf0] }
  0x7b   :  { %1945 = vmatpush.bf16.msrb.mxu3 %v3315_v63  ;;  %v3008_v37 = vld [vmem:[%s5516_s1 + $0x510] sm:$0xf0]  ;;  %v2883_v40 = vor.u32 %v3532_v28, %v2880_v29  ;;  %v2871_v63 = vor.u32 %v3531_v49, %v2870_v47  ;;  %v2598_v2 = vld [vmem:[%s5516_s1 + $0x1c8] sm:$0xf]  ;;  %v3527_v11 = vld [vmem:[%s5516_s1 + $0x3d4] sm:$0xf0] }
  0x7c   :  { %1927 = vmatpush.bf16.msrb.mxu2 %v3171_v4  ;;  %v3264_v41 = vld [vmem:[%s5516_s1 + $0x710] sm:$0xf0]  ;;  %v3011_v60 = vor.u32 %v3564_v36, %v3008_v37  ;;  %v2471_v4 = vor.u32 %v3431_v59, %v2470_v58  ;;  %v2854_v10 = vld [vmem:[%s5516_s1 + $0x3c8] sm:$0xf]  ;;  %v3491_v15 = vld [vmem:[%s5516_s1 + $0x2b4] sm:$0xf0] }
  0x7d   :  { %1908 = vmatpush.bf16.msrb.mxu1 %v3043_v18  ;;  %v3267_v61 = vor.u32 %v3628_v38, %v3264_v41  ;;  %v2710_v12 = vld [vmem:[%s5516_s1 + $0x2a8] sm:$0xf]  ;;  %v2855_v17 = vor.u32 %v3527_v11, %v2854_v10  ;;  %v3459_v21 = vld [vmem:[%s5516_s1 + $0x1b4] sm:$0xf0] }
  0x7e   :  { %1889 = vmatpush.bf16.msrb.mxu0 %v2915_v7  ;;  %v3463_v7 = vld [vmem:[%s5516_s1 + $0x1d4] sm:$0xf0]  ;;  %v2454_v18 = vld [vmem:[%s5516_s1 + $0xa8] sm:$0xf] }
  0x7f   :  { %1946 = vmatpush.bf16.msrb.mxu3 %v3299_v19  ;;  %v2599_v16 = vor.u32 %v3463_v7, %v2598_v2  ;;  %v3427_v19 = vld [vmem:[%s5516_s1 + $0xb4] sm:$0xf0]  ;;  %v2582_v20 = vld [vmem:[%s5516_s1 + $0x1a8] sm:$0xf] }
  0x80   :  { %1928 = vmatpush.bf16.msrb.mxu2 %v3155_v23  ;;  %v2838_v22 = vld [vmem:[%s5516_s1 + $0x3a8] sm:$0xf]  ;;  %v3523_v23 = vld [vmem:[%s5516_s1 + $0x3b4] sm:$0xf0]  ;;  %v2455_v25 = vor.u32 %v3427_v19, %v2454_v18  ;;  %v2583_v28 = vor.u32 %v3459_v21, %v2582_v20 }
  0x81   :  { %1909 = vmatpush.bf16.msrb.mxu1 %v3027_v34  ;;  %v2694_v26 = vld [vmem:[%s5516_s1 + $0x288] sm:$0xf]  ;;  %v3487_v27 = vld [vmem:[%s5516_s1 + $0x294] sm:$0xf0]  ;;  %v2839_v29 = vor.u32 %v3523_v23, %v2838_v22 }
  0x82   :  { %1890 = vmatpush.bf16.msrb.mxu0 %v2899_v24  ;;  %v2711_v24 = vor.u32 %v3491_v15, %v2710_v12  ;;  %v2438_v30 = vld [vmem:[%s5516_s1 + $0x88] sm:$0xf]  ;;  %v3423_v31 = vld [vmem:[%s5516_s1 + $0x94] sm:$0xf0]  ;;  %v2695_v36 = vor.u32 %v3487_v27, %v2694_v26 }
  0x83   :  { %1947 = vmatpush.bf16.msrb.mxu3 %v3283_v35  ;;  %v3455_v33 = vld [vmem:[%s5516_s1 + $0x194] sm:$0xf0]  ;;  %v2822_v34 = vld [vmem:[%s5516_s1 + $0x388] sm:$0xf]  ;;  %v2439_v37 = vor.u32 %v3423_v31, %v2438_v30 }
  0x84   :  { %1929 = vmatpush.bf16.msrb.mxu2 %v3139_v39  ;;  %v3519_v35 = vld [vmem:[%s5516_s1 + $0x394] sm:$0xf0]  ;;  %v2678_v38 = vld [vmem:[%s5516_s1 + $0x268] sm:$0xf] }
  0x85   :  { %1910 = vmatpush.bf16.msrb.mxu1 %v3011_v60  ;;  %v3483_v39 = vld [vmem:[%s5516_s1 + $0x274] sm:$0xf0]  ;;  %v2823_v41 = vor.u32 %v3519_v35, %v2822_v34  ;;  %v2422_v42 = vld [vmem:[%s5516_s1 + $0x68] sm:$0xf] }
  0x86   :  { %1891 = vmatpush.bf16.msrb.mxu0 %v2883_v40  ;;  %v2567_v40 = vor.u32 %v3455_v33, %v2566_v32  ;;  %v3419_v43 = vld [vmem:[%s5516_s1 + $0x74] sm:$0xf0]  ;;  %v2806_v47 = vld [vmem:[%s5516_s1 + $0x368] sm:$0xf]  ;;  %v2679_v52 = vor.u32 %v3483_v39, %v2678_v38 }
  0x87   :  { %1948 = vmatpush.bf16.msrb.mxu3 %v3267_v61  ;;  %1930 = vmatmul.bf16.vlgmr.msrb.gmra.mxu2 %v4219_v5  ;;  %v3515_v49 = vld [vmem:[%s5516_s1 + $0x374] sm:$0xf0]  ;;  %v2423_v55 = vor.u32 %v3419_v43, %v2422_v42  ;;  %v2662_v58 = vld [vmem:[%s5516_s1 + $0x248] sm:$0xf] }
  0x88   :  { %1998 = vmatpush.bf16.msra.mxu2 %v2743_v45  ;;  %1911 = vmatmul.bf16.vlgmr.msrb.gmra.mxu1 %v4208_v1  ;;  %v2550_v45 = vld [vmem:[%s5516_s1 + $0x168] sm:$0xf]  ;;  %v3479_v59 = vld [vmem:[%s5516_s1 + $0x254] sm:$0xf0]  ;;  %v2807_v61 = vor.u32 %v3515_v49, %v2806_v47 }
  0x89   :  { %1979 = vmatpush.bf16.msra.mxu1 %v2615_v62  ;;  %1892 = vmatmul.bf16.vlgmr.msrb.gmra.mxu0 %v4206_v0  ;;  %v2406_v62 = vld [vmem:[%s5516_s1 + $0x48] sm:$0xf]  ;;  %v3511_v7 = vld [vmem:[%s5516_s1 + $0x354] sm:$0xf0]  ;;  %v2663_v10 = vor.u32 %v3479_v59, %v2662_v58 }
  0x8a   :  { %1960 = vmatpush.bf16.msra.mxu0 %v2487_v46  ;;  %1949 = vmatmul.bf16.vlgmr.msrb.gmra.mxu3 %v4221_v6  ;;  %v3451_v46 = vld [vmem:[%s5516_s1 + $0x174] sm:$0xf0]  ;;  %v2534_v2 = vld [vmem:[%s5516_s1 + $0x148] sm:$0xf] }
  0x8b   :  { %2017 = vmatpush.bf16.msra.mxu3 %v2871_v63  ;;  %v2551_v60 = vor.u32 %v3451_v46, %v2550_v45  ;;  %v3415_v63 = vld [vmem:[%s5516_s1 + $0x54] sm:$0xf0]  ;;  %v2646_v12 = vld [vmem:[%s5516_s1 + $0x228] sm:$0xf] }
  0x8c   :  { %1999 = vmatpush.bf16.msra.mxu2 %v2727_v3  ;;  %v3447_v3 = vld [vmem:[%s5516_s1 + $0x154] sm:$0xf0]  ;;  %v2407_v11 = vor.u32 %v3415_v63, %v2406_v62  ;;  %v2390_v18 = vld [vmem:[%s5516_s1 + $0x28] sm:$0xf] }
  0x8d   :  { %1980 = vmatpush.bf16.msra.mxu1 %v2599_v16  ;;  %v3475_v15 = vld [vmem:[%s5516_s1 + $0x234] sm:$0xf0]  ;;  %v2535_v16 = vor.u32 %v3447_v3, %v2534_v2  ;;  %v2518_v20 = vld [vmem:[%s5516_s1 + $0x128] sm:$0xf] }
  0x8e   :  { %1961 = vmatpush.bf16.msra.mxu0 %v2471_v4  ;;  %v2790_v4 = vld [vmem:[%s5516_s1 + $0x348] sm:$0xf]  ;;  %v3411_v19 = vld [vmem:[%s5516_s1 + $0x34] sm:$0xf0] }
  0x8f   :  { %2018 = vmatpush.bf16.msra.mxu3 %v2855_v17  ;;  %v2791_v17 = vor.u32 %v3511_v7, %v2790_v4  ;;  %v3443_v21 = vld [vmem:[%s5516_s1 + $0x134] sm:$0xf0]  ;;  %v2774_v22 = vld [vmem:[%s5516_s1 + $0x328] sm:$0xf]  ;;  %v2391_v26 = vor.u32 %v3411_v19, %v2390_v18 }
  0x90   :  { %2000 = vmatpush.bf16.msra.mxu2 %v2711_v24  ;;  %v3507_v23 = vld [vmem:[%s5516_s1 + $0x334] sm:$0xf0]  ;;  %v2630_v24 = vld [vmem:[%s5516_s1 + $0x208] sm:$0xf]  ;;  %v2519_v30 = vor.u32 %v3443_v21, %v2518_v20 }
  0x91   :  { %1981 = vmatpush.bf16.msra.mxu1 %v2583_v28  ;;  %v3471_v27 = vld [vmem:[%s5516_s1 + $0x214] sm:$0xf0]  ;;  %v2374_v28 = vld [vmem:[%s5516_s1 + $0x8] sm:$0xf]  ;;  %v2775_v31 = vor.u32 %v3507_v23, %v2774_v22 }
  0x92   :  { %1962 = vmatpush.bf16.msra.mxu0 %v2455_v25  ;;  %v2647_v25 = vor.u32 %v3475_v15, %v2646_v12  ;;  %v2502_v32 = vld [vmem:[%s5516_s1 + $0x108] sm:$0xf]  ;;  %v3439_v33 = vld [vmem:[%s5516_s1 + $0x114] sm:$0xf0] }
  0x93   :  { %2019 = vmatpush.bf16.msra.mxu3 %v2839_v29  ;;  %v3407_v29 = vld [vmem:[%s5516_s1 + $0x14] sm:$0xf0]  ;;  %v2758_v34 = vld [vmem:[%s5516_s1 + $0x308] sm:$0xf]  ;;  %v2503_v47 = vor.u32 %v3439_v33, %v2502_v32 }
  0x94   :  { %2001 = vmatpush.bf16.msra.mxu2 %v2695_v36  ;;  %v3503_v35 = vld [vmem:[%s5516_s1 + $0x314] sm:$0xf0]  ;;  %v3254_v36 = vld [vmem:[%s5516_s1 + $0x6e8] sm:$0xf]  ;;  %v2375_v42 = vor.u32 %v3407_v29, %v2374_v28 }
  0x95   :  { %1982 = vmatpush.bf16.msra.mxu1 %v2567_v40  ;;  %v2998_v38 = vld [vmem:[%s5516_s1 + $0x4e8] sm:$0xf]  ;;  %v3563_v39 = vld [vmem:[%s5516_s1 + $0x4f4] sm:$0xf0]  ;;  %v2759_v49 = vor.u32 %v3503_v35, %v2758_v34 }
  0x96   :  { %1963 = vmatpush.bf16.msra.mxu0 %v2439_v37  ;;  %v3627_v37 = vld [vmem:[%s5516_s1 + $0x6f4] sm:$0xf0]  ;;  %v3126_v40 = vld [vmem:[%s5516_s1 + $0x5e8] sm:$0xf]  ;;  %v2999_v58 = vor.u32 %v3563_v39, %v2998_v38 }
  0x97   :  { %2020 = vmatpush.bf16.msra.mxu3 %v2823_v41  ;;  %1935 = vmatmul.bf16.gmra.mxu2 %v4351_v13  ;;  %v2631_v41 = vor.u32 %v3471_v27, %v2630_v24  ;;  %v3595_v43 = vld [vmem:[%s5516_s1 + $0x5f4] sm:$0xf0]  ;;  %v3382_v45 = vld [vmem:[%s5516_s1 + $0x7e8] sm:$0xf] }
  0x98   :  { %2002 = vmatpush.bf16.msra.mxu2 %v2679_v52  ;;  %1916 = vmatmul.bf16.gmra.mxu1 %v4340_v9  ;;  %v3659_v46 = vld [vmem:[%s5516_s1 + $0x7f4] sm:$0xf0]  ;;  %v4828_v52 = vld [vmem:[%s5518_s2] sm:$0xf]  ;;  %v3238_v59 = vld [vmem:[%s5516_s1 + $0x6c8] sm:$0xf] }
  0x99   :  { %1983 = vmatpush.bf16.msra.mxu1 %v2551_v60  ;;  %1897 = vmatmul.bf16.gmra.mxu0 %v4338_v8  ;;  %v3623_v60 = vld [vmem:[%s5516_s1 + $0x6d4] sm:$0xf0]  ;;  %v3383_v62 = vor.u32 %v3659_v46, %v3382_v45  ;;  %v2982_v63 = vld [vmem:[%s5516_s1 + $0x4c8] sm:$0xf]  ;;  %v4855_v15 = vperm.slane %v4828_v52, 0 }
  0x9a   :  { %1964 = vmatpush.bf16.msra.mxu0 %v2423_v55  ;;  %1954 = vmatmul.bf16.gmra.mxu3 %v4353_v14  ;;  %v3255_v55 = vor.u32 %v3627_v37, %v3254_v36  ;;  %v3559_v2 = vld [vmem:[%s5516_s1 + $0x4d4] sm:$0xf0]  ;;  %v3110_v3 = vld [vmem:[%s5516_s1 + $0x5c8] sm:$0xf] }
  0x9b   :  { %2021 = vmatpush.bf16.msra.mxu3 %v2807_v61  ;;  %v3127_v61 = vor.u32 %v3595_v43, %v3126_v40  ;;  %v3591_v4 = vld [vmem:[%s5516_s1 + $0x5d4] sm:$0xf0]  ;;  %v3366_v7 = vld [vmem:[%s5516_s1 + $0x7c8] sm:$0xf]  ;;  %v2983_v12 = vor.u32 %v3559_v2, %v2982_v63 }
  0x9c   :  { %2003 = vmatpush.bf16.msra.mxu2 %v2663_v10  ;;  %v3655_v10 = vld [vmem:[%s5516_s1 + $0x7d4] sm:$0xf0]  ;;  %v3222_v18 = vld [vmem:[%s5516_s1 + $0x6a8] sm:$0xf] }
  0x9d   :  { %1984 = vmatpush.bf16.msra.mxu1 %v2535_v16  ;;  %v3111_v16 = vor.u32 %v3591_v4, %v3110_v3  ;;  %v3619_v19 = vld [vmem:[%s5516_s1 + $0x6b4] sm:$0xf0]  ;;  %v2966_v20 = vld [vmem:[%s5516_s1 + $0x4a8] sm:$0xf] }
  0x9e   :  { %1965 = vmatpush.bf16.msra.mxu0 %v2407_v11  ;;  %v3239_v11 = vor.u32 %v3623_v60, %v3238_v59  ;;  %v3555_v21 = vld [vmem:[%s5516_s1 + $0x4b4] sm:$0xf0]  ;;  %v3094_v22 = vld [vmem:[%s5516_s1 + $0x5a8] sm:$0xf]  ;;  %v3223_v29 = vor.u32 %v3619_v19, %v3222_v18 }
  0x9f   :  { %2022 = vmatpush.bf16.msra.mxu3 %v2791_v17  ;;  %v3367_v17 = vor.u32 %v3655_v10, %v3366_v7  ;;  %v3587_v24 = vld [vmem:[%s5516_s1 + $0x5b4] sm:$0xf0]  ;;  %v2950_v36 = vld [vmem:[%s5516_s1 + $0x488] sm:$0xf] }
  0xa0   :  { %2004 = vmatpush.bf16.msra.mxu2 %v2647_v25  ;;  %v3350_v25 = vld [vmem:[%s5516_s1 + $0x7a8] sm:$0xf]  ;;  %v3615_v32 = vld [vmem:[%s5516_s1 + $0x694] sm:$0xf0]  ;;  %v3095_v34 = vor.u32 %v3587_v24, %v3094_v22 }
  0xa1   :  { %1985 = vmatpush.bf16.msra.mxu1 %v2519_v30  ;;  %v1684_v28 = vpop.f32.mrf.mxu1  ;;  %v2967_v30 = vor.u32 %v3555_v21, %v2966_v20  ;;  %v3551_v37 = vld [vmem:[%s5516_s1 + $0x494] sm:$0xf0]  ;;  %v3078_v38 = vld [vmem:[%s5516_s1 + $0x588] sm:$0xf] }
  0xa2   :  { %1966 = vmatpush.bf16.msra.mxu0 %v2391_v26  ;;  %v1665_v23 = vpop.f32.mrf.mxu0  ;;  %v3651_v26 = vld [vmem:[%s5516_s1 + $0x7b4] sm:$0xf0]  ;;  %v3334_v40 = vld [vmem:[%s5516_s1 + $0x788] sm:$0xf]  ;;  %v2951_v43 = vor.u32 %v3551_v37, %v2950_v36 }
  0xa3   :  { %2023 = vmatpush.bf16.msra.mxu3 %v2775_v31  ;;  %v1666_v27 = vadd.f32 %v1665_v23, %v4855_v15  ;;  %v3206_v31 = vld [vmem:[%s5516_s1 + $0x688] sm:$0xf]  ;;  %v3351_v35 = vor.u32 %v3651_v26, %v3350_v25  ;;  %v3583_v39 = vld [vmem:[%s5516_s1 + $0x594] sm:$0xf0] }
  0xa4   :  { %2005 = vmatpush.bf16.msra.mxu2 %v2631_v41  ;;  %v3647_v41 = vld [vmem:[%s5516_s1 + $0x794] sm:$0xf0]  ;;  %v3190_v45 = vld [vmem:[%s5516_s1 + $0x668] sm:$0xf] }
  0xa5   :  { %1986 = vmatpush.bf16.msra.mxu1 %v2503_v47  ;;  %v1685_v33 = vadd.f32 %v1684_v28, %v1666_v27  ;;  %v3611_v46 = vld [vmem:[%s5516_s1 + $0x674] sm:$0xf0]  ;;  %v3062_v60 = vld [vmem:[%s5516_s1 + $0x568] sm:$0xf] }
  0xa6   :  { %1967 = vmatpush.bf16.msra.mxu0 %v2375_v42  ;;  %v3207_v42 = vor.u32 %v3615_v32, %v3206_v31  ;;  %v3547_v59 = vld [vmem:[%s5516_s1 + $0x474] sm:$0xf0]  ;;  %v3318_v3 = vld [vmem:[%s5516_s1 + $0x768] sm:$0xf] }
  0xa7   :  { %2024 = vmatpush.bf16.msra.mxu3 %v2759_v49  ;;  %2006 = vmatmul.bf16.vlgmr.msra.gmra.mxu2 %v3931_v54  ;;  %v3079_v49 = vor.u32 %v3583_v39, %v3078_v38  ;;  %v3579_v2 = vld [vmem:[%s5516_s1 + $0x574] sm:$0xf0]  ;;  %v2918_v22 = vld [vmem:[%s5516_s1 + $0x448] sm:$0xf] }
  0xa8   :  { %2074 = vmatpush.bf16.msrb.mxu2 %v3255_v55  ;;  %1987 = vmatmul.bf16.vlgmr.msra.gmra.mxu1 %v3929_v53  ;;  %v1703_v47 = vpop.f32.mrf.mxu2  ;;  %v3335_v55 = vor.u32 %v3647_v41, %v3334_v40  ;;  %v3643_v4 = vld [vmem:[%s5516_s1 + $0x774] sm:$0xf0]  ;;  %v3063_v20 = vor.u32 %v3579_v2, %v3062_v60  ;;  %v3046_v24 = vld [vmem:[%s5516_s1 + $0x548] sm:$0xf] }
  0xa9   :  { %2055 = vmatpush.bf16.msrb.mxu1 %v3127_v61  ;;  %1968 = vmatmul.bf16.vlgmr.msra.gmra.mxu0 %v3918_v48  ;;  %v1704_v61 = vadd.f32 %v1703_v47, %v1685_v33  ;;  %v1686_v10 = vpop.f32.mrf.mxu1  ;;  %v3607_v18 = vld [vmem:[%s5516_s1 + $0x654] sm:$0xf0]  ;;  %v3319_v21 = vor.u32 %v3643_v4, %v3318_v3  ;;  %v3302_v26 = vld [vmem:[%s5516_s1 + $0x748] sm:$0xf] }
  0xaa   :  { %2036 = vmatpush.bf16.msrb.mxu0 %v2999_v58  ;;  %2025 = vmatmul.bf16.vlgmr.msra.gmra.mxu3 %v3939_v57  ;;  %v2934_v58 = vld [vmem:[%s5516_s1 + $0x468] sm:$0xf]  ;;  %v1667_v63 = vpop.f32.mrf.mxu0  ;;  %v3543_v23 = vld [vmem:[%s5516_s1 + $0x454] sm:$0xf0] }
  0xab   :  { %2093 = vmatpush.bf16.msrb.mxu3 %v3383_v62  ;;  %v1722_v62 = vpop.f32.mrf.mxu3  ;;  %v1668_v7 = vadd.f32 %v1667_v63, %v4855_v15  ;;  %v3575_v25 = vld [vmem:[%s5516_s1 + $0x554] sm:$0xf0]  ;;  %v3030_v37 = vld [vmem:[%s5516_s1 + $0x528] sm:$0xf] }
  0xac   :  { %2075 = vmatpush.bf16.msrb.mxu2 %v3239_v11  ;;  %v4935_v11 = vadd.f32 %v1722_v62, %v1704_v61  ;;  %v3639_v27 = vld [vmem:[%s5516_s1 + $0x754] sm:$0xf0]  ;;  %v3047_v33 = vor.u32 %v3575_v25, %v3046_v24  ;;  %v3142_v47 = vld [vmem:[%s5516_s1 + $0x608] sm:$0xf]  ;;  %v2872_v24 = vld [vmem:[%s5516_s1 + $0x3f8] sm:$0xf0] }
  0xad   :  { %2056 = vmatpush.bf16.msrb.mxu1 %v3111_v16  ;;  %v2935_v16 = vor.u32 %v3547_v59, %v2934_v58  ;;  %v1687_v19 = vadd.f32 %v1686_v10, %v1668_v7  ;;  %v3603_v31 = vld [vmem:[%s5516_s1 + $0x634] sm:$0xf0]  ;;  %v2886_v60 = vld [vmem:[%s5516_s1 + $0x408] sm:$0xf] }
  0xae   :  { %2037 = vmatpush.bf16.msrb.mxu0 %v2983_v12  ;;  %v3191_v12 = vor.u32 %v3611_v46, %v3190_v45  ;;  %v3539_v36 = vld [vmem:[%s5516_s1 + $0x434] sm:$0xf0]  ;;  %v3014_v3 = vld [vmem:[%s5516_s1 + $0x508] sm:$0xf] }
  0xaf   :  { %2094 = vmatpush.bf16.msrb.mxu3 %v3367_v17  ;;  %v3174_v17 = vld [vmem:[%s5516_s1 + $0x648] sm:$0xf]  ;;  %v3571_v41 = vld [vmem:[%s5516_s1 + $0x534] sm:$0xf0] }
  0xb0   :  { %2076 = vmatpush.bf16.msrb.mxu2 %v3223_v29  ;;  %v3175_v28 = vor.u32 %v3607_v18, %v3174_v17  ;;  %v2919_v29 = vor.u32 %v3543_v23, %v2918_v22  ;;  %v1705_v32 = vpop.f32.mrf.mxu2  ;;  %v3599_v59 = vld [vmem:[%s5516_s1 + $0x614] sm:$0xf0]  ;;  %v3031_v63 = vor.u32 %v3571_v41, %v3030_v37  ;;  %v3270_v7 = vld [vmem:[%s5516_s1 + $0x708] sm:$0xf]  ;;  %v3433_v17 = vld [vmem:[%s5516_s1 + $0xec] sm:$0xf] }
  0xb1   :  { %2057 = vmatpush.bf16.msrb.mxu1 %v3095_v34  ;;  %v3303_v34 = vor.u32 %v3639_v27, %v3302_v26  ;;  %v1706_v38 = vadd.f32 %v1705_v32, %v1687_v19  ;;  %v1689_v46 = vpop.f32.mrf.mxu1  ;;  %v3535_v61 = vld [vmem:[%s5516_s1 + $0x414] sm:$0xf0]  ;;  %v2488_v18 = vld [vmem:[%s5516_s1 + $0xf8] sm:$0xf0]  ;;  %v3465_v19 = vld [vmem:[%s5516_s1 + $0x1ec] sm:$0xf] }
  0xb2   :  { %2038 = vmatpush.bf16.msrb.mxu0 %v2967_v30  ;;  %v3158_v30 = vld [vmem:[%s5516_s1 + $0x628] sm:$0xf]  ;;  %v3567_v4 = vld [vmem:[%s5516_s1 + $0x514] sm:$0xf0]  ;;  %v2616_v22 = vld [vmem:[%s5516_s1 + $0x1f8] sm:$0xf0]  ;;  %v2491_v32 = vor.u32 %v3433_v17, %v2488_v18 }
  0xb3   :  { %2095 = vmatpush.bf16.msrb.mxu3 %v3351_v35  ;;  %v2902_v35 = vld [vmem:[%s5516_s1 + $0x428] sm:$0xf]  ;;  %v1724_v39 = vpop.f32.mrf.mxu3  ;;  %v3631_v10 = vld [vmem:[%s5516_s1 + $0x714] sm:$0xf0]  ;;  %v3529_v23 = vld [vmem:[%s5516_s1 + $0x3ec] sm:$0xf]  ;;  %v3015_v26 = vor.u32 %v3567_v4, %v3014_v3  ;;  %v2619_v37 = vor.u32 %v3465_v19, %v2616_v22 }
  0xb4   :  { %2077 = vmatpush.bf16.msrb.mxu2 %v3207_v42  ;;  %v1670_v40 = vpop.f32.mrf.mxu0  ;;  %v3286_v42 = vld [vmem:[%s5516_s1 + $0x728] sm:$0xf]  ;;  %v2903_v58 = vor.u32 %v3539_v36, %v2902_v35  ;;  %v3271_v27 = vor.u32 %v3631_v10, %v3270_v7  ;;  %v3461_v41 = vld [vmem:[%s5516_s1 + $0x1cc] sm:$0xf]  ;;  %v2584_v10 = vld [vmem:[%s5516_s1 + $0x1b8] sm:$0xf0] }
  0xb5   :  { %2058 = vmatpush.bf16.msrb.mxu1 %v3079_v49  ;;  %v1671_v45 = vadd.f32 %v1670_v40, %v4855_v15  ;;  %v4989_v49 = vadd.f32 %v1724_v39, %v1706_v38  ;;  %v2875_v38 = vor.u32 %v3529_v23, %v2872_v24  ;;  %v3429_v39 = vld [vmem:[%s5516_s1 + $0xcc] sm:$0xf]  ;;  %v2472_v40 = vld [vmem:[%s5516_s1 + $0xd8] sm:$0xf0] }
  0xb6   :  { %2039 = vmatpush.bf16.msrb.mxu0 %v2951_v43  ;;  %v3635_v43 = vld [vmem:[%s5516_s1 + $0x734] sm:$0xf0]  ;;  %v3457_v3 = vld [vmem:[%s5516_s1 + $0x1ac] sm:$0xf]  ;;  %v2696_v24 = vld [vmem:[%s5516_s1 + $0x298] sm:$0xf0] }
  0xb7   :  { %2096 = vmatpush.bf16.msrb.mxu3 %v3335_v55  ;;  %v3159_v55 = vor.u32 %v3603_v31, %v3158_v30  ;;  %v1690_v62 = vadd.f32 %v1689_v46, %v1671_v45  ;;  %v3287_v2 = vor.u32 %v3635_v43, %v3286_v42  ;;  %2011 = vmatmul.bf16.gmra.mxu2 %v4063_v51  ;;  %v3525_v43 = vld [vmem:[%s5516_s1 + $0x3cc] sm:$0xf]  ;;  %v2856_v45 = vld [vmem:[%s5516_s1 + $0x3d8] sm:$0xf0] }
  0xb8   :  { %2078 = vmatpush.bf16.msrb.mxu2 %v3191_v12  ;;  %1992 = vmatmul.bf16.gmra.mxu1 %v4061_v50  ;;  %v3497_v12 = vld [vmem:[%s5516_s1 + $0x2ec] sm:$0xf]  ;;  %v1708_v25 = vpop.f32.mrf.mxu2 }
  0xb9   :  { %2059 = vmatpush.bf16.msrb.mxu1 %v3063_v20  ;;  %1973 = vmatmul.bf16.gmra.mxu0 %v4050_v44  ;;  %v3143_v20 = vor.u32 %v3599_v59, %v3142_v47  ;;  %v1691_v36 = vpop.f32.mrf.mxu1  ;;  %v2859_v59 = vor.u32 %v3525_v43, %v2856_v45  ;;  %v3485_v23 = vld [vmem:[%s5516_s1 + $0x28c] sm:$0xf]  ;;  %v2552_v45 = vld [vmem:[%s5516_s1 + $0x178] sm:$0xf0] }
  0xba   :  { %2040 = vmatpush.bf16.msrb.mxu0 %v2935_v16  ;;  %v2744_v16 = vld [vmem:[%s5516_s1 + $0x2f8] sm:$0xf0]  ;;  %2030 = vmatmul.bf16.gmra.mxu3 %v4071_v56 }
  0xbb   :  { %2097 = vmatpush.bf16.msrb.mxu3 %v3319_v21  ;;  %v2887_v21 = vor.u32 %v3535_v61, %v2886_v60  ;;  %v2747_v31 = vor.u32 %v3497_v12, %v2744_v16  ;;  %v3489_v60 = vld [vmem:[%s5516_s1 + $0x2ac] sm:$0xf]  ;;  %v2712_v61 = vld [vmem:[%s5516_s1 + $0x2b8] sm:$0xf0] }
  0xbc   :  { %2079 = vmatpush.bf16.msrb.mxu2 %v3175_v28  ;;  %v1709_v28 = vadd.f32 %v1708_v25, %v1690_v62  ;;  %v1672_v30 = vpop.f32.mrf.mxu0  ;;  %v3521_v12 = vld [vmem:[%s5516_s1 + $0x3ac] sm:$0xf]  ;;  %v2840_v16 = vld [vmem:[%s5516_s1 + $0x3b8] sm:$0xf0]  ;;  %v2587_v25 = vor.u32 %v3457_v3, %v2584_v10 }
  0xbd   :  { %2060 = vmatpush.bf16.msrb.mxu1 %v3047_v33  ;;  %v3493_v33 = vld [vmem:[%s5516_s1 + $0x2cc] sm:$0xf]  ;;  %v1673_v35 = vadd.f32 %v1672_v30, %v4855_v15  ;;  %v2600_v15 = vld [vmem:[%s5516_s1 + $0x1d8] sm:$0xf0] }
  0xbe   :  { %2041 = vmatpush.bf16.msrb.mxu0 %v2919_v29  ;;  %v1727_v29 = vpop.f32.mrf.mxu3  ;;  %v2568_v30 = vld [vmem:[%s5516_s1 + $0x198] sm:$0xf0] }
  0xbf   :  { %2098 = vmatpush.bf16.msrb.mxu3 %v3303_v34  ;;  %v2728_v34 = vld [vmem:[%s5516_s1 + $0x2d8] sm:$0xf0]  ;;  %v5056_v42 = vadd.f32 %v1727_v29, %v1709_v28  ;;  %v1692_v46 = vadd.f32 %v1691_v36, %v1673_v35  ;;  %v3453_v28 = vld [vmem:[%s5516_s1 + $0x18c] sm:$0xf] }
  0xc0   :  { %2080 = vmatpush.bf16.msrb.mxu2 %v3159_v55  ;;  %v2731_v47 = vor.u32 %v3493_v33, %v2728_v34  ;;  %v2475_v55 = vor.u32 %v3429_v39, %v2472_v40  ;;  %v1710_v62 = vpop.f32.mrf.mxu2  ;;  %v2699_v33 = vor.u32 %v3485_v23, %v2696_v24  ;;  %v3481_v35 = vld [vmem:[%s5516_s1 + $0x26c] sm:$0xf]  ;;  %v2680_v36 = vld [vmem:[%s5516_s1 + $0x278] sm:$0xf0] }
  0xc1   :  { %2061 = vmatpush.bf16.msrb.mxu1 %v3031_v63  ;;  %v3425_v63 = vld [vmem:[%s5516_s1 + $0xac] sm:$0xf]  ;;  %v1711_v4 = vadd.f32 %v1710_v62, %v1692_v46  ;;  %v2424_v40 = vld [vmem:[%s5516_s1 + $0x78] sm:$0xf0] }
  0xc2   :  { %2042 = vmatpush.bf16.msrb.mxu0 %v2903_v58  ;;  %v2603_v58 = vor.u32 %v3461_v41, %v2600_v15  ;;  %v3417_v39 = vld [vmem:[%s5516_s1 + $0x6c] sm:$0xf]  ;;  %v2408_v10 = vld [vmem:[%s5516_s1 + $0x58] sm:$0xf0] }
  0xc3   :  { %2099 = vmatpush.bf16.msrb.mxu3 %v3287_v2  ;;  %v2456_v2 = vld [vmem:[%s5516_s1 + $0xb8] sm:$0xf0]  ;;  %v3449_v41 = vld [vmem:[%s5516_s1 + $0x16c] sm:$0xf]  ;;  %v2427_v62 = vor.u32 %v3417_v39, %v2424_v40 }
  0xc4   :  { %2081 = vmatpush.bf16.msrb.mxu2 %v3143_v20  ;;  %v2459_v22 = vor.u32 %v3425_v63, %v2456_v2  ;;  %v3513_v46 = vld [vmem:[%s5516_s1 + $0x36c] sm:$0xf]  ;;  %v2664_v2 = vld [vmem:[%s5516_s1 + $0x258] sm:$0xf0] }
  0xc5   :  { %2062 = vmatpush.bf16.msrb.mxu1 %v3015_v26  ;;  %v1760_v18 = vpop.f32.mrf.mxu1  ;;  %v2843_v26 = vor.u32 %v3521_v12, %v2840_v16  ;;  %v3477_v63 = vld [vmem:[%s5516_s1 + $0x24c] sm:$0xf]  ;;  %v2648_v24 = vld [vmem:[%s5516_s1 + $0x238] sm:$0xf0] }
  0xc6   :  { %2043 = vmatpush.bf16.msrb.mxu0 %v2887_v21  ;;  %v1729_v7 = vpop.f32.mrf.mxu3  ;;  %v1741_v17 = vpop.f32.mrf.mxu0  ;;  %v2715_v21 = vor.u32 %v3489_v60, %v2712_v61  ;;  %v2683_v61 = vor.u32 %v3481_v35, %v2680_v36  ;;  %v3445_v12 = vld [vmem:[%s5516_s1 + $0x14c] sm:$0xf] }
  0xc7   :  { %2100 = vmatpush.bf16.msrb.mxu3 %v3271_v27  ;;  %v5091_v19 = vadd.f32 %v1729_v7, %v1711_v4  ;;  %v1742_v20 = vadd.f32 %v1741_v17, %v4935_v11  ;;  %v3421_v27 = vld [vmem:[%s5516_s1 + $0x8c] sm:$0xf]  ;;  %v2440_v11 = vld [vmem:[%s5516_s1 + $0x98] sm:$0xf0]  ;;  %2082 = vmatmul.bf16.vlgmr.msrb.gmra.mxu2 %v4219_v5  ;;  %v2555_v4 = vor.u32 %v3449_v41, %v2552_v45 }
  0xc8   :  { %2150 = vmatpush.bf16.msra.mxu2 %v2747_v31  ;;  %2063 = vmatmul.bf16.vlgmr.msrb.gmra.mxu1 %v4208_v1  ;;  %v3517_v31 = vld [vmem:[%s5516_s1 + $0x38c] sm:$0xf]  ;;  %v2443_v34 = vor.u32 %v3421_v27, %v2440_v11  ;;  %v2536_v17 = vld [vmem:[%s5516_s1 + $0x158] sm:$0xf0] }
  0xc9   :  { %2131 = vmatpush.bf16.msra.mxu1 %v2619_v37  ;;  %v1761_v29 = vadd.f32 %v1760_v18, %v1742_v20  ;;  %2044 = vmatmul.bf16.vlgmr.msrb.gmra.mxu0 %v4206_v0  ;;  %v2571_v37 = vor.u32 %v3453_v28, %v2568_v30  ;;  %v3509_v18 = vld [vmem:[%s5516_s1 + $0x34c] sm:$0xf]  ;;  %v2792_v20 = vld [vmem:[%s5516_s1 + $0x358] sm:$0xf0] }
  0xca   :  { %2112 = vmatpush.bf16.msra.mxu0 %v2491_v32  ;;  %v2824_v32 = vld [vmem:[%s5516_s1 + $0x398] sm:$0xf0]  ;;  %2101 = vmatmul.bf16.vlgmr.msrb.gmra.mxu3 %v4221_v6  ;;  %v1779_v15 = vpop.f32.mrf.mxu2  ;;  %v3473_v23 = vld [vmem:[%s5516_s1 + $0x22c] sm:$0xf] }
  0xcb   :  { %2169 = vmatpush.bf16.msra.mxu3 %v2875_v38  ;;  %v2827_v38 = vor.u32 %v3517_v31, %v2824_v32  ;;  %v3409_v27 = vld [vmem:[%s5516_s1 + $0x2c] sm:$0xf]  ;;  %v2392_v11 = vld [vmem:[%s5516_s1 + $0x38] sm:$0xf0]  ;;  %v2651_v39 = vor.u32 %v3473_v23, %v2648_v24 }
  0xcc   :  { %2151 = vmatpush.bf16.msra.mxu2 %v2731_v47  ;;  %v2808_v47 = vld [vmem:[%s5516_s1 + $0x378] sm:$0xf0]  ;;  %v3441_v28 = vld [vmem:[%s5516_s1 + $0x12c] sm:$0xf]  ;;  %v2395_v40 = vor.u32 %v3409_v27, %v2392_v11 }
  0xcd   :  { %2132 = vmatpush.bf16.msra.mxu1 %v2603_v58  ;;  %v2811_v7 = vor.u32 %v3513_v46, %v2808_v47  ;;  %v2520_v31 = vld [vmem:[%s5516_s1 + $0x138] sm:$0xf0]  ;;  %v3505_v32 = vld [vmem:[%s5516_s1 + $0x32c] sm:$0xf] }
  0xce   :  { %2113 = vmatpush.bf16.msra.mxu0 %v2475_v55  ;;  %v1798_v43 = vpop.f32.mrf.mxu3  ;;  %v1780_v55 = vadd.f32 %v1779_v15, %v1761_v29  ;;  %v1743_v58 = vpop.f32.mrf.mxu0  ;;  %v2632_v41 = vld [vmem:[%s5516_s1 + $0x218] sm:$0xf0]  ;;  %v3405_v15 = vld [vmem:[%s5516_s1 + $0xc] sm:$0xf] }
  0xcf   :  { %2170 = vmatpush.bf16.msra.mxu3 %v2859_v59  ;;  %v1762_v59 = vpop.f32.mrf.mxu1  ;;  %v1744_v60 = vadd.f32 %v1743_v58, %v4989_v49  ;;  %v3413_v49 = vld [vmem:[%s5516_s1 + $0x4c] sm:$0xf] }
  0xd0   :  { %2152 = vmatpush.bf16.msra.mxu2 %v2715_v21  ;;  %v5153_v3 = vadd.f32 %v1798_v43, %v1780_v55  ;;  %v2667_v21 = vor.u32 %v3477_v63, %v2664_v2  ;;  %v2376_v43 = vld [vmem:[%s5516_s1 + $0x18] sm:$0xf0]  ;;  %v3437_v47 = vld [vmem:[%s5516_s1 + $0x10c] sm:$0xf] }
  0xd1   :  { %2133 = vmatpush.bf16.msra.mxu1 %v2587_v25  ;;  %v1763_v16 = vadd.f32 %v1762_v59, %v1744_v60  ;;  %v2539_v25 = vor.u32 %v3445_v12, %v2536_v17  ;;  %v2504_v55 = vld [vmem:[%s5516_s1 + $0x118] sm:$0xf0]  ;;  %v3501_v58 = vld [vmem:[%s5516_s1 + $0x30c] sm:$0xf] }
  0xd2   :  { %2114 = vmatpush.bf16.msra.mxu0 %v2459_v22  ;;  %v2411_v22 = vor.u32 %v3413_v49, %v2408_v10  ;;  %v1781_v29 = vpop.f32.mrf.mxu2  ;;  %v2760_v60 = vld [vmem:[%s5516_s1 + $0x318] sm:$0xf0]  ;;  %v3561_v63 = vld [vmem:[%s5516_s1 + $0x4ec] sm:$0xf]  ;;  %v2379_v49 = vor.u32 %v3405_v15, %v2376_v43  ;;  %v2507_v17 = vor.u32 %v3437_v47, %v2504_v55 }
  0xd3   :  { %2171 = vmatpush.bf16.msra.mxu3 %v2843_v26  ;;  %v2795_v26 = vor.u32 %v3509_v18, %v2792_v20  ;;  %v3000_v2 = vld [vmem:[%s5516_s1 + $0x4f8] sm:$0xf0]  ;;  %v3657_v12 = vld [vmem:[%s5516_s1 + $0x7ec] sm:$0xf]  ;;  %v2763_v18 = vor.u32 %v3501_v58, %v2760_v60 }
  0xd4   :  { %2153 = vmatpush.bf16.msra.mxu2 %v2699_v33  ;;  %v2776_v33 = vld [vmem:[%s5516_s1 + $0x338] sm:$0xf0]  ;;  %v3003_v23 = vor.u32 %v3561_v63, %v3000_v2  ;;  %v3621_v24 = vld [vmem:[%s5516_s1 + $0x6cc] sm:$0xf] }
  0xd5   :  { %2134 = vmatpush.bf16.msra.mxu1 %v2571_v37  ;;  %v3469_v37 = vld [vmem:[%s5516_s1 + $0x20c] sm:$0xf]  ;;  %v2779_v46 = vor.u32 %v3505_v32, %v2776_v33  ;;  %v3128_v10 = vld [vmem:[%s5516_s1 + $0x5f8] sm:$0xf0] }
  0xd6   :  { %2115 = vmatpush.bf16.msra.mxu0 %v2443_v34  ;;  %v1800_v30 = vpop.f32.mrf.mxu3  ;;  %v1782_v34 = vadd.f32 %v1781_v29, %v1763_v16  ;;  %v1746_v35 = vpop.f32.mrf.mxu0  ;;  %v3384_v16 = vld [vmem:[%s5516_s1 + $0x7f8] sm:$0xf0]  ;;  %v3589_v32 = vld [vmem:[%s5516_s1 + $0x5cc] sm:$0xf] }
  0xd7   :  { %2172 = vmatpush.bf16.msra.mxu3 %v2827_v38  ;;  %v1765_v36 = vpop.f32.mrf.mxu1  ;;  %v1747_v38 = vadd.f32 %v1746_v35, %v5056_v42  ;;  %v2523_v42 = vor.u32 %v3441_v28, %v2520_v31  ;;  %2087 = vmatmul.bf16.gmra.mxu2 %v4351_v13  ;;  %v3387_v29 = vor.u32 %v3657_v12, %v3384_v16  ;;  %v2984_v31 = vld [vmem:[%s5516_s1 + $0x4d8] sm:$0xf0]  ;;  %v3653_v35 = vld [vmem:[%s5516_s1 + $0x7cc] sm:$0xf] }
  0xd8   :  { %2154 = vmatpush.bf16.msra.mxu2 %v2683_v61  ;;  %v5210_v45 = vadd.f32 %v1800_v30, %v1782_v34  ;;  %2068 = vmatmul.bf16.gmra.mxu1 %v4340_v9  ;;  %v3625_v61 = vld [vmem:[%s5516_s1 + $0x6ec] sm:$0xf]  ;;  %v3112_v34 = vld [vmem:[%s5516_s1 + $0x5d8] sm:$0xf0] }
  0xd9   :  { %2135 = vmatpush.bf16.msra.mxu1 %v2555_v4  ;;  %v1766_v59 = vadd.f32 %v1765_v36, %v1747_v38  ;;  %2049 = vmatmul.bf16.gmra.mxu0 %v4338_v8  ;;  %v3593_v4 = vld [vmem:[%s5516_s1 + $0x5ec] sm:$0xf]  ;;  %v3368_v36 = vld [vmem:[%s5516_s1 + $0x7d8] sm:$0xf0] }
  0xda   :  { %2116 = vmatpush.bf16.msra.mxu0 %v2427_v62  ;;  %v3256_v62 = vld [vmem:[%s5516_s1 + $0x6f8] sm:$0xf0]  ;;  %2106 = vmatmul.bf16.gmra.mxu3 %v4353_v14  ;;  %v1784_v20 = vpop.f32.mrf.mxu2  ;;  %v3131_v28 = vor.u32 %v3593_v4, %v3128_v10  ;;  %v3557_v30 = vld [vmem:[%s5516_s1 + $0x4cc] sm:$0xf] }
  0xdb   :  { %2173 = vmatpush.bf16.msra.mxu3 %v2811_v7  ;;  %v2635_v7 = vor.u32 %v3469_v37, %v2632_v41  ;;  %v3371_v41 = vor.u32 %v3653_v35, %v3368_v36  ;;  %v3617_v15 = vld [vmem:[%s5516_s1 + $0x6ac] sm:$0xf]  ;;  %v3224_v43 = vld [vmem:[%s5516_s1 + $0x6b8] sm:$0xf0] }
  0xdc   :  { %2155 = vmatpush.bf16.msra.mxu2 %v2667_v21  ;;  %v3585_v47 = vld [vmem:[%s5516_s1 + $0x5ac] sm:$0xf]  ;;  %v3227_v4 = vor.u32 %v3617_v15, %v3224_v43  ;;  %v3208_v10 = vld [vmem:[%s5516_s1 + $0x698] sm:$0xf0] }
  0xdd   :  { %2136 = vmatpush.bf16.msra.mxu1 %v2539_v25  ;;  %v3240_v25 = vld [vmem:[%s5516_s1 + $0x6d8] sm:$0xf0]  ;;  %v3649_v60 = vld [vmem:[%s5516_s1 + $0x7ac] sm:$0xf] }
  0xde   :  { %2117 = vmatpush.bf16.msra.mxu0 %v2411_v22  ;;  %v1803_v21 = vpop.f32.mrf.mxu3  ;;  %v3259_v22 = vor.u32 %v3625_v61, %v3256_v62  ;;  %v1748_v27 = vpop.f32.mrf.mxu0  ;;  %v3352_v61 = vld [vmem:[%s5516_s1 + $0x7b8] sm:$0xf0]  ;;  %v3541_v15 = vld [vmem:[%s5516_s1 + $0x44c] sm:$0xf] }
  0xdf   :  { %2174 = vmatpush.bf16.msra.mxu3 %v2795_v26  ;;  %v1785_v26 = vadd.f32 %v1784_v20, %v1766_v59  ;;  %v1767_v11 = vpop.f32.mrf.mxu1  ;;  %v1749_v33 = vadd.f32 %v1748_v27, %v5091_v19  ;;  %v3243_v19 = vor.u32 %v3621_v24, %v3240_v25  ;;  %v3096_v59 = vld [vmem:[%s5516_s1 + $0x5b8] sm:$0xf0]  ;;  %v3609_v25 = vld [vmem:[%s5516_s1 + $0x66c] sm:$0xf] }
  0xe0   :  { %2156 = vmatpush.bf16.msra.mxu2 %v2651_v39  ;;  %v2987_v39 = vor.u32 %v3557_v30, %v2984_v31  ;;  %v3099_v16 = vor.u32 %v3585_v47, %v3096_v59  ;;  %v2952_v20 = vld [vmem:[%s5516_s1 + $0x498] sm:$0xf0]  ;;  %v3637_v47 = vld [vmem:[%s5516_s1 + $0x74c] sm:$0xf] }
  0xe1   :  { %2137 = vmatpush.bf16.msra.mxu1 %v2523_v42  ;;  %v5277_v37 = vadd.f32 %v1803_v21, %v1785_v26  ;;  %v1768_v38 = vadd.f32 %v1767_v11, %v1749_v33  ;;  %v3553_v42 = vld [vmem:[%s5516_s1 + $0x4ac] sm:$0xf]  ;;  %v3336_v24 = vld [vmem:[%s5516_s1 + $0x798] sm:$0xf0] }
  0xe2   :  { %2118 = vmatpush.bf16.msra.mxu0 %v2395_v40  ;;  %v3115_v40 = vor.u32 %v3589_v32, %v3112_v34  ;;  %v1786_v55 = vpop.f32.mrf.mxu2  ;;  %v3581_v21 = vld [vmem:[%s5516_s1 + $0x58c] sm:$0xf]  ;;  %v3192_v26 = vld [vmem:[%s5516_s1 + $0x678] sm:$0xf0] }
  0xe3   :  { %2175 = vmatpush.bf16.msra.mxu3 %v2779_v46  ;;  %v2968_v46 = vld [vmem:[%s5516_s1 + $0x4b8] sm:$0xf0]  ;;  %v1787_v62 = vadd.f32 %v1786_v55, %v1768_v38  ;;  %v3641_v32 = vld [vmem:[%s5516_s1 + $0x76c] sm:$0xf]  ;;  %v3195_v36 = vor.u32 %v3609_v25, %v3192_v26 }
  0xe4   :  { %2157 = vmatpush.bf16.msra.mxu2 %v2635_v7  ;;  %v2971_v7 = vor.u32 %v3553_v42, %v2968_v46  ;;  %v3064_v31 = vld [vmem:[%s5516_s1 + $0x578] sm:$0xf0]  ;;  %v3573_v42 = vld [vmem:[%s5516_s1 + $0x54c] sm:$0xf] }
  0xe5   :  { %2138 = vmatpush.bf16.msra.mxu1 %v2507_v17  ;;  %v3355_v17 = vor.u32 %v3649_v60, %v3352_v61  ;;  %v3320_v33 = vld [vmem:[%s5516_s1 + $0x778] sm:$0xf0]  ;;  %v3601_v60 = vld [vmem:[%s5516_s1 + $0x62c] sm:$0xf] }
  0xe6   :  { %2119 = vmatpush.bf16.msra.mxu0 %v2379_v49  ;;  %v1805_v58 = vpop.f32.mrf.mxu3  ;;  %v5303_v63 = vpop.f32.mrf.mxu0  ;;  %v3613_v49 = vld [vmem:[%s5516_s1 + $0x68c] sm:$0xf]  ;;  %v2920_v43 = vld [vmem:[%s5516_s1 + $0x458] sm:$0xf0] }
  0xe7   :  { %2176 = vmatpush.bf16.msra.mxu3 %v2763_v18  ;;  %v5305_v2 = vpop.f32.mrf.mxu1  ;;  %v5313_v12 = vadd.f32 %v1805_v58, %v1787_v62  ;;  %v3549_v18 = vld [vmem:[%s5516_s1 + $0x48c] sm:$0xf]  ;;  %2158 = vmatmul.bf16.vlgmr.msra.gmra.mxu2 %v3931_v54  ;;  %v3048_v46 = vld [vmem:[%s5516_s1 + $0x558] sm:$0xf0]  ;;  %v2923_v59 = vor.u32 %v3541_v15, %v2920_v43 }
  0xe8   :  { %2226 = vmatpush.bf16.msrb.mxu2 %v3259_v22  ;;  %2139 = vmatmul.bf16.vlgmr.msra.gmra.mxu1 %v3929_v53  ;;  %v3080_v22 = vld [vmem:[%s5516_s1 + $0x598] sm:$0xf0]  ;;  %v2955_v53 = vor.u32 %v3549_v18, %v2952_v20  ;;  %v3545_v54 = vld [vmem:[%s5516_s1 + $0x46c] sm:$0xf]  ;;  %v3051_v62 = vor.u32 %v3573_v42, %v3048_v46 }
  0xe9   :  { %2207 = vmatpush.bf16.msrb.mxu1 %v3131_v28  ;;  %2120 = vmatmul.bf16.vlgmr.msra.gmra.mxu0 %v3918_v48  ;;  %v3211_v48 = vor.u32 %v3613_v49, %v3208_v10  ;;  %v3083_v27 = vor.u32 %v3581_v21, %v3080_v22  ;;  %v3577_v28 = vld [vmem:[%s5516_s1 + $0x56c] sm:$0xf]  ;;  %v3304_v55 = vld [vmem:[%s5516_s1 + $0x758] sm:$0xf0]  ;;  %v5420_v22 = vperm.slane %v4828_v52, 1 }
  0xea   :  { %2188 = vmatpush.bf16.msrb.mxu0 %v3003_v23  ;;  %v3645_v23 = vld [vmem:[%s5516_s1 + $0x78c] sm:$0xf]  ;;  %2177 = vmatmul.bf16.vlgmr.msra.gmra.mxu3 %v3939_v57  ;;  %v2936_v57 = vld [vmem:[%s5516_s1 + $0x478] sm:$0xf0] }
  0xeb   :  { %2245 = vmatpush.bf16.msrb.mxu3 %v3387_v29  ;;  %v3339_v11 = vor.u32 %v3645_v23, %v3336_v24  ;;  %v5352_v29 = vpop.f32.mrf.mxu2  ;;  %v2939_v38 = vor.u32 %v3545_v54, %v2936_v57  ;;  %v3160_v61 = vld [vmem:[%s5516_s1 + $0x638] sm:$0xf0]  ;;  %v3569_v10 = vld [vmem:[%s5516_s1 + $0x52c] sm:$0xf] }
  0xec   :  { %2227 = vmatpush.bf16.msrb.mxu2 %v3243_v19  ;;  %v3605_v19 = vld [vmem:[%s5516_s1 + $0x64c] sm:$0xf]  ;;  %v2904_v49 = vld [vmem:[%s5516_s1 + $0x438] sm:$0xf0] }
  0xed   :  { %2208 = vmatpush.bf16.msrb.mxu1 %v3115_v40  ;;  %v3067_v40 = vor.u32 %v3577_v28, %v3064_v31  ;;  %v3032_v18 = vld [vmem:[%s5516_s1 + $0x538] sm:$0xf0]  ;;  %v3633_v20 = vld [vmem:[%s5516_s1 + $0x72c] sm:$0xf] }
  0xee   :  { %2189 = vmatpush.bf16.msrb.mxu0 %v2987_v39  ;;  %v5354_v30 = vpop.f32.mrf.mxu3  ;;  %v5365_v34 = vpop.f32.mrf.mxu0  ;;  %v3176_v39 = vld [vmem:[%s5516_s1 + $0x658] sm:$0xf0]  ;;  %v3597_v25 = vld [vmem:[%s5516_s1 + $0x60c] sm:$0xf] }
  0xef   :  { %2246 = vmatpush.bf16.msrb.mxu3 %v3371_v41  ;;  %v5367_v35 = vpop.f32.mrf.mxu1  ;;  %v3323_v41 = vor.u32 %v3641_v32, %v3320_v33  ;;  %v3179_v58 = vor.u32 %v3605_v19, %v3176_v39  ;;  %v3288_v21 = vld [vmem:[%s5516_s1 + $0x738] sm:$0xf0]  ;;  %v3533_v52 = vld [vmem:[%s5516_s1 + $0x40c] sm:$0xf]  ;;  %v1818_v33 = vadd.f32 %v5303_v63, %v5420_v22 }
  0xf0   :  { %2228 = vmatpush.bf16.msrb.mxu2 %v3227_v4  ;;  %v3307_v4 = vor.u32 %v3637_v47, %v3304_v55  ;;  %v3144_v26 = vld [vmem:[%s5516_s1 + $0x618] sm:$0xf0]  ;;  %v3565_v57 = vld [vmem:[%s5516_s1 + $0x50c] sm:$0xf] }
  0xf1   :  { %2209 = vmatpush.bf16.msrb.mxu1 %v3099_v16  ;;  %v2888_v54 = vld [vmem:[%s5516_s1 + $0x418] sm:$0xf0]  ;;  %v3629_v31 = vld [vmem:[%s5516_s1 + $0x70c] sm:$0xf] }
  0xf2   :  { %2190 = vmatpush.bf16.msrb.mxu0 %v2971_v7  ;;  %v3537_v7 = vld [vmem:[%s5516_s1 + $0x42c] sm:$0xf]  ;;  %v3016_v28 = vld [vmem:[%s5516_s1 + $0x518] sm:$0xf0] }
  0xf3   :  { %2247 = vmatpush.bf16.msrb.mxu3 %v3355_v17  ;;  %v1857_v16 = vpop.f32.mrf.mxu2  ;;  %v3272_v32 = vld [vmem:[%s5516_s1 + $0x718] sm:$0xf0] }
  0xf4   :  { %2229 = vmatpush.bf16.msrb.mxu2 %v3211_v48  ;;  %v3163_v48 = vor.u32 %v3601_v60, %v3160_v61 }
  0xf5   :  { %2210 = vmatpush.bf16.msrb.mxu1 %v3083_v27  ;;  %v3035_v27 = vor.u32 %v3569_v10, %v3032_v18 }
  0xf6   :  { %2191 = vmatpush.bf16.msrb.mxu0 %v2955_v53  ;;  %v5408_v17 = vpop.f32.mrf.mxu3  ;;  %v1822_v23 = vpop.f32.mrf.mxu0  ;;  %v2907_v53 = vor.u32 %v3537_v7, %v2904_v49 }
  0xf7   :  { %2248 = vmatpush.bf16.msrb.mxu3 %v3339_v11  ;;  %v1841_v24 = vpop.f32.mrf.mxu1  ;;  %v3291_v11 = vor.u32 %v3633_v20, %v3288_v21  ;;  %2163 = vmatmul.bf16.gmra.mxu2 %v4063_v51 }
  0xf8   :  { %2230 = vmatpush.bf16.msrb.mxu2 %v3195_v36  ;;  %2144 = vmatmul.bf16.gmra.mxu1 %v4061_v50  ;;  %v2891_v50 = vor.u32 %v3533_v52, %v2888_v54  ;;  %v3019_v36 = vor.u32 %v3565_v57, %v3016_v28 }
  0xf9   :  { %2211 = vmatpush.bf16.msrb.mxu1 %v3067_v40  ;;  %2125 = vmatmul.bf16.gmra.mxu0 %v4050_v44  ;;  %v3147_v44 = vor.u32 %v3597_v25, %v3144_v26  ;;  %v1837_v40 = vadd.f32 %v5305_v2, %v1818_v33 }
  0xfa   :  { %2192 = vmatpush.bf16.msrb.mxu0 %v2939_v38  ;;  %2182 = vmatmul.bf16.gmra.mxu3 %v4071_v56  ;;  %v3275_v38 = vor.u32 %v3629_v31, %v3272_v32  ;;  %v1820_v56 = vadd.f32 %v5365_v34, %v5420_v22  ;;  %v2272_v32 = vmax.f32 %v5277_v37, 0.0 }
  0xfb   :  { %2249 = vmatpush.bf16.msrb.mxu3 %v3323_v41  ;;  %v1860_v19 = vpop.f32.mrf.mxu2  ;;  %v1856_v51 = vadd.f32 %v5352_v29, %v1837_v40 }
  0xfc   :  { %2231 = vmatpush.bf16.msrb.mxu2 %v3179_v58  ;;  %v1839_v55 = vadd.f32 %v5367_v35, %v1820_v56 }
  0xfd   :  { %2212 = vmatpush.bf16.msrb.mxu1 %v3051_v62  ;;  %v1875_v42 = vadd.f32 %v5354_v30, %v1856_v51  ;;  %v2276_v51 = vmax.f32 %v5313_v12, 0.0 }
  0xfe   :  { %2193 = vmatpush.bf16.msrb.mxu0 %v2923_v59  ;;  %v1879_v39 = vpop.f32.mrf.mxu3  ;;  %v1824_v41 = vpop.f32.mrf.mxu0  ;;  %v1858_v58 = vadd.f32 %v1857_v16, %v1839_v55  ;;  %v1823_v59 = vadd.f32 %v1822_v23, %v5420_v22 }
  0xff   :  { %2250 = vmatpush.bf16.msrb.mxu3 %v3307_v4  ;;  %v1843_v15 = vpop.f32.mrf.mxu1  ;;  %v1825_v16 = vadd.f32 %v1824_v41, %v5420_v22 }
 0x100   :  { %2232 = vmatpush.bf16.msrb.mxu2 %v3163_v48  ;;  %v1877_v30 = vadd.f32 %v5408_v17, %v1858_v58  ;;  %v1842_v61 = vadd.f32 %v1841_v24, %v1823_v59 }
 0x101   :  { %2213 = vmatpush.bf16.msrb.mxu1 %v3035_v27  ;;  %v1844_v48 = vadd.f32 %v1843_v15, %v1825_v16 }
 0x102   :  { %2194 = vmatpush.bf16.msrb.mxu0 %v2907_v53  ;;  %v1861_v49 = vadd.f32 %v1860_v19, %v1842_v61 }
 0x103   :  { %2251 = vmatpush.bf16.msrb.mxu3 %v3291_v11  ;;  %v1862_v63 = vpop.f32.mrf.mxu2 }
 0x104   :  { %2233 = vmatpush.bf16.msrb.mxu2 %v3147_v44  ;;  %v1880_v21 = vadd.f32 %v1879_v39, %v1861_v49  ;;  %v1863_v22 = vadd.f32 %v1862_v63, %v1844_v48 }
 0x105   :  { %2214 = vmatpush.bf16.msrb.mxu1 %v3019_v36 }
 0x106   :  { %2195 = vmatpush.bf16.msrb.mxu0 %v2891_v50  ;;  %v1881_v43 = vpop.f32.mrf.mxu3  ;;  %v1893_v46 = vpop.f32.mrf.mxu0 }
 0x107   :  { %2252 = vmatpush.bf16.msrb.mxu3 %v3275_v38  ;;  %v1912_v47 = vpop.f32.mrf.mxu1  ;;  %v1894_v2 = vadd.f32 %v1893_v46, %v1875_v42  ;;  %2234 = vmatmul.bf16.vlgmr.msrb.gmra.mxu2 %v4219_v5  ;;  %v1882_v57 = vadd.f32 %v1881_v43, %v1863_v22 }
 0x108   :  { %2215 = vmatmul.bf16.vlgmr.msrb.gmra.mxu1 %v4208_v1  ;;  %v2264_v1 = vmax.f32 %v5153_v3, 0.0  ;;  %v2268_v3 = vmax.f32 %v5210_v45, 0.0 }
 0x109   :  { %2196 = vmatmul.bf16.vlgmr.msrb.gmra.mxu0 %v4206_v0  ;;  %v1913_v29 = vadd.f32 %v1912_v47, %v1894_v2 }
 0x10a   :  { %2253 = vmatmul.bf16.vlgmr.msrb.gmra.mxu3 %v4221_v6 }
 0x10b   :  { %v1931_v34 = vpop.f32.mrf.mxu2 }
 0x10c   :  { %v1932_v62 = vadd.f32 %v1931_v34, %v1913_v29 }
 0x10e   :  { %v1950_v60 = vpop.f32.mrf.mxu3  ;;  %v1895_v35 = vpop.f32.mrf.mxu0 }
 0x10f   :  { %v1914_v4 = vpop.f32.mrf.mxu1  ;;  %v1951_v7 = vadd.f32 %v1950_v60, %v1932_v62  ;;  %v1896_v0 = vadd.f32 %v1895_v35, %v1877_v30 }
 0x111   :  { %v2265_v10 = vmax.f32 %v1951_v7, 0.0  ;;  %v1915_v18 = vadd.f32 %v1914_v4, %v1896_v0 }
 0x113   :  { %v2280_v5 = vpack.c.bf16 %v2265_v10, %v2264_v1  ;;  %v1933_v6 = vpop.f32.mrf.mxu2 }
 0x114   :  { %v1934_v17 = vadd.f32 %v1933_v6, %v1915_v18 }
 0x115   :  { %2288 = vst [vmem:[%s5519_s3] sm:$0xff] %v2280_v5 }
 0x116   :  { %v1952_v20 = vpop.f32.mrf.mxu3  ;;  %v1898_v23 = vpop.f32.mrf.mxu0 }
 0x117   :  { %v1917_v24 = vpop.f32.mrf.mxu1  ;;  %v1953_v53 = vadd.f32 %v1952_v20, %v1934_v17  ;;  %v1899_v25 = vadd.f32 %v1898_v23, %v1880_v21  ;;  %2239 = vmatmul.bf16.gmra.mxu2 %v4351_v13  ;;  %v5481_v13 = vld [vmem:[%s5518_s2] sm:$0xf] }
 0x118   :  { %2220 = vmatmul.bf16.gmra.mxu1 %v4340_v9 }
 0x119   :  { %2201 = vmatmul.bf16.gmra.mxu0 %v4338_v8  ;;  %v2269_v26 = vmax.f32 %v1953_v53, 0.0  ;;  %v1918_v11 = vadd.f32 %v1917_v24, %v1899_v25 }
 0x11a   :  { %2258 = vmatmul.bf16.gmra.mxu3 %v4353_v14  ;;  %v290_v14 = vperm.slane %v5481_v13, 2 }
 0x11b   :  { %v2282_v27 = vpack.c.bf16 %v2269_v26, %v2268_v3  ;;  %v1936_v52 = vpop.f32.mrf.mxu2 }
 0x11c   :  { %v1937_v8 = vadd.f32 %v1936_v52, %v1918_v11 }
 0x11d   :  { %2290 = vst [vmem:[%s5519_s3 + $0x10] sm:$0xff] %v2282_v27 }
 0x11e   :  { %v1955_v54 = vpop.f32.mrf.mxu3  ;;  %v1900_v28 = vpop.f32.mrf.mxu0 }
 0x11f   :  { %v1919_v9 = vpop.f32.mrf.mxu1  ;;  %v1956_v31 = vadd.f32 %v1955_v54, %v1937_v8  ;;  %v1901_v45 = vadd.f32 %v1900_v28, %v1882_v57 }
 0x121   :  { %v2273_v33 = vmax.f32 %v1956_v31, 0.0  ;;  %v1920_v50 = vadd.f32 %v1919_v9, %v1901_v45 }
 0x123   :  { %v2284_v44 = vpack.c.bf16 %v2273_v33, %v2272_v32  ;;  %v1938_v36 = vpop.f32.mrf.mxu2 }
 0x124   :  { %v1939_v19 = vadd.f32 %v1938_v36, %v1920_v50 }
 0x125   :  { %2292 = vst [vmem:[%s5519_s3 + $0x20] sm:$0xff] %v2284_v44 }
 0x126   :  { %v1957_v38 = vpop.f32.mrf.mxu3  ;;  %v1969_v39 = vpop.f32.mrf.mxu0 }
 0x127   :  { %v1988_v40 = vpop.f32.mrf.mxu1  ;;  %v1970_v37 = vadd.f32 %v1969_v39, %v290_v14  ;;  %v1958_v41 = vadd.f32 %v1957_v38, %v1939_v19 }
 0x129   :  { %v1989_v15 = vadd.f32 %v1988_v40, %v1970_v37  ;;  %v2277_v56 = vmax.f32 %v1958_v41, 0.0 }
 0x12b   :  { %v2286_v63 = vpack.c.bf16 %v2277_v56, %v2276_v51  ;;  %v2007_v43 = vpop.f32.mrf.mxu2 }
 0x12c   :  { %v2008_v46 = vadd.f32 %v2007_v43, %v1989_v15 }
 0x12d   :  { %2294 = vst [vmem:[%s5519_s3 + $0x30] sm:$0xff] %v2286_v63 }
 0x12e   :  { %v2026_v42 = vpop.f32.mrf.mxu3  ;;  %v1971_v47 = vpop.f32.mrf.mxu0 }
 0x12f   :  { %v1990_v55 = vpop.f32.mrf.mxu1  ;;  %v1972_v2 = vadd.f32 %v1971_v47, %v290_v14  ;;  %v2027_v58 = vadd.f32 %v2026_v42, %v2008_v46 }
 0x131   :  { %v1991_v59 = vadd.f32 %v1990_v55, %v1972_v2  ;;  %v291_v2 = vperm.slane %v5481_v13, 3 }
 0x133   :  { %v2009_v29 = vpop.f32.mrf.mxu2 }
 0x134   :  { %v2010_v60 = vadd.f32 %v2009_v29, %v1991_v59 }
 0x136   :  { %v2028_v34 = vpop.f32.mrf.mxu3  ;;  %v1974_v30 = vpop.f32.mrf.mxu0 }
 0x137   :  { %v1993_v61 = vpop.f32.mrf.mxu1  ;;  %v1975_v12 = vadd.f32 %v1974_v30, %v290_v14  ;;  %v2029_v62 = vadd.f32 %v2028_v34, %v2010_v60 }
 0x139   :  { %v1994_v35 = vadd.f32 %v1993_v61, %v1975_v12 }
 0x13b   :  { %v2012_v4 = vpop.f32.mrf.mxu2 }
 0x13c   :  { %v2013_v0 = vadd.f32 %v2012_v4, %v1994_v35 }
 0x13e   :  { %v2031_v7 = vpop.f32.mrf.mxu3  ;;  %v1976_v1 = vpop.f32.mrf.mxu0 }
 0x13f   :  { %v1995_v49 = vpop.f32.mrf.mxu1  ;;  %v1977_v10 = vadd.f32 %v1976_v1, %v290_v14  ;;  %v2032_v16 = vadd.f32 %v2031_v7, %v2013_v0 }
 0x141   :  { %v1996_v5 = vadd.f32 %v1995_v49, %v1977_v10 }
 0x143   :  { %v2014_v18 = vpop.f32.mrf.mxu2 }
 0x144   :  { %v2015_v20 = vadd.f32 %v2014_v18, %v1996_v5 }
 0x146   :  { %v2033_v6 = vpop.f32.mrf.mxu3  ;;  %v2045_v21 = vpop.f32.mrf.mxu0 }
 0x147   :  { %v2064_v17 = vpop.f32.mrf.mxu1  ;;  %v2046_v23 = vadd.f32 %v2045_v21, %v2027_v58  ;;  %v2034_v24 = vadd.f32 %v2033_v6, %v2015_v20 }
 0x149   :  { %v2065_v48 = vadd.f32 %v2064_v17, %v2046_v23 }
 0x14b   :  { %v2083_v53 = vpop.f32.mrf.mxu2 }
 0x14c   :  { %v2084_v3 = vadd.f32 %v2083_v53, %v2065_v48 }
 0x14e   :  { %v2102_v25 = vpop.f32.mrf.mxu3  ;;  %v2047_v22 = vpop.f32.mrf.mxu0 }
 0x14f   :  { %v2066_v26 = vpop.f32.mrf.mxu1  ;;  %v2048_v27 = vadd.f32 %v2047_v22, %v2029_v62  ;;  %v5491_v11 = vadd.f32 %v2102_v25, %v2084_v3 }
 0x151   :  { %v2067_v52 = vadd.f32 %v2066_v26, %v2048_v27  ;;  %v2266_v3 = vmax.f32 %v5491_v11, 0.0 }
 0x153   :  { %v2085_v54 = vpop.f32.mrf.mxu2 }
 0x154   :  { %v2086_v8 = vadd.f32 %v2085_v54, %v2067_v52 }
 0x156   :  { %v2104_v57 = vpop.f32.mrf.mxu3  ;;  %v2050_v28 = vpop.f32.mrf.mxu0 }
 0x157   :  { %v2069_v9 = vpop.f32.mrf.mxu1  ;;  %v2051_v31 = vadd.f32 %v2050_v28, %v2032_v16  ;;  %v5493_v45 = vadd.f32 %v2104_v57, %v2086_v8 }
 0x159   :  { %v2070_v32 = vadd.f32 %v2069_v9, %v2051_v31  ;;  %v2270_v11 = vmax.f32 %v5493_v45, 0.0 }
 0x15b   :  { %v2088_v33 = vpop.f32.mrf.mxu2 }
 0x15c   :  { %v2089_v44 = vadd.f32 %v2088_v33, %v2070_v32 }
 0x15e   :  { %v2107_v14 = vpop.f32.mrf.mxu3  ;;  %v2052_v50 = vpop.f32.mrf.mxu0 }
 0x15f   :  { %v2071_v36 = vpop.f32.mrf.mxu1  ;;  %v2053_v38 = vadd.f32 %v2052_v50, %v2034_v24  ;;  %v5495_v19 = vadd.f32 %v2107_v14, %v2089_v44 }
 0x161   :  { %v2072_v39 = vadd.f32 %v2071_v36, %v2053_v38 }
 0x163   :  { %v2090_v40 = vpop.f32.mrf.mxu2 }
 0x164   :  { %v2091_v41 = vadd.f32 %v2090_v40, %v2072_v39 }
 0x166   :  { %v2109_v37 = vpop.f32.mrf.mxu3  ;;  %v2121_v15 = vpop.f32.mrf.mxu0 }
 0x167   :  { %v2140_v51 = vpop.f32.mrf.mxu1  ;;  %v5497_v56 = vadd.f32 %v2109_v37, %v2091_v41  ;;  %v2122_v29 = vadd.f32 %v2121_v15, %v291_v2 }
 0x169   :  { %v2141_v30 = vadd.f32 %v2140_v51, %v2122_v29 }
 0x16b   :  { %v2159_v63 = vpop.f32.mrf.mxu2 }
 0x16c   :  { %v2160_v62 = vadd.f32 %v2159_v63, %v2141_v30 }
 0x16e   :  { %v2178_v43 = vpop.f32.mrf.mxu3  ;;  %v2123_v42 = vpop.f32.mrf.mxu0 }
 0x16f   :  { %v2142_v46 = vpop.f32.mrf.mxu1  ;;  %v2124_v35 = vadd.f32 %v2123_v42, %v291_v2  ;;  %v2179_v0 = vadd.f32 %v2178_v43, %v2160_v62  ;;  %v2274_v42 = vmax.f32 %v5495_v19, 0.0 }
 0x171   :  { %v2143_v10 = vadd.f32 %v2142_v46, %v2124_v35 }
 0x173   :  { %v2161_v47 = vpop.f32.mrf.mxu2 }
 0x174   :  { %v2162_v5 = vadd.f32 %v2161_v47, %v2143_v10 }
 0x176   :  { %v2180_v55 = vpop.f32.mrf.mxu3  ;;  %v2126_v58 = vpop.f32.mrf.mxu0 }
 0x177   :  { %v2145_v59 = vpop.f32.mrf.mxu1  ;;  %v2127_v18 = vadd.f32 %v2126_v58, %v291_v2  ;;  %v2181_v21 = vadd.f32 %v2180_v55, %v2162_v5 }
 0x179   :  { %v2146_v17 = vadd.f32 %v2145_v59, %v2127_v18 }
 0x17b   :  { %v2164_v34 = vpop.f32.mrf.mxu2 }
 0x17c   :  { %v2165_v22 = vadd.f32 %v2164_v34, %v2146_v17  ;;  %v2278_v34 = vmax.f32 %v5497_v56, 0.0 }
 0x17e   :  { %v2183_v60 = vpop.f32.mrf.mxu3  ;;  %v2128_v61 = vpop.f32.mrf.mxu0 }
 0x17f   :  { %v2147_v12 = vpop.f32.mrf.mxu1  ;;  %v2129_v27 = vadd.f32 %v2128_v61, %v291_v2  ;;  %v2184_v28 = vadd.f32 %v2183_v60, %v2165_v22 }
 0x181   :  { %v2148_v32 = vadd.f32 %v2147_v12, %v2129_v27 }
 0x183   :  { %v2166_v4 = vpop.f32.mrf.mxu2 }
 0x184   :  { %v2167_v50 = vadd.f32 %v2166_v4, %v2148_v32 }
 0x186   :  { %v2185_v7 = vpop.f32.mrf.mxu3  ;;  %v2197_v1 = vpop.f32.mrf.mxu0 }
 0x187   :  { %v2216_v49 = vpop.f32.mrf.mxu1  ;;  %v2198_v16 = vadd.f32 %v2197_v1, %v2179_v0  ;;  %v2186_v41 = vadd.f32 %v2185_v7, %v2167_v50 }
 0x189   :  { %v2217_v13 = vadd.f32 %v2216_v49, %v2198_v16 }
 0x18b   :  { %v2235_v6 = vpop.f32.mrf.mxu2 }
 0x18c   :  { %v2236_v23 = vadd.f32 %v2235_v6, %v2217_v13 }
 0x18e   :  { %v2254_v20 = vpop.f32.mrf.mxu3  ;;  %v2199_v24 = vpop.f32.mrf.mxu0 }
 0x18f   :  { %v2218_v48 = vpop.f32.mrf.mxu1  ;;  %v2255_v53 = vadd.f32 %v2254_v20, %v2236_v23  ;;  %v2200_v25 = vadd.f32 %v2199_v24, %v2181_v21 }
 0x191   :  { %v2267_v26 = vmax.f32 %v2255_v53, 0.0  ;;  %v2219_v54 = vadd.f32 %v2218_v48, %v2200_v25 }
 0x193   :  { %v2281_v52 = vpack.c.bf16 %v2267_v26, %v2266_v3  ;;  %v2237_v57 = vpop.f32.mrf.mxu2 }
 0x194   :  { %v2238_v9 = vadd.f32 %v2237_v57, %v2219_v54 }
 0x195   :  { %2289 = vst [vmem:[%s5519_s3 + $0x8] sm:$0xff] %v2281_v52 }
 0x196   :  { %v2256_v8 = vpop.f32.mrf.mxu3  ;;  %v2202_v31 = vpop.f32.mrf.mxu0 }
 0x197   :  { %v2257_v33 = vadd.f32 %v2256_v8, %v2238_v9  ;;  %v2203_v14 = vadd.f32 %v2202_v31, %v2184_v28  ;;  %v2221_v44 = vpop.f32.mrf.mxu1 }
 0x199   :  { %v2271_v36 = vmax.f32 %v2257_v33, 0.0  ;;  %v2222_v39 = vadd.f32 %v2221_v44, %v2203_v14 }
 0x19b   :  { %v2283_v38 = vpack.c.bf16 %v2271_v36, %v2270_v11  ;;  %v2240_v40 = vpop.f32.mrf.mxu2 }
 0x19c   :  { %v2241_v15 = vadd.f32 %v2240_v40, %v2222_v39 }
 0x19d   :  { %2291 = vst [vmem:[%s5519_s3 + $0x18] sm:$0xff] %v2283_v38 }
 0x19e   :  { %v2259_v37 = vpop.f32.mrf.mxu3  ;;  %v2204_v51 = vpop.f32.mrf.mxu0 }
 0x19f   :  { %v2260_v63 = vadd.f32 %v2259_v37, %v2241_v15  ;;  %v2205_v43 = vadd.f32 %v2204_v51, %v2186_v41  ;;  %v2223_v47 = vpop.f32.mrf.mxu1 }
 0x1a1   :  { %v2275_v46 = vmax.f32 %v2260_v63, 0.0  ;;  %v2224_v55 = vadd.f32 %v2223_v47, %v2205_v43 }
 0x1a3   :  { %v2285_v45 = vpack.c.bf16 %v2275_v46, %v2274_v42  ;;  %v2242_v2 = vpop.f32.mrf.mxu2 }
 0x1a4   :  { %v2243_v58 = vadd.f32 %v2242_v2, %v2224_v55 }
 0x1a5   :  { %2293 = vst [vmem:[%s5519_s3 + $0x28] sm:$0xff] %v2285_v45 }
 0x1a6   :  { %v2261_v59 = vpop.f32.mrf.mxu3 }
 0x1a7   :  { %v2262_v29 = vadd.f32 %v2261_v59, %v2243_v58 }
 0x1a9   :  { %v2279_v60 = vmax.f32 %v2262_v29, 0.0 }
 0x1ab   :  { %v2287_v30 = vpack.c.bf16 %v2279_v60, %v2278_v34 }
 0x1ad   :  { %2295 = vst [vmem:[%s5519_s3 + $0x38] sm:$0xff] %v2287_v30 }

// kernel: sent_encoder_forward.11
= control target key start
LH: loop header
LB: loop body
LE: loop exit
PB: predicated region body
PF: predicated region fallthrough
CT: control target
= control target key end

     0   :  { %s7971_s12 = smov 0   ;;  %s8576_s0 = inlined_call_operand.vmem [shape: bf16[2,8192], index: 0, kind: input, shape index: {}]   ;;  %s8577_s1 = inlined_call_operand.vmem [shape: bf16[2,8192,64], index: 1, kind: input, shape index: {}]   ;;  %s8578_s2 = inlined_call_operand.vmem [shape: f32[2,1,64], index: 2, kind: input, shape index: {}]   ;;  %s8579_s3 = inlined_call_operand.vmem [shape: f32[2,2,64], index: 3, kind: output, shape index: {}]  }
   0x1 LB: > { %s7977_s13 = sadd.s32 4294967295, %s7949_s12   ;;  %p5361_p0 = scmp.ge.s32.totalorder %s7949_s12, 1  ;;  %s7949_s12 = sphi %s7971_s12, %s13_s12  }
   0x2   : > { %p145_p1 = scmp.lt.s32.totalorder %s7949_s12, 3 }
   0x4   : > { %p146_p2 = pnand %p5361_p0, %p145_p1 }
   0x5   : > { %p171_p3 = scmp.lt.s32.totalorder (!%p146_p2), %s7977_s13, 1  ;;  %p7413_p4 = scmp.ne.s32.totalorder (!%p146_p2), %s7977_s13, 0 }
   0x6   : > { %149 = sbr.rel (%p146_p2) target bundleno = 709 (0x2c5), region = 32 }
   0xb   : > { %s7983_s14 = scalar_select %p171_p3, %s7977_s13, 1  ;;  %v183_v20 = vld [vmem:[%s8576_s0] sm:$0xff]  ;;  %v184_v52 = vld [vmem:[%s8576_s0 + $0x8] sm:$0xff] }
   0xc   : > { %1220 = vst [vmem:[#allocation1] ss:$9 sm:$0xff] %v183_v20 }
   0xd   : > { %s7417_s15 = sshll.u32 %s7983_s14, 12  ;;  %s178_s25 = scalar_lea.vmem %s8578_s2, %s7983_s14 }
   0xe   : > { %s7989_s18 = scalar_lea.vmem %s8577_s1, %s7417_s15  ;;  %s5364_s26 = sshll.u32 %s7983_s14, 1 }
   0xf   : > { %v7425_v0 = vld [vmem:[%s7989_s18 + $0x38] sm:$0xff]  ;;  %v7424_v4 = vld [vmem:[%s7989_s18 + $0x30] sm:$0xff]  ;;  %v7423_v8 = vld [vmem:[%s7989_s18 + $0x28] sm:$0xff]  ;;  %s8075_s29 = scalar_lea.vmem %s8579_s3, %s5364_s26 }
  0x10   : > { %v7433_v1 = vld [vmem:[%s7989_s18 + $0x78] sm:$0xff]  ;;  %4435 = vmatpush.bf16.msra.mxu0 %v7425_v0  ;;  %v7432_v5 = vld [vmem:[%s7989_s18 + $0x70] sm:$0xff]  ;;  %v7431_v9 = vld [vmem:[%s7989_s18 + $0x68] sm:$0xff] }
  0x11   : > { %v7441_v2 = vld [vmem:[%s7989_s18 + $0xb8] sm:$0xff]  ;;  %4448 = vmatpush.bf16.msra.mxu1 %v7433_v1  ;;  %v7440_v6 = vld [vmem:[%s7989_s18 + $0xb0] sm:$0xff]  ;;  %v7439_v10 = vld [vmem:[%s7989_s18 + $0xa8] sm:$0xff] }
  0x12   : > { %v7449_v3 = vld [vmem:[%s7989_s18 + $0xf8] sm:$0xff]  ;;  %4461 = vmatpush.bf16.msra.mxu2 %v7441_v2  ;;  %v7448_v7 = vld [vmem:[%s7989_s18 + $0xf0] sm:$0xff]  ;;  %v7447_v11 = vld [vmem:[%s7989_s18 + $0xe8] sm:$0xff] }
  0x13   : > { %4474 = vmatpush.bf16.msra.mxu3 %v7449_v3  ;;  %v7422_v12 = vld [vmem:[%s7989_s18 + $0x20] sm:$0xff]  ;;  %v7421_v16 = vld [vmem:[%s7989_s18 + $0x18] sm:$0xff]  ;;  %v7420_v21 = vld [vmem:[%s7989_s18 + $0x10] sm:$0xff] }
  0x14   : > { %4436 = vmatpush.bf16.msra.mxu0 %v7424_v4  ;;  %v7430_v13 = vld [vmem:[%s7989_s18 + $0x60] sm:$0xff]  ;;  %v7429_v17 = vld [vmem:[%s7989_s18 + $0x58] sm:$0xff]  ;;  %v7428_v22 = vld [vmem:[%s7989_s18 + $0x50] sm:$0xff] }
  0x15   : > { %4449 = vmatpush.bf16.msra.mxu1 %v7432_v5  ;;  %v7438_v14 = vld [vmem:[%s7989_s18 + $0xa0] sm:$0xff]  ;;  %v7437_v18 = vld [vmem:[%s7989_s18 + $0x98] sm:$0xff]  ;;  %v7436_v23 = vld [vmem:[%s7989_s18 + $0x90] sm:$0xff] }
  0x16   : > { %4462 = vmatpush.bf16.msra.mxu2 %v7440_v6  ;;  %v7446_v15 = vld [vmem:[%s7989_s18 + $0xe0] sm:$0xff]  ;;  %v7445_v19 = vld [vmem:[%s7989_s18 + $0xd8] sm:$0xff]  ;;  %v7444_v24 = vld [vmem:[%s7989_s18 + $0xd0] sm:$0xff] }
  0x17   : > { %4475 = vmatpush.bf16.msra.mxu3 %v7448_v7  ;;  %v7419_v25 = vld [vmem:[%s7989_s18 + $0x8] sm:$0xff]  ;;  %v7418_v29 = vld [vmem:[%s7989_s18] sm:$0xff]  ;;  %v7457_v33 = vld [vmem:[%s7989_s18 + $0x138] sm:$0xff] }
  0x18   : > { %4437 = vmatpush.bf16.msra.mxu0 %v7423_v8  ;;  %v7427_v26 = vld [vmem:[%s7989_s18 + $0x48] sm:$0xff]  ;;  %v7426_v30 = vld [vmem:[%s7989_s18 + $0x40] sm:$0xff]  ;;  %v7465_v34 = vld [vmem:[%s7989_s18 + $0x178] sm:$0xff] }
  0x19   : > { %4450 = vmatpush.bf16.msra.mxu1 %v7431_v9  ;;  %v7435_v27 = vld [vmem:[%s7989_s18 + $0x88] sm:$0xff]  ;;  %v7434_v31 = vld [vmem:[%s7989_s18 + $0x80] sm:$0xff]  ;;  %v7473_v35 = vld [vmem:[%s7989_s18 + $0x1b8] sm:$0xff] }
  0x1a   : > { %4463 = vmatpush.bf16.msra.mxu2 %v7439_v10  ;;  %v7443_v28 = vld [vmem:[%s7989_s18 + $0xc8] sm:$0xff]  ;;  %v7442_v32 = vld [vmem:[%s7989_s18 + $0xc0] sm:$0xff]  ;;  %v7481_v36 = vld [vmem:[%s7989_s18 + $0x1f8] sm:$0xff] }
  0x1b   : > { %4476 = vmatpush.bf16.msra.mxu3 %v7447_v11  ;;  %v7456_v37 = vld [vmem:[%s7989_s18 + $0x130] sm:$0xff]  ;;  %v1221_v39 = vld [vmem:[#allocation1] sm:$0xff]  ;;  %v7455_v45 = vld [vmem:[%s7989_s18 + $0x128] sm:$0xff] }
  0x1c   : > { %4438 = vmatpush.bf16.msra.mxu0 %v7422_v12  ;;  %v1223_v38 = vld [vmem:[#allocation1 + $0x12] sm:$0xff]  ;;  %v1224_v41 = vld [vmem:[#allocation1 + $0x1b] sm:$0xff]  ;;  %v1222_v42 = vld [vmem:[#allocation1 + $0x9] sm:$0xff] }
  0x1d   : > { %4451 = vmatpush.bf16.msra.mxu1 %v7430_v13  ;;  %v7464_v40 = vld [vmem:[%s7989_s18 + $0x170] sm:$0xff]  ;;  %v7463_v46 = vld [vmem:[%s7989_s18 + $0x168] sm:$0xff]  ;;  %v8042_v51 = vld [vmem:[#allocation1 + $0x3f] sm:$0xff] }
  0x1e   : > { %4464 = vmatpush.bf16.msra.mxu2 %v7438_v14  ;;  %v7472_v43 = vld [vmem:[%s7989_s18 + $0x1b0] sm:$0xff]  ;;  %v7471_v47 = vld [vmem:[%s7989_s18 + $0x1a8] sm:$0xff]  ;;  %v7454_v54 = vld [vmem:[%s7989_s18 + $0x120] sm:$0xff] }
  0x1f   : > { %4477 = vmatpush.bf16.msra.mxu3 %v7446_v15  ;;  %v7480_v44 = vld [vmem:[%s7989_s18 + $0x1f0] sm:$0xff]  ;;  %v7479_v48 = vld [vmem:[%s7989_s18 + $0x1e8] sm:$0xff]  ;;  %v7462_v55 = vld [vmem:[%s7989_s18 + $0x160] sm:$0xff] }
  0x20   : > { %4439 = vmatpush.bf16.msra.mxu0 %v7421_v16  ;;  %v8038_v49 = vld [vmem:[#allocation1 + $0x36] sm:$0xff]  ;;  %v8040_v50 = vld [vmem:[#allocation1 + $0x24] sm:$0xff]  ;;  %v8047_v53 = vld [vmem:[#allocation1 + $0x2d] sm:$0xff] }
  0x21   : > { %4452 = vmatpush.bf16.msra.mxu1 %v7429_v17  ;;  %1230 = vst [vmem:[#allocation1] ss:$9 sm:$0xff] %v184_v52  ;;  %v7470_v56 = vld [vmem:[%s7989_s18 + $0x1a0] sm:$0xff]  ;;  %v7453_v58 = vld [vmem:[%s7989_s18 + $0x118] sm:$0xff]  ;;  %v7452_v62 = vld [vmem:[%s7989_s18 + $0x110] sm:$0xff] }
  0x22   : > { %4465 = vmatpush.bf16.msra.mxu2 %v7437_v18  ;;  %v7478_v57 = vld [vmem:[%s7989_s18 + $0x1e0] sm:$0xff]  ;;  %v7461_v59 = vld [vmem:[%s7989_s18 + $0x158] sm:$0xff]  ;;  %v7460_v63 = vld [vmem:[%s7989_s18 + $0x150] sm:$0xff] }
  0x23   : > { %4478 = vmatpush.bf16.msra.mxu3 %v7445_v19  ;;  %v7469_v60 = vld [vmem:[%s7989_s18 + $0x198] sm:$0xff]  ;;  %v7468_v0 = vld [vmem:[%s7989_s18 + $0x190] sm:$0xff]  ;;  %v7451_v2 = vld [vmem:[%s7989_s18 + $0x108] sm:$0xff] }
  0x24   : > { %4440 = vmatpush.bf16.msra.mxu0 %v7420_v21  ;;  %v7477_v61 = vld [vmem:[%s7989_s18 + $0x1d8] sm:$0xff]  ;;  %v7476_v1 = vld [vmem:[%s7989_s18 + $0x1d0] sm:$0xff]  ;;  %v7459_v3 = vld [vmem:[%s7989_s18 + $0x148] sm:$0xff] }
  0x25   : > { %4453 = vmatpush.bf16.msra.mxu1 %v7428_v22  ;;  %v7467_v4 = vld [vmem:[%s7989_s18 + $0x188] sm:$0xff]  ;;  %v7450_v6 = vld [vmem:[%s7989_s18 + $0x100] sm:$0xff]  ;;  %v7489_v10 = vld [vmem:[%s7989_s18 + $0x238] sm:$0xff] }
  0x26   : > { %4466 = vmatpush.bf16.msra.mxu2 %v7436_v23  ;;  %v7475_v5 = vld [vmem:[%s7989_s18 + $0x1c8] sm:$0xff]  ;;  %v7458_v7 = vld [vmem:[%s7989_s18 + $0x140] sm:$0xff]  ;;  %v7497_v11 = vld [vmem:[%s7989_s18 + $0x278] sm:$0xff] }
  0x27   : > { %4479 = vmatpush.bf16.msra.mxu3 %v7444_v24  ;;  %v7466_v8 = vld [vmem:[%s7989_s18 + $0x180] sm:$0xff]  ;;  %v7505_v12 = vld [vmem:[%s7989_s18 + $0x2b8] sm:$0xff]  ;;  %v7488_v14 = vld [vmem:[%s7989_s18 + $0x230] sm:$0xff] }
  0x28   : > { %4441 = vmatpush.bf16.msra.mxu0 %v7419_v25  ;;  %v7474_v9 = vld [vmem:[%s7989_s18 + $0x1c0] sm:$0xff]  ;;  %v7513_v13 = vld [vmem:[%s7989_s18 + $0x2f8] sm:$0xff]  ;;  %v7496_v15 = vld [vmem:[%s7989_s18 + $0x270] sm:$0xff] }
  0x29   : > { %4454 = vmatpush.bf16.msra.mxu1 %v7427_v26  ;;  %v7504_v16 = vld [vmem:[%s7989_s18 + $0x2b0] sm:$0xff]  ;;  %v7487_v18 = vld [vmem:[%s7989_s18 + $0x228] sm:$0xff]  ;;  %v7486_v22 = vld [vmem:[%s7989_s18 + $0x220] sm:$0xff] }
  0x2a   : > { %4467 = vmatpush.bf16.msra.mxu2 %v7435_v27  ;;  %v7512_v17 = vld [vmem:[%s7989_s18 + $0x2f0] sm:$0xff]  ;;  %v7495_v19 = vld [vmem:[%s7989_s18 + $0x268] sm:$0xff]  ;;  %v7494_v23 = vld [vmem:[%s7989_s18 + $0x260] sm:$0xff] }
  0x2b   : > { %4480 = vmatpush.bf16.msra.mxu3 %v7443_v28  ;;  %v7503_v20 = vld [vmem:[%s7989_s18 + $0x2a8] sm:$0xff]  ;;  %v7502_v24 = vld [vmem:[%s7989_s18 + $0x2a0] sm:$0xff]  ;;  %v7485_v26 = vld [vmem:[%s7989_s18 + $0x218] sm:$0xff] }
  0x2c   : > { %4442 = vmatpush.bf16.msra.mxu0 %v7418_v29  ;;  %v7511_v21 = vld [vmem:[%s7989_s18 + $0x2e8] sm:$0xff]  ;;  %v7510_v25 = vld [vmem:[%s7989_s18 + $0x2e0] sm:$0xff]  ;;  %v7493_v27 = vld [vmem:[%s7989_s18 + $0x258] sm:$0xff] }
  0x2d   : > { %4455 = vmatpush.bf16.msra.mxu1 %v7426_v30  ;;  %v7501_v28 = vld [vmem:[%s7989_s18 + $0x298] sm:$0xff]  ;;  %v7484_v30 = vld [vmem:[%s7989_s18 + $0x210] sm:$0xff] }
  0x2e   : > { %4468 = vmatpush.bf16.msra.mxu2 %v7434_v31  ;;  %v7509_v29 = vld [vmem:[%s7989_s18 + $0x2d8] sm:$0xff]  ;;  %v7492_v31 = vld [vmem:[%s7989_s18 + $0x250] sm:$0xff] }
  0x2f   : > { %4481 = vmatpush.bf16.msra.mxu3 %v7442_v32  ;;  %4443 = vmatmul.bf16.vlgmr.msra.gmra.mxu0 %v1221_v39  ;;  %v7500_v32 = vld [vmem:[%s7989_s18 + $0x290] sm:$0xff]  ;;  %v7490_v39 = vld [vmem:[%s7989_s18 + $0x240] sm:$0xff] }
  0x30   : > { %4487 = vmatpush.bf16.msrb.mxu0 %v7457_v33  ;;  %4456 = vmatmul.bf16.vlgmr.msra.gmra.mxu1 %v1222_v42  ;;  %v7508_v33 = vld [vmem:[%s7989_s18 + $0x2d0] sm:$0xff]  ;;  %v7521_v42 = vld [vmem:[%s7989_s18 + $0x338] sm:$0xff] }
  0x31   : > { %4500 = vmatpush.bf16.msrb.mxu1 %v7465_v34  ;;  %4469 = vmatmul.bf16.vlgmr.msra.gmra.mxu2 %v1223_v38  ;;  %v7483_v34 = vld [vmem:[%s7989_s18 + $0x208] sm:$0xff]  ;;  %v7482_v38 = vld [vmem:[%s7989_s18 + $0x200] sm:$0xff]  ;;  %v7536_v52 = vld [vmem:[%s7989_s18 + $0x3b0] sm:$0xff] }
  0x32   : > { %4513 = vmatpush.bf16.msrb.mxu2 %v7473_v35  ;;  %4482 = vmatmul.bf16.vlgmr.msra.gmra.mxu3 %v1224_v41  ;;  %v7491_v35 = vld [vmem:[%s7989_s18 + $0x248] sm:$0xff]  ;;  %v7506_v41 = vld [vmem:[%s7989_s18 + $0x2c0] sm:$0xff] }
  0x33   : > { %4526 = vmatpush.bf16.msrb.mxu3 %v7481_v36  ;;  %v7499_v36 = vld [vmem:[%s7989_s18 + $0x288] sm:$0xff] }
  0x34   : > { %4488 = vmatpush.bf16.msrb.mxu0 %v7456_v37  ;;  %v7507_v37 = vld [vmem:[%s7989_s18 + $0x2c8] sm:$0xff] }
  0x35   : > { %4501 = vmatpush.bf16.msrb.mxu1 %v7464_v40  ;;  %v7498_v40 = vld [vmem:[%s7989_s18 + $0x280] sm:$0xff] }
  0x36   : > { %4514 = vmatpush.bf16.msrb.mxu2 %v7472_v43  ;;  %v7529_v43 = vld [vmem:[%s7989_s18 + $0x378] sm:$0xff] }
  0x37   : > { %4527 = vmatpush.bf16.msrb.mxu3 %v7480_v44  ;;  %v7537_v44 = vld [vmem:[%s7989_s18 + $0x3b8] sm:$0xff] }
  0x38   : > { %4489 = vmatpush.bf16.msrb.mxu0 %v7455_v45  ;;  %v7545_v45 = vld [vmem:[%s7989_s18 + $0x3f8] sm:$0xff] }
  0x39   : > { %4502 = vmatpush.bf16.msrb.mxu1 %v7463_v46  ;;  %v1231_v46 = vld [vmem:[#allocation1] sm:$0xff] }
  0x3a   : > { %4515 = vmatpush.bf16.msrb.mxu2 %v7471_v47  ;;  %v1233_v47 = vld [vmem:[#allocation1 + $0x12] sm:$0xff] }
  0x3b   : > { %4528 = vmatpush.bf16.msrb.mxu3 %v7479_v48  ;;  %v1232_v48 = vld [vmem:[#allocation1 + $0x9] sm:$0xff] }
  0x3c   : > { %4490 = vmatpush.bf16.msrb.mxu0 %v7454_v54  ;;  %v7519_v54 = vld [vmem:[%s7989_s18 + $0x328] sm:$0xff] }
  0x3d   : > { %4503 = vmatpush.bf16.msrb.mxu1 %v7462_v55  ;;  %v7527_v55 = vld [vmem:[%s7989_s18 + $0x368] sm:$0xff] }
  0x3e   : > { %4516 = vmatpush.bf16.msrb.mxu2 %v7470_v56  ;;  %v7535_v56 = vld [vmem:[%s7989_s18 + $0x3a8] sm:$0xff] }
  0x3f   : > { %4529 = vmatpush.bf16.msrb.mxu3 %v7478_v57  ;;  %v7543_v57 = vld [vmem:[%s7989_s18 + $0x3e8] sm:$0xff] }
  0x40   : > { %4491 = vmatpush.bf16.msrb.mxu0 %v7453_v58  ;;  %v7518_v58 = vld [vmem:[%s7989_s18 + $0x320] sm:$0xff] }
  0x41   : > { %4504 = vmatpush.bf16.msrb.mxu1 %v7461_v59  ;;  %v7526_v59 = vld [vmem:[%s7989_s18 + $0x360] sm:$0xff] }
  0x42   : > { %4517 = vmatpush.bf16.msrb.mxu2 %v7469_v60  ;;  %v7534_v60 = vld [vmem:[%s7989_s18 + $0x3a0] sm:$0xff] }
  0x43   : > { %4530 = vmatpush.bf16.msrb.mxu3 %v7477_v61  ;;  %v7542_v61 = vld [vmem:[%s7989_s18 + $0x3e0] sm:$0xff] }
  0x44   : > { %4492 = vmatpush.bf16.msrb.mxu0 %v7452_v62  ;;  %v7517_v62 = vld [vmem:[%s7989_s18 + $0x318] sm:$0xff] }
  0x45   : > { %4505 = vmatpush.bf16.msrb.mxu1 %v7460_v63  ;;  %v7525_v63 = vld [vmem:[%s7989_s18 + $0x358] sm:$0xff] }
  0x46   : > { %4518 = vmatpush.bf16.msrb.mxu2 %v7468_v0  ;;  %v7533_v0 = vld [vmem:[%s7989_s18 + $0x398] sm:$0xff] }
  0x47   : > { %4531 = vmatpush.bf16.msrb.mxu3 %v7476_v1  ;;  %v7541_v1 = vld [vmem:[%s7989_s18 + $0x3d8] sm:$0xff] }
  0x48   : > { %4493 = vmatpush.bf16.msrb.mxu0 %v7451_v2  ;;  %v7516_v2 = vld [vmem:[%s7989_s18 + $0x310] sm:$0xff] }
  0x49   : > { %4506 = vmatpush.bf16.msrb.mxu1 %v7459_v3  ;;  %v7524_v3 = vld [vmem:[%s7989_s18 + $0x350] sm:$0xff] }
  0x4a   : > { %4519 = vmatpush.bf16.msrb.mxu2 %v7467_v4  ;;  %v7532_v4 = vld [vmem:[%s7989_s18 + $0x390] sm:$0xff] }
  0x4b   : > { %4532 = vmatpush.bf16.msrb.mxu3 %v7475_v5  ;;  %v7540_v5 = vld [vmem:[%s7989_s18 + $0x3d0] sm:$0xff] }
  0x4c   : > { %4494 = vmatpush.bf16.msrb.mxu0 %v7450_v6  ;;  %v7515_v6 = vld [vmem:[%s7989_s18 + $0x308] sm:$0xff] }
  0x4d   : > { %4507 = vmatpush.bf16.msrb.mxu1 %v7458_v7  ;;  %v7523_v7 = vld [vmem:[%s7989_s18 + $0x348] sm:$0xff] }
  0x4e   : > { %4520 = vmatpush.bf16.msrb.mxu2 %v7466_v8  ;;  %v7531_v8 = vld [vmem:[%s7989_s18 + $0x388] sm:$0xff] }
  0x4f   : > { %4533 = vmatpush.bf16.msrb.mxu3 %v7474_v9  ;;  %4495 = vmatmul.bf16.vlgmr.msrb.gmra.mxu0 %v8040_v50  ;;  %v7520_v50 = vld [vmem:[%s7989_s18 + $0x330] sm:$0xff]  ;;  %v7539_v9 = vld [vmem:[%s7989_s18 + $0x3c8] sm:$0xff] }
  0x50   : > { %4539 = vmatpush.bf16.msra.mxu0 %v7489_v10  ;;  %4508 = vmatmul.bf16.vlgmr.msrb.gmra.mxu1 %v8047_v53  ;;  %v7544_v53 = vld [vmem:[%s7989_s18 + $0x3f0] sm:$0xff]  ;;  %v1235_v10 = vld [vmem:[#allocation1 + $0x24] sm:$0xff] }
  0x51   : > { %4552 = vmatpush.bf16.msra.mxu1 %v7497_v11  ;;  %4521 = vmatmul.bf16.vlgmr.msrb.gmra.mxu2 %v8038_v49  ;;  %v1234_v49 = vld [vmem:[#allocation1 + $0x1b] sm:$0xff] }
  0x52   : > { %4565 = vmatpush.bf16.msra.mxu2 %v7505_v12  ;;  %4534 = vmatmul.bf16.vlgmr.msrb.gmra.mxu3 %v8042_v51  ;;  %v7528_v51 = vld [vmem:[%s7989_s18 + $0x370] sm:$0xff] }
  0x53   : > { %4578 = vmatpush.bf16.msra.mxu3 %v7513_v13  ;;  %v1237_v11 = vld [vmem:[#allocation1 + $0x36] sm:$0xff]  ;;  %v1236_v12 = vld [vmem:[#allocation1 + $0x2d] sm:$0xff]  ;;  %v1238_v13 = vld [vmem:[#allocation1 + $0x3f] sm:$0xff] }
  0x54   : > { %4540 = vmatpush.bf16.msra.mxu0 %v7488_v14  ;;  %v185_v14 = vld [vmem:[%s8576_s0 + $0x10] sm:$0xff] }
  0x55   : > { %4553 = vmatpush.bf16.msra.mxu1 %v7496_v15  ;;  %1240 = vst [vmem:[#allocation1] ss:$9 sm:$0xff] %v185_v14  ;;  %v7514_v15 = vld [vmem:[%s7989_s18 + $0x300] sm:$0xff]  ;;  %v7597_v14 = vld [vmem:[%s7989_s18 + $0x598] sm:$0xff] }
  0x56   : > { %4566 = vmatpush.bf16.msra.mxu2 %v7504_v16  ;;  %v7522_v16 = vld [vmem:[%s7989_s18 + $0x340] sm:$0xff] }
  0x57   : > { %4579 = vmatpush.bf16.msra.mxu3 %v7512_v17  ;;  %v7530_v17 = vld [vmem:[%s7989_s18 + $0x380] sm:$0xff] }
  0x58   : > { %4541 = vmatpush.bf16.msra.mxu0 %v7487_v18  ;;  %v7538_v18 = vld [vmem:[%s7989_s18 + $0x3c0] sm:$0xff] }
  0x59   : > { %4554 = vmatpush.bf16.msra.mxu1 %v7495_v19  ;;  %v7553_v19 = vld [vmem:[%s7989_s18 + $0x438] sm:$0xff] }
  0x5a   : > { %4567 = vmatpush.bf16.msra.mxu2 %v7503_v20  ;;  %v7561_v20 = vld [vmem:[%s7989_s18 + $0x478] sm:$0xff] }
  0x5b   : > { %4580 = vmatpush.bf16.msra.mxu3 %v7511_v21  ;;  %v7569_v21 = vld [vmem:[%s7989_s18 + $0x4b8] sm:$0xff] }
  0x5c   : > { %4542 = vmatpush.bf16.msra.mxu0 %v7486_v22  ;;  %v7577_v22 = vld [vmem:[%s7989_s18 + $0x4f8] sm:$0xff] }
  0x5d   : > { %4555 = vmatpush.bf16.msra.mxu1 %v7494_v23  ;;  %v7552_v23 = vld [vmem:[%s7989_s18 + $0x430] sm:$0xff] }
  0x5e   : > { %4568 = vmatpush.bf16.msra.mxu2 %v7502_v24  ;;  %v7560_v24 = vld [vmem:[%s7989_s18 + $0x470] sm:$0xff] }
  0x5f   : > { %4581 = vmatpush.bf16.msra.mxu3 %v7510_v25  ;;  %v7568_v25 = vld [vmem:[%s7989_s18 + $0x4b0] sm:$0xff] }
  0x60   : > { %4543 = vmatpush.bf16.msra.mxu0 %v7485_v26  ;;  %v7576_v26 = vld [vmem:[%s7989_s18 + $0x4f0] sm:$0xff] }
  0x61   : > { %4556 = vmatpush.bf16.msra.mxu1 %v7493_v27  ;;  %v7551_v27 = vld [vmem:[%s7989_s18 + $0x428] sm:$0xff] }
  0x62   : > { %4569 = vmatpush.bf16.msra.mxu2 %v7501_v28  ;;  %v7559_v28 = vld [vmem:[%s7989_s18 + $0x468] sm:$0xff] }
  0x63   : > { %4582 = vmatpush.bf16.msra.mxu3 %v7509_v29  ;;  %v7567_v29 = vld [vmem:[%s7989_s18 + $0x4a8] sm:$0xff] }
  0x64   : > { %4544 = vmatpush.bf16.msra.mxu0 %v7484_v30  ;;  %v7575_v30 = vld [vmem:[%s7989_s18 + $0x4e8] sm:$0xff] }
  0x65   : > { %4557 = vmatpush.bf16.msra.mxu1 %v7492_v31  ;;  %v7550_v31 = vld [vmem:[%s7989_s18 + $0x420] sm:$0xff] }
  0x66   : > { %4570 = vmatpush.bf16.msra.mxu2 %v7500_v32  ;;  %v7558_v32 = vld [vmem:[%s7989_s18 + $0x460] sm:$0xff] }
  0x67   : > { %4583 = vmatpush.bf16.msra.mxu3 %v7508_v33  ;;  %v7566_v33 = vld [vmem:[%s7989_s18 + $0x4a0] sm:$0xff] }
  0x68   : > { %4545 = vmatpush.bf16.msra.mxu0 %v7483_v34  ;;  %v7574_v34 = vld [vmem:[%s7989_s18 + $0x4e0] sm:$0xff] }
  0x69   : > { %4558 = vmatpush.bf16.msra.mxu1 %v7491_v35  ;;  %v7549_v35 = vld [vmem:[%s7989_s18 + $0x418] sm:$0xff] }
  0x6a   : > { %4571 = vmatpush.bf16.msra.mxu2 %v7499_v36  ;;  %v7557_v36 = vld [vmem:[%s7989_s18 + $0x458] sm:$0xff] }
  0x6b   : > { %4584 = vmatpush.bf16.msra.mxu3 %v7507_v37  ;;  %v7565_v37 = vld [vmem:[%s7989_s18 + $0x498] sm:$0xff] }
  0x6c   : > { %4546 = vmatpush.bf16.msra.mxu0 %v7482_v38  ;;  %v7573_v38 = vld [vmem:[%s7989_s18 + $0x4d8] sm:$0xff] }
  0x6d   : > { %4559 = vmatpush.bf16.msra.mxu1 %v7490_v39  ;;  %v7548_v39 = vld [vmem:[%s7989_s18 + $0x410] sm:$0xff] }
  0x6e   : > { %4572 = vmatpush.bf16.msra.mxu2 %v7498_v40  ;;  %v7556_v40 = vld [vmem:[%s7989_s18 + $0x450] sm:$0xff] }
  0x6f   : > { %4585 = vmatpush.bf16.msra.mxu3 %v7506_v41  ;;  %4547 = vmatmul.bf16.vlgmr.msra.gmra.mxu0 %v1231_v46  ;;  %v7564_v41 = vld [vmem:[%s7989_s18 + $0x490] sm:$0xff]  ;;  %v7571_v46 = vld [vmem:[%s7989_s18 + $0x4c8] sm:$0xff] }
  0x70   : > { %4591 = vmatpush.bf16.msrb.mxu0 %v7521_v42  ;;  %4560 = vmatmul.bf16.vlgmr.msra.gmra.mxu1 %v1232_v48  ;;  %v7572_v42 = vld [vmem:[%s7989_s18 + $0x4d0] sm:$0xff]  ;;  %v7554_v48 = vld [vmem:[%s7989_s18 + $0x440] sm:$0xff] }
  0x71   : > { %4604 = vmatpush.bf16.msrb.mxu1 %v7529_v43  ;;  %4573 = vmatmul.bf16.vlgmr.msra.gmra.mxu2 %v1233_v47  ;;  %v7547_v43 = vld [vmem:[%s7989_s18 + $0x408] sm:$0xff]  ;;  %v7546_v47 = vld [vmem:[%s7989_s18 + $0x400] sm:$0xff] }
  0x72   : > { %4617 = vmatpush.bf16.msrb.mxu2 %v7537_v44  ;;  %4586 = vmatmul.bf16.vlgmr.msra.gmra.mxu3 %v1234_v49  ;;  %v7555_v44 = vld [vmem:[%s7989_s18 + $0x448] sm:$0xff]  ;;  %v7562_v49 = vld [vmem:[%s7989_s18 + $0x480] sm:$0xff] }
  0x73   : > { %4630 = vmatpush.bf16.msrb.mxu3 %v7545_v45  ;;  %v7563_v45 = vld [vmem:[%s7989_s18 + $0x488] sm:$0xff] }
  0x74   : > { %4592 = vmatpush.bf16.msrb.mxu0 %v7520_v50  ;;  %v7570_v50 = vld [vmem:[%s7989_s18 + $0x4c0] sm:$0xff] }
  0x75   : > { %4605 = vmatpush.bf16.msrb.mxu1 %v7528_v51  ;;  %v7585_v51 = vld [vmem:[%s7989_s18 + $0x538] sm:$0xff] }
  0x76   : > { %4618 = vmatpush.bf16.msrb.mxu2 %v7536_v52  ;;  %v7593_v52 = vld [vmem:[%s7989_s18 + $0x578] sm:$0xff] }
  0x77   : > { %4631 = vmatpush.bf16.msrb.mxu3 %v7544_v53  ;;  %v7601_v53 = vld [vmem:[%s7989_s18 + $0x5b8] sm:$0xff] }
  0x78   : > { %4593 = vmatpush.bf16.msrb.mxu0 %v7519_v54  ;;  %v7609_v54 = vld [vmem:[%s7989_s18 + $0x5f8] sm:$0xff] }
  0x79   : > { %4606 = vmatpush.bf16.msrb.mxu1 %v7527_v55  ;;  %v1241_v55 = vld [vmem:[#allocation1] sm:$0xff] }
  0x7a   : > { %4619 = vmatpush.bf16.msrb.mxu2 %v7535_v56  ;;  %v1243_v56 = vld [vmem:[#allocation1 + $0x12] sm:$0xff] }
  0x7b   : > { %4632 = vmatpush.bf16.msrb.mxu3 %v7543_v57  ;;  %v1242_v57 = vld [vmem:[#allocation1 + $0x9] sm:$0xff] }
  0x7c   : > { %4594 = vmatpush.bf16.msrb.mxu0 %v7518_v58  ;;  %v1244_v58 = vld [vmem:[#allocation1 + $0x1b] sm:$0xff] }
  0x7d   : > { %4607 = vmatpush.bf16.msrb.mxu1 %v7526_v59  ;;  %v7584_v59 = vld [vmem:[%s7989_s18 + $0x530] sm:$0xff] }
  0x7e   : > { %4620 = vmatpush.bf16.msrb.mxu2 %v7534_v60  ;;  %v7592_v60 = vld [vmem:[%s7989_s18 + $0x570] sm:$0xff] }
  0x7f   : > { %4633 = vmatpush.bf16.msrb.mxu3 %v7542_v61  ;;  %v7600_v61 = vld [vmem:[%s7989_s18 + $0x5b0] sm:$0xff] }
  0x80   : > { %4595 = vmatpush.bf16.msrb.mxu0 %v7517_v62  ;;  %v7608_v62 = vld [vmem:[%s7989_s18 + $0x5f0] sm:$0xff] }
  0x81   : > { %4608 = vmatpush.bf16.msrb.mxu1 %v7525_v63  ;;  %v7583_v63 = vld [vmem:[%s7989_s18 + $0x528] sm:$0xff] }
  0x82   : > { %4621 = vmatpush.bf16.msrb.mxu2 %v7533_v0  ;;  %v7591_v0 = vld [vmem:[%s7989_s18 + $0x568] sm:$0xff] }
  0x83   : > { %4634 = vmatpush.bf16.msrb.mxu3 %v7541_v1  ;;  %v7938_v1 = vld [vmem:[%s178_s25] ss:$0 sm:$0xff] }
  0x84   : > { %4596 = vmatpush.bf16.msrb.mxu0 %v7516_v2  ;;  %v7599_v2 = vld [vmem:[%s7989_s18 + $0x5a8] sm:$0xff] }
  0x85   : > { %4609 = vmatpush.bf16.msrb.mxu1 %v7524_v3  ;;  %v7607_v3 = vld [vmem:[%s7989_s18 + $0x5e8] sm:$0xff] }
  0x86   : > { %4622 = vmatpush.bf16.msrb.mxu2 %v7532_v4 }
  0x87   : > { %4635 = vmatpush.bf16.msrb.mxu3 %v7540_v5  ;;  %v7582_v5 = vld [vmem:[%s7989_s18 + $0x520] sm:$0xff] }
  0x88   : > { %4597 = vmatpush.bf16.msrb.mxu0 %v7515_v6  ;;  %v7590_v6 = vld [vmem:[%s7989_s18 + $0x560] sm:$0xff] }
  0x89   : > { %4610 = vmatpush.bf16.msrb.mxu1 %v7523_v7 }
  0x8a   : > { %4623 = vmatpush.bf16.msrb.mxu2 %v7531_v8 }
  0x8b   : > { %4636 = vmatpush.bf16.msrb.mxu3 %v7539_v9  ;;  %v7598_v9 = vld [vmem:[%s7989_s18 + $0x5a0] sm:$0xff] }
  0x8c   : > { %4598 = vmatpush.bf16.msrb.mxu0 %v7514_v15  ;;  %v7605_v15 = vld [vmem:[%s7989_s18 + $0x5d8] sm:$0xff] }
  0x8d   : > { %4611 = vmatpush.bf16.msrb.mxu1 %v7522_v16 }
  0x8e   : > { %4624 = vmatpush.bf16.msrb.mxu2 %v7530_v17 }
  0x8f   : > { %4637 = vmatpush.bf16.msrb.mxu3 %v7538_v18  ;;  %4599 = vmatmul.bf16.vlgmr.msrb.gmra.mxu0 %v1235_v10  ;;  %v7606_v10 = vld [vmem:[%s7989_s18 + $0x5e0] sm:$0xff] }
  0x90   : > { %4643 = vmatpush.bf16.msra.mxu0 %v7553_v19  ;;  %4612 = vmatmul.bf16.vlgmr.msrb.gmra.mxu1 %v1236_v12  ;;  %v7581_v12 = vld [vmem:[%s7989_s18 + $0x518] sm:$0xff] }
  0x91   : > { %4656 = vmatpush.bf16.msra.mxu1 %v7561_v20  ;;  %4625 = vmatmul.bf16.vlgmr.msrb.gmra.mxu2 %v1237_v11  ;;  %v7580_v20 = vld [vmem:[%s7989_s18 + $0x510] sm:$0xff] }
  0x92   : > { %4669 = vmatpush.bf16.msra.mxu2 %v7569_v21  ;;  %4638 = vmatmul.bf16.vlgmr.msrb.gmra.mxu3 %v1238_v13  ;;  %v7589_v13 = vld [vmem:[%s7989_s18 + $0x558] sm:$0xff]  ;;  %v7588_v21 = vld [vmem:[%s7989_s18 + $0x550] sm:$0xff] }
  0x93   : > { %4682 = vmatpush.bf16.msra.mxu3 %v7577_v22 }
  0x94   : > { %4644 = vmatpush.bf16.msra.mxu0 %v7552_v23 }
  0x95   : > { %4657 = vmatpush.bf16.msra.mxu1 %v7560_v24  ;;  %v7596_v24 = vld [vmem:[%s7989_s18 + $0x590] sm:$0xff] }
  0x96   : > { %4670 = vmatpush.bf16.msra.mxu2 %v7568_v25  ;;  %v7604_v25 = vld [vmem:[%s7989_s18 + $0x5d0] sm:$0xff] }
  0x97   : > { %4683 = vmatpush.bf16.msra.mxu3 %v7576_v26  ;;  %v7579_v26 = vld [vmem:[%s7989_s18 + $0x508] sm:$0xff] }
  0x98   : > { %4645 = vmatpush.bf16.msra.mxu0 %v7551_v27  ;;  %v7587_v27 = vld [vmem:[%s7989_s18 + $0x548] sm:$0xff] }
  0x99   : > { %4658 = vmatpush.bf16.msra.mxu1 %v7559_v28  ;;  %v7595_v28 = vld [vmem:[%s7989_s18 + $0x588] sm:$0xff] }
  0x9a   : > { %4671 = vmatpush.bf16.msra.mxu2 %v7567_v29  ;;  %v7603_v29 = vld [vmem:[%s7989_s18 + $0x5c8] sm:$0xff] }
  0x9b   : > { %4684 = vmatpush.bf16.msra.mxu3 %v7575_v30  ;;  %v1245_v30 = vld [vmem:[#allocation1 + $0x24] sm:$0xff] }
  0x9c   : > { %4646 = vmatpush.bf16.msra.mxu0 %v7550_v31  ;;  %v1247_v31 = vld [vmem:[#allocation1 + $0x36] sm:$0xff] }
  0x9d   : > { %4659 = vmatpush.bf16.msra.mxu1 %v7558_v32 }
  0x9e   : > { %4672 = vmatpush.bf16.msra.mxu2 %v7566_v33  ;;  %v1246_v33 = vld [vmem:[#allocation1 + $0x2d] sm:$0xff] }
  0x9f   : > { %4685 = vmatpush.bf16.msra.mxu3 %v7574_v34  ;;  %v1248_v34 = vld [vmem:[#allocation1 + $0x3f] sm:$0xff] }
  0xa0   : > { %4647 = vmatpush.bf16.msra.mxu0 %v7549_v35 }
  0xa1   : > { %4660 = vmatpush.bf16.msra.mxu1 %v7557_v36  ;;  %v186_v36 = vld [vmem:[%s8576_s0 + $0x18] sm:$0xff] }
  0xa2   : > { %4673 = vmatpush.bf16.msra.mxu2 %v7565_v37  ;;  %1250 = vst [vmem:[#allocation1] ss:$9 sm:$0xff] %v186_v36  ;;  %v7578_v37 = vld [vmem:[%s7989_s18 + $0x500] sm:$0xff]  ;;  %v7671_v36 = vld [vmem:[%s7989_s18 + $0x7e8] sm:$0xff] }
  0xa3   : > { %4686 = vmatpush.bf16.msra.mxu3 %v7573_v38  ;;  %v7586_v38 = vld [vmem:[%s7989_s18 + $0x540] sm:$0xff] }
  0xa4   : > { %4648 = vmatpush.bf16.msra.mxu0 %v7548_v39  ;;  %v7594_v39 = vld [vmem:[%s7989_s18 + $0x580] sm:$0xff] }
  0xa5   : > { %4661 = vmatpush.bf16.msra.mxu1 %v7556_v40  ;;  %v7602_v40 = vld [vmem:[%s7989_s18 + $0x5c0] sm:$0xff] }
  0xa6   : > { %4674 = vmatpush.bf16.msra.mxu2 %v7564_v41  ;;  %v7617_v41 = vld [vmem:[%s7989_s18 + $0x638] sm:$0xff] }
  0xa7   : > { %4687 = vmatpush.bf16.msra.mxu3 %v7572_v42  ;;  %v7625_v42 = vld [vmem:[%s7989_s18 + $0x678] sm:$0xff] }
  0xa8   : > { %4649 = vmatpush.bf16.msra.mxu0 %v7547_v43  ;;  %v7633_v43 = vld [vmem:[%s7989_s18 + $0x6b8] sm:$0xff] }
  0xa9   : > { %4662 = vmatpush.bf16.msra.mxu1 %v7555_v44  ;;  %v7641_v44 = vld [vmem:[%s7989_s18 + $0x6f8] sm:$0xff] }
  0xaa   : > { %4675 = vmatpush.bf16.msra.mxu2 %v7563_v45  ;;  %v7616_v45 = vld [vmem:[%s7989_s18 + $0x630] sm:$0xff] }
  0xab   : > { %4688 = vmatpush.bf16.msra.mxu3 %v7571_v46  ;;  %v7624_v46 = vld [vmem:[%s7989_s18 + $0x670] sm:$0xff] }
  0xac   : > { %4650 = vmatpush.bf16.msra.mxu0 %v7546_v47  ;;  %v4444_v4 = vpop.f32.mrf.mxu0  ;;  %v7632_v47 = vld [vmem:[%s7989_s18 + $0x6b0] sm:$0xff] }
  0xad   : > { %4663 = vmatpush.bf16.msra.mxu1 %v7554_v48  ;;  %v4445_v7 = vadd.f32 %v7938_v1, %v4444_v4  ;;  %v4457_v8 = vpop.f32.mrf.mxu1  ;;  %v7640_v48 = vld [vmem:[%s7989_s18 + $0x6f0] sm:$0xff] }
  0xae   : > { %4676 = vmatpush.bf16.msra.mxu2 %v7562_v49  ;;  %v7615_v49 = vld [vmem:[%s7989_s18 + $0x628] sm:$0xff] }
  0xaf   : > { %4689 = vmatpush.bf16.msra.mxu3 %v7570_v50  ;;  %4651 = vmatmul.bf16.vlgmr.msra.gmra.mxu0 %v1241_v55  ;;  %v4458_v11 = vadd.f32 %v4457_v8, %v4445_v7  ;;  %v7623_v50 = vld [vmem:[%s7989_s18 + $0x668] sm:$0xff]  ;;  %v7622_v55 = vld [vmem:[%s7989_s18 + $0x660] sm:$0xff] }
  0xb0   : > { %4695 = vmatpush.bf16.msrb.mxu0 %v7585_v51  ;;  %4664 = vmatmul.bf16.vlgmr.msra.gmra.mxu1 %v1242_v57  ;;  %v7631_v51 = vld [vmem:[%s7989_s18 + $0x6a8] sm:$0xff] }
  0xb1   : > { %4708 = vmatpush.bf16.msrb.mxu1 %v7593_v52  ;;  %4677 = vmatmul.bf16.vlgmr.msra.gmra.mxu2 %v1243_v56  ;;  %v7639_v52 = vld [vmem:[%s7989_s18 + $0x6e8] sm:$0xff] }
  0xb2   : > { %4721 = vmatpush.bf16.msrb.mxu2 %v7601_v53  ;;  %4690 = vmatmul.bf16.vlgmr.msra.gmra.mxu3 %v1244_v58  ;;  %v7630_v58 = vld [vmem:[%s7989_s18 + $0x6a0] sm:$0xff] }
  0xb3   : > { %4734 = vmatpush.bf16.msrb.mxu3 %v7609_v54  ;;  %v7614_v54 = vld [vmem:[%s7989_s18 + $0x620] sm:$0xff] }
  0xb4   : > { %4696 = vmatpush.bf16.msrb.mxu0 %v7584_v59  ;;  %v4470_v16 = vpop.f32.mrf.mxu2  ;;  %v4446_v19 = vpop.f32.mrf.mxu0  ;;  %v7638_v59 = vld [vmem:[%s7989_s18 + $0x6e0] sm:$0xff] }
  0xb5   : > { %4709 = vmatpush.bf16.msrb.mxu1 %v7592_v60  ;;  %v4471_v17 = vadd.f32 %v4470_v16, %v4458_v11  ;;  %v4483_v18 = vpop.f32.mrf.mxu3  ;;  %v4459_v23 = vpop.f32.mrf.mxu1  ;;  %v7611_v11 = vld [vmem:[%s7989_s18 + $0x608] sm:$0xff]  ;;  %v7626_v19 = vld [vmem:[%s7989_s18 + $0x680] sm:$0xff] }
  0xb6   : > { %4722 = vmatpush.bf16.msrb.mxu2 %v7600_v61  ;;  %v7613_v61 = vld [vmem:[%s7989_s18 + $0x618] sm:$0xff] }
  0xb7   : > { %4735 = vmatpush.bf16.msrb.mxu3 %v7608_v62  ;;  %v8209_v22 = vadd.f32 %v4483_v18, %v4471_v17  ;;  %v7621_v62 = vld [vmem:[%s7989_s18 + $0x658] sm:$0xff]  ;;  %v7610_v17 = vld [vmem:[%s7989_s18 + $0x600] sm:$0xff] }
  0xb8   : > { %4697 = vmatpush.bf16.msrb.mxu0 %v7583_v63  ;;  %v7629_v63 = vld [vmem:[%s7989_s18 + $0x698] sm:$0xff]  ;;  %v7618_v18 = vld [vmem:[%s7989_s18 + $0x640] sm:$0xff] }
  0xb9   : > { %4710 = vmatpush.bf16.msrb.mxu1 %v7591_v0  ;;  %v7637_v0 = vld [vmem:[%s7989_s18 + $0x6d8] sm:$0xff] }
  0xba   : > { %4723 = vmatpush.bf16.msrb.mxu2 %v7599_v2  ;;  %v7665_v23 = vld [vmem:[%s7989_s18 + $0x7b8] sm:$0xff] }
  0xbb   : > { %4736 = vmatpush.bf16.msrb.mxu3 %v7607_v3 }
  0xbc   : > { %4698 = vmatpush.bf16.msrb.mxu0 %v7582_v5  ;;  %v4472_v32 = vpop.f32.mrf.mxu2  ;;  %v7612_v5 = vld [vmem:[%s7989_s18 + $0x610] sm:$0xff] }
  0xbd   : > { %4711 = vmatpush.bf16.msrb.mxu1 %v7590_v6  ;;  %v4485_v35 = vpop.f32.mrf.mxu3  ;;  %v7620_v6 = vld [vmem:[%s7989_s18 + $0x650] sm:$0xff] }
  0xbe   : > { %4724 = vmatpush.bf16.msrb.mxu2 %v7598_v9  ;;  %v7628_v9 = vld [vmem:[%s7989_s18 + $0x690] sm:$0xff]  ;;  %v7663_v35 = vld [vmem:[%s7989_s18 + $0x7a8] sm:$0xff] }
  0xbf   : > { %4737 = vmatpush.bf16.msrb.mxu3 %v7606_v10  ;;  %v7636_v10 = vld [vmem:[%s7989_s18 + $0x6d0] sm:$0xff] }
  0xc0   : > { %4699 = vmatpush.bf16.msrb.mxu0 %v7581_v12  ;;  %v7619_v12 = vld [vmem:[%s7989_s18 + $0x648] sm:$0xff]  ;;  %v7672_v32 = vld [vmem:[%s7989_s18 + $0x7f0] sm:$0xff] }
  0xc1   : > { %4712 = vmatpush.bf16.msrb.mxu1 %v7589_v13  ;;  %v7627_v13 = vld [vmem:[%s7989_s18 + $0x688] sm:$0xff] }
  0xc2   : > { %4725 = vmatpush.bf16.msrb.mxu2 %v7597_v14  ;;  %v7635_v14 = vld [vmem:[%s7989_s18 + $0x6c8] sm:$0xff] }
  0xc3   : > { %4738 = vmatpush.bf16.msrb.mxu3 %v7605_v15 }
  0xc4   : > { %4700 = vmatpush.bf16.msrb.mxu0 %v7580_v20  ;;  %v7634_v20 = vld [vmem:[%s7989_s18 + $0x6c0] sm:$0xff] }
  0xc5   : > { %4713 = vmatpush.bf16.msrb.mxu1 %v7588_v21  ;;  %v7649_v21 = vld [vmem:[%s7989_s18 + $0x738] sm:$0xff] }
  0xc6   : > { %4726 = vmatpush.bf16.msrb.mxu2 %v7596_v24  ;;  %v7673_v24 = vld [vmem:[%s7989_s18 + $0x7f8] sm:$0xff] }
  0xc7   : > { %4739 = vmatpush.bf16.msrb.mxu3 %v7604_v25  ;;  %v1251_v25 = vld [vmem:[#allocation1] sm:$0xff] }
  0xc8   : > { %4701 = vmatpush.bf16.msrb.mxu0 %v7579_v26  ;;  %v1253_v26 = vld [vmem:[#allocation1 + $0x12] sm:$0xff] }
  0xc9   : > { %4714 = vmatpush.bf16.msrb.mxu1 %v7587_v27  ;;  %v1252_v27 = vld [vmem:[#allocation1 + $0x9] sm:$0xff] }
  0xca   : > { %4727 = vmatpush.bf16.msrb.mxu2 %v7595_v28  ;;  %v1254_v28 = vld [vmem:[#allocation1 + $0x1b] sm:$0xff] }
  0xcb   : > { %4740 = vmatpush.bf16.msrb.mxu3 %v7603_v29  ;;  %v7648_v29 = vld [vmem:[%s7989_s18 + $0x730] sm:$0xff] }
  0xcc   : > { %4702 = vmatpush.bf16.msrb.mxu0 %v7578_v37  ;;  %v4496_v53 = vpop.f32.mrf.mxu0 }
  0xcd   : > { %4715 = vmatpush.bf16.msrb.mxu1 %v7586_v38  ;;  %v4497_v56 = vadd.f32 %v4496_v53, %v8209_v22  ;;  %v4509_v57 = vpop.f32.mrf.mxu1  ;;  %v7657_v22 = vld [vmem:[%s7989_s18 + $0x778] sm:$0xff] }
  0xce   : > { %4728 = vmatpush.bf16.msrb.mxu2 %v7594_v39  ;;  %v7646_v39 = vld [vmem:[%s7989_s18 + $0x720] sm:$0xff] }
  0xcf   : > { %4741 = vmatpush.bf16.msrb.mxu3 %v7602_v40  ;;  %4703 = vmatmul.bf16.vlgmr.msrb.gmra.mxu0 %v1245_v30  ;;  %v4510_v60 = vadd.f32 %v4509_v57, %v4497_v56  ;;  %v7656_v30 = vld [vmem:[%s7989_s18 + $0x770] sm:$0xff]  ;;  %v7654_v40 = vld [vmem:[%s7989_s18 + $0x760] sm:$0xff] }
  0xd0   : > { %4747 = vmatpush.bf16.msra.mxu0 %v7617_v41  ;;  %4716 = vmatmul.bf16.vlgmr.msrb.gmra.mxu1 %v1246_v33  ;;  %v7647_v33 = vld [vmem:[%s7989_s18 + $0x728] sm:$0xff]  ;;  %v7660_v57 = vld [vmem:[%s7989_s18 + $0x790] sm:$0xff] }
  0xd1   : > { %4760 = vmatpush.bf16.msra.mxu1 %v7625_v42  ;;  %4729 = vmatmul.bf16.vlgmr.msrb.gmra.mxu2 %v1247_v31  ;;  %v7664_v31 = vld [vmem:[%s7989_s18 + $0x7b0] sm:$0xff]  ;;  %v7662_v42 = vld [vmem:[%s7989_s18 + $0x7a0] sm:$0xff] }
  0xd2   : > { %4773 = vmatpush.bf16.msra.mxu2 %v7633_v43  ;;  %4742 = vmatmul.bf16.vlgmr.msrb.gmra.mxu3 %v1248_v34  ;;  %v7655_v34 = vld [vmem:[%s7989_s18 + $0x768] sm:$0xff]  ;;  %v7670_v43 = vld [vmem:[%s7989_s18 + $0x7e0] sm:$0xff] }
  0xd3   : > { %4786 = vmatpush.bf16.msra.mxu3 %v7641_v44 }
  0xd4   : > { %4748 = vmatpush.bf16.msra.mxu0 %v7616_v45  ;;  %v4522_v1 = vpop.f32.mrf.mxu2  ;;  %v4498_v4 = vpop.f32.mrf.mxu0  ;;  %v7645_v45 = vld [vmem:[%s7989_s18 + $0x718] sm:$0xff] }
  0xd5   : > { %4761 = vmatpush.bf16.msra.mxu1 %v7624_v46  ;;  %v4523_v2 = vadd.f32 %v4522_v1, %v4510_v60  ;;  %v4535_v3 = vpop.f32.mrf.mxu3  ;;  %v4511_v8 = vpop.f32.mrf.mxu1  ;;  %v7653_v46 = vld [vmem:[%s7989_s18 + $0x758] sm:$0xff]  ;;  %v7651_v60 = vld [vmem:[%s7989_s18 + $0x748] sm:$0xff] }
  0xd6   : > { %4774 = vmatpush.bf16.msra.mxu2 %v7632_v47  ;;  %v7661_v47 = vld [vmem:[%s7989_s18 + $0x798] sm:$0xff]  ;;  %v7658_v8 = vld [vmem:[%s7989_s18 + $0x780] sm:$0xff] }
  0xd7   : > { %4787 = vmatpush.bf16.msra.mxu3 %v7640_v48  ;;  %v4536_v7 = vadd.f32 %v4535_v3, %v4523_v2  ;;  %v7669_v48 = vld [vmem:[%s7989_s18 + $0x7d8] sm:$0xff]  ;;  %v1256_v2 = vld [vmem:[#allocation1 + $0x2d] sm:$0xff] }
  0xd8   : > { %4749 = vmatpush.bf16.msra.mxu0 %v7615_v49  ;;  %v1258_v3 = vld [vmem:[#allocation1 + $0x3f] sm:$0xff] }
  0xd9   : > { %4762 = vmatpush.bf16.msra.mxu1 %v7623_v50 }
  0xda   : > { %4775 = vmatpush.bf16.msra.mxu2 %v7631_v51 }
  0xdb   : > { %4788 = vmatpush.bf16.msra.mxu3 %v7639_v52 }
  0xdc   : > { %4750 = vmatpush.bf16.msra.mxu0 %v7614_v54  ;;  %v4524_v15 = vpop.f32.mrf.mxu2  ;;  %v7644_v54 = vld [vmem:[%s7989_s18 + $0x710] sm:$0xff] }
  0xdd   : > { %4763 = vmatpush.bf16.msra.mxu1 %v7622_v55  ;;  %v4537_v16 = vpop.f32.mrf.mxu3  ;;  %v7652_v55 = vld [vmem:[%s7989_s18 + $0x750] sm:$0xff] }
  0xde   : > { %4776 = vmatpush.bf16.msra.mxu2 %v7630_v58  ;;  %v7668_v58 = vld [vmem:[%s7989_s18 + $0x7d0] sm:$0xff] }
  0xdf   : > { %4789 = vmatpush.bf16.msra.mxu3 %v7638_v59  ;;  %v7643_v59 = vld [vmem:[%s7989_s18 + $0x708] sm:$0xff]  ;;  %v7688_v15 = vld [vmem:[%s7989_s18 + $0x870] sm:$0xff] }
  0xe0   : > { %4751 = vmatpush.bf16.msra.mxu0 %v7613_v61  ;;  %v7659_v61 = vld [vmem:[%s7989_s18 + $0x788] sm:$0xff]  ;;  %v7696_v16 = vld [vmem:[%s7989_s18 + $0x8b0] sm:$0xff] }
  0xe1   : > { %4764 = vmatpush.bf16.msra.mxu1 %v7621_v62  ;;  %v7667_v62 = vld [vmem:[%s7989_s18 + $0x7c8] sm:$0xff] }
  0xe2   : > { %4777 = vmatpush.bf16.msra.mxu2 %v7629_v63  ;;  %v1255_v63 = vld [vmem:[#allocation1 + $0x24] sm:$0xff] }
  0xe3   : > { %4790 = vmatpush.bf16.msra.mxu3 %v7637_v0  ;;  %v1257_v0 = vld [vmem:[#allocation1 + $0x36] sm:$0xff] }
  0xe4   : > { %4752 = vmatpush.bf16.msra.mxu0 %v7612_v5  ;;  %v187_v5 = vld [vmem:[%s8576_s0 + $0x20] sm:$0xff] }
  0xe5   : > { %4765 = vmatpush.bf16.msra.mxu1 %v7620_v6  ;;  %1260 = vst [vmem:[#allocation1] ss:$9 sm:$0xff] %v187_v5  ;;  %v7642_v6 = vld [vmem:[%s7989_s18 + $0x700] sm:$0xff]  ;;  %v7735_v5 = vld [vmem:[%s7989_s18 + $0x9e8] sm:$0xff] }
  0xe6   : > { %4778 = vmatpush.bf16.msra.mxu2 %v7628_v9  ;;  %v7666_v9 = vld [vmem:[%s7989_s18 + $0x7c0] sm:$0xff] }
  0xe7   : > { %4791 = vmatpush.bf16.msra.mxu3 %v7636_v10  ;;  %v7681_v10 = vld [vmem:[%s7989_s18 + $0x838] sm:$0xff] }
  0xe8   : > { %4753 = vmatpush.bf16.msra.mxu0 %v7611_v11  ;;  %v7689_v11 = vld [vmem:[%s7989_s18 + $0x878] sm:$0xff] }
  0xe9   : > { %4766 = vmatpush.bf16.msra.mxu1 %v7619_v12  ;;  %v7697_v12 = vld [vmem:[%s7989_s18 + $0x8b8] sm:$0xff] }
  0xea   : > { %4779 = vmatpush.bf16.msra.mxu2 %v7627_v13  ;;  %v7705_v13 = vld [vmem:[%s7989_s18 + $0x8f8] sm:$0xff] }
  0xeb   : > { %4792 = vmatpush.bf16.msra.mxu3 %v7635_v14  ;;  %v7680_v14 = vld [vmem:[%s7989_s18 + $0x830] sm:$0xff] }
  0xec   : > { %4754 = vmatpush.bf16.msra.mxu0 %v7610_v17  ;;  %v4548_v37 = vpop.f32.mrf.mxu0  ;;  %v7704_v17 = vld [vmem:[%s7989_s18 + $0x8f0] sm:$0xff] }
  0xed   : > { %4767 = vmatpush.bf16.msra.mxu1 %v7618_v18  ;;  %v4549_v38 = vadd.f32 %v4548_v37, %v4536_v7  ;;  %v4561_v41 = vpop.f32.mrf.mxu1  ;;  %v7650_v7 = vld [vmem:[%s7989_s18 + $0x740] sm:$0xff]  ;;  %v7679_v18 = vld [vmem:[%s7989_s18 + $0x828] sm:$0xff] }
  0xee   : > { %4780 = vmatpush.bf16.msra.mxu2 %v7626_v19  ;;  %v7687_v19 = vld [vmem:[%s7989_s18 + $0x868] sm:$0xff] }
  0xef   : > { %4793 = vmatpush.bf16.msra.mxu3 %v7634_v20  ;;  %4755 = vmatmul.bf16.vlgmr.msra.gmra.mxu0 %v1251_v25  ;;  %v4562_v44 = vadd.f32 %v4561_v41, %v4549_v38  ;;  %v7695_v20 = vld [vmem:[%s7989_s18 + $0x8a8] sm:$0xff]  ;;  %v7686_v25 = vld [vmem:[%s7989_s18 + $0x860] sm:$0xff] }
  0xf0   : > { %4799 = vmatpush.bf16.msrb.mxu0 %v7649_v21  ;;  %4768 = vmatmul.bf16.vlgmr.msra.gmra.mxu1 %v1252_v27  ;;  %v7703_v21 = vld [vmem:[%s7989_s18 + $0x8e8] sm:$0xff]  ;;  %v7694_v27 = vld [vmem:[%s7989_s18 + $0x8a0] sm:$0xff] }
  0xf1   : > { %4812 = vmatpush.bf16.msrb.mxu1 %v7657_v22  ;;  %4781 = vmatmul.bf16.vlgmr.msra.gmra.mxu2 %v1253_v26 }
  0xf2   : > { %4825 = vmatpush.bf16.msrb.mxu2 %v7665_v23  ;;  %4794 = vmatmul.bf16.vlgmr.msra.gmra.mxu3 %v1254_v28  ;;  %v7702_v28 = vld [vmem:[%s7989_s18 + $0x8e0] sm:$0xff] }
  0xf3   : > { %4838 = vmatpush.bf16.msrb.mxu3 %v7673_v24  ;;  %v7678_v24 = vld [vmem:[%s7989_s18 + $0x820] sm:$0xff] }
  0xf4   : > { %4800 = vmatpush.bf16.msrb.mxu0 %v7648_v29  ;;  %v4574_v49 = vpop.f32.mrf.mxu2  ;;  %v4550_v52 = vpop.f32.mrf.mxu0 }
  0xf5   : > { %4813 = vmatpush.bf16.msrb.mxu1 %v7656_v30  ;;  %v4575_v50 = vadd.f32 %v4574_v49, %v4562_v44  ;;  %v4587_v51 = vpop.f32.mrf.mxu3  ;;  %v4563_v56 = vpop.f32.mrf.mxu1  ;;  %v7677_v30 = vld [vmem:[%s7989_s18 + $0x818] sm:$0xff]  ;;  %v7675_v44 = vld [vmem:[%s7989_s18 + $0x808] sm:$0xff]  ;;  %v7690_v52 = vld [vmem:[%s7989_s18 + $0x880] sm:$0xff] }
  0xf6   : > { %4826 = vmatpush.bf16.msrb.mxu2 %v7664_v31  ;;  %v7685_v31 = vld [vmem:[%s7989_s18 + $0x858] sm:$0xff] }
  0xf7   : > { %4839 = vmatpush.bf16.msrb.mxu3 %v7672_v32  ;;  %v8277_v53 = vadd.f32 %v4587_v51, %v4575_v50  ;;  %v7693_v32 = vld [vmem:[%s7989_s18 + $0x898] sm:$0xff]  ;;  %v7674_v50 = vld [vmem:[%s7989_s18 + $0x800] sm:$0xff] }
  0xf8   : > { %4801 = vmatpush.bf16.msrb.mxu0 %v7647_v33  ;;  %v7701_v33 = vld [vmem:[%s7989_s18 + $0x8d8] sm:$0xff]  ;;  %v7682_v51 = vld [vmem:[%s7989_s18 + $0x840] sm:$0xff] }
  0xf9   : > { %4814 = vmatpush.bf16.msrb.mxu1 %v7655_v34  ;;  %v7729_v56 = vld [vmem:[%s7989_s18 + $0x9b8] sm:$0xff] }
  0xfa   : > { %4827 = vmatpush.bf16.msrb.mxu2 %v7663_v35 }
  0xfb   : > { %4840 = vmatpush.bf16.msrb.mxu3 %v7671_v36 }
  0xfc   : > { %4802 = vmatpush.bf16.msrb.mxu0 %v7646_v39  ;;  %v4576_v1 = vpop.f32.mrf.mxu2  ;;  %v7676_v39 = vld [vmem:[%s7989_s18 + $0x810] sm:$0xff] }
  0xfd   : > { %4815 = vmatpush.bf16.msrb.mxu1 %v7654_v40  ;;  %v4589_v4 = vpop.f32.mrf.mxu3  ;;  %v7684_v40 = vld [vmem:[%s7989_s18 + $0x850] sm:$0xff] }
  0xfe   : > { %4828 = vmatpush.bf16.msrb.mxu2 %v7662_v42  ;;  %v7692_v42 = vld [vmem:[%s7989_s18 + $0x890] sm:$0xff]  ;;  %v7727_v4 = vld [vmem:[%s7989_s18 + $0x9a8] sm:$0xff] }
  0xff   : > { %4841 = vmatpush.bf16.msrb.mxu3 %v7670_v43  ;;  %v7700_v43 = vld [vmem:[%s7989_s18 + $0x8d0] sm:$0xff] }
 0x100   : > { %4803 = vmatpush.bf16.msrb.mxu0 %v7645_v45  ;;  %v7683_v45 = vld [vmem:[%s7989_s18 + $0x848] sm:$0xff]  ;;  %v7736_v1 = vld [vmem:[%s7989_s18 + $0x9f0] sm:$0xff] }
 0x101   : > { %4816 = vmatpush.bf16.msrb.mxu1 %v7653_v46  ;;  %v7691_v46 = vld [vmem:[%s7989_s18 + $0x888] sm:$0xff] }
 0x102   : > { %4829 = vmatpush.bf16.msrb.mxu2 %v7661_v47  ;;  %v7699_v47 = vld [vmem:[%s7989_s18 + $0x8c8] sm:$0xff] }
 0x103   : > { %4842 = vmatpush.bf16.msrb.mxu3 %v7669_v48 }
 0x104   : > { %4804 = vmatpush.bf16.msrb.mxu0 %v7644_v54  ;;  %v7713_v54 = vld [vmem:[%s7989_s18 + $0x938] sm:$0xff] }
 0x105   : > { %4817 = vmatpush.bf16.msrb.mxu1 %v7652_v55  ;;  %v7721_v55 = vld [vmem:[%s7989_s18 + $0x978] sm:$0xff] }
 0x106   : > { %4830 = vmatpush.bf16.msrb.mxu2 %v7660_v57  ;;  %v7737_v57 = vld [vmem:[%s7989_s18 + $0x9f8] sm:$0xff] }
 0x107   : > { %4843 = vmatpush.bf16.msrb.mxu3 %v7668_v58  ;;  %v1261_v58 = vld [vmem:[#allocation1] sm:$0xff] }
 0x108   : > { %4805 = vmatpush.bf16.msrb.mxu0 %v7643_v59  ;;  %v1263_v59 = vld [vmem:[#allocation1 + $0x12] sm:$0xff] }
 0x109   : > { %4818 = vmatpush.bf16.msrb.mxu1 %v7651_v60  ;;  %v1262_v60 = vld [vmem:[#allocation1 + $0x9] sm:$0xff] }
 0x10a   : > { %4831 = vmatpush.bf16.msrb.mxu2 %v7659_v61  ;;  %v1264_v61 = vld [vmem:[#allocation1 + $0x1b] sm:$0xff] }
 0x10b   : > { %4844 = vmatpush.bf16.msrb.mxu3 %v7667_v62  ;;  %v7712_v62 = vld [vmem:[%s7989_s18 + $0x930] sm:$0xff] }
 0x10c   : > { %4806 = vmatpush.bf16.msrb.mxu0 %v7642_v6  ;;  %v4600_v22 = vpop.f32.mrf.mxu0 }
 0x10d   : > { %4819 = vmatpush.bf16.msrb.mxu1 %v7650_v7  ;;  %v4601_v23 = vadd.f32 %v4600_v22, %v8277_v53  ;;  %v4613_v26 = vpop.f32.mrf.mxu1  ;;  %v7698_v53 = vld [vmem:[%s7989_s18 + $0x8c0] sm:$0xff] }
 0x10e   : > { %4832 = vmatpush.bf16.msrb.mxu2 %v7658_v8  ;;  %v7710_v8 = vld [vmem:[%s7989_s18 + $0x920] sm:$0xff] }
 0x10f   : > { %4845 = vmatpush.bf16.msrb.mxu3 %v7666_v9  ;;  %4807 = vmatmul.bf16.vlgmr.msrb.gmra.mxu0 %v1255_v63  ;;  %v4614_v29 = vadd.f32 %v4613_v26, %v4601_v23  ;;  %v7720_v63 = vld [vmem:[%s7989_s18 + $0x970] sm:$0xff]  ;;  %v7718_v9 = vld [vmem:[%s7989_s18 + $0x960] sm:$0xff] }
 0x110   : > { %4851 = vmatpush.bf16.msra.mxu0 %v7681_v10  ;;  %4820 = vmatmul.bf16.vlgmr.msrb.gmra.mxu1 %v1256_v2  ;;  %v7711_v2 = vld [vmem:[%s7989_s18 + $0x928] sm:$0xff]  ;;  %v7708_v23 = vld [vmem:[%s7989_s18 + $0x910] sm:$0xff] }
 0x111   : > { %4864 = vmatpush.bf16.msra.mxu1 %v7689_v11  ;;  %4833 = vmatmul.bf16.vlgmr.msrb.gmra.mxu2 %v1257_v0  ;;  %v7728_v0 = vld [vmem:[%s7989_s18 + $0x9b0] sm:$0xff]  ;;  %v7726_v11 = vld [vmem:[%s7989_s18 + $0x9a0] sm:$0xff] }
 0x112   : > { %4877 = vmatpush.bf16.msra.mxu2 %v7697_v12  ;;  %4846 = vmatmul.bf16.vlgmr.msrb.gmra.mxu3 %v1258_v3  ;;  %v7719_v3 = vld [vmem:[%s7989_s18 + $0x968] sm:$0xff]  ;;  %v7734_v12 = vld [vmem:[%s7989_s18 + $0x9e0] sm:$0xff]  ;;  %v7724_v26 = vld [vmem:[%s7989_s18 + $0x990] sm:$0xff] }
 0x113   : > { %4890 = vmatpush.bf16.msra.mxu3 %v7705_v13 }
 0x114   : > { %4852 = vmatpush.bf16.msra.mxu0 %v7680_v14  ;;  %v4626_v34 = vpop.f32.mrf.mxu2  ;;  %v4602_v37 = vpop.f32.mrf.mxu0  ;;  %v7709_v14 = vld [vmem:[%s7989_s18 + $0x918] sm:$0xff] }
 0x115   : > { %4865 = vmatpush.bf16.msra.mxu1 %v7688_v15  ;;  %v4627_v35 = vadd.f32 %v4626_v34, %v4614_v29  ;;  %v4639_v36 = vpop.f32.mrf.mxu3  ;;  %v4615_v41 = vpop.f32.mrf.mxu1  ;;  %v7717_v15 = vld [vmem:[%s7989_s18 + $0x958] sm:$0xff]  ;;  %v7715_v29 = vld [vmem:[%s7989_s18 + $0x948] sm:$0xff] }
 0x116   : > { %4878 = vmatpush.bf16.msra.mxu2 %v7696_v16  ;;  %v7725_v16 = vld [vmem:[%s7989_s18 + $0x998] sm:$0xff]  ;;  %v7722_v41 = vld [vmem:[%s7989_s18 + $0x980] sm:$0xff] }
 0x117   : > { %4891 = vmatpush.bf16.msra.mxu3 %v7704_v17  ;;  %v4640_v38 = vadd.f32 %v4639_v36, %v4627_v35  ;;  %v7733_v17 = vld [vmem:[%s7989_s18 + $0x9d8] sm:$0xff]  ;;  %v1266_v35 = vld [vmem:[#allocation1 + $0x2d] sm:$0xff] }
 0x118   : > { %4853 = vmatpush.bf16.msra.mxu0 %v7679_v18  ;;  %v1268_v36 = vld [vmem:[#allocation1 + $0x3f] sm:$0xff] }
 0x119   : > { %4866 = vmatpush.bf16.msra.mxu1 %v7687_v19 }
 0x11a   : > { %4879 = vmatpush.bf16.msra.mxu2 %v7695_v20 }
 0x11b   : > { %4892 = vmatpush.bf16.msra.mxu3 %v7703_v21 }
 0x11c   : > { %4854 = vmatpush.bf16.msra.mxu0 %v7678_v24  ;;  %v4628_v48 = vpop.f32.mrf.mxu2  ;;  %v7716_v24 = vld [vmem:[%s7989_s18 + $0x950] sm:$0xff] }
 0x11d   : > { %4867 = vmatpush.bf16.msra.mxu1 %v7686_v25  ;;  %v4641_v49 = vpop.f32.mrf.mxu3  ;;  %v7752_v48 = vld [vmem:[%s7989_s18 + $0xa70] sm:$0xff] }
 0x11e   : > { %4880 = vmatpush.bf16.msra.mxu2 %v7694_v27  ;;  %v7732_v27 = vld [vmem:[%s7989_s18 + $0x9d0] sm:$0xff] }
 0x11f   : > { %4893 = vmatpush.bf16.msra.mxu3 %v7702_v28  ;;  %v7707_v28 = vld [vmem:[%s7989_s18 + $0x908] sm:$0xff]  ;;  %v7760_v49 = vld [vmem:[%s7989_s18 + $0xab0] sm:$0xff] }
 0x120   : > { %4855 = vmatpush.bf16.msra.mxu0 %v7677_v30  ;;  %v7723_v30 = vld [vmem:[%s7989_s18 + $0x988] sm:$0xff] }
 0x121   : > { %4868 = vmatpush.bf16.msra.mxu1 %v7685_v31  ;;  %v7731_v31 = vld [vmem:[%s7989_s18 + $0x9c8] sm:$0xff] }
 0x122   : > { %4881 = vmatpush.bf16.msra.mxu2 %v7693_v32  ;;  %v1265_v32 = vld [vmem:[#allocation1 + $0x24] sm:$0xff] }
 0x123   : > { %4894 = vmatpush.bf16.msra.mxu3 %v7701_v33  ;;  %v1267_v33 = vld [vmem:[#allocation1 + $0x36] sm:$0xff] }
 0x124   : > { %4856 = vmatpush.bf16.msra.mxu0 %v7676_v39  ;;  %v7706_v39 = vld [vmem:[%s7989_s18 + $0x900] sm:$0xff] }
 0x125   : > { %4869 = vmatpush.bf16.msra.mxu1 %v7684_v40  ;;  %v7714_v40 = vld [vmem:[%s7989_s18 + $0x940] sm:$0xff] }
 0x126   : > { %4882 = vmatpush.bf16.msra.mxu2 %v7692_v42  ;;  %v7730_v42 = vld [vmem:[%s7989_s18 + $0x9c0] sm:$0xff] }
 0x127   : > { %4895 = vmatpush.bf16.msra.mxu3 %v7700_v43  ;;  %v7745_v43 = vld [vmem:[%s7989_s18 + $0xa38] sm:$0xff] }
 0x128   : > { %4857 = vmatpush.bf16.msra.mxu0 %v7675_v44  ;;  %v7753_v44 = vld [vmem:[%s7989_s18 + $0xa78] sm:$0xff] }
 0x129   : > { %4870 = vmatpush.bf16.msra.mxu1 %v7683_v45  ;;  %v7761_v45 = vld [vmem:[%s7989_s18 + $0xab8] sm:$0xff] }
 0x12a   : > { %4883 = vmatpush.bf16.msra.mxu2 %v7691_v46  ;;  %v7769_v46 = vld [vmem:[%s7989_s18 + $0xaf8] sm:$0xff] }
 0x12b   : > { %4896 = vmatpush.bf16.msra.mxu3 %v7699_v47  ;;  %v7744_v47 = vld [vmem:[%s7989_s18 + $0xa30] sm:$0xff] }
 0x12c   : > { %4858 = vmatpush.bf16.msra.mxu0 %v7674_v50  ;;  %v4652_v6 = vpop.f32.mrf.mxu0  ;;  %v7768_v50 = vld [vmem:[%s7989_s18 + $0xaf0] sm:$0xff] }
 0x12d   : > { %4871 = vmatpush.bf16.msra.mxu1 %v7682_v51  ;;  %v4653_v7 = vadd.f32 %v4652_v6, %v4640_v38  ;;  %v4665_v10 = vpop.f32.mrf.mxu1  ;;  %v188_v38 = vld [vmem:[%s8576_s0 + $0x28] sm:$0xff] }
 0x12e   : > { %4884 = vmatpush.bf16.msra.mxu2 %v7690_v52  ;;  %1270 = vst [vmem:[#allocation1] ss:$9 sm:$0xff] %v188_v38  ;;  %v7743_v51 = vld [vmem:[%s7989_s18 + $0xa28] sm:$0xff] }
 0x12f   : > { %4897 = vmatpush.bf16.msra.mxu3 %v7698_v53  ;;  %4859 = vmatmul.bf16.vlgmr.msra.gmra.mxu0 %v1261_v58  ;;  %v4666_v13 = vadd.f32 %v4665_v10, %v4653_v7  ;;  %v7751_v52 = vld [vmem:[%s7989_s18 + $0xa68] sm:$0xff]  ;;  %v7750_v58 = vld [vmem:[%s7989_s18 + $0xa60] sm:$0xff] }
 0x130   : > { %4903 = vmatpush.bf16.msrb.mxu0 %v7713_v54  ;;  %4872 = vmatmul.bf16.vlgmr.msra.gmra.mxu1 %v1262_v60  ;;  %v7759_v53 = vld [vmem:[%s7989_s18 + $0xaa8] sm:$0xff]  ;;  %v7758_v60 = vld [vmem:[%s7989_s18 + $0xaa0] sm:$0xff] }
 0x131   : > { %4916 = vmatpush.bf16.msrb.mxu1 %v7721_v55  ;;  %4885 = vmatmul.bf16.vlgmr.msra.gmra.mxu2 %v1263_v59  ;;  %v7767_v54 = vld [vmem:[%s7989_s18 + $0xae8] sm:$0xff] }
 0x132   : > { %4929 = vmatpush.bf16.msrb.mxu2 %v7729_v56  ;;  %4898 = vmatmul.bf16.vlgmr.msra.gmra.mxu3 %v1264_v61  ;;  %v7766_v61 = vld [vmem:[%s7989_s18 + $0xae0] sm:$0xff]  ;;  %v7799_v38 = vld [vmem:[%s7989_s18 + $0xbe8] sm:$0xff] }
 0x133   : > { %4942 = vmatpush.bf16.msrb.mxu3 %v7737_v57  ;;  %v7742_v57 = vld [vmem:[%s7989_s18 + $0xa20] sm:$0xff] }
 0x134   : > { %4904 = vmatpush.bf16.msrb.mxu0 %v7712_v62  ;;  %v4678_v18 = vpop.f32.mrf.mxu2  ;;  %v4654_v21 = vpop.f32.mrf.mxu0 }
 0x135   : > { %4917 = vmatpush.bf16.msrb.mxu1 %v7720_v63  ;;  %v4679_v19 = vadd.f32 %v4678_v18, %v4666_v13  ;;  %v4691_v20 = vpop.f32.mrf.mxu3  ;;  %v4667_v25 = vpop.f32.mrf.mxu1  ;;  %v7741_v63 = vld [vmem:[%s7989_s18 + $0xa18] sm:$0xff]  ;;  %v7739_v13 = vld [vmem:[%s7989_s18 + $0xa08] sm:$0xff]  ;;  %v7754_v21 = vld [vmem:[%s7989_s18 + $0xa80] sm:$0xff] }
 0x136   : > { %4930 = vmatpush.bf16.msrb.mxu2 %v7728_v0  ;;  %v7749_v0 = vld [vmem:[%s7989_s18 + $0xa58] sm:$0xff] }
 0x137   : > { %4943 = vmatpush.bf16.msrb.mxu3 %v7736_v1  ;;  %v8347_v22 = vadd.f32 %v4691_v20, %v4679_v19  ;;  %v7757_v1 = vld [vmem:[%s7989_s18 + $0xa98] sm:$0xff]  ;;  %v7738_v19 = vld [vmem:[%s7989_s18 + $0xa00] sm:$0xff] }
 0x138   : > { %4905 = vmatpush.bf16.msrb.mxu0 %v7711_v2  ;;  %v7765_v2 = vld [vmem:[%s7989_s18 + $0xad8] sm:$0xff]  ;;  %v7746_v20 = vld [vmem:[%s7989_s18 + $0xa40] sm:$0xff] }
 0x139   : > { %4918 = vmatpush.bf16.msrb.mxu1 %v7719_v3  ;;  %v7793_v25 = vld [vmem:[%s7989_s18 + $0xbb8] sm:$0xff] }
 0x13a   : > { %4931 = vmatpush.bf16.msrb.mxu2 %v7727_v4 }
 0x13b   : > { %4944 = vmatpush.bf16.msrb.mxu3 %v7735_v5 }
 0x13c   : > { %4906 = vmatpush.bf16.msrb.mxu0 %v7710_v8  ;;  %v4680_v34 = vpop.f32.mrf.mxu2  ;;  %v7740_v8 = vld [vmem:[%s7989_s18 + $0xa10] sm:$0xff] }
 0x13d   : > { %4919 = vmatpush.bf16.msrb.mxu1 %v7718_v9  ;;  %v4693_v37 = vpop.f32.mrf.mxu3  ;;  %v7748_v9 = vld [vmem:[%s7989_s18 + $0xa50] sm:$0xff] }
 0x13e   : > { %4932 = vmatpush.bf16.msrb.mxu2 %v7726_v11  ;;  %v7756_v11 = vld [vmem:[%s7989_s18 + $0xa90] sm:$0xff]  ;;  %v7791_v37 = vld [vmem:[%s7989_s18 + $0xba8] sm:$0xff] }
 0x13f   : > { %4945 = vmatpush.bf16.msrb.mxu3 %v7734_v12  ;;  %v7764_v12 = vld [vmem:[%s7989_s18 + $0xad0] sm:$0xff] }
 0x140   : > { %4907 = vmatpush.bf16.msrb.mxu0 %v7709_v14  ;;  %v7747_v14 = vld [vmem:[%s7989_s18 + $0xa48] sm:$0xff]  ;;  %v7800_v34 = vld [vmem:[%s7989_s18 + $0xbf0] sm:$0xff] }
 0x141   : > { %4920 = vmatpush.bf16.msrb.mxu1 %v7717_v15  ;;  %v7755_v15 = vld [vmem:[%s7989_s18 + $0xa88] sm:$0xff] }
 0x142   : > { %4933 = vmatpush.bf16.msrb.mxu2 %v7725_v16  ;;  %v7763_v16 = vld [vmem:[%s7989_s18 + $0xac8] sm:$0xff] }
 0x143   : > { %4946 = vmatpush.bf16.msrb.mxu3 %v7733_v17 }
 0x144   : > { %4908 = vmatpush.bf16.msrb.mxu0 %v7708_v23  ;;  %v7777_v23 = vld [vmem:[%s7989_s18 + $0xb38] sm:$0xff] }
 0x145   : > { %4921 = vmatpush.bf16.msrb.mxu1 %v7716_v24  ;;  %v7785_v24 = vld [vmem:[%s7989_s18 + $0xb78] sm:$0xff] }
 0x146   : > { %4934 = vmatpush.bf16.msrb.mxu2 %v7724_v26  ;;  %v7801_v26 = vld [vmem:[%s7989_s18 + $0xbf8] sm:$0xff] }
 0x147   : > { %4947 = vmatpush.bf16.msrb.mxu3 %v7732_v27  ;;  %v1271_v27 = vld [vmem:[#allocation1] sm:$0xff] }
 0x148   : > { %4909 = vmatpush.bf16.msrb.mxu0 %v7707_v28  ;;  %v1273_v28 = vld [vmem:[#allocation1 + $0x12] sm:$0xff] }
 0x149   : > { %4922 = vmatpush.bf16.msrb.mxu1 %v7715_v29  ;;  %v1272_v29 = vld [vmem:[#allocation1 + $0x9] sm:$0xff] }
 0x14a   : > { %4935 = vmatpush.bf16.msrb.mxu2 %v7723_v30  ;;  %v1274_v30 = vld [vmem:[#allocation1 + $0x1b] sm:$0xff] }
 0x14b   : > { %4948 = vmatpush.bf16.msrb.mxu3 %v7731_v31  ;;  %v7776_v31 = vld [vmem:[%s7989_s18 + $0xb30] sm:$0xff] }
 0x14c   : > { %4910 = vmatpush.bf16.msrb.mxu0 %v7706_v39  ;;  %v4704_v55 = vpop.f32.mrf.mxu0 }
 0x14d   : > { %4923 = vmatpush.bf16.msrb.mxu1 %v7714_v40  ;;  %v4705_v56 = vadd.f32 %v4704_v55, %v8347_v22  ;;  %v4717_v59 = vpop.f32.mrf.mxu1  ;;  %v7762_v22 = vld [vmem:[%s7989_s18 + $0xac0] sm:$0xff] }
 0x14e   : > { %4936 = vmatpush.bf16.msrb.mxu2 %v7722_v41  ;;  %v7774_v41 = vld [vmem:[%s7989_s18 + $0xb20] sm:$0xff] }
 0x14f   : > { %4949 = vmatpush.bf16.msrb.mxu3 %v7730_v42  ;;  %4911 = vmatmul.bf16.vlgmr.msrb.gmra.mxu0 %v1265_v32  ;;  %v4718_v62 = vadd.f32 %v4717_v59, %v4705_v56  ;;  %v7784_v32 = vld [vmem:[%s7989_s18 + $0xb70] sm:$0xff]  ;;  %v7782_v42 = vld [vmem:[%s7989_s18 + $0xb60] sm:$0xff] }
 0x150   : > { %4955 = vmatpush.bf16.msra.mxu0 %v7745_v43  ;;  %4924 = vmatmul.bf16.vlgmr.msrb.gmra.mxu1 %v1266_v35  ;;  %v7775_v35 = vld [vmem:[%s7989_s18 + $0xb28] sm:$0xff]  ;;  %v7772_v56 = vld [vmem:[%s7989_s18 + $0xb10] sm:$0xff] }
 0x151   : > { %4968 = vmatpush.bf16.msra.mxu1 %v7753_v44  ;;  %4937 = vmatmul.bf16.vlgmr.msrb.gmra.mxu2 %v1267_v33  ;;  %v7792_v33 = vld [vmem:[%s7989_s18 + $0xbb0] sm:$0xff]  ;;  %v7790_v44 = vld [vmem:[%s7989_s18 + $0xba0] sm:$0xff] }
 0x152   : > { %4981 = vmatpush.bf16.msra.mxu2 %v7761_v45  ;;  %4950 = vmatmul.bf16.vlgmr.msrb.gmra.mxu3 %v1268_v36  ;;  %v7783_v36 = vld [vmem:[%s7989_s18 + $0xb68] sm:$0xff]  ;;  %v7798_v45 = vld [vmem:[%s7989_s18 + $0xbe0] sm:$0xff]  ;;  %v7788_v59 = vld [vmem:[%s7989_s18 + $0xb90] sm:$0xff] }
 0x153   : > { %4994 = vmatpush.bf16.msra.mxu3 %v7769_v46 }
 0x154   : > { %4956 = vmatpush.bf16.msra.mxu0 %v7744_v47  ;;  %v4730_v3 = vpop.f32.mrf.mxu2  ;;  %v4706_v6 = vpop.f32.mrf.mxu0  ;;  %v7773_v47 = vld [vmem:[%s7989_s18 + $0xb18] sm:$0xff] }
 0x155   : > { %4969 = vmatpush.bf16.msra.mxu1 %v7752_v48  ;;  %v4731_v4 = vadd.f32 %v4730_v3, %v4718_v62  ;;  %v4743_v5 = vpop.f32.mrf.mxu3  ;;  %v4719_v10 = vpop.f32.mrf.mxu1  ;;  %v7781_v48 = vld [vmem:[%s7989_s18 + $0xb58] sm:$0xff]  ;;  %v7779_v62 = vld [vmem:[%s7989_s18 + $0xb48] sm:$0xff] }
 0x156   : > { %4982 = vmatpush.bf16.msra.mxu2 %v7760_v49  ;;  %v7789_v49 = vld [vmem:[%s7989_s18 + $0xb98] sm:$0xff]  ;;  %v7786_v10 = vld [vmem:[%s7989_s18 + $0xb80] sm:$0xff] }
 0x157   : > { %4995 = vmatpush.bf16.msra.mxu3 %v7768_v50  ;;  %v4744_v7 = vadd.f32 %v4743_v5, %v4731_v4  ;;  %v7797_v50 = vld [vmem:[%s7989_s18 + $0xbd8] sm:$0xff]  ;;  %v1276_v4 = vld [vmem:[#allocation1 + $0x2d] sm:$0xff] }
 0x158   : > { %4957 = vmatpush.bf16.msra.mxu0 %v7743_v51  ;;  %v1278_v5 = vld [vmem:[#allocation1 + $0x3f] sm:$0xff] }
 0x159   : > { %4970 = vmatpush.bf16.msra.mxu1 %v7751_v52 }
 0x15a   : > { %4983 = vmatpush.bf16.msra.mxu2 %v7759_v53 }
 0x15b   : > { %4996 = vmatpush.bf16.msra.mxu3 %v7767_v54 }
 0x15c   : > { %4958 = vmatpush.bf16.msra.mxu0 %v7742_v57  ;;  %v4732_v17 = vpop.f32.mrf.mxu2  ;;  %v7780_v57 = vld [vmem:[%s7989_s18 + $0xb50] sm:$0xff] }
 0x15d   : > { %4971 = vmatpush.bf16.msra.mxu1 %v7750_v58  ;;  %v4745_v18 = vpop.f32.mrf.mxu3  ;;  %v7816_v17 = vld [vmem:[%s7989_s18 + $0xc70] sm:$0xff] }
 0x15e   : > { %4984 = vmatpush.bf16.msra.mxu2 %v7758_v60  ;;  %v7796_v60 = vld [vmem:[%s7989_s18 + $0xbd0] sm:$0xff] }
 0x15f   : > { %4997 = vmatpush.bf16.msra.mxu3 %v7766_v61  ;;  %v7771_v61 = vld [vmem:[%s7989_s18 + $0xb08] sm:$0xff]  ;;  %v7824_v18 = vld [vmem:[%s7989_s18 + $0xcb0] sm:$0xff] }
 0x160   : > { %4959 = vmatpush.bf16.msra.mxu0 %v7741_v63  ;;  %v7787_v63 = vld [vmem:[%s7989_s18 + $0xb88] sm:$0xff] }
 0x161   : > { %4972 = vmatpush.bf16.msra.mxu1 %v7749_v0  ;;  %v7795_v0 = vld [vmem:[%s7989_s18 + $0xbc8] sm:$0xff] }
 0x162   : > { %4985 = vmatpush.bf16.msra.mxu2 %v7757_v1  ;;  %v1275_v1 = vld [vmem:[#allocation1 + $0x24] sm:$0xff] }
 0x163   : > { %4998 = vmatpush.bf16.msra.mxu3 %v7765_v2  ;;  %v1277_v2 = vld [vmem:[#allocation1 + $0x36] sm:$0xff] }
 0x164   : > { %4960 = vmatpush.bf16.msra.mxu0 %v7740_v8  ;;  %v7770_v8 = vld [vmem:[%s7989_s18 + $0xb00] sm:$0xff] }
 0x165   : > { %4973 = vmatpush.bf16.msra.mxu1 %v7748_v9  ;;  %v7778_v9 = vld [vmem:[%s7989_s18 + $0xb40] sm:$0xff] }
 0x166   : > { %4986 = vmatpush.bf16.msra.mxu2 %v7756_v11  ;;  %v7794_v11 = vld [vmem:[%s7989_s18 + $0xbc0] sm:$0xff] }
 0x167   : > { %4999 = vmatpush.bf16.msra.mxu3 %v7764_v12  ;;  %v7809_v12 = vld [vmem:[%s7989_s18 + $0xc38] sm:$0xff] }
 0x168   : > { %4961 = vmatpush.bf16.msra.mxu0 %v7739_v13  ;;  %v7817_v13 = vld [vmem:[%s7989_s18 + $0xc78] sm:$0xff] }
 0x169   : > { %4974 = vmatpush.bf16.msra.mxu1 %v7747_v14  ;;  %v7825_v14 = vld [vmem:[%s7989_s18 + $0xcb8] sm:$0xff] }
 0x16a   : > { %4987 = vmatpush.bf16.msra.mxu2 %v7755_v15  ;;  %v7833_v15 = vld [vmem:[%s7989_s18 + $0xcf8] sm:$0xff] }
 0x16b   : > { %5000 = vmatpush.bf16.msra.mxu3 %v7763_v16  ;;  %v7808_v16 = vld [vmem:[%s7989_s18 + $0xc30] sm:$0xff] }
 0x16c   : > { %4962 = vmatpush.bf16.msra.mxu0 %v7738_v19  ;;  %v4756_v39 = vpop.f32.mrf.mxu0  ;;  %v7832_v19 = vld [vmem:[%s7989_s18 + $0xcf0] sm:$0xff] }
 0x16d   : > { %4975 = vmatpush.bf16.msra.mxu1 %v7746_v20  ;;  %v4757_v40 = vadd.f32 %v4756_v39, %v4744_v7  ;;  %v4769_v43 = vpop.f32.mrf.mxu1  ;;  %v189_v7 = vld [vmem:[%s8576_s0 + $0x30] sm:$0xff]  ;;  %v7807_v20 = vld [vmem:[%s7989_s18 + $0xc28] sm:$0xff] }
 0x16e   : > { %4988 = vmatpush.bf16.msra.mxu2 %v7754_v21  ;;  %1280 = vst [vmem:[#allocation1] ss:$9 sm:$0xff] %v189_v7  ;;  %v7815_v21 = vld [vmem:[%s7989_s18 + $0xc68] sm:$0xff] }
 0x16f   : > { %5001 = vmatpush.bf16.msra.mxu3 %v7762_v22  ;;  %4963 = vmatmul.bf16.vlgmr.msra.gmra.mxu0 %v1271_v27  ;;  %v4770_v46 = vadd.f32 %v4769_v43, %v4757_v40  ;;  %v7823_v22 = vld [vmem:[%s7989_s18 + $0xca8] sm:$0xff]  ;;  %v7814_v27 = vld [vmem:[%s7989_s18 + $0xc60] sm:$0xff] }
 0x170   : > { %5007 = vmatpush.bf16.msrb.mxu0 %v7777_v23  ;;  %4976 = vmatmul.bf16.vlgmr.msra.gmra.mxu1 %v1272_v29  ;;  %v7831_v23 = vld [vmem:[%s7989_s18 + $0xce8] sm:$0xff]  ;;  %v7822_v29 = vld [vmem:[%s7989_s18 + $0xca0] sm:$0xff] }
 0x171   : > { %5020 = vmatpush.bf16.msrb.mxu1 %v7785_v24  ;;  %4989 = vmatmul.bf16.vlgmr.msra.gmra.mxu2 %v1273_v28  ;;  %v7863_v7 = vld [vmem:[%s7989_s18 + $0xde8] sm:$0xff] }
 0x172   : > { %5033 = vmatpush.bf16.msrb.mxu2 %v7793_v25  ;;  %5002 = vmatmul.bf16.vlgmr.msra.gmra.mxu3 %v1274_v30  ;;  %v7830_v30 = vld [vmem:[%s7989_s18 + $0xce0] sm:$0xff] }
 0x173   : > { %5046 = vmatpush.bf16.msrb.mxu3 %v7801_v26  ;;  %v7806_v26 = vld [vmem:[%s7989_s18 + $0xc20] sm:$0xff] }
 0x174   : > { %5008 = vmatpush.bf16.msrb.mxu0 %v7776_v31  ;;  %v4782_v51 = vpop.f32.mrf.mxu2  ;;  %v4758_v54 = vpop.f32.mrf.mxu0 }
 0x175   : > { %5021 = vmatpush.bf16.msrb.mxu1 %v7784_v32  ;;  %v4783_v52 = vadd.f32 %v4782_v51, %v4770_v46  ;;  %v4795_v53 = vpop.f32.mrf.mxu3  ;;  %v4771_v58 = vpop.f32.mrf.mxu1  ;;  %v7805_v32 = vld [vmem:[%s7989_s18 + $0xc18] sm:$0xff]  ;;  %v7803_v46 = vld [vmem:[%s7989_s18 + $0xc08] sm:$0xff]  ;;  %v7818_v54 = vld [vmem:[%s7989_s18 + $0xc80] sm:$0xff] }
 0x176   : > { %5034 = vmatpush.bf16.msrb.mxu2 %v7792_v33  ;;  %v7813_v33 = vld [vmem:[%s7989_s18 + $0xc58] sm:$0xff] }
 0x177   : > { %5047 = vmatpush.bf16.msrb.mxu3 %v7800_v34  ;;  %v8417_v55 = vadd.f32 %v4795_v53, %v4783_v52  ;;  %v7821_v34 = vld [vmem:[%s7989_s18 + $0xc98] sm:$0xff]  ;;  %v7802_v52 = vld [vmem:[%s7989_s18 + $0xc00] sm:$0xff] }
 0x178   : > { %5009 = vmatpush.bf16.msrb.mxu0 %v7775_v35  ;;  %v7829_v35 = vld [vmem:[%s7989_s18 + $0xcd8] sm:$0xff]  ;;  %v7810_v53 = vld [vmem:[%s7989_s18 + $0xc40] sm:$0xff] }
 0x179   : > { %5022 = vmatpush.bf16.msrb.mxu1 %v7783_v36  ;;  %v7857_v58 = vld [vmem:[%s7989_s18 + $0xdb8] sm:$0xff] }
 0x17a   : > { %5035 = vmatpush.bf16.msrb.mxu2 %v7791_v37 }
 0x17b   : > { %5048 = vmatpush.bf16.msrb.mxu3 %v7799_v38 }
 0x17c   : > { %5010 = vmatpush.bf16.msrb.mxu0 %v7774_v41  ;;  %v4784_v3 = vpop.f32.mrf.mxu2  ;;  %v7804_v41 = vld [vmem:[%s7989_s18 + $0xc10] sm:$0xff] }
 0x17d   : > { %5023 = vmatpush.bf16.msrb.mxu1 %v7782_v42  ;;  %v4797_v6 = vpop.f32.mrf.mxu3  ;;  %v7812_v42 = vld [vmem:[%s7989_s18 + $0xc50] sm:$0xff] }
 0x17e   : > { %5036 = vmatpush.bf16.msrb.mxu2 %v7790_v44  ;;  %v7820_v44 = vld [vmem:[%s7989_s18 + $0xc90] sm:$0xff]  ;;  %v7855_v6 = vld [vmem:[%s7989_s18 + $0xda8] sm:$0xff] }
 0x17f   : > { %5049 = vmatpush.bf16.msrb.mxu3 %v7798_v45  ;;  %v7828_v45 = vld [vmem:[%s7989_s18 + $0xcd0] sm:$0xff] }
 0x180   : > { %5011 = vmatpush.bf16.msrb.mxu0 %v7773_v47  ;;  %v7811_v47 = vld [vmem:[%s7989_s18 + $0xc48] sm:$0xff]  ;;  %v7864_v3 = vld [vmem:[%s7989_s18 + $0xdf0] sm:$0xff] }
 0x181   : > { %5024 = vmatpush.bf16.msrb.mxu1 %v7781_v48  ;;  %v7819_v48 = vld [vmem:[%s7989_s18 + $0xc88] sm:$0xff] }
 0x182   : > { %5037 = vmatpush.bf16.msrb.mxu2 %v7789_v49  ;;  %v7827_v49 = vld [vmem:[%s7989_s18 + $0xcc8] sm:$0xff] }
 0x183   : > { %5050 = vmatpush.bf16.msrb.mxu3 %v7797_v50 }
 0x184   : > { %5012 = vmatpush.bf16.msrb.mxu0 %v7772_v56  ;;  %v7841_v56 = vld [vmem:[%s7989_s18 + $0xd38] sm:$0xff] }
 0x185   : > { %5025 = vmatpush.bf16.msrb.mxu1 %v7780_v57  ;;  %v7849_v57 = vld [vmem:[%s7989_s18 + $0xd78] sm:$0xff] }
 0x186   : > { %5038 = vmatpush.bf16.msrb.mxu2 %v7788_v59  ;;  %v7865_v59 = vld [vmem:[%s7989_s18 + $0xdf8] sm:$0xff] }
 0x187   : > { %5051 = vmatpush.bf16.msrb.mxu3 %v7796_v60  ;;  %v1281_v60 = vld [vmem:[#allocation1] sm:$0xff] }
 0x188   : > { %5013 = vmatpush.bf16.msrb.mxu0 %v7771_v61  ;;  %v1283_v61 = vld [vmem:[#allocation1 + $0x12] sm:$0xff] }
 0x189   : > { %5026 = vmatpush.bf16.msrb.mxu1 %v7779_v62  ;;  %v1282_v62 = vld [vmem:[#allocation1 + $0x9] sm:$0xff] }
 0x18a   : > { %5039 = vmatpush.bf16.msrb.mxu2 %v7787_v63  ;;  %v1284_v63 = vld [vmem:[#allocation1 + $0x1b] sm:$0xff] }
 0x18b   : > { %5052 = vmatpush.bf16.msrb.mxu3 %v7795_v0  ;;  %v7840_v0 = vld [vmem:[%s7989_s18 + $0xd30] sm:$0xff] }
 0x18c   : > { %5014 = vmatpush.bf16.msrb.mxu0 %v7770_v8  ;;  %v4808_v24 = vpop.f32.mrf.mxu0 }
 0x18d   : > { %5027 = vmatpush.bf16.msrb.mxu1 %v7778_v9  ;;  %v4809_v25 = vadd.f32 %v4808_v24, %v8417_v55  ;;  %v4821_v28 = vpop.f32.mrf.mxu1  ;;  %v7826_v55 = vld [vmem:[%s7989_s18 + $0xcc0] sm:$0xff] }
 0x18e   : > { %5040 = vmatpush.bf16.msrb.mxu2 %v7786_v10  ;;  %v7838_v10 = vld [vmem:[%s7989_s18 + $0xd20] sm:$0xff] }
 0x18f   : > { %5053 = vmatpush.bf16.msrb.mxu3 %v7794_v11  ;;  %5015 = vmatmul.bf16.vlgmr.msrb.gmra.mxu0 %v1275_v1  ;;  %v4822_v31 = vadd.f32 %v4821_v28, %v4809_v25  ;;  %v7848_v1 = vld [vmem:[%s7989_s18 + $0xd70] sm:$0xff]  ;;  %v7846_v11 = vld [vmem:[%s7989_s18 + $0xd60] sm:$0xff] }
 0x190   : > { %5059 = vmatpush.bf16.msra.mxu0 %v7809_v12  ;;  %5028 = vmatmul.bf16.vlgmr.msrb.gmra.mxu1 %v1276_v4  ;;  %v7839_v4 = vld [vmem:[%s7989_s18 + $0xd28] sm:$0xff]  ;;  %v7836_v25 = vld [vmem:[%s7989_s18 + $0xd10] sm:$0xff] }
 0x191   : > { %5072 = vmatpush.bf16.msra.mxu1 %v7817_v13  ;;  %5041 = vmatmul.bf16.vlgmr.msrb.gmra.mxu2 %v1277_v2  ;;  %v7856_v2 = vld [vmem:[%s7989_s18 + $0xdb0] sm:$0xff]  ;;  %v7854_v13 = vld [vmem:[%s7989_s18 + $0xda0] sm:$0xff] }
 0x192   : > { %5085 = vmatpush.bf16.msra.mxu2 %v7825_v14  ;;  %5054 = vmatmul.bf16.vlgmr.msrb.gmra.mxu3 %v1278_v5  ;;  %v7847_v5 = vld [vmem:[%s7989_s18 + $0xd68] sm:$0xff]  ;;  %v7862_v14 = vld [vmem:[%s7989_s18 + $0xde0] sm:$0xff]  ;;  %v7852_v28 = vld [vmem:[%s7989_s18 + $0xd90] sm:$0xff] }
 0x193   : > { %5098 = vmatpush.bf16.msra.mxu3 %v7833_v15 }
 0x194   : > { %5060 = vmatpush.bf16.msra.mxu0 %v7808_v16  ;;  %v4834_v36 = vpop.f32.mrf.mxu2  ;;  %v4810_v39 = vpop.f32.mrf.mxu0  ;;  %v7837_v16 = vld [vmem:[%s7989_s18 + $0xd18] sm:$0xff] }
 0x195   : > { %5073 = vmatpush.bf16.msra.mxu1 %v7816_v17  ;;  %v4835_v37 = vadd.f32 %v4834_v36, %v4822_v31  ;;  %v4847_v38 = vpop.f32.mrf.mxu3  ;;  %v4823_v43 = vpop.f32.mrf.mxu1  ;;  %v7845_v17 = vld [vmem:[%s7989_s18 + $0xd58] sm:$0xff]  ;;  %v7843_v31 = vld [vmem:[%s7989_s18 + $0xd48] sm:$0xff] }
 0x196   : > { %5086 = vmatpush.bf16.msra.mxu2 %v7824_v18  ;;  %v7853_v18 = vld [vmem:[%s7989_s18 + $0xd98] sm:$0xff]  ;;  %v7850_v43 = vld [vmem:[%s7989_s18 + $0xd80] sm:$0xff] }
 0x197   : > { %5099 = vmatpush.bf16.msra.mxu3 %v7832_v19  ;;  %v4848_v40 = vadd.f32 %v4847_v38, %v4835_v37  ;;  %v7861_v19 = vld [vmem:[%s7989_s18 + $0xdd8] sm:$0xff]  ;;  %v1286_v37 = vld [vmem:[#allocation1 + $0x2d] sm:$0xff] }
 0x198   : > { %5061 = vmatpush.bf16.msra.mxu0 %v7807_v20  ;;  %v1288_v38 = vld [vmem:[#allocation1 + $0x3f] sm:$0xff] }
 0x199   : > { %5074 = vmatpush.bf16.msra.mxu1 %v7815_v21 }
 0x19a   : > { %5087 = vmatpush.bf16.msra.mxu2 %v7823_v22 }
 0x19b   : > { %5100 = vmatpush.bf16.msra.mxu3 %v7831_v23 }
 0x19c   : > { %5062 = vmatpush.bf16.msra.mxu0 %v7806_v26  ;;  %v4836_v50 = vpop.f32.mrf.mxu2  ;;  %v7844_v26 = vld [vmem:[%s7989_s18 + $0xd50] sm:$0xff] }
 0x19d   : > { %5075 = vmatpush.bf16.msra.mxu1 %v7814_v27  ;;  %v4849_v51 = vpop.f32.mrf.mxu3  ;;  %v7880_v50 = vld [vmem:[%s7989_s18 + $0xe70] sm:$0xff] }
 0x19e   : > { %5088 = vmatpush.bf16.msra.mxu2 %v7822_v29  ;;  %v7860_v29 = vld [vmem:[%s7989_s18 + $0xdd0] sm:$0xff] }
 0x19f   : > { %5101 = vmatpush.bf16.msra.mxu3 %v7830_v30  ;;  %v7835_v30 = vld [vmem:[%s7989_s18 + $0xd08] sm:$0xff]  ;;  %v7888_v51 = vld [vmem:[%s7989_s18 + $0xeb0] sm:$0xff] }
 0x1a0   : > { %5063 = vmatpush.bf16.msra.mxu0 %v7805_v32  ;;  %v7851_v32 = vld [vmem:[%s7989_s18 + $0xd88] sm:$0xff] }
 0x1a1   : > { %5076 = vmatpush.bf16.msra.mxu1 %v7813_v33  ;;  %v7859_v33 = vld [vmem:[%s7989_s18 + $0xdc8] sm:$0xff] }
 0x1a2   : > { %5089 = vmatpush.bf16.msra.mxu2 %v7821_v34  ;;  %v1285_v34 = vld [vmem:[#allocation1 + $0x24] sm:$0xff] }
 0x1a3   : > { %5102 = vmatpush.bf16.msra.mxu3 %v7829_v35  ;;  %v1287_v35 = vld [vmem:[#allocation1 + $0x36] sm:$0xff] }
 0x1a4   : > { %5064 = vmatpush.bf16.msra.mxu0 %v7804_v41  ;;  %v7834_v41 = vld [vmem:[%s7989_s18 + $0xd00] sm:$0xff] }
 0x1a5   : > { %5077 = vmatpush.bf16.msra.mxu1 %v7812_v42  ;;  %v7842_v42 = vld [vmem:[%s7989_s18 + $0xd40] sm:$0xff] }
 0x1a6   : > { %5090 = vmatpush.bf16.msra.mxu2 %v7820_v44  ;;  %v7858_v44 = vld [vmem:[%s7989_s18 + $0xdc0] sm:$0xff] }
 0x1a7   : > { %5103 = vmatpush.bf16.msra.mxu3 %v7828_v45  ;;  %v7873_v45 = vld [vmem:[%s7989_s18 + $0xe38] sm:$0xff] }
 0x1a8   : > { %5065 = vmatpush.bf16.msra.mxu0 %v7803_v46  ;;  %v7881_v46 = vld [vmem:[%s7989_s18 + $0xe78] sm:$0xff] }
 0x1a9   : > { %5078 = vmatpush.bf16.msra.mxu1 %v7811_v47  ;;  %v7889_v47 = vld [vmem:[%s7989_s18 + $0xeb8] sm:$0xff] }
 0x1aa   : > { %5091 = vmatpush.bf16.msra.mxu2 %v7819_v48  ;;  %v7897_v48 = vld [vmem:[%s7989_s18 + $0xef8] sm:$0xff] }
 0x1ab   : > { %5104 = vmatpush.bf16.msra.mxu3 %v7827_v49  ;;  %v7872_v49 = vld [vmem:[%s7989_s18 + $0xe30] sm:$0xff] }
 0x1ac   : > { %5066 = vmatpush.bf16.msra.mxu0 %v7802_v52  ;;  %v4860_v8 = vpop.f32.mrf.mxu0  ;;  %v7896_v52 = vld [vmem:[%s7989_s18 + $0xef0] sm:$0xff] }
 0x1ad   : > { %5079 = vmatpush.bf16.msra.mxu1 %v7810_v53  ;;  %v4861_v9 = vadd.f32 %v4860_v8, %v4848_v40  ;;  %v4873_v12 = vpop.f32.mrf.mxu1  ;;  %v190_v40 = vld [vmem:[%s8576_s0 + $0x38] sm:$0xff]  ;;  %v7871_v53 = vld [vmem:[%s7989_s18 + $0xe28] sm:$0xff] }
 0x1ae   : > { %5092 = vmatpush.bf16.msra.mxu2 %v7818_v54  ;;  %1290 = vst [vmem:[#allocation1] ss:$9 sm:$0xff] %v190_v40  ;;  %v7879_v54 = vld [vmem:[%s7989_s18 + $0xe68] sm:$0xff] }
 0x1af   : > { %5105 = vmatpush.bf16.msra.mxu3 %v7826_v55  ;;  %5067 = vmatmul.bf16.vlgmr.msra.gmra.mxu0 %v1281_v60  ;;  %v4874_v15 = vadd.f32 %v4873_v12, %v4861_v9  ;;  %v7887_v55 = vld [vmem:[%s7989_s18 + $0xea8] sm:$0xff]  ;;  %v7878_v60 = vld [vmem:[%s7989_s18 + $0xe60] sm:$0xff] }
 0x1b0   : > { %5111 = vmatpush.bf16.msrb.mxu0 %v7841_v56  ;;  %5080 = vmatmul.bf16.vlgmr.msra.gmra.mxu1 %v1282_v62  ;;  %v7895_v56 = vld [vmem:[%s7989_s18 + $0xee8] sm:$0xff]  ;;  %v7886_v62 = vld [vmem:[%s7989_s18 + $0xea0] sm:$0xff] }
 0x1b1   : > { %5124 = vmatpush.bf16.msrb.mxu1 %v7849_v57  ;;  %5093 = vmatmul.bf16.vlgmr.msra.gmra.mxu2 %v1283_v61  ;;  %v7927_v40 = vld [vmem:[%s7989_s18 + $0xfe8] sm:$0xff] }
 0x1b2   : > { %5137 = vmatpush.bf16.msrb.mxu2 %v7857_v58  ;;  %5106 = vmatmul.bf16.vlgmr.msra.gmra.mxu3 %v1284_v63  ;;  %v7894_v63 = vld [vmem:[%s7989_s18 + $0xee0] sm:$0xff] }
 0x1b3   : > { %5150 = vmatpush.bf16.msrb.mxu3 %v7865_v59  ;;  %v7870_v59 = vld [vmem:[%s7989_s18 + $0xe20] sm:$0xff] }
 0x1b4   : > { %5112 = vmatpush.bf16.msrb.mxu0 %v7840_v0  ;;  %v4886_v20 = vpop.f32.mrf.mxu2  ;;  %v4862_v23 = vpop.f32.mrf.mxu0 }
 0x1b5   : > { %5125 = vmatpush.bf16.msrb.mxu1 %v7848_v1  ;;  %v4887_v21 = vadd.f32 %v4886_v20, %v4874_v15  ;;  %v4899_v22 = vpop.f32.mrf.mxu3  ;;  %v4875_v27 = vpop.f32.mrf.mxu1  ;;  %v7869_v1 = vld [vmem:[%s7989_s18 + $0xe18] sm:$0xff]  ;;  %v7867_v15 = vld [vmem:[%s7989_s18 + $0xe08] sm:$0xff]  ;;  %v7882_v23 = vld [vmem:[%s7989_s18 + $0xe80] sm:$0xff] }
 0x1b6   : > { %5138 = vmatpush.bf16.msrb.mxu2 %v7856_v2  ;;  %v7877_v2 = vld [vmem:[%s7989_s18 + $0xe58] sm:$0xff] }
 0x1b7   : > { %5151 = vmatpush.bf16.msrb.mxu3 %v7864_v3  ;;  %v8487_v24 = vadd.f32 %v4899_v22, %v4887_v21  ;;  %v7885_v3 = vld [vmem:[%s7989_s18 + $0xe98] sm:$0xff]  ;;  %v7866_v21 = vld [vmem:[%s7989_s18 + $0xe00] sm:$0xff] }
 0x1b8   : > { %5113 = vmatpush.bf16.msrb.mxu0 %v7839_v4  ;;  %v7893_v4 = vld [vmem:[%s7989_s18 + $0xed8] sm:$0xff]  ;;  %v7874_v22 = vld [vmem:[%s7989_s18 + $0xe40] sm:$0xff] }
 0x1b9   : > { %5126 = vmatpush.bf16.msrb.mxu1 %v7847_v5  ;;  %v7921_v27 = vld [vmem:[%s7989_s18 + $0xfb8] sm:$0xff] }
 0x1ba   : > { %5139 = vmatpush.bf16.msrb.mxu2 %v7855_v6 }
 0x1bb   : > { %5152 = vmatpush.bf16.msrb.mxu3 %v7863_v7 }
 0x1bc   : > { %5114 = vmatpush.bf16.msrb.mxu0 %v7838_v10  ;;  %v4888_v36 = vpop.f32.mrf.mxu2  ;;  %v7868_v10 = vld [vmem:[%s7989_s18 + $0xe10] sm:$0xff] }
 0x1bd   : > { %5127 = vmatpush.bf16.msrb.mxu1 %v7846_v11  ;;  %v4901_v39 = vpop.f32.mrf.mxu3  ;;  %v7876_v11 = vld [vmem:[%s7989_s18 + $0xe50] sm:$0xff] }
 0x1be   : > { %5140 = vmatpush.bf16.msrb.mxu2 %v7854_v13  ;;  %v7884_v13 = vld [vmem:[%s7989_s18 + $0xe90] sm:$0xff]  ;;  %v7919_v39 = vld [vmem:[%s7989_s18 + $0xfa8] sm:$0xff] }
 0x1bf   : > { %5153 = vmatpush.bf16.msrb.mxu3 %v7862_v14  ;;  %v7892_v14 = vld [vmem:[%s7989_s18 + $0xed0] sm:$0xff] }
 0x1c0   : > { %5115 = vmatpush.bf16.msrb.mxu0 %v7837_v16  ;;  %v7875_v16 = vld [vmem:[%s7989_s18 + $0xe48] sm:$0xff]  ;;  %v7928_v36 = vld [vmem:[%s7989_s18 + $0xff0] sm:$0xff] }
 0x1c1   : > { %5128 = vmatpush.bf16.msrb.mxu1 %v7845_v17  ;;  %v7883_v17 = vld [vmem:[%s7989_s18 + $0xe88] sm:$0xff] }
 0x1c2   : > { %5141 = vmatpush.bf16.msrb.mxu2 %v7853_v18  ;;  %v7891_v18 = vld [vmem:[%s7989_s18 + $0xec8] sm:$0xff] }
 0x1c3   : > { %5154 = vmatpush.bf16.msrb.mxu3 %v7861_v19 }
 0x1c4   : > { %5116 = vmatpush.bf16.msrb.mxu0 %v7836_v25  ;;  %v7905_v25 = vld [vmem:[%s7989_s18 + $0xf38] sm:$0xff] }
 0x1c5   : > { %5129 = vmatpush.bf16.msrb.mxu1 %v7844_v26  ;;  %v7913_v26 = vld [vmem:[%s7989_s18 + $0xf78] sm:$0xff] }
 0x1c6   : > { %5142 = vmatpush.bf16.msrb.mxu2 %v7852_v28  ;;  %v7929_v28 = vld [vmem:[%s7989_s18 + $0xff8] sm:$0xff] }
 0x1c7   : > { %5155 = vmatpush.bf16.msrb.mxu3 %v7860_v29  ;;  %v1291_v29 = vld [vmem:[#allocation1] sm:$0xff] }
 0x1c8   : > { %5117 = vmatpush.bf16.msrb.mxu0 %v7835_v30  ;;  %v1293_v30 = vld [vmem:[#allocation1 + $0x12] sm:$0xff] }
 0x1c9   : > { %5130 = vmatpush.bf16.msrb.mxu1 %v7843_v31  ;;  %v1292_v31 = vld [vmem:[#allocation1 + $0x9] sm:$0xff] }
 0x1ca   : > { %5143 = vmatpush.bf16.msrb.mxu2 %v7851_v32  ;;  %v1294_v32 = vld [vmem:[#allocation1 + $0x1b] sm:$0xff] }
 0x1cb   : > { %5156 = vmatpush.bf16.msrb.mxu3 %v7859_v33  ;;  %v7904_v33 = vld [vmem:[%s7989_s18 + $0xf30] sm:$0xff] }
 0x1cc   : > { %5118 = vmatpush.bf16.msrb.mxu0 %v7834_v41  ;;  %v4912_v57 = vpop.f32.mrf.mxu0 }
 0x1cd   : > { %5131 = vmatpush.bf16.msrb.mxu1 %v7842_v42  ;;  %v4913_v58 = vadd.f32 %v4912_v57, %v8487_v24  ;;  %v4925_v61 = vpop.f32.mrf.mxu1  ;;  %v7890_v24 = vld [vmem:[%s7989_s18 + $0xec0] sm:$0xff] }
 0x1ce   : > { %5144 = vmatpush.bf16.msrb.mxu2 %v7850_v43  ;;  %v7902_v43 = vld [vmem:[%s7989_s18 + $0xf20] sm:$0xff] }
 0x1cf   : > { %5157 = vmatpush.bf16.msrb.mxu3 %v7858_v44  ;;  %5119 = vmatmul.bf16.vlgmr.msrb.gmra.mxu0 %v1285_v34  ;;  %v4926_v0 = vadd.f32 %v4925_v61, %v4913_v58  ;;  %v7912_v34 = vld [vmem:[%s7989_s18 + $0xf70] sm:$0xff]  ;;  %v7910_v44 = vld [vmem:[%s7989_s18 + $0xf60] sm:$0xff] }
 0x1d0   : > { %5163 = vmatpush.bf16.msra.mxu0 %v7873_v45  ;;  %5132 = vmatmul.bf16.vlgmr.msrb.gmra.mxu1 %v1286_v37  ;;  %v7903_v37 = vld [vmem:[%s7989_s18 + $0xf28] sm:$0xff]  ;;  %v7900_v58 = vld [vmem:[%s7989_s18 + $0xf10] sm:$0xff] }
 0x1d1   : > { %5176 = vmatpush.bf16.msra.mxu1 %v7881_v46  ;;  %5145 = vmatmul.bf16.vlgmr.msrb.gmra.mxu2 %v1287_v35  ;;  %v7920_v35 = vld [vmem:[%s7989_s18 + $0xfb0] sm:$0xff]  ;;  %v7918_v46 = vld [vmem:[%s7989_s18 + $0xfa0] sm:$0xff] }
 0x1d2   : > { %5189 = vmatpush.bf16.msra.mxu2 %v7889_v47  ;;  %5158 = vmatmul.bf16.vlgmr.msrb.gmra.mxu3 %v1288_v38  ;;  %v7911_v38 = vld [vmem:[%s7989_s18 + $0xf68] sm:$0xff]  ;;  %v7926_v47 = vld [vmem:[%s7989_s18 + $0xfe0] sm:$0xff]  ;;  %v7916_v61 = vld [vmem:[%s7989_s18 + $0xf90] sm:$0xff] }
 0x1d3   : > { %5202 = vmatpush.bf16.msra.mxu3 %v7897_v48 }
 0x1d4   : > { %5164 = vmatpush.bf16.msra.mxu0 %v7872_v49  ;;  %v4938_v5 = vpop.f32.mrf.mxu2  ;;  %v4914_v8 = vpop.f32.mrf.mxu0  ;;  %v7901_v49 = vld [vmem:[%s7989_s18 + $0xf18] sm:$0xff] }
 0x1d5   : > { %5177 = vmatpush.bf16.msra.mxu1 %v7880_v50  ;;  %v4939_v6 = vadd.f32 %v4938_v5, %v4926_v0  ;;  %v4951_v7 = vpop.f32.mrf.mxu3  ;;  %v4927_v12 = vpop.f32.mrf.mxu1  ;;  %v7909_v50 = vld [vmem:[%s7989_s18 + $0xf58] sm:$0xff]  ;;  %v7907_v0 = vld [vmem:[%s7989_s18 + $0xf48] sm:$0xff]  ;;  %v7898_v5 = vld [vmem:[%s7989_s18 + $0xf00] sm:$0xff] }
 0x1d6   : > { %5190 = vmatpush.bf16.msra.mxu2 %v7888_v51  ;;  %v7917_v51 = vld [vmem:[%s7989_s18 + $0xf98] sm:$0xff]  ;;  %v7922_v8 = vld [vmem:[%s7989_s18 + $0xfc0] sm:$0xff] }
 0x1d7   : > { %5203 = vmatpush.bf16.msra.mxu3 %v7896_v52  ;;  %v4952_v9 = vadd.f32 %v4951_v7, %v4939_v6  ;;  %v7925_v52 = vld [vmem:[%s7989_s18 + $0xfd8] sm:$0xff]  ;;  %v7906_v6 = vld [vmem:[%s7989_s18 + $0xf40] sm:$0xff] }
 0x1d8   : > { %5165 = vmatpush.bf16.msra.mxu0 %v7871_v53  ;;  %v7914_v7 = vld [vmem:[%s7989_s18 + $0xf80] sm:$0xff] }
 0x1d9   : > { %5178 = vmatpush.bf16.msra.mxu1 %v7879_v54  ;;  %v1298_v12 = vld [vmem:[#allocation1 + $0x3f] sm:$0xff] }
 0x1da   : > { %5191 = vmatpush.bf16.msra.mxu2 %v7887_v55 }
 0x1db   : > { %5204 = vmatpush.bf16.msra.mxu3 %v7895_v56 }
 0x1dc   : > { %5166 = vmatpush.bf16.msra.mxu0 %v7870_v59  ;;  %v4940_v19 = vpop.f32.mrf.mxu2  ;;  %v7908_v59 = vld [vmem:[%s7989_s18 + $0xf50] sm:$0xff] }
 0x1dd   : > { %5179 = vmatpush.bf16.msra.mxu1 %v7878_v60  ;;  %v4953_v20 = vpop.f32.mrf.mxu3 }
 0x1de   : > { %5192 = vmatpush.bf16.msra.mxu2 %v7886_v62  ;;  %v7924_v62 = vld [vmem:[%s7989_s18 + $0xfd0] sm:$0xff] }
 0x1df   : > { %5205 = vmatpush.bf16.msra.mxu3 %v7894_v63  ;;  %v7899_v63 = vld [vmem:[%s7989_s18 + $0xf08] sm:$0xff] }
 0x1e0   : > { %5167 = vmatpush.bf16.msra.mxu0 %v7869_v1  ;;  %v7915_v1 = vld [vmem:[%s7989_s18 + $0xf88] sm:$0xff] }
 0x1e1   : > { %5180 = vmatpush.bf16.msra.mxu1 %v7877_v2  ;;  %v7923_v2 = vld [vmem:[%s7989_s18 + $0xfc8] sm:$0xff] }
 0x1e2   : > { %5193 = vmatpush.bf16.msra.mxu2 %v7885_v3 }
 0x1e3   : > { %5206 = vmatpush.bf16.msra.mxu3 %v7893_v4 }
 0x1e4   : > { %5168 = vmatpush.bf16.msra.mxu0 %v7868_v10  ;;  %v1296_v10 = vld [vmem:[#allocation1 + $0x2d] sm:$0xff] }
 0x1e5   : > { %5181 = vmatpush.bf16.msra.mxu1 %v7876_v11  ;;  %v1297_v11 = vld [vmem:[#allocation1 + $0x36] sm:$0xff] }
 0x1e6   : > { %5194 = vmatpush.bf16.msra.mxu2 %v7884_v13 }
 0x1e7   : > { %5207 = vmatpush.bf16.msra.mxu3 %v7892_v14 }
 0x1e8   : > { %5169 = vmatpush.bf16.msra.mxu0 %v7867_v15 }
 0x1e9   : > { %5182 = vmatpush.bf16.msra.mxu1 %v7875_v16 }
 0x1ea   : > { %5195 = vmatpush.bf16.msra.mxu2 %v7883_v17 }
 0x1eb   : > { %5208 = vmatpush.bf16.msra.mxu3 %v7891_v18 }
 0x1ec   : > { %5170 = vmatpush.bf16.msra.mxu0 %v7866_v21  ;;  %v4964_v41 = vpop.f32.mrf.mxu0 }
 0x1ed   : > { %5183 = vmatpush.bf16.msra.mxu1 %v7874_v22  ;;  %v4965_v42 = vadd.f32 %v4964_v41, %v4952_v9  ;;  %v4977_v45 = vpop.f32.mrf.mxu1  ;;  %v1295_v9 = vld [vmem:[#allocation1 + $0x24] sm:$0xff] }
 0x1ee   : > { %5196 = vmatpush.bf16.msra.mxu2 %v7882_v23 }
 0x1ef   : > { %5209 = vmatpush.bf16.msra.mxu3 %v7890_v24  ;;  %5171 = vmatmul.bf16.vlgmr.msra.gmra.mxu0 %v1291_v29  ;;  %v4978_v48 = vadd.f32 %v4977_v45, %v4965_v42 }
 0x1f0   : > { %5215 = vmatpush.bf16.msrb.mxu0 %v7905_v25  ;;  %5184 = vmatmul.bf16.vlgmr.msra.gmra.mxu1 %v1292_v31 }
 0x1f1   : > { %5228 = vmatpush.bf16.msrb.mxu1 %v7913_v26  ;;  %5197 = vmatmul.bf16.vlgmr.msra.gmra.mxu2 %v1293_v30 }
 0x1f2   : > { %5241 = vmatpush.bf16.msrb.mxu2 %v7921_v27  ;;  %5210 = vmatmul.bf16.vlgmr.msra.gmra.mxu3 %v1294_v32 }
 0x1f3   : > { %5254 = vmatpush.bf16.msrb.mxu3 %v7929_v28 }
 0x1f4   : > { %5216 = vmatpush.bf16.msrb.mxu0 %v7904_v33  ;;  %v4990_v53 = vpop.f32.mrf.mxu2  ;;  %v4966_v56 = vpop.f32.mrf.mxu0 }
 0x1f5   : > { %5229 = vmatpush.bf16.msrb.mxu1 %v7912_v34  ;;  %v4991_v54 = vadd.f32 %v4990_v53, %v4978_v48  ;;  %v5003_v55 = vpop.f32.mrf.mxu3  ;;  %v4979_v60 = vpop.f32.mrf.mxu1 }
 0x1f6   : > { %5242 = vmatpush.bf16.msrb.mxu2 %v7920_v35 }
 0x1f7   : > { %5255 = vmatpush.bf16.msrb.mxu3 %v7928_v36  ;;  %v5004_v57 = vadd.f32 %v5003_v55, %v4991_v54 }
 0x1f8   : > { %5217 = vmatpush.bf16.msrb.mxu0 %v7903_v37 }
 0x1f9   : > { %5230 = vmatpush.bf16.msrb.mxu1 %v7911_v38 }
 0x1fa   : > { %5243 = vmatpush.bf16.msrb.mxu2 %v7919_v39 }
 0x1fb   : > { %5256 = vmatpush.bf16.msrb.mxu3 %v7927_v40 }
 0x1fc   : > { %5218 = vmatpush.bf16.msrb.mxu0 %v7902_v43  ;;  %v4992_v3 = vpop.f32.mrf.mxu2 }
 0x1fd   : > { %5231 = vmatpush.bf16.msrb.mxu1 %v7910_v44  ;;  %v5005_v4 = vpop.f32.mrf.mxu3 }
 0x1fe   : > { %5244 = vmatpush.bf16.msrb.mxu2 %v7918_v46 }
 0x1ff   : > { %5257 = vmatpush.bf16.msrb.mxu3 %v7926_v47 }
 0x200   : > { %5219 = vmatpush.bf16.msrb.mxu0 %v7901_v49 }
 0x201   : > { %5232 = vmatpush.bf16.msrb.mxu1 %v7909_v50 }
 0x202   : > { %5245 = vmatpush.bf16.msrb.mxu2 %v7917_v51 }
 0x203   : > { %5258 = vmatpush.bf16.msrb.mxu3 %v7925_v52 }
 0x204   : > { %5220 = vmatpush.bf16.msrb.mxu0 %v7900_v58 }
 0x205   : > { %5233 = vmatpush.bf16.msrb.mxu1 %v7908_v59 }
 0x206   : > { %5246 = vmatpush.bf16.msrb.mxu2 %v7916_v61 }
 0x207   : > { %5259 = vmatpush.bf16.msrb.mxu3 %v7924_v62 }
 0x208   : > { %5221 = vmatpush.bf16.msrb.mxu0 %v7899_v63 }
 0x209   : > { %5234 = vmatpush.bf16.msrb.mxu1 %v7907_v0 }
 0x20a   : > { %5247 = vmatpush.bf16.msrb.mxu2 %v7915_v1 }
 0x20b   : > { %5260 = vmatpush.bf16.msrb.mxu3 %v7923_v2 }
 0x20c   : > { %5222 = vmatpush.bf16.msrb.mxu0 %v7898_v5  ;;  %v5016_v13 = vpop.f32.mrf.mxu0 }
 0x20d   : > { %5235 = vmatpush.bf16.msrb.mxu1 %v7906_v6  ;;  %v5017_v14 = vadd.f32 %v5016_v13, %v5004_v57  ;;  %v5029_v15 = vpop.f32.mrf.mxu1 }
 0x20e   : > { %5248 = vmatpush.bf16.msrb.mxu2 %v7914_v7 }
 0x20f   : > { %5261 = vmatpush.bf16.msrb.mxu3 %v7922_v8  ;;  %5223 = vmatmul.bf16.vlgmr.msrb.gmra.mxu0 %v1295_v9  ;;  %v5030_v16 = vadd.f32 %v5029_v15, %v5017_v14 }
 0x210   : > { %5236 = vmatmul.bf16.vlgmr.msrb.gmra.mxu1 %v1296_v10 }
 0x211   : > { %5249 = vmatmul.bf16.vlgmr.msrb.gmra.mxu2 %v1297_v11 }
 0x212   : > { %5262 = vmatmul.bf16.vlgmr.msrb.gmra.mxu3 %v1298_v12 }
 0x214   : > { %v5042_v17 = vpop.f32.mrf.mxu2  ;;  %v5018_v20 = vpop.f32.mrf.mxu0 }
 0x215   : > { %v5043_v18 = vadd.f32 %v5042_v17, %v5030_v16  ;;  %v5055_v19 = vpop.f32.mrf.mxu3  ;;  %v5031_v22 = vpop.f32.mrf.mxu1 }
 0x217   : > { %v5056_v21 = vadd.f32 %v5055_v19, %v5043_v18 }
 0x21c   : > { %v5044_v23 = vpop.f32.mrf.mxu2 }
 0x21d   : > { %v5057_v24 = vpop.f32.mrf.mxu3 }
 0x22c   : > { %v5068_v25 = vpop.f32.mrf.mxu0 }
 0x22d   : > { %v5069_v26 = vadd.f32 %v5068_v25, %v5056_v21  ;;  %v5081_v27 = vpop.f32.mrf.mxu1 }
 0x22f   : > { %v5082_v28 = vadd.f32 %v5081_v27, %v5069_v26 }
 0x234   : > { %v5094_v29 = vpop.f32.mrf.mxu2  ;;  %v5070_v32 = vpop.f32.mrf.mxu0 }
 0x235   : > { %v5095_v30 = vadd.f32 %v5094_v29, %v5082_v28  ;;  %v5107_v31 = vpop.f32.mrf.mxu3  ;;  %v5083_v34 = vpop.f32.mrf.mxu1 }
 0x237   : > { %v5108_v33 = vadd.f32 %v5107_v31, %v5095_v30 }
 0x23c   : > { %v5096_v35 = vpop.f32.mrf.mxu2 }
 0x23d   : > { %v5109_v36 = vpop.f32.mrf.mxu3 }
 0x24c   : > { %v5120_v37 = vpop.f32.mrf.mxu0 }
 0x24d   : > { %v5133_v38 = vpop.f32.mrf.mxu1  ;;  %v5121_v48 = vadd.f32 %v5120_v37, %v5108_v33 }
 0x24f   : > { %v5134_v52 = vadd.f32 %v5133_v38, %v5121_v48 }
 0x254   : > { %v5146_v39 = vpop.f32.mrf.mxu2  ;;  %v5122_v41 = vpop.f32.mrf.mxu0 }
 0x255   : > { %v5159_v40 = vpop.f32.mrf.mxu3  ;;  %v5135_v42 = vpop.f32.mrf.mxu1  ;;  %v5147_v53 = vadd.f32 %v5146_v39, %v5134_v52 }
 0x257   : > { %v5160_v56 = vadd.f32 %v5159_v40, %v5147_v53 }
 0x25c   : > { %v5148_v43 = vpop.f32.mrf.mxu2 }
 0x25d   : > { %v5161_v44 = vpop.f32.mrf.mxu3 }
 0x26c   : > { %v5172_v45 = vpop.f32.mrf.mxu0 }
 0x26d   : > { %v5185_v46 = vpop.f32.mrf.mxu1  ;;  %v5173_v57 = vadd.f32 %v5172_v45, %v5160_v56 }
 0x26f   : > { %v5186_v58 = vadd.f32 %v5185_v46, %v5173_v57 }
 0x274   : > { %v5198_v47 = vpop.f32.mrf.mxu2  ;;  %v5174_v50 = vpop.f32.mrf.mxu0 }
 0x275   : > { %v5211_v49 = vpop.f32.mrf.mxu3  ;;  %v5187_v51 = vpop.f32.mrf.mxu1  ;;  %v5199_v59 = vadd.f32 %v5198_v47, %v5186_v58 }
 0x277   : > { %v5212_v60 = vadd.f32 %v5211_v49, %v5199_v59 }
 0x27c   : > { %v5200_v54 = vpop.f32.mrf.mxu2 }
 0x27d   : > { %v5213_v55 = vpop.f32.mrf.mxu3 }
 0x28c   : > { %v5224_v61 = vpop.f32.mrf.mxu0 }
 0x28d   : > { %v5237_v62 = vpop.f32.mrf.mxu1  ;;  %v5225_v63 = vadd.f32 %v5224_v61, %v5212_v60 }
 0x28f   : > { %v5238_v0 = vadd.f32 %v5237_v62, %v5225_v63 }
 0x294   : > { %v5250_v1 = vpop.f32.mrf.mxu2  ;;  %v5226_v4 = vpop.f32.mrf.mxu0 }
 0x295   : > { %v5263_v2 = vpop.f32.mrf.mxu3  ;;  %v5251_v3 = vadd.f32 %v5250_v1, %v5238_v0  ;;  %v5239_v5 = vpop.f32.mrf.mxu1 }
 0x297   : > { %v5264_v6 = vadd.f32 %v5263_v2, %v5251_v3 }
 0x299   : > { %5270 = sbr.rel (%p7413_p4) target bundleno = 672 (0x2a0), region = 36 }
 0x29c   : > { %v5252_v7 = vpop.f32.mrf.mxu2 }
 0x29d   : > { %v5265_v8 = vpop.f32.mrf.mxu3 }
 0x29e   : > { %vm5271_vm0 = vcmask 517120  }
 0x29f   : > { %5272 = vst.msk [vmem:[%s8075_s29] sm:$0x3] %vm5271_vm0, %v5264_v6 }
 0x2a0 PF: > { %p7414_p5 = scmp.ne.s32.totalorder %s7977_s13, 1 }
 0x2a2   : > { %5276 = sbr.rel (%p7414_p5) target bundleno = 709 (0x2c5), region = 40 }
 0x2a7   : > { %v5278_v9 = vand.u32 2147483647, %v5264_v6  ;;  %v5277_v19 = vmax.f32 %v5264_v6, 0.0  ;;  %vm5293_vm2 = vcmask 517120  }
 0x2a9   : > { %v5279_v10 = vsub.f32 0.0, %v5278_v9 }
 0x2ab   : > { %v5280_v11 = vmul.f32 1.442695, %v5279_v10 }
 0x2ad   : > { %7939 = vpow2.f32 %v5280_v11 }
 0x2b3   : > { %v7940_v12 = vpop.eup %7939 }
 0x2b4   : > { %v5282_v13 = vadd.f32 1.0, %v7940_v12  ;;  %v5285_v14 = vmul.f32 -0.5, %v7940_v12  ;;  %v5288_v16 = vand.u32 2147483647, %v7940_v12 }
 0x2b6   : > { %7941 = vlog2.f32 %v5282_v13  ;;  %v5286_v15 = vadd.f32 1.0, %v5285_v14  ;;  %vm5289_vm1 = vcmp.lt.f32.partialorder %v5288_v16, 0.0004427343 }
 0x2b8   : > { %v5287_v17 = vmul.f32 %v7940_v12, %v5286_v15 }
 0x2bc   : > { %v7942_v18 = vpop.eup %7941 }
 0x2bd   : > { %v5284_v20 = vmul.f32 0.6931472, %v7942_v18 }
 0x2bf   : > { %v5290_v21 = vsel %vm5289_vm1, %v5287_v17, %v5284_v20 }
 0x2c0   : > { %v5291_v22 = vadd.f32 %v5290_v21, %v5277_v19 }
 0x2c2   : > { %v5292_v23 = vadd.f32 1e-06, %v5291_v22 }
 0x2c4   : > { %5294 = vst.msk [vmem:[%s8075_s29] sm:$0x3] %vm5293_vm2, %v5292_v23 }
 0x2c5 PF: > { %s13_s12 = sadd.s32 1, %s7949_s12  }
 0x2c6   : > { %p10_p6 = scmp.ge.s32.totalorder %s13_s12, 4  }
 0x2c8   :  { %12 = sbr.rel (!%p10_p6) target bundleno = 1 (0x1), region = 73 }

</bundles_post_ra>
